<compile_context>
chip_gen: v7x
topology: tpu7x:2x2x1
jax: 0.10.0
libtpu: 0.0.40
codegen_flags: <defaults>
</compile_context>

<pallas_src>
import functools
import math

import jax
import jax.numpy as jnp
from jax import lax
from jax.experimental import pallas as pl
from jax.experimental.pallas import tpu as pltpu


def _bound(vr, vi):
    """Hard-bound a complex vector (separate real/imag halves) to |.| <= 1."""
    s = lax.rsqrt(jnp.maximum(vr * vr + vi * vi, 1.0))
    return vr * s, vi * s


def _sigmoid(x):
    """sigmoid via EUP exp + approx reciprocal (keeps the divide off the VALU)."""
    return pl.reciprocal(1.0 + jnp.exp(-x), approx=True)


def _lstm_kernel(x_ref, wx_hbm, wh_hbm, b_ref, wo_ref, bout_ref,
                 out_ref,
                 wx_vmem, wh_vmem, hh_sc, cr_sc, ci_sc, xw_sc, hist_sc,
                 *, TT, B, Hp):
    # First time-block of this batch shard: load the resident weights (single-buffered
    # VMEM scratch; done per core/shard so megacore sharding stays correct) and zero
    # the recurrent state.
    @pl.when(pl.program_id(1) == 0)
    def _init():
        pltpu.sync_copy(wx_hbm, wx_vmem)
        pltpu.sync_copy(wh_hbm, wh_vmem)
        hh_sc[...] = jnp.zeros_like(hh_sc)
        cr_sc[...] = jnp.zeros_like(cr_sc)
        ci_sc[...] = jnp.zeros_like(ci_sc)

    # 1) Batched input projection for all TT timesteps of this block: one wide MXU call
    #    (bf16 operands, f32 accumulate), bias pre-summed in the wrapper.
    xw_sc[...] = (jnp.dot(x_ref[...].astype(jnp.bfloat16), wx_vmem[...],
                          preferred_element_type=jnp.float32)
                  + b_ref[...])

    # 2) Sequential recurrence.  State hh = [h_r | h_i] (B, 2*Hp); ONE K=2*Hp MXU dot
    #    per timestep; all gate slices are 128-lane aligned views.  TT is small ->
    #    static unroll (use lax.fori_loop(unroll=k) for large TT).
    hh = hh_sc[...]
    c_r = cr_sc[...]
    c_i = ci_sc[...]
    for t in range(TT):
        pre = (xw_sc[pl.ds(t * B, B), :]
               + jnp.dot(hh.astype(jnp.bfloat16), wh_vmem[...],
                         preferred_element_type=jnp.float32))
        g_f = _sigmoid(pre[:, 0 * Hp:1 * Hp])
        g_i = _sigmoid(pre[:, 1 * Hp:2 * Hp])
        g_o = _sigmoid(pre[:, 2 * Hp:3 * Hp])
        rir, rii = _bound(pre[:, 3 * Hp:4 * Hp], pre[:, 4 * Hp:5 * Hp])
        ror, roi = _bound(pre[:, 5 * Hp:6 * Hp], pre[:, 6 * Hp:7 * Hp])
        u_r, u_i = _bound(pre[:, 7 * Hp:8 * Hp], pre[:, 8 * Hp:9 * Hp])

        # c_t = g_f * c + r_i (x) (g_i * u)        (complex multiply, split halves)
        t_r = g_i * u_r
        t_i = g_i * u_i
        c_r = g_f * c_r + (rir * t_r - rii * t_i)
        c_i = g_f * c_i + (rir * t_i + rii * t_r)

        # h_t = g_o * bound(r_o (x) c_t)
        o_r, o_i = _bound(ror * c_r - roi * c_i, ror * c_i + roi * c_r)
        h_r = g_o * o_r
        h_i = g_o * o_i
        hh = jnp.concatenate([h_r, h_i], axis=1)   # lane-aligned placement (Hp=128k)

        # Lane-dense (B, 2*Hp) store of the hidden-state history for the batched head.
        hist_sc[pl.ds(t * B, B), :] = hh

    # Persist state across time blocks of this shard.
    hh_sc[...] = hh
    cr_sc[...] = c_r
    ci_sc[...] = c_i

    # 3) Output head out of the time loop: VPU multiply + lane reduce (avoids a
    #    degenerate 1-column MXU op), one store for all TT*B rows.
    logits = (jnp.sum(hist_sc[...] * wo_ref[...], axis=-1, keepdims=True)
              + bout_ref[...])
    out_ref[...] = _sigmoid(logits)


def lstm_forward(x, params, H, *, block_timesteps=None, batch_shards=1,
                 vmem_budget_bytes=24 << 20):
    """x: (T, B, I) float32. Returns (T, B, 1) float32."""
    T, B, I = x.shape
    assert B % batch_shards == 0, "batch must divide evenly across shards"
    Bs = B // batch_shards
    assert batch_shards == 1 or Bs % 8 == 0, "per-shard batch should be a multiple of 8"

    # Per-gate group width padded to a 128-lane boundary.
    Hp = ((H + 127) // 128) * 128

    # Auto-size the time block against the VMEM budget (dominant scratch is the
    # batched x-projection + hidden history: ~TT*Bs*(9+2)*Hp*4 bytes).
    if block_timesteps is None:
        per_t = Bs * (9 * Hp + 2 * Hp) * 4
        TT = max(1, min(T, vmem_budget_bytes // per_t))
        while T % TT:
            TT -= 1
    else:
        TT = block_timesteps
        assert T % TT == 0, "T must be divisible by block_timesteps"
    n_k = T // TT
    n_rows = TT * Bs

    def pad_lane(w):  # (rows, H) -> (rows, Hp), zero-padded
        return jnp.pad(w, ((0, 0), (0, Hp - H)))

    wi2h, wh2h = params["w_i2h"], params["w_h2h"]     # (7H, I), (7H, 2H)
    wi2u, wh2u = params["w_i2u"], params["w_h2u"]     # (2H, I), (2H, 2H)
    b_gates = params["b_i2h"] + params["b_h2h"]       # (7H,)
    b_u = params["b_i2u"] + params["b_h2u"]           # (2H,)

    # 9 output groups (each H wide in torch layout): f, i, o, r_i_re, r_i_im,
    # r_o_re, r_o_im, u_re, u_im.
    gx = [wi2h[g * H:(g + 1) * H] for g in range(7)] + \
         [wi2u[g * H:(g + 1) * H] for g in range(2)]
    gh = [wh2h[g * H:(g + 1) * H] for g in range(7)] + \
         [wh2u[g * H:(g + 1) * H] for g in range(2)]
    gb = [b_gates[g * H:(g + 1) * H] for g in range(7)] + \
         [b_u[g * H:(g + 1) * H] for g in range(2)]

    # Fused, lane-padded bf16 weights:
    #   x-path  (I, 9*Hp);   h-path stacked real-over-imag (2*Hp, 9*Hp).
    w_x = jnp.concatenate([pad_lane(g.T) for g in gx], axis=1).astype(jnp.bfloat16)
    w_hr = jnp.pad(jnp.concatenate([pad_lane(g[:, :H].T) for g in gh], axis=1),
                   ((0, Hp - H), (0, 0)))
    w_hi = jnp.pad(jnp.concatenate([pad_lane(g[:, H:].T) for g in gh], axis=1),
                   ((0, Hp - H), (0, 0)))
    w_h = jnp.concatenate([w_hr, w_hi], axis=0).astype(jnp.bfloat16)
    b_f = jnp.concatenate([jnp.pad(g, (0, Hp - H)) for g in gb]).reshape(1, 9 * Hp)

    w_out = params["w_out"].reshape(2 * H)
    w_o = jnp.concatenate([jnp.pad(w_out[:H], (0, Hp - H)),
                           jnp.pad(w_out[H:], (0, Hp - H))]).reshape(1, 2 * Hp)
    b_out = params["b_out"].reshape(1, 1)

    # Reorder rows so each (shard s, time-block k) tile is contiguous:
    #   row = s*T*Bs + t*Bs + b.
    x2d = (x.reshape(T, batch_shards, Bs, I)
            .transpose(1, 0, 2, 3)
            .reshape(batch_shards * T * Bs, I))

    const2d = lambda a: pl.BlockSpec(a.shape, lambda s, k: (0, 0))
    kernel = functools.partial(_lstm_kernel, TT=TT, B=Bs, Hp=Hp)

    # Explicit VMEM budget (scratch + the small double-buffered pipelined operands).
    scratch_bytes = (w_x.size * 2 + w_h.size * 2
                     + (Bs * 2 * Hp + 2 * Bs * Hp
                        + n_rows * 9 * Hp + n_rows * 2 * Hp) * 4)
    io_bytes = 2 * ((n_rows * I + n_rows) * 4 + (9 * Hp + 2 * Hp + 1) * 4)
    vmem_limit = int(min(max(32 << 20,
                             int(1.25 * (scratch_bytes + io_bytes)) + (4 << 20)),
                         60 << 20))   # stay under v7x's 64 MiB physical VMEM

    out_flat = pl.pallas_call(
        kernel,
        out_shape=jax.ShapeDtypeStruct((batch_shards * T * Bs, 1), jnp.float32),
        grid_spec=pltpu.PrefetchScalarGridSpec(
            num_scalar_prefetch=0,
            grid=(batch_shards, n_k),
            in_specs=[
                pl.BlockSpec((n_rows, I), lambda s, k: (s * n_k + k, 0)),
                pl.BlockSpec(memory_space=pl.ANY),   # w_x -> copied once to VMEM scratch
                pl.BlockSpec(memory_space=pl.ANY),   # w_h -> copied once to VMEM scratch
                const2d(b_f), const2d(w_o), const2d(b_out),
            ],
            out_specs=pl.BlockSpec((n_rows, 1), lambda s, k: (s * n_k + k, 0)),
            scratch_shapes=[
                pltpu.VMEM((I, 9 * Hp), jnp.bfloat16),        # resident w_x
                pltpu.VMEM((2 * Hp, 9 * Hp), jnp.bfloat16),   # resident w_h
                pltpu.VMEM((Bs, 2 * Hp), jnp.float32),        # hh = [h_r | h_i]
                pltpu.VMEM((Bs, Hp), jnp.float32),            # c real
                pltpu.VMEM((Bs, Hp), jnp.float32),            # c imag
                pltpu.VMEM((n_rows, 9 * Hp), jnp.float32),    # batched input projection
                pltpu.VMEM((n_rows, 2 * Hp), jnp.float32),    # hidden-state history
            ],
        ),
        compiler_params=pltpu.CompilerParams(
            dimension_semantics=("parallel", "arbitrary"),
            vmem_limit_bytes=vmem_limit,
        ),
    )(x2d, w_x, w_h, b_f, w_o, b_out)

    return (out_flat.reshape(batch_shards, T, Bs, 1)
            .transpose(1, 0, 2, 3)
            .reshape(T, B, 1))


def lstm_reference(x, params, H):
    """Pure-JAX reference of the torch module forward (kept torch-faithful)."""
    def bound(v):
        vr, vi = v[:, :H], v[:, H:]
        d = jnp.maximum(jnp.sqrt(vr * vr + vi * vi), 1.0)
        return v / jnp.concatenate([d, d], axis=1)

    def cmul(u, v):
        ur, ui = u[:, :H], u[:, H:]
        vr, vi = v[:, :H], v[:, H:]
        return jnp.concatenate([ur * vr - ui * vi, ur * vi + ui * vr], axis=1)

    T, B, _ = x.shape
    h = jnp.zeros((B, 2 * H), jnp.float32)
    c = jnp.zeros((B, 2 * H), jnp.float32)
    outs = []
    for t in range(T):
        xt = x[t]
        preact = (xt @ params["w_i2h"].T + params["b_i2h"]
                  + h @ params["w_h2h"].T + params["b_h2h"])
        gates, keys = preact[:, :3 * H], preact[:, 3 * H:]
        g = jax.nn.sigmoid(gates)
        g_f = jnp.tile(g[:, :H], (1, 2))
        g_i = jnp.tile(g[:, H:2 * H], (1, 2))
        g_o = jnp.tile(g[:, 2 * H:], (1, 2))
        r_i, r_o = keys[:, :2 * H], keys[:, 2 * H:]
        u = bound(xt @ params["w_i2u"].T + params["b_i2u"]
                  + h @ params["w_h2u"].T + params["b_h2u"])
        r_i, r_o = bound(r_i), bound(r_o)
        c = g_f * c + cmul(r_i, g_i * u)
        h = g_o * bound(cmul(r_o, c))
        outs.append(jax.nn.sigmoid(h @ params["w_out"].T + params["b_out"]))
    return jnp.stack(outs, axis=0)


def init_params(key, input_size, hidden_size):
    H, I = hidden_size, input_size
    std = 1.0 / math.sqrt(H)
    std_out = 1.0 / math.sqrt(2 * H)
    ks = jax.random.split(key, 10)
    u = lambda k, shape, s: jax.random.uniform(k, shape, jnp.float32, -s, s)
    return {
        "w_i2h": u(ks[0], (7 * H, I), std), "b_i2h": u(ks[1], (7 * H,), std),
        "w_h2h": u(ks[2], (7 * H, 2 * H), std), "b_h2h": u(ks[3], (7 * H,), std),
        "w_i2u": u(ks[4], (2 * H, I), std), "b_i2u": u(ks[5], (2 * H,), std),
        "w_h2u": u(ks[6], (2 * H, 2 * H), std), "b_h2u": u(ks[7], (2 * H,), std),
        "w_out": u(ks[8], (1, 2 * H), std_out), "b_out": u(ks[9], (1,), std_out),
    }


if __name__ == "__main__":
    T, B, I, H = 8, 8, 16, 32
    key = jax.random.PRNGKey(0)
    kx, kp = jax.random.split(key)
    x = jax.random.normal(kx, (T, B, I), jnp.float32)
    params = init_params(kp, I, H)

    out = lstm_forward(x, params, H)
    out = jax.block_until_ready(out)

    ref = lstm_reference(x, params, H)
    assert out.shape == (T, B, 1)
    err = float(jnp.max(jnp.abs(out - ref)))
    # bf16 matmul operands -> relaxed tolerance vs the f32 reference.
    assert err < 5e-2, f"mismatch vs reference: max abs err = {err}"
    print("KERNEL_OK")
</pallas_src>

<mosaic_0001>
module attributes {stable_mosaic.version = 11 : i64} {
  func.func @_lstm_kernel(%arg0: i32, %arg1: i32, %arg2: memref<64x16xf32, #tpu.memory_space<vmem>>, %arg3: memref<16x1152xbf16, #tpu.memory_space<any>>, %arg4: memref<256x1152xbf16, #tpu.memory_space<any>>, %arg5: memref<1x1152xf32, #tpu.memory_space<vmem>>, %arg6: memref<1x256xf32, #tpu.memory_space<vmem>>, %arg7: memref<1x1xf32, #tpu.memory_space<vmem>>, %arg8: memref<64x1xf32, #tpu.memory_space<vmem>>, %arg9: memref<16x1152xbf16, #tpu.memory_space<vmem>>, %arg10: memref<256x1152xbf16, #tpu.memory_space<vmem>>, %arg11: memref<8x256xf32, #tpu.memory_space<vmem>>, %arg12: memref<8x128xf32, #tpu.memory_space<vmem>>, %arg13: memref<8x128xf32, #tpu.memory_space<vmem>>, %arg14: memref<64x1152xf32, #tpu.memory_space<vmem>>, %arg15: memref<64x256xf32, #tpu.memory_space<vmem>>) attributes {dimension_semantics = [#tpu.dimension_semantics<parallel>, #tpu.dimension_semantics<arbitrary>], iteration_bounds = array<i64: 1, 1>, scalar_prefetch = 0 : i64, scratch_operands = 7 : i64, tpu.core_type = #tpu.core_type<tc>, window_params = [{transform_indices = @transform_0, window_bounds = array<i64: 64, 16>}, {}, {}, {pipeline_mode = #tpu.pipeline_mode<synchronous>, transform_indices = @transform_3, window_bounds = array<i64: 1, 1152>}, {pipeline_mode = #tpu.pipeline_mode<synchronous>, transform_indices = @transform_4, window_bounds = array<i64: 1, 256>}, {pipeline_mode = #tpu.pipeline_mode<synchronous>, transform_indices = @transform_5, window_bounds = array<i64: 1, 1>}, {transform_indices = @transform_6, window_bounds = array<i64: 64, 1>}]} {
    %c0_i32 = arith.constant 0 : i32
    %0 = arith.cmpi eq, %arg1, %c0_i32 : i32
    %1 = arith.extui %0 : i1 to i32
    %c0_i32_0 = arith.constant 0 : i32
    %2 = arith.cmpi ne, %1, %c0_i32_0 : i32
    scf.if %2 {
      "tpu.region"() ({
        %727 = tpu.sem_alloc : memref<!tpu.dma_semaphore, #tpu.memory_space<semaphore_mem>>
        tpu.enqueue_dma source(%arg3 : memref<16x1152xbf16, #tpu.memory_space<any>>) target(%arg9 : memref<16x1152xbf16, #tpu.memory_space<vmem>>) target_semaphore(%727 : memref<!tpu.dma_semaphore, #tpu.memory_space<semaphore_mem>>)
        tpu.wait_dma2 semaphore(%727 : memref<!tpu.dma_semaphore, #tpu.memory_space<semaphore_mem>>) src(%arg3 : memref<16x1152xbf16, #tpu.memory_space<any>>) dst(%arg9 : memref<16x1152xbf16, #tpu.memory_space<vmem>>)
        tpu.yield
      }) : () -> ()
      "tpu.region"() ({
        %727 = tpu.sem_alloc : memref<!tpu.dma_semaphore, #tpu.memory_space<semaphore_mem>>
        tpu.enqueue_dma source(%arg4 : memref<256x1152xbf16, #tpu.memory_space<any>>) target(%arg10 : memref<256x1152xbf16, #tpu.memory_space<vmem>>) target_semaphore(%727 : memref<!tpu.dma_semaphore, #tpu.memory_space<semaphore_mem>>)
        tpu.wait_dma2 semaphore(%727 : memref<!tpu.dma_semaphore, #tpu.memory_space<semaphore_mem>>) src(%arg4 : memref<256x1152xbf16, #tpu.memory_space<any>>) dst(%arg10 : memref<256x1152xbf16, #tpu.memory_space<vmem>>)
        tpu.yield
      }) : () -> ()
      %cst_160 = arith.constant 0.000000e+00 : f32
      %721 = vector.broadcast %cst_160 : f32 to vector<8x256xf32>
      %c0_161 = arith.constant 0 : index
      %c0_162 = arith.constant 0 : index
      %722 = vector.load %arg11[%c0_161, %c0_162] : memref<8x256xf32, #tpu.memory_space<vmem>>, vector<8x256xf32>
      tpu.vector_store %arg11[%c0_161, %c0_162], %721 {strides = array<i32>} : memref<8x256xf32, #tpu.memory_space<vmem>>, vector<8x256xf32>,
      %cst_163 = arith.constant 0.000000e+00 : f32
      %723 = vector.broadcast %cst_163 : f32 to vector<8x128xf32>
      %c0_164 = arith.constant 0 : index
      %c0_165 = arith.constant 0 : index
      %724 = vector.load %arg12[%c0_164, %c0_165] : memref<8x128xf32, #tpu.memory_space<vmem>>, vector<8x128xf32>
      tpu.vector_store %arg12[%c0_164, %c0_165], %723 {strides = array<i32>} : memref<8x128xf32, #tpu.memory_space<vmem>>, vector<8x128xf32>,
      %cst_166 = arith.constant 0.000000e+00 : f32
      %725 = vector.broadcast %cst_166 : f32 to vector<8x128xf32>
      %c0_167 = arith.constant 0 : index
      %c0_168 = arith.constant 0 : index
      %726 = vector.load %arg13[%c0_167, %c0_168] : memref<8x128xf32, #tpu.memory_space<vmem>>, vector<8x128xf32>
      tpu.vector_store %arg13[%c0_167, %c0_168], %725 {strides = array<i32>} : memref<8x128xf32, #tpu.memory_space<vmem>>, vector<8x128xf32>,
    } else {
    }
    %c0 = arith.constant 0 : index
    %c0_1 = arith.constant 0 : index
    %3 = vector.load %arg2[%c0, %c0_1] : memref<64x16xf32, #tpu.memory_space<vmem>>, vector<64x16xf32>
    %4 = arith.truncf %3 : vector<64x16xf32> to vector<64x16xbf16>
    %c0_2 = arith.constant 0 : index
    %c0_3 = arith.constant 0 : index
    %5 = vector.load %arg9[%c0_2, %c0_3] : memref<16x1152xbf16, #tpu.memory_space<vmem>>, vector<16x1152xbf16>
    %cst = arith.constant dense<0.000000e+00> : vector<64x1152xf32>
    %6 = tpu.matmul %4, %5, %cst {dimension_numbers = #tpu.dot_dimension_numbers<[1], [0], [0], [1], [0, 0, 1, 1], [], []>} : vector<64x16xbf16>, vector<16x1152xbf16>, vector<64x1152xf32> -> vector<64x1152xf32>
    %c0_4 = arith.constant 0 : index
    %c0_5 = arith.constant 0 : index
    %7 = vector.load %arg5[%c0_4, %c0_5] : memref<1x1152xf32, #tpu.memory_space<vmem>>, vector<1x1152xf32>
    %8 = vector.broadcast %7 : vector<1x1152xf32> to vector<64x1152xf32>
    %9 = arith.addf %6, %8 : vector<64x1152xf32>
    %c0_6 = arith.constant 0 : index
    %c0_7 = arith.constant 0 : index
    %10 = vector.load %arg14[%c0_6, %c0_7] : memref<64x1152xf32, #tpu.memory_space<vmem>>, vector<64x1152xf32>
    tpu.vector_store %arg14[%c0_6, %c0_7], %9 {strides = array<i32>} : memref<64x1152xf32, #tpu.memory_space<vmem>>, vector<64x1152xf32>,
    %c0_8 = arith.constant 0 : index
    %c0_9 = arith.constant 0 : index
    %11 = vector.load %arg11[%c0_8, %c0_9] : memref<8x256xf32, #tpu.memory_space<vmem>>, vector<8x256xf32>
    %c0_10 = arith.constant 0 : index
    %c0_11 = arith.constant 0 : index
    %12 = vector.load %arg12[%c0_10, %c0_11] : memref<8x128xf32, #tpu.memory_space<vmem>>, vector<8x128xf32>
    %c0_12 = arith.constant 0 : index
    %c0_13 = arith.constant 0 : index
    %13 = vector.load %arg13[%c0_12, %c0_13] : memref<8x128xf32, #tpu.memory_space<vmem>>, vector<8x128xf32>
    %c0_14 = arith.constant 0 : index
    %c0_15 = arith.constant 0 : index
    %14 = vector.load %arg14[%c0_14, %c0_15] : memref<64x1152xf32, #tpu.memory_space<vmem>>, vector<8x1152xf32>
    %15 = arith.truncf %11 : vector<8x256xf32> to vector<8x256xbf16>
    %c0_16 = arith.constant 0 : index
    %c0_17 = arith.constant 0 : index
    %16 = vector.load %arg10[%c0_16, %c0_17] : memref<256x1152xbf16, #tpu.memory_space<vmem>>, vector<256x1152xbf16>
    %cst_18 = arith.constant dense<0.000000e+00> : vector<8x1152xf32>
    %17 = tpu.matmul %15, %16, %cst_18 {dimension_numbers = #tpu.dot_dimension_numbers<[1], [0], [0], [1], [0, 0, 1, 1], [], []>} : vector<8x256xbf16>, vector<256x1152xbf16>, vector<8x1152xf32> -> vector<8x1152xf32>
    %18 = arith.addf %14, %17 : vector<8x1152xf32>
    %19 = vector.extract_strided_slice %18 {offsets = [0, 0], sizes = [8, 128], strides = [1, 1]} : vector<8x1152xf32> to vector<8x128xf32>
    %cst_19 = arith.constant 0.000000e+00 : f32
    %20 = vector.broadcast %cst_19 : f32 to vector<8x128xf32>
    %21 = arith.subf %20, %19 : vector<8x128xf32>
    %22 = math.exp %21 : vector<8x128xf32>
    %cst_20 = arith.constant 1.000000e+00 : f32
    %23 = vector.broadcast %cst_20 : f32 to vector<8x128xf32>
    %24 = arith.addf %23, %22 : vector<8x128xf32>
    %25 = tpu.reciprocal %24 {approx = true} : vector<8x128xf32> -> vector<8x128xf32>
    %26 = vector.extract_strided_slice %18 {offsets = [0, 128], sizes = [8, 128], strides = [1, 1]} : vector<8x1152xf32> to vector<8x128xf32>
    %cst_21 = arith.constant 0.000000e+00 : f32
    %27 = vector.broadcast %cst_21 : f32 to vector<8x128xf32>
    %28 = arith.subf %27, %26 : vector<8x128xf32>
    %29 = math.exp %28 : vector<8x128xf32>
    %cst_22 = arith.constant 1.000000e+00 : f32
    %30 = vector.broadcast %cst_22 : f32 to vector<8x128xf32>
    %31 = arith.addf %30, %29 : vector<8x128xf32>
    %32 = tpu.reciprocal %31 {approx = true} : vector<8x128xf32> -> vector<8x128xf32>
    %33 = vector.extract_strided_slice %18 {offsets = [0, 256], sizes = [8, 128], strides = [1, 1]} : vector<8x1152xf32> to vector<8x128xf32>
    %cst_23 = arith.constant 0.000000e+00 : f32
    %34 = vector.broadcast %cst_23 : f32 to vector<8x128xf32>
    %35 = arith.subf %34, %33 : vector<8x128xf32>
    %36 = math.exp %35 : vector<8x128xf32>
    %cst_24 = arith.constant 1.000000e+00 : f32
    %37 = vector.broadcast %cst_24 : f32 to vector<8x128xf32>
    %38 = arith.addf %37, %36 : vector<8x128xf32>
    %39 = tpu.reciprocal %38 {approx = true} : vector<8x128xf32> -> vector<8x128xf32>
    %40 = vector.extract_strided_slice %18 {offsets = [0, 384], sizes = [8, 128], strides = [1, 1]} : vector<8x1152xf32> to vector<8x128xf32>
    %41 = vector.extract_strided_slice %18 {offsets = [0, 512], sizes = [8, 128], strides = [1, 1]} : vector<8x1152xf32> to vector<8x128xf32>
    %42 = arith.mulf %40, %40 : vector<8x128xf32>
    %43 = arith.mulf %41, %41 : vector<8x128xf32>
    %44 = arith.addf %42, %43 : vector<8x128xf32>
    %cst_25 = arith.constant 1.000000e+00 : f32
    %45 = vector.broadcast %cst_25 : f32 to vector<8x128xf32>
    %46 = arith.maximumf %44, %45 : vector<8x128xf32>
    %47 = math.rsqrt %46 : vector<8x128xf32>
    %48 = arith.mulf %40, %47 : vector<8x128xf32>
    %49 = arith.mulf %41, %47 : vector<8x128xf32>
    %50 = vector.extract_strided_slice %18 {offsets = [0, 640], sizes = [8, 128], strides = [1, 1]} : vector<8x1152xf32> to vector<8x128xf32>
    %51 = vector.extract_strided_slice %18 {offsets = [0, 768], sizes = [8, 128], strides = [1, 1]} : vector<8x1152xf32> to vector<8x128xf32>
    %52 = arith.mulf %50, %50 : vector<8x128xf32>
    %53 = arith.mulf %51, %51 : vector<8x128xf32>
    %54 = arith.addf %52, %53 : vector<8x128xf32>
    %cst_26 = arith.constant 1.000000e+00 : f32
    %55 = vector.broadcast %cst_26 : f32 to vector<8x128xf32>
    %56 = arith.maximumf %54, %55 : vector<8x128xf32>
    %57 = math.rsqrt %56 : vector<8x128xf32>
    %58 = arith.mulf %50, %57 : vector<8x128xf32>
    %59 = arith.mulf %51, %57 : vector<8x128xf32>
    %60 = vector.extract_strided_slice %18 {offsets = [0, 896], sizes = [8, 128], strides = [1, 1]} : vector<8x1152xf32> to vector<8x128xf32>
    %61 = vector.extract_strided_slice %18 {offsets = [0, 1024], sizes = [8, 128], strides = [1, 1]} : vector<8x1152xf32> to vector<8x128xf32>
    %62 = arith.mulf %60, %60 : vector<8x128xf32>
    %63 = arith.mulf %61, %61 : vector<8x128xf32>
    %64 = arith.addf %62, %63 : vector<8x128xf32>
    %cst_27 = arith.constant 1.000000e+00 : f32
    %65 = vector.broadcast %cst_27 : f32 to vector<8x128xf32>
    %66 = arith.maximumf %64, %65 : vector<8x128xf32>
    %67 = math.rsqrt %66 : vector<8x128xf32>
    %68 = arith.mulf %60, %67 : vector<8x128xf32>
    %69 = arith.mulf %61, %67 : vector<8x128xf32>
    %70 = arith.mulf %32, %68 : vector<8x128xf32>
    %71 = arith.mulf %32, %69 : vector<8x128xf32>
    %72 = arith.mulf %25, %12 : vector<8x128xf32>
    %73 = arith.mulf %48, %70 : vector<8x128xf32>
    %74 = arith.mulf %49, %71 : vector<8x128xf32>
    %75 = arith.subf %73, %74 : vector<8x128xf32>
    %76 = arith.addf %72, %75 : vector<8x128xf32>
    %77 = arith.mulf %25, %13 : vector<8x128xf32>
    %78 = arith.mulf %48, %71 : vector<8x128xf32>
    %79 = arith.mulf %49, %70 : vector<8x128xf32>
    %80 = arith.addf %78, %79 : vector<8x128xf32>
    %81 = arith.addf %77, %80 : vector<8x128xf32>
    %82 = arith.mulf %58, %76 : vector<8x128xf32>
    %83 = arith.mulf %59, %81 : vector<8x128xf32>
    %84 = arith.subf %82, %83 : vector<8x128xf32>
    %85 = arith.mulf %58, %81 : vector<8x128xf32>
    %86 = arith.mulf %59, %76 : vector<8x128xf32>
    %87 = arith.addf %85, %86 : vector<8x128xf32>
    %88 = arith.mulf %84, %84 : vector<8x128xf32>
    %89 = arith.mulf %87, %87 : vector<8x128xf32>
    %90 = arith.addf %88, %89 : vector<8x128xf32>
    %cst_28 = arith.constant 1.000000e+00 : f32
    %91 = vector.broadcast %cst_28 : f32 to vector<8x128xf32>
    %92 = arith.maximumf %90, %91 : vector<8x128xf32>
    %93 = math.rsqrt %92 : vector<8x128xf32>
    %94 = arith.mulf %84, %93 : vector<8x128xf32>
    %95 = arith.mulf %87, %93 : vector<8x128xf32>
    %96 = arith.mulf %39, %94 : vector<8x128xf32>
    %97 = arith.mulf %39, %95 : vector<8x128xf32>
    %98 = tpu.concatenate %96, %97 in 1 : vector<8x128xf32>, vector<8x128xf32> -> vector<8x256xf32>
    %c0_29 = arith.constant 0 : index
    %c0_30 = arith.constant 0 : index
    %99 = vector.load %arg15[%c0_29, %c0_30] : memref<64x256xf32, #tpu.memory_space<vmem>>, vector<8x256xf32>
    tpu.vector_store %arg15[%c0_29, %c0_30], %98 {strides = array<i32>} : memref<64x256xf32, #tpu.memory_space<vmem>>, vector<8x256xf32>,
    %c8 = arith.constant 8 : index
    %c0_31 = arith.constant 0 : index
    %100 = vector.load %arg14[%c8, %c0_31] : memref<64x1152xf32, #tpu.memory_space<vmem>>, vector<8x1152xf32>
    %101 = arith.truncf %98 : vector<8x256xf32> to vector<8x256xbf16>
    %c0_32 = arith.constant 0 : index
    %c0_33 = arith.constant 0 : index
    %102 = vector.load %arg10[%c0_32, %c0_33] : memref<256x1152xbf16, #tpu.memory_space<vmem>>, vector<256x1152xbf16>
    %cst_34 = arith.constant dense<0.000000e+00> : vector<8x1152xf32>
    %103 = tpu.matmul %101, %102, %cst_34 {dimension_numbers = #tpu.dot_dimension_numbers<[1], [0], [0], [1], [0, 0, 1, 1], [], []>} : vector<8x256xbf16>, vector<256x1152xbf16>, vector<8x1152xf32> -> vector<8x1152xf32>
    %104 = arith.addf %100, %103 : vector<8x1152xf32>
    %105 = vector.extract_strided_slice %104 {offsets = [0, 0], sizes = [8, 128], strides = [1, 1]} : vector<8x1152xf32> to vector<8x128xf32>
    %cst_35 = arith.constant 0.000000e+00 : f32
    %106 = vector.broadcast %cst_35 : f32 to vector<8x128xf32>
    %107 = arith.subf %106, %105 : vector<8x128xf32>
    %108 = math.exp %107 : vector<8x128xf32>
    %cst_36 = arith.constant 1.000000e+00 : f32
    %109 = vector.broadcast %cst_36 : f32 to vector<8x128xf32>
    %110 = arith.addf %109, %108 : vector<8x128xf32>
    %111 = tpu.reciprocal %110 {approx = true} : vector<8x128xf32> -> vector<8x128xf32>
    %112 = vector.extract_strided_slice %104 {offsets = [0, 128], sizes = [8, 128], strides = [1, 1]} : vector<8x1152xf32> to vector<8x128xf32>
    %cst_37 = arith.constant 0.000000e+00 : f32
    %113 = vector.broadcast %cst_37 : f32 to vector<8x128xf32>
    %114 = arith.subf %113, %112 : vector<8x128xf32>
    %115 = math.exp %114 : vector<8x128xf32>
    %cst_38 = arith.constant 1.000000e+00 : f32
    %116 = vector.broadcast %cst_38 : f32 to vector<8x128xf32>
    %117 = arith.addf %116, %115 : vector<8x128xf32>
    %118 = tpu.reciprocal %117 {approx = true} : vector<8x128xf32> -> vector<8x128xf32>
    %119 = vector.extract_strided_slice %104 {offsets = [0, 256], sizes = [8, 128], strides = [1, 1]} : vector<8x1152xf32> to vector<8x128xf32>
    %cst_39 = arith.constant 0.000000e+00 : f32
    %120 = vector.broadcast %cst_39 : f32 to vector<8x128xf32>
    %121 = arith.subf %120, %119 : vector<8x128xf32>
    %122 = math.exp %121 : vector<8x128xf32>
    %cst_40 = arith.constant 1.000000e+00 : f32
    %123 = vector.broadcast %cst_40 : f32 to vector<8x128xf32>
    %124 = arith.addf %123, %122 : vector<8x128xf32>
    %125 = tpu.reciprocal %124 {approx = true} : vector<8x128xf32> -> vector<8x128xf32>
    %126 = vector.extract_strided_slice %104 {offsets = [0, 384], sizes = [8, 128], strides = [1, 1]} : vector<8x1152xf32> to vector<8x128xf32>
    %127 = vector.extract_strided_slice %104 {offsets = [0, 512], sizes = [8, 128], strides = [1, 1]} : vector<8x1152xf32> to vector<8x128xf32>
    %128 = arith.mulf %126, %126 : vector<8x128xf32>
    %129 = arith.mulf %127, %127 : vector<8x128xf32>
    %130 = arith.addf %128, %129 : vector<8x128xf32>
    %cst_41 = arith.constant 1.000000e+00 : f32
    %131 = vector.broadcast %cst_41 : f32 to vector<8x128xf32>
    %132 = arith.maximumf %130, %131 : vector<8x128xf32>
    %133 = math.rsqrt %132 : vector<8x128xf32>
    %134 = arith.mulf %126, %133 : vector<8x128xf32>
    %135 = arith.mulf %127, %133 : vector<8x128xf32>
    %136 = vector.extract_strided_slice %104 {offsets = [0, 640], sizes = [8, 128], strides = [1, 1]} : vector<8x1152xf32> to vector<8x128xf32>
    %137 = vector.extract_strided_slice %104 {offsets = [0, 768], sizes = [8, 128], strides = [1, 1]} : vector<8x1152xf32> to vector<8x128xf32>
    %138 = arith.mulf %136, %136 : vector<8x128xf32>
    %139 = arith.mulf %137, %137 : vector<8x128xf32>
    %140 = arith.addf %138, %139 : vector<8x128xf32>
    %cst_42 = arith.constant 1.000000e+00 : f32
    %141 = vector.broadcast %cst_42 : f32 to vector<8x128xf32>
    %142 = arith.maximumf %140, %141 : vector<8x128xf32>
    %143 = math.rsqrt %142 : vector<8x128xf32>
    %144 = arith.mulf %136, %143 : vector<8x128xf32>
    %145 = arith.mulf %137, %143 : vector<8x128xf32>
    %146 = vector.extract_strided_slice %104 {offsets = [0, 896], sizes = [8, 128], strides = [1, 1]} : vector<8x1152xf32> to vector<8x128xf32>
    %147 = vector.extract_strided_slice %104 {offsets = [0, 1024], sizes = [8, 128], strides = [1, 1]} : vector<8x1152xf32> to vector<8x128xf32>
    %148 = arith.mulf %146, %146 : vector<8x128xf32>
    %149 = arith.mulf %147, %147 : vector<8x128xf32>
    %150 = arith.addf %148, %149 : vector<8x128xf32>
    %cst_43 = arith.constant 1.000000e+00 : f32
    %151 = vector.broadcast %cst_43 : f32 to vector<8x128xf32>
    %152 = arith.maximumf %150, %151 : vector<8x128xf32>
    %153 = math.rsqrt %152 : vector<8x128xf32>
    %154 = arith.mulf %146, %153 : vector<8x128xf32>
    %155 = arith.mulf %147, %153 : vector<8x128xf32>
    %156 = arith.mulf %118, %154 : vector<8x128xf32>
    %157 = arith.mulf %118, %155 : vector<8x128xf32>
    %158 = arith.mulf %111, %76 : vector<8x128xf32>
    %159 = arith.mulf %134, %156 : vector<8x128xf32>
    %160 = arith.mulf %135, %157 : vector<8x128xf32>
    %161 = arith.subf %159, %160 : vector<8x128xf32>
    %162 = arith.addf %158, %161 : vector<8x128xf32>
    %163 = arith.mulf %111, %81 : vector<8x128xf32>
    %164 = arith.mulf %134, %157 : vector<8x128xf32>
    %165 = arith.mulf %135, %156 : vector<8x128xf32>
    %166 = arith.addf %164, %165 : vector<8x128xf32>
    %167 = arith.addf %163, %166 : vector<8x128xf32>
    %168 = arith.mulf %144, %162 : vector<8x128xf32>
    %169 = arith.mulf %145, %167 : vector<8x128xf32>
    %170 = arith.subf %168, %169 : vector<8x128xf32>
    %171 = arith.mulf %144, %167 : vector<8x128xf32>
    %172 = arith.mulf %145, %162 : vector<8x128xf32>
    %173 = arith.addf %171, %172 : vector<8x128xf32>
    %174 = arith.mulf %170, %170 : vector<8x128xf32>
    %175 = arith.mulf %173, %173 : vector<8x128xf32>
    %176 = arith.addf %174, %175 : vector<8x128xf32>
    %cst_44 = arith.constant 1.000000e+00 : f32
    %177 = vector.broadcast %cst_44 : f32 to vector<8x128xf32>
    %178 = arith.maximumf %176, %177 : vector<8x128xf32>
    %179 = math.rsqrt %178 : vector<8x128xf32>
    %180 = arith.mulf %170, %179 : vector<8x128xf32>
    %181 = arith.mulf %173, %179 : vector<8x128xf32>
    %182 = arith.mulf %125, %180 : vector<8x128xf32>
    %183 = arith.mulf %125, %181 : vector<8x128xf32>
    %184 = tpu.concatenate %182, %183 in 1 : vector<8x128xf32>, vector<8x128xf32> -> vector<8x256xf32>
    %c8_45 = arith.constant 8 : index
    %c0_46 = arith.constant 0 : index
    %185 = vector.load %arg15[%c8_45, %c0_46] : memref<64x256xf32, #tpu.memory_space<vmem>>, vector<8x256xf32>
    tpu.vector_store %arg15[%c8_45, %c0_46], %184 {strides = array<i32>} : memref<64x256xf32, #tpu.memory_space<vmem>>, vector<8x256xf32>,
    %c16 = arith.constant 16 : index
    %c0_47 = arith.constant 0 : index
    %186 = vector.load %arg14[%c16, %c0_47] : memref<64x1152xf32, #tpu.memory_space<vmem>>, vector<8x1152xf32>
    %187 = arith.truncf %184 : vector<8x256xf32> to vector<8x256xbf16>
    %c0_48 = arith.constant 0 : index
    %c0_49 = arith.constant 0 : index
    %188 = vector.load %arg10[%c0_48, %c0_49] : memref<256x1152xbf16, #tpu.memory_space<vmem>>, vector<256x1152xbf16>
    %cst_50 = arith.constant dense<0.000000e+00> : vector<8x1152xf32>
    %189 = tpu.matmul %187, %188, %cst_50 {dimension_numbers = #tpu.dot_dimension_numbers<[1], [0], [0], [1], [0, 0, 1, 1], [], []>} : vector<8x256xbf16>, vector<256x1152xbf16>, vector<8x1152xf32> -> vector<8x1152xf32>
    %190 = arith.addf %186, %189 : vector<8x1152xf32>
    %191 = vector.extract_strided_slice %190 {offsets = [0, 0], sizes = [8, 128], strides = [1, 1]} : vector<8x1152xf32> to vector<8x128xf32>
    %cst_51 = arith.constant 0.000000e+00 : f32
    %192 = vector.broadcast %cst_51 : f32 to vector<8x128xf32>
    %193 = arith.subf %192, %191 : vector<8x128xf32>
    %194 = math.exp %193 : vector<8x128xf32>
    %cst_52 = arith.constant 1.000000e+00 : f32
    %195 = vector.broadcast %cst_52 : f32 to vector<8x128xf32>
    %196 = arith.addf %195, %194 : vector<8x128xf32>
    %197 = tpu.reciprocal %196 {approx = true} : vector<8x128xf32> -> vector<8x128xf32>
    %198 = vector.extract_strided_slice %190 {offsets = [0, 128], sizes = [8, 128], strides = [1, 1]} : vector<8x1152xf32> to vector<8x128xf32>
    %cst_53 = arith.constant 0.000000e+00 : f32
    %199 = vector.broadcast %cst_53 : f32 to vector<8x128xf32>
    %200 = arith.subf %199, %198 : vector<8x128xf32>
    %201 = math.exp %200 : vector<8x128xf32>
    %cst_54 = arith.constant 1.000000e+00 : f32
    %202 = vector.broadcast %cst_54 : f32 to vector<8x128xf32>
    %203 = arith.addf %202, %201 : vector<8x128xf32>
    %204 = tpu.reciprocal %203 {approx = true} : vector<8x128xf32> -> vector<8x128xf32>
    %205 = vector.extract_strided_slice %190 {offsets = [0, 256], sizes = [8, 128], strides = [1, 1]} : vector<8x1152xf32> to vector<8x128xf32>
    %cst_55 = arith.constant 0.000000e+00 : f32
    %206 = vector.broadcast %cst_55 : f32 to vector<8x128xf32>
    %207 = arith.subf %206, %205 : vector<8x128xf32>
    %208 = math.exp %207 : vector<8x128xf32>
    %cst_56 = arith.constant 1.000000e+00 : f32
    %209 = vector.broadcast %cst_56 : f32 to vector<8x128xf32>
    %210 = arith.addf %209, %208 : vector<8x128xf32>
    %211 = tpu.reciprocal %210 {approx = true} : vector<8x128xf32> -> vector<8x128xf32>
    %212 = vector.extract_strided_slice %190 {offsets = [0, 384], sizes = [8, 128], strides = [1, 1]} : vector<8x1152xf32> to vector<8x128xf32>
    %213 = vector.extract_strided_slice %190 {offsets = [0, 512], sizes = [8, 128], strides = [1, 1]} : vector<8x1152xf32> to vector<8x128xf32>
    %214 = arith.mulf %212, %212 : vector<8x128xf32>
    %215 = arith.mulf %213, %213 : vector<8x128xf32>
    %216 = arith.addf %214, %215 : vector<8x128xf32>
    %cst_57 = arith.constant 1.000000e+00 : f32
    %217 = vector.broadcast %cst_57 : f32 to vector<8x128xf32>
    %218 = arith.maximumf %216, %217 : vector<8x128xf32>
    %219 = math.rsqrt %218 : vector<8x128xf32>
    %220 = arith.mulf %212, %219 : vector<8x128xf32>
    %221 = arith.mulf %213, %219 : vector<8x128xf32>
    %222 = vector.extract_strided_slice %190 {offsets = [0, 640], sizes = [8, 128], strides = [1, 1]} : vector<8x1152xf32> to vector<8x128xf32>
    %223 = vector.extract_strided_slice %190 {offsets = [0, 768], sizes = [8, 128], strides = [1, 1]} : vector<8x1152xf32> to vector<8x128xf32>
    %224 = arith.mulf %222, %222 : vector<8x128xf32>
    %225 = arith.mulf %223, %223 : vector<8x128xf32>
    %226 = arith.addf %224, %225 : vector<8x128xf32>
    %cst_58 = arith.constant 1.000000e+00 : f32
    %227 = vector.broadcast %cst_58 : f32 to vector<8x128xf32>
    %228 = arith.maximumf %226, %227 : vector<8x128xf32>
    %229 = math.rsqrt %228 : vector<8x128xf32>
    %230 = arith.mulf %222, %229 : vector<8x128xf32>
    %231 = arith.mulf %223, %229 : vector<8x128xf32>
    %232 = vector.extract_strided_slice %190 {offsets = [0, 896], sizes = [8, 128], strides = [1, 1]} : vector<8x1152xf32> to vector<8x128xf32>
    %233 = vector.extract_strided_slice %190 {offsets = [0, 1024], sizes = [8, 128], strides = [1, 1]} : vector<8x1152xf32> to vector<8x128xf32>
    %234 = arith.mulf %232, %232 : vector<8x128xf32>
    %235 = arith.mulf %233, %233 : vector<8x128xf32>
    %236 = arith.addf %234, %235 : vector<8x128xf32>
    %cst_59 = arith.constant 1.000000e+00 : f32
    %237 = vector.broadcast %cst_59 : f32 to vector<8x128xf32>
    %238 = arith.maximumf %236, %237 : vector<8x128xf32>
    %239 = math.rsqrt %238 : vector<8x128xf32>
    %240 = arith.mulf %232, %239 : vector<8x128xf32>
    %241 = arith.mulf %233, %239 : vector<8x128xf32>
    %242 = arith.mulf %204, %240 : vector<8x128xf32>
    %243 = arith.mulf %204, %241 : vector<8x128xf32>
    %244 = arith.mulf %197, %162 : vector<8x128xf32>
    %245 = arith.mulf %220, %242 : vector<8x128xf32>
    %246 = arith.mulf %221, %243 : vector<8x128xf32>
    %247 = arith.subf %245, %246 : vector<8x128xf32>
    %248 = arith.addf %244, %247 : vector<8x128xf32>
    %249 = arith.mulf %197, %167 : vector<8x128xf32>
    %250 = arith.mulf %220, %243 : vector<8x128xf32>
    %251 = arith.mulf %221, %242 : vector<8x128xf32>
    %252 = arith.addf %250, %251 : vector<8x128xf32>
    %253 = arith.addf %249, %252 : vector<8x128xf32>
    %254 = arith.mulf %230, %248 : vector<8x128xf32>
    %255 = arith.mulf %231, %253 : vector<8x128xf32>
    %256 = arith.subf %254, %255 : vector<8x128xf32>
    %257 = arith.mulf %230, %253 : vector<8x128xf32>
    %258 = arith.mulf %231, %248 : vector<8x128xf32>
    %259 = arith.addf %257, %258 : vector<8x128xf32>
    %260 = arith.mulf %256, %256 : vector<8x128xf32>
    %261 = arith.mulf %259, %259 : vector<8x128xf32>
    %262 = arith.addf %260, %261 : vector<8x128xf32>
    %cst_60 = arith.constant 1.000000e+00 : f32
    %263 = vector.broadcast %cst_60 : f32 to vector<8x128xf32>
    %264 = arith.maximumf %262, %263 : vector<8x128xf32>
    %265 = math.rsqrt %264 : vector<8x128xf32>
    %266 = arith.mulf %256, %265 : vector<8x128xf32>
    %267 = arith.mulf %259, %265 : vector<8x128xf32>
    %268 = arith.mulf %211, %266 : vector<8x128xf32>
    %269 = arith.mulf %211, %267 : vector<8x128xf32>
    %270 = tpu.concatenate %268, %269 in 1 : vector<8x128xf32>, vector<8x128xf32> -> vector<8x256xf32>
    %c16_61 = arith.constant 16 : index
    %c0_62 = arith.constant 0 : index
    %271 = vector.load %arg15[%c16_61, %c0_62] : memref<64x256xf32, #tpu.memory_space<vmem>>, vector<8x256xf32>
    tpu.vector_store %arg15[%c16_61, %c0_62], %270 {strides = array<i32>} : memref<64x256xf32, #tpu.memory_space<vmem>>, vector<8x256xf32>,
    %c24 = arith.constant 24 : index
    %c0_63 = arith.constant 0 : index
    %272 = vector.load %arg14[%c24, %c0_63] : memref<64x1152xf32, #tpu.memory_space<vmem>>, vector<8x1152xf32>
    %273 = arith.truncf %270 : vector<8x256xf32> to vector<8x256xbf16>
    %c0_64 = arith.constant 0 : index
    %c0_65 = arith.constant 0 : index
    %274 = vector.load %arg10[%c0_64, %c0_65] : memref<256x1152xbf16, #tpu.memory_space<vmem>>, vector<256x1152xbf16>
    %cst_66 = arith.constant dense<0.000000e+00> : vector<8x1152xf32>
    %275 = tpu.matmul %273, %274, %cst_66 {dimension_numbers = #tpu.dot_dimension_numbers<[1], [0], [0], [1], [0, 0, 1, 1], [], []>} : vector<8x256xbf16>, vector<256x1152xbf16>, vector<8x1152xf32> -> vector<8x1152xf32>
    %276 = arith.addf %272, %275 : vector<8x1152xf32>
    %277 = vector.extract_strided_slice %276 {offsets = [0, 0], sizes = [8, 128], strides = [1, 1]} : vector<8x1152xf32> to vector<8x128xf32>
    %cst_67 = arith.constant 0.000000e+00 : f32
    %278 = vector.broadcast %cst_67 : f32 to vector<8x128xf32>
    %279 = arith.subf %278, %277 : vector<8x128xf32>
    %280 = math.exp %279 : vector<8x128xf32>
    %cst_68 = arith.constant 1.000000e+00 : f32
    %281 = vector.broadcast %cst_68 : f32 to vector<8x128xf32>
    %282 = arith.addf %281, %280 : vector<8x128xf32>
    %283 = tpu.reciprocal %282 {approx = true} : vector<8x128xf32> -> vector<8x128xf32>
    %284 = vector.extract_strided_slice %276 {offsets = [0, 128], sizes = [8, 128], strides = [1, 1]} : vector<8x1152xf32> to vector<8x128xf32>
    %cst_69 = arith.constant 0.000000e+00 : f32
    %285 = vector.broadcast %cst_69 : f32 to vector<8x128xf32>
    %286 = arith.subf %285, %284 : vector<8x128xf32>
    %287 = math.exp %286 : vector<8x128xf32>
    %cst_70 = arith.constant 1.000000e+00 : f32
    %288 = vector.broadcast %cst_70 : f32 to vector<8x128xf32>
    %289 = arith.addf %288, %287 : vector<8x128xf32>
    %290 = tpu.reciprocal %289 {approx = true} : vector<8x128xf32> -> vector<8x128xf32>
    %291 = vector.extract_strided_slice %276 {offsets = [0, 256], sizes = [8, 128], strides = [1, 1]} : vector<8x1152xf32> to vector<8x128xf32>
    %cst_71 = arith.constant 0.000000e+00 : f32
    %292 = vector.broadcast %cst_71 : f32 to vector<8x128xf32>
    %293 = arith.subf %292, %291 : vector<8x128xf32>
    %294 = math.exp %293 : vector<8x128xf32>
    %cst_72 = arith.constant 1.000000e+00 : f32
    %295 = vector.broadcast %cst_72 : f32 to vector<8x128xf32>
    %296 = arith.addf %295, %294 : vector<8x128xf32>
    %297 = tpu.reciprocal %296 {approx = true} : vector<8x128xf32> -> vector<8x128xf32>
    %298 = vector.extract_strided_slice %276 {offsets = [0, 384], sizes = [8, 128], strides = [1, 1]} : vector<8x1152xf32> to vector<8x128xf32>
    %299 = vector.extract_strided_slice %276 {offsets = [0, 512], sizes = [8, 128], strides = [1, 1]} : vector<8x1152xf32> to vector<8x128xf32>
    %300 = arith.mulf %298, %298 : vector<8x128xf32>
    %301 = arith.mulf %299, %299 : vector<8x128xf32>
    %302 = arith.addf %300, %301 : vector<8x128xf32>
    %cst_73 = arith.constant 1.000000e+00 : f32
    %303 = vector.broadcast %cst_73 : f32 to vector<8x128xf32>
    %304 = arith.maximumf %302, %303 : vector<8x128xf32>
    %305 = math.rsqrt %304 : vector<8x128xf32>
    %306 = arith.mulf %298, %305 : vector<8x128xf32>
    %307 = arith.mulf %299, %305 : vector<8x128xf32>
    %308 = vector.extract_strided_slice %276 {offsets = [0, 640], sizes = [8, 128], strides = [1, 1]} : vector<8x1152xf32> to vector<8x128xf32>
    %309 = vector.extract_strided_slice %276 {offsets = [0, 768], sizes = [8, 128], strides = [1, 1]} : vector<8x1152xf32> to vector<8x128xf32>
    %310 = arith.mulf %308, %308 : vector<8x128xf32>
    %311 = arith.mulf %309, %309 : vector<8x128xf32>
    %312 = arith.addf %310, %311 : vector<8x128xf32>
    %cst_74 = arith.constant 1.000000e+00 : f32
    %313 = vector.broadcast %cst_74 : f32 to vector<8x128xf32>
    %314 = arith.maximumf %312, %313 : vector<8x128xf32>
    %315 = math.rsqrt %314 : vector<8x128xf32>
    %316 = arith.mulf %308, %315 : vector<8x128xf32>
    %317 = arith.mulf %309, %315 : vector<8x128xf32>
    %318 = vector.extract_strided_slice %276 {offsets = [0, 896], sizes = [8, 128], strides = [1, 1]} : vector<8x1152xf32> to vector<8x128xf32>
    %319 = vector.extract_strided_slice %276 {offsets = [0, 1024], sizes = [8, 128], strides = [1, 1]} : vector<8x1152xf32> to vector<8x128xf32>
    %320 = arith.mulf %318, %318 : vector<8x128xf32>
    %321 = arith.mulf %319, %319 : vector<8x128xf32>
    %322 = arith.addf %320, %321 : vector<8x128xf32>
    %cst_75 = arith.constant 1.000000e+00 : f32
    %323 = vector.broadcast %cst_75 : f32 to vector<8x128xf32>
    %324 = arith.maximumf %322, %323 : vector<8x128xf32>
    %325 = math.rsqrt %324 : vector<8x128xf32>
    %326 = arith.mulf %318, %325 : vector<8x128xf32>
    %327 = arith.mulf %319, %325 : vector<8x128xf32>
    %328 = arith.mulf %290, %326 : vector<8x128xf32>
    %329 = arith.mulf %290, %327 : vector<8x128xf32>
    %330 = arith.mulf %283, %248 : vector<8x128xf32>
    %331 = arith.mulf %306, %328 : vector<8x128xf32>
    %332 = arith.mulf %307, %329 : vector<8x128xf32>
    %333 = arith.subf %331, %332 : vector<8x128xf32>
    %334 = arith.addf %330, %333 : vector<8x128xf32>
    %335 = arith.mulf %283, %253 : vector<8x128xf32>
    %336 = arith.mulf %306, %329 : vector<8x128xf32>
    %337 = arith.mulf %307, %328 : vector<8x128xf32>
    %338 = arith.addf %336, %337 : vector<8x128xf32>
    %339 = arith.addf %335, %338 : vector<8x128xf32>
    %340 = arith.mulf %316, %334 : vector<8x128xf32>
    %341 = arith.mulf %317, %339 : vector<8x128xf32>
    %342 = arith.subf %340, %341 : vector<8x128xf32>
    %343 = arith.mulf %316, %339 : vector<8x128xf32>
    %344 = arith.mulf %317, %334 : vector<8x128xf32>
    %345 = arith.addf %343, %344 : vector<8x128xf32>
    %346 = arith.mulf %342, %342 : vector<8x128xf32>
    %347 = arith.mulf %345, %345 : vector<8x128xf32>
    %348 = arith.addf %346, %347 : vector<8x128xf32>
    %cst_76 = arith.constant 1.000000e+00 : f32
    %349 = vector.broadcast %cst_76 : f32 to vector<8x128xf32>
    %350 = arith.maximumf %348, %349 : vector<8x128xf32>
    %351 = math.rsqrt %350 : vector<8x128xf32>
    %352 = arith.mulf %342, %351 : vector<8x128xf32>
    %353 = arith.mulf %345, %351 : vector<8x128xf32>
    %354 = arith.mulf %297, %352 : vector<8x128xf32>
    %355 = arith.mulf %297, %353 : vector<8x128xf32>
    %356 = tpu.concatenate %354, %355 in 1 : vector<8x128xf32>, vector<8x128xf32> -> vector<8x256xf32>
    %c24_77 = arith.constant 24 : index
    %c0_78 = arith.constant 0 : index
    %357 = vector.load %arg15[%c24_77, %c0_78] : memref<64x256xf32, #tpu.memory_space<vmem>>, vector<8x256xf32>
    tpu.vector_store %arg15[%c24_77, %c0_78], %356 {strides = array<i32>} : memref<64x256xf32, #tpu.memory_space<vmem>>, vector<8x256xf32>,
    %c32 = arith.constant 32 : index
    %c0_79 = arith.constant 0 : index
    %358 = vector.load %arg14[%c32, %c0_79] : memref<64x1152xf32, #tpu.memory_space<vmem>>, vector<8x1152xf32>
    %359 = arith.truncf %356 : vector<8x256xf32> to vector<8x256xbf16>
    %c0_80 = arith.constant 0 : index
    %c0_81 = arith.constant 0 : index
    %360 = vector.load %arg10[%c0_80, %c0_81] : memref<256x1152xbf16, #tpu.memory_space<vmem>>, vector<256x1152xbf16>
    %cst_82 = arith.constant dense<0.000000e+00> : vector<8x1152xf32>
    %361 = tpu.matmul %359, %360, %cst_82 {dimension_numbers = #tpu.dot_dimension_numbers<[1], [0], [0], [1], [0, 0, 1, 1], [], []>} : vector<8x256xbf16>, vector<256x1152xbf16>, vector<8x1152xf32> -> vector<8x1152xf32>
    %362 = arith.addf %358, %361 : vector<8x1152xf32>
    %363 = vector.extract_strided_slice %362 {offsets = [0, 0], sizes = [8, 128], strides = [1, 1]} : vector<8x1152xf32> to vector<8x128xf32>
    %cst_83 = arith.constant 0.000000e+00 : f32
    %364 = vector.broadcast %cst_83 : f32 to vector<8x128xf32>
    %365 = arith.subf %364, %363 : vector<8x128xf32>
    %366 = math.exp %365 : vector<8x128xf32>
    %cst_84 = arith.constant 1.000000e+00 : f32
    %367 = vector.broadcast %cst_84 : f32 to vector<8x128xf32>
    %368 = arith.addf %367, %366 : vector<8x128xf32>
    %369 = tpu.reciprocal %368 {approx = true} : vector<8x128xf32> -> vector<8x128xf32>
    %370 = vector.extract_strided_slice %362 {offsets = [0, 128], sizes = [8, 128], strides = [1, 1]} : vector<8x1152xf32> to vector<8x128xf32>
    %cst_85 = arith.constant 0.000000e+00 : f32
    %371 = vector.broadcast %cst_85 : f32 to vector<8x128xf32>
    %372 = arith.subf %371, %370 : vector<8x128xf32>
    %373 = math.exp %372 : vector<8x128xf32>
    %cst_86 = arith.constant 1.000000e+00 : f32
    %374 = vector.broadcast %cst_86 : f32 to vector<8x128xf32>
    %375 = arith.addf %374, %373 : vector<8x128xf32>
    %376 = tpu.reciprocal %375 {approx = true} : vector<8x128xf32> -> vector<8x128xf32>
    %377 = vector.extract_strided_slice %362 {offsets = [0, 256], sizes = [8, 128], strides = [1, 1]} : vector<8x1152xf32> to vector<8x128xf32>
    %cst_87 = arith.constant 0.000000e+00 : f32
    %378 = vector.broadcast %cst_87 : f32 to vector<8x128xf32>
    %379 = arith.subf %378, %377 : vector<8x128xf32>
    %380 = math.exp %379 : vector<8x128xf32>
    %cst_88 = arith.constant 1.000000e+00 : f32
    %381 = vector.broadcast %cst_88 : f32 to vector<8x128xf32>
    %382 = arith.addf %381, %380 : vector<8x128xf32>
    %383 = tpu.reciprocal %382 {approx = true} : vector<8x128xf32> -> vector<8x128xf32>
    %384 = vector.extract_strided_slice %362 {offsets = [0, 384], sizes = [8, 128], strides = [1, 1]} : vector<8x1152xf32> to vector<8x128xf32>
    %385 = vector.extract_strided_slice %362 {offsets = [0, 512], sizes = [8, 128], strides = [1, 1]} : vector<8x1152xf32> to vector<8x128xf32>
    %386 = arith.mulf %384, %384 : vector<8x128xf32>
    %387 = arith.mulf %385, %385 : vector<8x128xf32>
    %388 = arith.addf %386, %387 : vector<8x128xf32>
    %cst_89 = arith.constant 1.000000e+00 : f32
    %389 = vector.broadcast %cst_89 : f32 to vector<8x128xf32>
    %390 = arith.maximumf %388, %389 : vector<8x128xf32>
    %391 = math.rsqrt %390 : vector<8x128xf32>
    %392 = arith.mulf %384, %391 : vector<8x128xf32>
    %393 = arith.mulf %385, %391 : vector<8x128xf32>
    %394 = vector.extract_strided_slice %362 {offsets = [0, 640], sizes = [8, 128], strides = [1, 1]} : vector<8x1152xf32> to vector<8x128xf32>
    %395 = vector.extract_strided_slice %362 {offsets = [0, 768], sizes = [8, 128], strides = [1, 1]} : vector<8x1152xf32> to vector<8x128xf32>
    %396 = arith.mulf %394, %394 : vector<8x128xf32>
    %397 = arith.mulf %395, %395 : vector<8x128xf32>
    %398 = arith.addf %396, %397 : vector<8x128xf32>
    %cst_90 = arith.constant 1.000000e+00 : f32
    %399 = vector.broadcast %cst_90 : f32 to vector<8x128xf32>
    %400 = arith.maximumf %398, %399 : vector<8x128xf32>
    %401 = math.rsqrt %400 : vector<8x128xf32>
    %402 = arith.mulf %394, %401 : vector<8x128xf32>
    %403 = arith.mulf %395, %401 : vector<8x128xf32>
    %404 = vector.extract_strided_slice %362 {offsets = [0, 896], sizes = [8, 128], strides = [1, 1]} : vector<8x1152xf32> to vector<8x128xf32>
    %405 = vector.extract_strided_slice %362 {offsets = [0, 1024], sizes = [8, 128], strides = [1, 1]} : vector<8x1152xf32> to vector<8x128xf32>
    %406 = arith.mulf %404, %404 : vector<8x128xf32>
    %407 = arith.mulf %405, %405 : vector<8x128xf32>
    %408 = arith.addf %406, %407 : vector<8x128xf32>
    %cst_91 = arith.constant 1.000000e+00 : f32
    %409 = vector.broadcast %cst_91 : f32 to vector<8x128xf32>
    %410 = arith.maximumf %408, %409 : vector<8x128xf32>
    %411 = math.rsqrt %410 : vector<8x128xf32>
    %412 = arith.mulf %404, %411 : vector<8x128xf32>
    %413 = arith.mulf %405, %411 : vector<8x128xf32>
    %414 = arith.mulf %376, %412 : vector<8x128xf32>
    %415 = arith.mulf %376, %413 : vector<8x128xf32>
    %416 = arith.mulf %369, %334 : vector<8x128xf32>
    %417 = arith.mulf %392, %414 : vector<8x128xf32>
    %418 = arith.mulf %393, %415 : vector<8x128xf32>
    %419 = arith.subf %417, %418 : vector<8x128xf32>
    %420 = arith.addf %416, %419 : vector<8x128xf32>
    %421 = arith.mulf %369, %339 : vector<8x128xf32>
    %422 = arith.mulf %392, %415 : vector<8x128xf32>
    %423 = arith.mulf %393, %414 : vector<8x128xf32>
    %424 = arith.addf %422, %423 : vector<8x128xf32>
    %425 = arith.addf %421, %424 : vector<8x128xf32>
    %426 = arith.mulf %402, %420 : vector<8x128xf32>
    %427 = arith.mulf %403, %425 : vector<8x128xf32>
    %428 = arith.subf %426, %427 : vector<8x128xf32>
    %429 = arith.mulf %402, %425 : vector<8x128xf32>
    %430 = arith.mulf %403, %420 : vector<8x128xf32>
    %431 = arith.addf %429, %430 : vector<8x128xf32>
    %432 = arith.mulf %428, %428 : vector<8x128xf32>
    %433 = arith.mulf %431, %431 : vector<8x128xf32>
    %434 = arith.addf %432, %433 : vector<8x128xf32>
    %cst_92 = arith.constant 1.000000e+00 : f32
    %435 = vector.broadcast %cst_92 : f32 to vector<8x128xf32>
    %436 = arith.maximumf %434, %435 : vector<8x128xf32>
    %437 = math.rsqrt %436 : vector<8x128xf32>
    %438 = arith.mulf %428, %437 : vector<8x128xf32>
    %439 = arith.mulf %431, %437 : vector<8x128xf32>
    %440 = arith.mulf %383, %438 : vector<8x128xf32>
    %441 = arith.mulf %383, %439 : vector<8x128xf32>
    %442 = tpu.concatenate %440, %441 in 1 : vector<8x128xf32>, vector<8x128xf32> -> vector<8x256xf32>
    %c32_93 = arith.constant 32 : index
    %c0_94 = arith.constant 0 : index
    %443 = vector.load %arg15[%c32_93, %c0_94] : memref<64x256xf32, #tpu.memory_space<vmem>>, vector<8x256xf32>
    tpu.vector_store %arg15[%c32_93, %c0_94], %442 {strides = array<i32>} : memref<64x256xf32, #tpu.memory_space<vmem>>, vector<8x256xf32>,
    %c40 = arith.constant 40 : index
    %c0_95 = arith.constant 0 : index
    %444 = vector.load %arg14[%c40, %c0_95] : memref<64x1152xf32, #tpu.memory_space<vmem>>, vector<8x1152xf32>
    %445 = arith.truncf %442 : vector<8x256xf32> to vector<8x256xbf16>
    %c0_96 = arith.constant 0 : index
    %c0_97 = arith.constant 0 : index
    %446 = vector.load %arg10[%c0_96, %c0_97] : memref<256x1152xbf16, #tpu.memory_space<vmem>>, vector<256x1152xbf16>
    %cst_98 = arith.constant dense<0.000000e+00> : vector<8x1152xf32>
    %447 = tpu.matmul %445, %446, %cst_98 {dimension_numbers = #tpu.dot_dimension_numbers<[1], [0], [0], [1], [0, 0, 1, 1], [], []>} : vector<8x256xbf16>, vector<256x1152xbf16>, vector<8x1152xf32> -> vector<8x1152xf32>
    %448 = arith.addf %444, %447 : vector<8x1152xf32>
    %449 = vector.extract_strided_slice %448 {offsets = [0, 0], sizes = [8, 128], strides = [1, 1]} : vector<8x1152xf32> to vector<8x128xf32>
    %cst_99 = arith.constant 0.000000e+00 : f32
    %450 = vector.broadcast %cst_99 : f32 to vector<8x128xf32>
    %451 = arith.subf %450, %449 : vector<8x128xf32>
    %452 = math.exp %451 : vector<8x128xf32>
    %cst_100 = arith.constant 1.000000e+00 : f32
    %453 = vector.broadcast %cst_100 : f32 to vector<8x128xf32>
    %454 = arith.addf %453, %452 : vector<8x128xf32>
    %455 = tpu.reciprocal %454 {approx = true} : vector<8x128xf32> -> vector<8x128xf32>
    %456 = vector.extract_strided_slice %448 {offsets = [0, 128], sizes = [8, 128], strides = [1, 1]} : vector<8x1152xf32> to vector<8x128xf32>
    %cst_101 = arith.constant 0.000000e+00 : f32
    %457 = vector.broadcast %cst_101 : f32 to vector<8x128xf32>
    %458 = arith.subf %457, %456 : vector<8x128xf32>
    %459 = math.exp %458 : vector<8x128xf32>
    %cst_102 = arith.constant 1.000000e+00 : f32
    %460 = vector.broadcast %cst_102 : f32 to vector<8x128xf32>
    %461 = arith.addf %460, %459 : vector<8x128xf32>
    %462 = tpu.reciprocal %461 {approx = true} : vector<8x128xf32> -> vector<8x128xf32>
    %463 = vector.extract_strided_slice %448 {offsets = [0, 256], sizes = [8, 128], strides = [1, 1]} : vector<8x1152xf32> to vector<8x128xf32>
    %cst_103 = arith.constant 0.000000e+00 : f32
    %464 = vector.broadcast %cst_103 : f32 to vector<8x128xf32>
    %465 = arith.subf %464, %463 : vector<8x128xf32>
    %466 = math.exp %465 : vector<8x128xf32>
    %cst_104 = arith.constant 1.000000e+00 : f32
    %467 = vector.broadcast %cst_104 : f32 to vector<8x128xf32>
    %468 = arith.addf %467, %466 : vector<8x128xf32>
    %469 = tpu.reciprocal %468 {approx = true} : vector<8x128xf32> -> vector<8x128xf32>
    %470 = vector.extract_strided_slice %448 {offsets = [0, 384], sizes = [8, 128], strides = [1, 1]} : vector<8x1152xf32> to vector<8x128xf32>
    %471 = vector.extract_strided_slice %448 {offsets = [0, 512], sizes = [8, 128], strides = [1, 1]} : vector<8x1152xf32> to vector<8x128xf32>
    %472 = arith.mulf %470, %470 : vector<8x128xf32>
    %473 = arith.mulf %471, %471 : vector<8x128xf32>
    %474 = arith.addf %472, %473 : vector<8x128xf32>
    %cst_105 = arith.constant 1.000000e+00 : f32
    %475 = vector.broadcast %cst_105 : f32 to vector<8x128xf32>
    %476 = arith.maximumf %474, %475 : vector<8x128xf32>
    %477 = math.rsqrt %476 : vector<8x128xf32>
    %478 = arith.mulf %470, %477 : vector<8x128xf32>
    %479 = arith.mulf %471, %477 : vector<8x128xf32>
    %480 = vector.extract_strided_slice %448 {offsets = [0, 640], sizes = [8, 128], strides = [1, 1]} : vector<8x1152xf32> to vector<8x128xf32>
    %481 = vector.extract_strided_slice %448 {offsets = [0, 768], sizes = [8, 128], strides = [1, 1]} : vector<8x1152xf32> to vector<8x128xf32>
    %482 = arith.mulf %480, %480 : vector<8x128xf32>
    %483 = arith.mulf %481, %481 : vector<8x128xf32>
    %484 = arith.addf %482, %483 : vector<8x128xf32>
    %cst_106 = arith.constant 1.000000e+00 : f32
    %485 = vector.broadcast %cst_106 : f32 to vector<8x128xf32>
    %486 = arith.maximumf %484, %485 : vector<8x128xf32>
    %487 = math.rsqrt %486 : vector<8x128xf32>
    %488 = arith.mulf %480, %487 : vector<8x128xf32>
    %489 = arith.mulf %481, %487 : vector<8x128xf32>
    %490 = vector.extract_strided_slice %448 {offsets = [0, 896], sizes = [8, 128], strides = [1, 1]} : vector<8x1152xf32> to vector<8x128xf32>
    %491 = vector.extract_strided_slice %448 {offsets = [0, 1024], sizes = [8, 128], strides = [1, 1]} : vector<8x1152xf32> to vector<8x128xf32>
    %492 = arith.mulf %490, %490 : vector<8x128xf32>
    %493 = arith.mulf %491, %491 : vector<8x128xf32>
    %494 = arith.addf %492, %493 : vector<8x128xf32>
    %cst_107 = arith.constant 1.000000e+00 : f32
    %495 = vector.broadcast %cst_107 : f32 to vector<8x128xf32>
    %496 = arith.maximumf %494, %495 : vector<8x128xf32>
    %497 = math.rsqrt %496 : vector<8x128xf32>
    %498 = arith.mulf %490, %497 : vector<8x128xf32>
    %499 = arith.mulf %491, %497 : vector<8x128xf32>
    %500 = arith.mulf %462, %498 : vector<8x128xf32>
    %501 = arith.mulf %462, %499 : vector<8x128xf32>
    %502 = arith.mulf %455, %420 : vector<8x128xf32>
    %503 = arith.mulf %478, %500 : vector<8x128xf32>
    %504 = arith.mulf %479, %501 : vector<8x128xf32>
    %505 = arith.subf %503, %504 : vector<8x128xf32>
    %506 = arith.addf %502, %505 : vector<8x128xf32>
    %507 = arith.mulf %455, %425 : vector<8x128xf32>
    %508 = arith.mulf %478, %501 : vector<8x128xf32>
    %509 = arith.mulf %479, %500 : vector<8x128xf32>
    %510 = arith.addf %508, %509 : vector<8x128xf32>
    %511 = arith.addf %507, %510 : vector<8x128xf32>
    %512 = arith.mulf %488, %506 : vector<8x128xf32>
    %513 = arith.mulf %489, %511 : vector<8x128xf32>
    %514 = arith.subf %512, %513 : vector<8x128xf32>
    %515 = arith.mulf %488, %511 : vector<8x128xf32>
    %516 = arith.mulf %489, %506 : vector<8x128xf32>
    %517 = arith.addf %515, %516 : vector<8x128xf32>
    %518 = arith.mulf %514, %514 : vector<8x128xf32>
    %519 = arith.mulf %517, %517 : vector<8x128xf32>
    %520 = arith.addf %518, %519 : vector<8x128xf32>
    %cst_108 = arith.constant 1.000000e+00 : f32
    %521 = vector.broadcast %cst_108 : f32 to vector<8x128xf32>
    %522 = arith.maximumf %520, %521 : vector<8x128xf32>
    %523 = math.rsqrt %522 : vector<8x128xf32>
    %524 = arith.mulf %514, %523 : vector<8x128xf32>
    %525 = arith.mulf %517, %523 : vector<8x128xf32>
    %526 = arith.mulf %469, %524 : vector<8x128xf32>
    %527 = arith.mulf %469, %525 : vector<8x128xf32>
    %528 = tpu.concatenate %526, %527 in 1 : vector<8x128xf32>, vector<8x128xf32> -> vector<8x256xf32>
    %c40_109 = arith.constant 40 : index
    %c0_110 = arith.constant 0 : index
    %529 = vector.load %arg15[%c40_109, %c0_110] : memref<64x256xf32, #tpu.memory_space<vmem>>, vector<8x256xf32>
    tpu.vector_store %arg15[%c40_109, %c0_110], %528 {strides = array<i32>} : memref<64x256xf32, #tpu.memory_space<vmem>>, vector<8x256xf32>,
    %c48 = arith.constant 48 : index
    %c0_111 = arith.constant 0 : index
    %530 = vector.load %arg14[%c48, %c0_111] : memref<64x1152xf32, #tpu.memory_space<vmem>>, vector<8x1152xf32>
    %531 = arith.truncf %528 : vector<8x256xf32> to vector<8x256xbf16>
    %c0_112 = arith.constant 0 : index
    %c0_113 = arith.constant 0 : index
    %532 = vector.load %arg10[%c0_112, %c0_113] : memref<256x1152xbf16, #tpu.memory_space<vmem>>, vector<256x1152xbf16>
    %cst_114 = arith.constant dense<0.000000e+00> : vector<8x1152xf32>
    %533 = tpu.matmul %531, %532, %cst_114 {dimension_numbers = #tpu.dot_dimension_numbers<[1], [0], [0], [1], [0, 0, 1, 1], [], []>} : vector<8x256xbf16>, vector<256x1152xbf16>, vector<8x1152xf32> -> vector<8x1152xf32>
    %534 = arith.addf %530, %533 : vector<8x1152xf32>
    %535 = vector.extract_strided_slice %534 {offsets = [0, 0], sizes = [8, 128], strides = [1, 1]} : vector<8x1152xf32> to vector<8x128xf32>
    %cst_115 = arith.constant 0.000000e+00 : f32
    %536 = vector.broadcast %cst_115 : f32 to vector<8x128xf32>
    %537 = arith.subf %536, %535 : vector<8x128xf32>
    %538 = math.exp %537 : vector<8x128xf32>
    %cst_116 = arith.constant 1.000000e+00 : f32
    %539 = vector.broadcast %cst_116 : f32 to vector<8x128xf32>
    %540 = arith.addf %539, %538 : vector<8x128xf32>
    %541 = tpu.reciprocal %540 {approx = true} : vector<8x128xf32> -> vector<8x128xf32>
    %542 = vector.extract_strided_slice %534 {offsets = [0, 128], sizes = [8, 128], strides = [1, 1]} : vector<8x1152xf32> to vector<8x128xf32>
    %cst_117 = arith.constant 0.000000e+00 : f32
    %543 = vector.broadcast %cst_117 : f32 to vector<8x128xf32>
    %544 = arith.subf %543, %542 : vector<8x128xf32>
    %545 = math.exp %544 : vector<8x128xf32>
    %cst_118 = arith.constant 1.000000e+00 : f32
    %546 = vector.broadcast %cst_118 : f32 to vector<8x128xf32>
    %547 = arith.addf %546, %545 : vector<8x128xf32>
    %548 = tpu.reciprocal %547 {approx = true} : vector<8x128xf32> -> vector<8x128xf32>
    %549 = vector.extract_strided_slice %534 {offsets = [0, 256], sizes = [8, 128], strides = [1, 1]} : vector<8x1152xf32> to vector<8x128xf32>
    %cst_119 = arith.constant 0.000000e+00 : f32
    %550 = vector.broadcast %cst_119 : f32 to vector<8x128xf32>
    %551 = arith.subf %550, %549 : vector<8x128xf32>
    %552 = math.exp %551 : vector<8x128xf32>
    %cst_120 = arith.constant 1.000000e+00 : f32
    %553 = vector.broadcast %cst_120 : f32 to vector<8x128xf32>
    %554 = arith.addf %553, %552 : vector<8x128xf32>
    %555 = tpu.reciprocal %554 {approx = true} : vector<8x128xf32> -> vector<8x128xf32>
    %556 = vector.extract_strided_slice %534 {offsets = [0, 384], sizes = [8, 128], strides = [1, 1]} : vector<8x1152xf32> to vector<8x128xf32>
    %557 = vector.extract_strided_slice %534 {offsets = [0, 512], sizes = [8, 128], strides = [1, 1]} : vector<8x1152xf32> to vector<8x128xf32>
    %558 = arith.mulf %556, %556 : vector<8x128xf32>
    %559 = arith.mulf %557, %557 : vector<8x128xf32>
    %560 = arith.addf %558, %559 : vector<8x128xf32>
    %cst_121 = arith.constant 1.000000e+00 : f32
    %561 = vector.broadcast %cst_121 : f32 to vector<8x128xf32>
    %562 = arith.maximumf %560, %561 : vector<8x128xf32>
    %563 = math.rsqrt %562 : vector<8x128xf32>
    %564 = arith.mulf %556, %563 : vector<8x128xf32>
    %565 = arith.mulf %557, %563 : vector<8x128xf32>
    %566 = vector.extract_strided_slice %534 {offsets = [0, 640], sizes = [8, 128], strides = [1, 1]} : vector<8x1152xf32> to vector<8x128xf32>
    %567 = vector.extract_strided_slice %534 {offsets = [0, 768], sizes = [8, 128], strides = [1, 1]} : vector<8x1152xf32> to vector<8x128xf32>
    %568 = arith.mulf %566, %566 : vector<8x128xf32>
    %569 = arith.mulf %567, %567 : vector<8x128xf32>
    %570 = arith.addf %568, %569 : vector<8x128xf32>
    %cst_122 = arith.constant 1.000000e+00 : f32
    %571 = vector.broadcast %cst_122 : f32 to vector<8x128xf32>
    %572 = arith.maximumf %570, %571 : vector<8x128xf32>
    %573 = math.rsqrt %572 : vector<8x128xf32>
    %574 = arith.mulf %566, %573 : vector<8x128xf32>
    %575 = arith.mulf %567, %573 : vector<8x128xf32>
    %576 = vector.extract_strided_slice %534 {offsets = [0, 896], sizes = [8, 128], strides = [1, 1]} : vector<8x1152xf32> to vector<8x128xf32>
    %577 = vector.extract_strided_slice %534 {offsets = [0, 1024], sizes = [8, 128], strides = [1, 1]} : vector<8x1152xf32> to vector<8x128xf32>
    %578 = arith.mulf %576, %576 : vector<8x128xf32>
    %579 = arith.mulf %577, %577 : vector<8x128xf32>
    %580 = arith.addf %578, %579 : vector<8x128xf32>
    %cst_123 = arith.constant 1.000000e+00 : f32
    %581 = vector.broadcast %cst_123 : f32 to vector<8x128xf32>
    %582 = arith.maximumf %580, %581 : vector<8x128xf32>
    %583 = math.rsqrt %582 : vector<8x128xf32>
    %584 = arith.mulf %576, %583 : vector<8x128xf32>
    %585 = arith.mulf %577, %583 : vector<8x128xf32>
    %586 = arith.mulf %548, %584 : vector<8x128xf32>
    %587 = arith.mulf %548, %585 : vector<8x128xf32>
    %588 = arith.mulf %541, %506 : vector<8x128xf32>
    %589 = arith.mulf %564, %586 : vector<8x128xf32>
    %590 = arith.mulf %565, %587 : vector<8x128xf32>
    %591 = arith.subf %589, %590 : vector<8x128xf32>
    %592 = arith.addf %588, %591 : vector<8x128xf32>
    %593 = arith.mulf %541, %511 : vector<8x128xf32>
    %594 = arith.mulf %564, %587 : vector<8x128xf32>
    %595 = arith.mulf %565, %586 : vector<8x128xf32>
    %596 = arith.addf %594, %595 : vector<8x128xf32>
    %597 = arith.addf %593, %596 : vector<8x128xf32>
    %598 = arith.mulf %574, %592 : vector<8x128xf32>
    %599 = arith.mulf %575, %597 : vector<8x128xf32>
    %600 = arith.subf %598, %599 : vector<8x128xf32>
    %601 = arith.mulf %574, %597 : vector<8x128xf32>
    %602 = arith.mulf %575, %592 : vector<8x128xf32>
    %603 = arith.addf %601, %602 : vector<8x128xf32>
    %604 = arith.mulf %600, %600 : vector<8x128xf32>
    %605 = arith.mulf %603, %603 : vector<8x128xf32>
    %606 = arith.addf %604, %605 : vector<8x128xf32>
    %cst_124 = arith.constant 1.000000e+00 : f32
    %607 = vector.broadcast %cst_124 : f32 to vector<8x128xf32>
    %608 = arith.maximumf %606, %607 : vector<8x128xf32>
    %609 = math.rsqrt %608 : vector<8x128xf32>
    %610 = arith.mulf %600, %609 : vector<8x128xf32>
    %611 = arith.mulf %603, %609 : vector<8x128xf32>
    %612 = arith.mulf %555, %610 : vector<8x128xf32>
    %613 = arith.mulf %555, %611 : vector<8x128xf32>
    %614 = tpu.concatenate %612, %613 in 1 : vector<8x128xf32>, vector<8x128xf32> -> vector<8x256xf32>
    %c48_125 = arith.constant 48 : index
    %c0_126 = arith.constant 0 : index
    %615 = vector.load %arg15[%c48_125, %c0_126] : memref<64x256xf32, #tpu.memory_space<vmem>>, vector<8x256xf32>
    tpu.vector_store %arg15[%c48_125, %c0_126], %614 {strides = array<i32>} : memref<64x256xf32, #tpu.memory_space<vmem>>, vector<8x256xf32>,
    %c56 = arith.constant 56 : index
    %c0_127 = arith.constant 0 : index
    %616 = vector.load %arg14[%c56, %c0_127] : memref<64x1152xf32, #tpu.memory_space<vmem>>, vector<8x1152xf32>
    %617 = arith.truncf %614 : vector<8x256xf32> to vector<8x256xbf16>
    %c0_128 = arith.constant 0 : index
    %c0_129 = arith.constant 0 : index
    %618 = vector.load %arg10[%c0_128, %c0_129] : memref<256x1152xbf16, #tpu.memory_space<vmem>>, vector<256x1152xbf16>
    %cst_130 = arith.constant dense<0.000000e+00> : vector<8x1152xf32>
    %619 = tpu.matmul %617, %618, %cst_130 {dimension_numbers = #tpu.dot_dimension_numbers<[1], [0], [0], [1], [0, 0, 1, 1], [], []>} : vector<8x256xbf16>, vector<256x1152xbf16>, vector<8x1152xf32> -> vector<8x1152xf32>
    %620 = arith.addf %616, %619 : vector<8x1152xf32>
    %621 = vector.extract_strided_slice %620 {offsets = [0, 0], sizes = [8, 128], strides = [1, 1]} : vector<8x1152xf32> to vector<8x128xf32>
    %cst_131 = arith.constant 0.000000e+00 : f32
    %622 = vector.broadcast %cst_131 : f32 to vector<8x128xf32>
    %623 = arith.subf %622, %621 : vector<8x128xf32>
    %624 = math.exp %623 : vector<8x128xf32>
    %cst_132 = arith.constant 1.000000e+00 : f32
    %625 = vector.broadcast %cst_132 : f32 to vector<8x128xf32>
    %626 = arith.addf %625, %624 : vector<8x128xf32>
    %627 = tpu.reciprocal %626 {approx = true} : vector<8x128xf32> -> vector<8x128xf32>
    %628 = vector.extract_strided_slice %620 {offsets = [0, 128], sizes = [8, 128], strides = [1, 1]} : vector<8x1152xf32> to vector<8x128xf32>
    %cst_133 = arith.constant 0.000000e+00 : f32
    %629 = vector.broadcast %cst_133 : f32 to vector<8x128xf32>
    %630 = arith.subf %629, %628 : vector<8x128xf32>
    %631 = math.exp %630 : vector<8x128xf32>
    %cst_134 = arith.constant 1.000000e+00 : f32
    %632 = vector.broadcast %cst_134 : f32 to vector<8x128xf32>
    %633 = arith.addf %632, %631 : vector<8x128xf32>
    %634 = tpu.reciprocal %633 {approx = true} : vector<8x128xf32> -> vector<8x128xf32>
    %635 = vector.extract_strided_slice %620 {offsets = [0, 256], sizes = [8, 128], strides = [1, 1]} : vector<8x1152xf32> to vector<8x128xf32>
    %cst_135 = arith.constant 0.000000e+00 : f32
    %636 = vector.broadcast %cst_135 : f32 to vector<8x128xf32>
    %637 = arith.subf %636, %635 : vector<8x128xf32>
    %638 = math.exp %637 : vector<8x128xf32>
    %cst_136 = arith.constant 1.000000e+00 : f32
    %639 = vector.broadcast %cst_136 : f32 to vector<8x128xf32>
    %640 = arith.addf %639, %638 : vector<8x128xf32>
    %641 = tpu.reciprocal %640 {approx = true} : vector<8x128xf32> -> vector<8x128xf32>
    %642 = vector.extract_strided_slice %620 {offsets = [0, 384], sizes = [8, 128], strides = [1, 1]} : vector<8x1152xf32> to vector<8x128xf32>
    %643 = vector.extract_strided_slice %620 {offsets = [0, 512], sizes = [8, 128], strides = [1, 1]} : vector<8x1152xf32> to vector<8x128xf32>
    %644 = arith.mulf %642, %642 : vector<8x128xf32>
    %645 = arith.mulf %643, %643 : vector<8x128xf32>
    %646 = arith.addf %644, %645 : vector<8x128xf32>
    %cst_137 = arith.constant 1.000000e+00 : f32
    %647 = vector.broadcast %cst_137 : f32 to vector<8x128xf32>
    %648 = arith.maximumf %646, %647 : vector<8x128xf32>
    %649 = math.rsqrt %648 : vector<8x128xf32>
    %650 = arith.mulf %642, %649 : vector<8x128xf32>
    %651 = arith.mulf %643, %649 : vector<8x128xf32>
    %652 = vector.extract_strided_slice %620 {offsets = [0, 640], sizes = [8, 128], strides = [1, 1]} : vector<8x1152xf32> to vector<8x128xf32>
    %653 = vector.extract_strided_slice %620 {offsets = [0, 768], sizes = [8, 128], strides = [1, 1]} : vector<8x1152xf32> to vector<8x128xf32>
    %654 = arith.mulf %652, %652 : vector<8x128xf32>
    %655 = arith.mulf %653, %653 : vector<8x128xf32>
    %656 = arith.addf %654, %655 : vector<8x128xf32>
    %cst_138 = arith.constant 1.000000e+00 : f32
    %657 = vector.broadcast %cst_138 : f32 to vector<8x128xf32>
    %658 = arith.maximumf %656, %657 : vector<8x128xf32>
    %659 = math.rsqrt %658 : vector<8x128xf32>
    %660 = arith.mulf %652, %659 : vector<8x128xf32>
    %661 = arith.mulf %653, %659 : vector<8x128xf32>
    %662 = vector.extract_strided_slice %620 {offsets = [0, 896], sizes = [8, 128], strides = [1, 1]} : vector<8x1152xf32> to vector<8x128xf32>
    %663 = vector.extract_strided_slice %620 {offsets = [0, 1024], sizes = [8, 128], strides = [1, 1]} : vector<8x1152xf32> to vector<8x128xf32>
    %664 = arith.mulf %662, %662 : vector<8x128xf32>
    %665 = arith.mulf %663, %663 : vector<8x128xf32>
    %666 = arith.addf %664, %665 : vector<8x128xf32>
    %cst_139 = arith.constant 1.000000e+00 : f32
    %667 = vector.broadcast %cst_139 : f32 to vector<8x128xf32>
    %668 = arith.maximumf %666, %667 : vector<8x128xf32>
    %669 = math.rsqrt %668 : vector<8x128xf32>
    %670 = arith.mulf %662, %669 : vector<8x128xf32>
    %671 = arith.mulf %663, %669 : vector<8x128xf32>
    %672 = arith.mulf %634, %670 : vector<8x128xf32>
    %673 = arith.mulf %634, %671 : vector<8x128xf32>
    %674 = arith.mulf %627, %592 : vector<8x128xf32>
    %675 = arith.mulf %650, %672 : vector<8x128xf32>
    %676 = arith.mulf %651, %673 : vector<8x128xf32>
    %677 = arith.subf %675, %676 : vector<8x128xf32>
    %678 = arith.addf %674, %677 : vector<8x128xf32>
    %679 = arith.mulf %627, %597 : vector<8x128xf32>
    %680 = arith.mulf %650, %673 : vector<8x128xf32>
    %681 = arith.mulf %651, %672 : vector<8x128xf32>
    %682 = arith.addf %680, %681 : vector<8x128xf32>
    %683 = arith.addf %679, %682 : vector<8x128xf32>
    %684 = arith.mulf %660, %678 : vector<8x128xf32>
    %685 = arith.mulf %661, %683 : vector<8x128xf32>
    %686 = arith.subf %684, %685 : vector<8x128xf32>
    %687 = arith.mulf %660, %683 : vector<8x128xf32>
    %688 = arith.mulf %661, %678 : vector<8x128xf32>
    %689 = arith.addf %687, %688 : vector<8x128xf32>
    %690 = arith.mulf %686, %686 : vector<8x128xf32>
    %691 = arith.mulf %689, %689 : vector<8x128xf32>
    %692 = arith.addf %690, %691 : vector<8x128xf32>
    %cst_140 = arith.constant 1.000000e+00 : f32
    %693 = vector.broadcast %cst_140 : f32 to vector<8x128xf32>
    %694 = arith.maximumf %692, %693 : vector<8x128xf32>
    %695 = math.rsqrt %694 : vector<8x128xf32>
    %696 = arith.mulf %686, %695 : vector<8x128xf32>
    %697 = arith.mulf %689, %695 : vector<8x128xf32>
    %698 = arith.mulf %641, %696 : vector<8x128xf32>
    %699 = arith.mulf %641, %697 : vector<8x128xf32>
    %700 = tpu.concatenate %698, %699 in 1 : vector<8x128xf32>, vector<8x128xf32> -> vector<8x256xf32>
    %c56_141 = arith.constant 56 : index
    %c0_142 = arith.constant 0 : index
    %701 = vector.load %arg15[%c56_141, %c0_142] : memref<64x256xf32, #tpu.memory_space<vmem>>, vector<8x256xf32>
    tpu.vector_store %arg15[%c56_141, %c0_142], %700 {strides = array<i32>} : memref<64x256xf32, #tpu.memory_space<vmem>>, vector<8x256xf32>,
    %c0_143 = arith.constant 0 : index
    %c0_144 = arith.constant 0 : index
    %702 = vector.load %arg11[%c0_143, %c0_144] : memref<8x256xf32, #tpu.memory_space<vmem>>, vector<8x256xf32>
    tpu.vector_store %arg11[%c0_143, %c0_144], %700 {strides = array<i32>} : memref<8x256xf32, #tpu.memory_space<vmem>>, vector<8x256xf32>,
    %c0_145 = arith.constant 0 : index
    %c0_146 = arith.constant 0 : index
    %703 = vector.load %arg12[%c0_145, %c0_146] : memref<8x128xf32, #tpu.memory_space<vmem>>, vector<8x128xf32>
    tpu.vector_store %arg12[%c0_145, %c0_146], %678 {strides = array<i32>} : memref<8x128xf32, #tpu.memory_space<vmem>>, vector<8x128xf32>,
    %c0_147 = arith.constant 0 : index
    %c0_148 = arith.constant 0 : index
    %704 = vector.load %arg13[%c0_147, %c0_148] : memref<8x128xf32, #tpu.memory_space<vmem>>, vector<8x128xf32>
    tpu.vector_store %arg13[%c0_147, %c0_148], %683 {strides = array<i32>} : memref<8x128xf32, #tpu.memory_space<vmem>>, vector<8x128xf32>,
    %c0_149 = arith.constant 0 : index
    %c0_150 = arith.constant 0 : index
    %705 = vector.load %arg15[%c0_149, %c0_150] : memref<64x256xf32, #tpu.memory_space<vmem>>, vector<64x256xf32>
    %c0_151 = arith.constant 0 : index
    %c0_152 = arith.constant 0 : index
    %706 = vector.load %arg6[%c0_151, %c0_152] : memref<1x256xf32, #tpu.memory_space<vmem>>, vector<1x256xf32>
    %707 = vector.broadcast %706 : vector<1x256xf32> to vector<64x256xf32>
    %708 = arith.mulf %705, %707 : vector<64x256xf32>
    %cst_153 = arith.constant dense<0.000000e+00> : vector<64xf32>
    %709 = vector.multi_reduction <add>, %708, %cst_153 [1] : vector<64x256xf32> to vector<64xf32>
    %710 = vector.shape_cast %709 : vector<64xf32> to vector<64x1xf32>
    %c0_154 = arith.constant 0 : index
    %c0_155 = arith.constant 0 : index
    %711 = vector.load %arg7[%c0_154, %c0_155] : memref<1x1xf32, #tpu.memory_space<vmem>>, vector<1x1xf32>
    %712 = vector.broadcast %711 : vector<1x1xf32> to vector<64x1xf32>
    %713 = arith.addf %710, %712 : vector<64x1xf32>
    %cst_156 = arith.constant 0.000000e+00 : f32
    %714 = vector.broadcast %cst_156 : f32 to vector<64x1xf32>
    %715 = arith.subf %714, %713 : vector<64x1xf32>
    %716 = math.exp %715 : vector<64x1xf32>
    %cst_157 = arith.constant 1.000000e+00 : f32
    %717 = vector.broadcast %cst_157 : f32 to vector<64x1xf32>
    %718 = arith.addf %717, %716 : vector<64x1xf32>
    %719 = tpu.reciprocal %718 {approx = true} : vector<64x1xf32> -> vector<64x1xf32>
    %c0_158 = arith.constant 0 : index
    %c0_159 = arith.constant 0 : index
    %720 = vector.load %arg8[%c0_158, %c0_159] : memref<64x1xf32, #tpu.memory_space<vmem>>, vector<64x1xf32>
    tpu.vector_store %arg8[%c0_158, %c0_159], %719 {strides = array<i32>} : memref<64x1xf32, #tpu.memory_space<vmem>>, vector<64x1xf32>,
    return
  }
  func.func @transform_0(%arg0: i32, %arg1: i32) -> (i32, i32) {
    %c1_i32 = arith.constant 1 : i32
    %0 = arith.muli %arg0, %c1_i32 : i32
    %1 = arith.addi %0, %arg1 : i32
    %c0_i32 = arith.constant 0 : i32
    %c0_i32_0 = arith.constant 0 : i32
    return %1, %c0_i32 : i32, i32
  }
  func.func @transform_3(%arg0: i32, %arg1: i32) -> (i32, i32) {
    %c0_i32 = arith.constant 0 : i32
    %c0_i32_0 = arith.constant 0 : i32
    %c0_i32_1 = arith.constant 0 : i32
    return %c0_i32, %c0_i32_0 : i32, i32
  }
  func.func @transform_4(%arg0: i32, %arg1: i32) -> (i32, i32) {
    %c0_i32 = arith.constant 0 : i32
    %c0_i32_0 = arith.constant 0 : i32
    %c0_i32_1 = arith.constant 0 : i32
    return %c0_i32, %c0_i32_0 : i32, i32
  }
  func.func @transform_5(%arg0: i32, %arg1: i32) -> (i32, i32) {
    %c0_i32 = arith.constant 0 : i32
    %c0_i32_0 = arith.constant 0 : i32
    %c0_i32_1 = arith.constant 0 : i32
    return %c0_i32, %c0_i32_0 : i32, i32
  }
  func.func @transform_6(%arg0: i32, %arg1: i32) -> (i32, i32) {
    %c1_i32 = arith.constant 1 : i32
    %0 = arith.muli %arg0, %c1_i32 : i32
    %1 = arith.addi %0, %arg1 : i32
    %c0_i32 = arith.constant 0 : i32
    %c0_i32_0 = arith.constant 0 : i32
    return %1, %c0_i32 : i32, i32
  }
}

</mosaic_0001>

<bundles_post_ra>
// kernel: tpu_custom_call.1
= control target key start
LH: loop header
LB: loop body
LE: loop exit
PB: predicated region body
PF: predicated region fallthrough
CT: control target
= control target key end

     0   :  { %s7385_s0 = inlined_call_operand.vmem [shape: f32[64,16], index: 0, kind: input, shape index: {}]   ;;  %s7386_s1 = inlined_call_operand.vmem [shape: bf16[16,1152], index: 1, kind: input, shape index: {}]   ;;  %s7387_s2 = inlined_call_operand.hbm [shape: bf16[256,1152], index: 2, kind: input, shape index: {}]   ;;  %s7388_s3 = inlined_call_operand.vmem [shape: f32[1,1152], index: 3, kind: input, shape index: {}]   ;;  %s7389_s4 = inlined_call_operand.vmem [shape: f32[1,256], index: 4, kind: input, shape index: {}]   ;;  %s7390_s5 = inlined_call_operand.<no memory space> [shape: f32[1,1], index: 5, kind: input, shape index: {}]   ;;  %s7391_s6 = inlined_call_operand.vmem [shape: f32[64,1], index: 6, kind: output, shape index: {}]  }
   0x1   :  { %v11_v0 = vstv %s7390_s5 }
   0x2   :  { %12 = vst [vmem:[#allocation9] sm:$0x1] %v11_v0 }
   0x3   :  { %v79_v1 = vld [vmem:[%s7386_s1] sm:$0xf]  ;;  %v81_v2 = vld [vmem:[%s7386_s1 + $0x24] sm:$0xf]  ;;  %v85_v4 = vld [vmem:[%s7386_s1 + $0x28] sm:$0xf] }
   0x4   :  { %v83_v3 = vld [vmem:[%s7386_s1 + $0x4] sm:$0xf]  ;;  %80 = vst [vmem:[#allocation2] sm:$0xf] %v79_v1  ;;  %82 = vst [vmem:[#allocation2 + $0x4] sm:$0xf] %v81_v2 }
   0x5   :  { %84 = vst [vmem:[#allocation2 + $0x8] sm:$0xf] %v83_v3  ;;  %v87_v5 = vld [vmem:[%s7386_s1 + $0x8] sm:$0xf]  ;;  %v89_v6 = vld [vmem:[%s7386_s1 + $0x2c] sm:$0xf] }
   0x6   :  { %86 = vst [vmem:[#allocation2 + $0xc] sm:$0xf] %v85_v4  ;;  %88 = vst [vmem:[#allocation2 + $0x10] sm:$0xf] %v87_v5  ;;  %v91_v7 = vld [vmem:[%s7386_s1 + $0xc] sm:$0xf] }
   0x7   :  { %90 = vst [vmem:[#allocation2 + $0x14] sm:$0xf] %v89_v6  ;;  %v93_v8 = vld [vmem:[%s7386_s1 + $0x30] sm:$0xf]  ;;  %92 = vst [vmem:[#allocation2 + $0x18] sm:$0xf] %v91_v7 }
   0x8   :  { %v95_v9 = vld [vmem:[%s7386_s1 + $0x10] sm:$0xf]  ;;  %94 = vst [vmem:[#allocation2 + $0x1c] sm:$0xf] %v93_v8  ;;  %v97_v10 = vld [vmem:[%s7386_s1 + $0x34] sm:$0xf] }
   0x9   :  { %96 = vst [vmem:[#allocation2 + $0x20] sm:$0xf] %v95_v9  ;;  %v99_v11 = vld [vmem:[%s7386_s1 + $0x14] sm:$0xf]  ;;  %v101_v12 = vld [vmem:[%s7386_s1 + $0x38] sm:$0xf] }
   0xa   :  { %98 = vst [vmem:[#allocation2 + $0x24] sm:$0xf] %v97_v10  ;;  %100 = vst [vmem:[#allocation2 + $0x28] sm:$0xf] %v99_v11  ;;  %v103_v13 = vld [vmem:[%s7386_s1 + $0x18] sm:$0xf] }
   0xb   :  { %102 = vst [vmem:[#allocation2 + $0x2c] sm:$0xf] %v101_v12  ;;  %v105_v14 = vld [vmem:[%s7386_s1 + $0x3c] sm:$0xf]  ;;  %104 = vst [vmem:[#allocation2 + $0x30] sm:$0xf] %v103_v13 }
   0xc   :  { %v107_v15 = vld [vmem:[%s7386_s1 + $0x1c] sm:$0xf]  ;;  %106 = vst [vmem:[#allocation2 + $0x34] sm:$0xf] %v105_v14  ;;  %v109_v16 = vld [vmem:[%s7386_s1 + $0x40] sm:$0xf] }
   0xd   :  { %108 = vst [vmem:[#allocation2 + $0x38] sm:$0xf] %v107_v15  ;;  %v111_v17 = vld [vmem:[%s7386_s1 + $0x20] sm:$0xf]  ;;  %v113_v18 = vld [vmem:[%s7386_s1 + $0x44] sm:$0xf] }
   0xe   :  { %110 = vst [vmem:[#allocation2 + $0x3c] sm:$0xf] %v109_v16  ;;  %112 = vst [vmem:[#allocation2 + $0x40] sm:$0xf] %v111_v17 }
   0xf   :  { %114 = vst [vmem:[#allocation2 + $0x44] sm:$0xf] %v113_v18 }
  0x10   :  { %181 = vsyncadd [#allocation10], 1152 }
  0x11   :  { %4815 = dma.done.wait [#allocation10], 1152 }
  0x12   :  { %4816 = vsyncadd [#allocation10], 4294966144 }
  0x13   :  { %s190_s9 = sld [smem:[#allocation0]]   ;;  %s4819_s10 = smov [#allocation3]  }
  0x14   :  { %s198_s11 = sshll.u32 %s4819_s10, 4  ;;  %s4820_s12 = smov 1152   ;;  %s199_s11 = int_to_ptr.vmem [resolvable:$true] %s198_s11 }
  0x15   :  { %202 = sst [smem:[#allocation14]] %s4820_s12  ;;  %s4821_s13 = smov 9  }
  0x16   :  { %204 = sst [smem:[#allocation14 + $0x1]] %s4820_s12  ;;  %s4822_s14 = smov 64  }
  0x17   :  { %206 = sst [smem:[#allocation14 + $0x2]] %s4821_s13  ;;  %s4823_s16 = smov 128  }
  0x18   :  { %208 = sst [smem:[#allocation14 + $0x3]] %s4822_s14  ;;  %s4824_s17 = smov 2  }
  0x19   :  { %s4391_s15 = sshll.u32 %s190_s9, 26  ;;  %210 = sst [smem:[#allocation14 + $0x4]] %s4823_s16 }
  0x1a   :  { %s4392_s1 = sadd.s32 134217728, %s4391_s15  ;;  %212 = sst [smem:[#allocation14 + $0x5]] %s4824_s17 }
  0x1b   :  { %s4825_s18 = smov 576   ;;  %216 = sst [smem:[#allocation14 + $0x7]] %s4822_s14 }
  0x1c   :  { %214 = sst [smem:[#allocation14 + $0x6]] %s4825_s18  ;;  %s4826_s19 = smov 4  }
  0x1d   :  { %218 = sst [smem:[#allocation14 + $0x8]] %s4826_s19  ;;  %s4827_s20 = smov [#allocation12]  }
  0x1e   :  { %s4828_s21 = smov [#allocation13]  }
  0x1f   :  { %220 = dma.general %s7387_s2, 18432, %s199_s11, %s4827_s20, %s4828_s21, [#allocation14], %s4392_s1, 0  }
  0x20   :  { %4817 = dma.done.wait [#allocation12], 18432 }
  0x21   :  { %4818 = vsyncadd [#allocation12], 4294948864  ;;  %v242_v19 = vld [vmem:[#allocation2 + $0x8] sm:$0xff]  ;;  %v241_v20 = vld [vmem:[#allocation2] sm:$0xff]  ;;  %vm299_vm0 = vcmask 130048   ;;  %v4829_v28 = vmov 0  }
  0x22   :  { %v229_v21 = vld [vmem:[%s7385_s0] sm:$0xff]  ;;  %312 = vmatprep.subr.bf16.mxu0 %v242_v19  ;;  %4606 = vmatprep.subr.bf16.mxu1 %v242_v19  ;;  %v230_v22 = vld [vmem:[%s7385_s0 + $0x8] sm:$0xff]  ;;  %v244_v27 = vld [vmem:[#allocation2 + $0x18] sm:$0xff]  ;;  %v4830_v59 = vmov 0.0|0.0   ;;  %vm4336_vm1 = vcmask 7168  }
  0x23   :  { %v233_v23 = vld [vmem:[%s7385_s0 + $0x20] sm:$0xff]  ;;  %v234_v24 = vld [vmem:[%s7385_s0 + $0x28] sm:$0xff]  ;;  %313 = vmatpush1.bf16.msra.mxu0 %v241_v20  ;;  %4607 = vmatpush1.bf16.msra.mxu1 %v241_v20  ;;  %v237_v25 = vpack.c.bf16 %v230_v22, %v229_v21  ;;  %v243_v29 = vld [vmem:[#allocation2 + $0x10] sm:$0xff] }
  0x24   :  { %v4938_v26 = vpack.c.bf16 %v234_v24, %v233_v23  ;;  %344 = vmatprep.mubr.bf16.mxu0 %v4829_v28  ;;  %364 = vmatprep.mubr.bf16.mxu1 %v4829_v28  ;;  %v231_v30 = vld [vmem:[%s7385_s0 + $0x10] sm:$0xff]  ;;  %v246_v31 = vld [vmem:[#allocation2 + $0x28] sm:$0xff]  ;;  %v232_v32 = vld [vmem:[%s7385_s0 + $0x18] sm:$0xff] }
  0x25   :  { %385 = vmatprep.subr.bf16.mxu1 %v244_v27  ;;  %v245_v33 = vld [vmem:[#allocation2 + $0x20] sm:$0xff]  ;;  %v248_v34 = vld [vmem:[#allocation2 + $0x38] sm:$0xff]  ;;  %v235_v35 = vld [vmem:[%s7385_s0 + $0x30] sm:$0xff]  ;;  %458 = vmatprep.subr.bf16.mxu0 %v246_v31  ;;  %v238_v38 = vpack.c.bf16 %v232_v32, %v231_v30 }
  0x26   :  { %4394 = vmatmul.mubr.msk.bf16.vlgmr.msra.gmra.mrb[0].mxu0 %vm299_vm0, %v237_v25  ;;  %4396 = vmatmul.mubr.msk.bf16.vlgmr.msra.gmra.mrb[0].mxu1 %vm299_vm0, %v4938_v26  ;;  %v236_v36 = vld [vmem:[%s7385_s0 + $0x38] sm:$0xff]  ;;  %v249_v37 = vld [vmem:[#allocation2 + $0x40] sm:$0xff]  ;;  %v247_v40 = vld [vmem:[#allocation2 + $0x30] sm:$0xff] }
  0x27   :  { %386 = vmatpush1.bf16.msra.mxu1 %v243_v29  ;;  %354 = vmatprep.mubr.bf16.mxu0 %v4829_v28  ;;  %v4959_v39 = vpack.c.bf16 %v236_v36, %v235_v35  ;;  %v757_v41 = vld [vmem:[#allocation3 + $0x8] sm:$0xff]  ;;  %v759_v42 = vld [vmem:[#allocation3 + $0x18] sm:$0xff]  ;;  %v756_v43 = vld [vmem:[#allocation3] sm:$0xff] }
  0x28   :  { %374 = vmatprep.mubr.bf16.mxu1 %v4829_v28  ;;  %459 = vmatpush1.bf16.msra.mxu0 %v245_v33  ;;  %v758_v44 = vld [vmem:[#allocation3 + $0x10] sm:$0xff]  ;;  %v768_v46 = vld [vmem:[#allocation3 + $0x60] sm:$0xff]  ;;  %v765_v47 = vld [vmem:[#allocation3 + $0x48] sm:$0xff] }
  0x29   :  { %531 = vmatprep.subr.bf16.mxu1 %v248_v34  ;;  %4596 = vmatprep.subr.bf16.mxu0 %v249_v37  ;;  %v766_v45 = vld [vmem:[#allocation3 + $0x50] sm:$0xff]  ;;  %v767_v48 = vld [vmem:[#allocation3 + $0x58] sm:$0xff]  ;;  %v777_v50 = vld [vmem:[#allocation3 + $0xa8] sm:$0xff] }
  0x2a   :  { %v775_v49 = vld [vmem:[#allocation3 + $0x98] sm:$0xff]  ;;  %v774_v51 = vld [vmem:[#allocation3 + $0x90] sm:$0xff]  ;;  %v776_v52 = vld [vmem:[#allocation3 + $0xa0] sm:$0xff] }
  0x2b   :  { %v784_v53 = vld [vmem:[#allocation3 + $0xe0] sm:$0xff]  ;;  %v786_v54 = vld [vmem:[#allocation3 + $0xf0] sm:$0xff]  ;;  %v783_v55 = vld [vmem:[#allocation3 + $0xd8] sm:$0xff] }
  0x2c   :  { %v785_v56 = vld [vmem:[#allocation3 + $0xe8] sm:$0xff]  ;;  %v795_v58 = vld [vmem:[#allocation3 + $0x138] sm:$0xff]  ;;  %v792_v60 = vld [vmem:[#allocation3 + $0x120] sm:$0xff] }
  0x2d   :  { %v793_v57 = vld [vmem:[#allocation3 + $0x128] sm:$0xff]  ;;  %v794_v61 = vld [vmem:[#allocation3 + $0x130] sm:$0xff]  ;;  %v804_v63 = vld [vmem:[#allocation3 + $0x180] sm:$0xff] }
  0x2e   :  { %4395 = vmatmul.mubr.msk.bf16.gmra.mrb[4].mxu0 %vm299_vm0, %v238_v38  ;;  %4397 = vmatmul.mubr.msk.bf16.gmra.mrb[4].mxu1 %vm299_vm0, %v4959_v39  ;;  %v802_v62 = vld [vmem:[#allocation3 + $0x170] sm:$0xff]  ;;  %v801_v0 = vld [vmem:[#allocation3 + $0x168] sm:$0xff]  ;;  %v803_v1 = vld [vmem:[#allocation3 + $0x178] sm:$0xff] }
  0x2f   :  { %417 = vmatprep.mubr.bf16.mxu1 %v4829_v28  ;;  %490 = vmatprep.mubr.bf16.mxu0 %v4829_v28  ;;  %v811_v2 = vld [vmem:[#allocation3 + $0x1b8] sm:$0xff]  ;;  %v813_v3 = vld [vmem:[#allocation3 + $0x1c8] sm:$0xff]  ;;  %v810_v4 = vld [vmem:[#allocation3 + $0x1b0] sm:$0xff] }
  0x30   :  { %v812_v5 = vld [vmem:[#allocation3 + $0x1c0] sm:$0xff]  ;;  %v822_v7 = vld [vmem:[#allocation3 + $0x210] sm:$0xff]  ;;  %v819_v8 = vld [vmem:[#allocation3 + $0x1f8] sm:$0xff] }
  0x31   :  { %v820_v6 = vld [vmem:[#allocation3 + $0x200] sm:$0xff]  ;;  %v821_v9 = vld [vmem:[#allocation3 + $0x208] sm:$0xff]  ;;  %v831_v11 = vld [vmem:[#allocation3 + $0x258] sm:$0xff] }
  0x32   :  { %v829_v10 = vld [vmem:[#allocation3 + $0x248] sm:$0xff]  ;;  %v828_v12 = vld [vmem:[#allocation3 + $0x240] sm:$0xff]  ;;  %v830_v13 = vld [vmem:[#allocation3 + $0x250] sm:$0xff] }
  0x33   :  { %v838_v14 = vld [vmem:[#allocation3 + $0x290] sm:$0xff]  ;;  %v840_v15 = vld [vmem:[#allocation3 + $0x2a0] sm:$0xff]  ;;  %v837_v16 = vld [vmem:[#allocation3 + $0x288] sm:$0xff] }
  0x34   :  { %v839_v17 = vld [vmem:[#allocation3 + $0x298] sm:$0xff]  ;;  %v849_v19 = vld [vmem:[#allocation3 + $0x2e8] sm:$0xff]  ;;  %v846_v20 = vld [vmem:[#allocation3 + $0x2d0] sm:$0xff] }
  0x35   :  { %v847_v18 = vld [vmem:[#allocation3 + $0x2d8] sm:$0xff]  ;;  %v848_v21 = vld [vmem:[#allocation3 + $0x2e0] sm:$0xff]  ;;  %v858_v23 = vld [vmem:[#allocation3 + $0x330] sm:$0xff] }
  0x36   :  { %4398 = vmatmul.mubr.msk.bf16.vlgmr.msra.gmra.mrb[8].mxu1 %vm299_vm0, %v237_v25  ;;  %4402 = vmatmul.mubr.msk.bf16.vlgmr.msra.gmra.mrb[8].mxu0 %vm299_vm0, %v237_v25  ;;  %v856_v22 = vld [vmem:[#allocation3 + $0x320] sm:$0xff]  ;;  %v855_v24 = vld [vmem:[#allocation3 + $0x318] sm:$0xff]  ;;  %v866_v29 = vld [vmem:[#allocation3 + $0x370] sm:$0xff] }
  0x37   :  { %532 = vmatpush1.bf16.msra.mxu1 %v247_v40  ;;  %427 = vmatprep.mubr.bf16.mxu1 %v4829_v28  ;;  %v867_v27 = vld [vmem:[#allocation3 + $0x378] sm:$0xff]  ;;  %v874_v30 = vld [vmem:[#allocation3 + $0x3b0] sm:$0xff]  ;;  %v876_v31 = vld [vmem:[#allocation3 + $0x3c0] sm:$0xff] }
  0x38   :  { %500 = vmatprep.mubr.bf16.mxu0 %v4829_v28  ;;  %4597 = vmatpush3.bf16.msra.mxu0 %v249_v37  ;;  %v873_v32 = vld [vmem:[#allocation3 + $0x3a8] sm:$0xff]  ;;  %v875_v33 = vld [vmem:[#allocation3 + $0x3b8] sm:$0xff]  ;;  %v882_v36 = vld [vmem:[#allocation3 + $0x3f0] sm:$0xff] }
  0x39   :  { %900 = vmatprep.subr.bf16.mxu1 %v757_v41  ;;  %941 = vmatprep.subr.bf16.mxu0 %v759_v42  ;;  %v883_v34 = vld [vmem:[#allocation3 + $0x3f8] sm:$0xff]  ;;  %v885_v35 = vld [vmem:[#allocation3 + $0x408] sm:$0xff]  ;;  %v884_v37 = vld [vmem:[#allocation3 + $0x400] sm:$0xff] }
  0x3a   :  { %v891_v40 = vld [vmem:[#allocation3 + $0x438] sm:$0xff]  ;;  %v893_v41 = vld [vmem:[#allocation3 + $0x448] sm:$0xff] }
  0x3b   :  { %v761_v42 = vld [vmem:[#allocation3 + $0x28] sm:$0xff] }
  0x3e   :  { %4399 = vmatmul.mubr.msk.bf16.gmra.mrb[12].mxu1 %vm299_vm0, %v238_v38  ;;  %4403 = vmatmul.mubr.msk.bf16.gmra.mrb[12].mxu0 %vm299_vm0, %v238_v38 }
  0x3f   :  { %437 = vmatprep.mubr.bf16.mxu1 %v4829_v28  ;;  %510 = vmatprep.mubr.bf16.mxu0 %v4829_v28 }
  0x46   :  { %4400 = vmatmul.mubr.msk.bf16.gmra.mrb[16].mxu1 %vm299_vm0, %v4938_v26  ;;  %4404 = vmatmul.mubr.msk.bf16.gmra.mrb[16].mxu0 %vm299_vm0, %v4938_v26 }
  0x47   :  { %447 = vmatprep.mubr.bf16.mxu1 %v4829_v28  ;;  %520 = vmatprep.mubr.bf16.mxu0 %v4829_v28 }
  0x4e   :  { %4401 = vmatmul.mubr.msk.bf16.gmra.mrb[20].mxu1 %vm299_vm0, %v4959_v39  ;;  %4405 = vmatmul.mubr.msk.bf16.gmra.mrb[20].mxu0 %vm299_vm0, %v4959_v39 }
  0x4f   :  { %563 = vmatprep.mubr.bf16.mxu1 %v4829_v28  ;;  %4598 = vmatprep.mubr.msk.bf16.mxu0 %vm299_vm0, %v237_v25 }
  0x56   :  { %4406 = vmatmul.mubr.msk.bf16.vlgmr.msra.gmra.mrb[24].mxu1 %vm299_vm0, %v237_v25  ;;  %4599 = vmatmul.mubr.msk.bf16.vlgmr.msra.gmra.mrb[24].mxu0 %vm299_vm0, %v238_v38  ;;  %v857_v25 = vld [vmem:[#allocation3 + $0x328] sm:$0xff] }
  0x57   :  { %901 = vmatpush1.bf16.msra.mxu1 %v756_v43  ;;  %942 = vmatpush1.bf16.msra.mxu0 %v758_v44  ;;  %v763_v43 = vld [vmem:[#allocation3 + $0x38] sm:$0xff]  ;;  %v760_v44 = vld [vmem:[#allocation3 + $0x20] sm:$0xff] }
  0x58   :  { %902 = vmatprep.subr.bf16.mxu1 %v766_v45  ;;  %943 = vmatprep.subr.bf16.mxu0 %v768_v46  ;;  %v762_v45 = vld [vmem:[#allocation3 + $0x30] sm:$0xff] }
  0x59   :  { %573 = vmatprep.mubr.bf16.mxu1 %v4829_v28  ;;  %4602 = vmatprep.mubr.msk.bf16.mxu0 %vm299_vm0, %v4938_v26  ;;  %v770_v46 = vld [vmem:[#allocation3 + $0x70] sm:$0xff] }
  0x5b   :  { %903 = vmatpush1.bf16.msra.mxu1 %v765_v47  ;;  %944 = vmatpush1.bf16.msra.mxu0 %v767_v48  ;;  %v772_v47 = vld [vmem:[#allocation3 + $0x80] sm:$0xff]  ;;  %v769_v48 = vld [vmem:[#allocation3 + $0x68] sm:$0xff] }
  0x5c   :  { %904 = vmatprep.subr.bf16.mxu1 %v775_v49  ;;  %945 = vmatprep.subr.bf16.mxu0 %v777_v50  ;;  %v771_v49 = vld [vmem:[#allocation3 + $0x78] sm:$0xff] }
  0x5d   :  { %v779_v50 = vld [vmem:[#allocation3 + $0xb8] sm:$0xff] }
  0x5e   :  { %4407 = vmatmul.mubr.msk.bf16.gmra.mrb[28].mxu1 %vm299_vm0, %v238_v38  ;;  %4603 = vmatmul.mubr.msk.bf16.gmra.mrb[28].mxu0 %vm299_vm0, %v4959_v39  ;;  %v892_v38 = vld [vmem:[#allocation3 + $0x440] sm:$0xff] }
  0x5f   :  { %905 = vmatpush1.bf16.msra.mxu1 %v774_v51  ;;  %946 = vmatpush1.bf16.msra.mxu0 %v776_v52  ;;  %v781_v51 = vld [vmem:[#allocation3 + $0xc8] sm:$0xff]  ;;  %v778_v52 = vld [vmem:[#allocation3 + $0xb0] sm:$0xff] }
  0x60   :  { %906 = vmatprep.subr.bf16.mxu1 %v784_v53  ;;  %947 = vmatprep.subr.bf16.mxu0 %v786_v54  ;;  %v780_v53 = vld [vmem:[#allocation3 + $0xc0] sm:$0xff] }
  0x61   :  { %583 = vmatprep.mubr.bf16.mxu1 %v4829_v28  ;;  %973 = vmatprep.mubr.bf16.mxu0 %v4830_v59  ;;  %v788_v54 = vld [vmem:[#allocation3 + $0x100] sm:$0xff] }
  0x63   :  { %907 = vmatpush1.bf16.msra.mxu1 %v783_v55  ;;  %948 = vmatpush1.bf16.msra.mxu0 %v785_v56  ;;  %v790_v55 = vld [vmem:[#allocation3 + $0x110] sm:$0xff]  ;;  %v787_v56 = vld [vmem:[#allocation3 + $0xf8] sm:$0xff] }
  0x64   :  { %908 = vmatprep.subr.bf16.mxu1 %v793_v57  ;;  %949 = vmatprep.subr.bf16.mxu0 %v795_v58  ;;  %v789_v57 = vld [vmem:[#allocation3 + $0x108] sm:$0xff] }
  0x65   :  { %v797_v58 = vld [vmem:[#allocation3 + $0x148] sm:$0xff] }
  0x66   :  { %4408 = vmatmul.mubr.msk.bf16.gmra.mrb[32].mxu1 %vm299_vm0, %v4938_v26  ;;  %v865_v26 = vld [vmem:[#allocation3 + $0x368] sm:$0xff] }
  0x67   :  { %909 = vmatpush1.bf16.msra.mxu1 %v792_v60  ;;  %950 = vmatpush1.bf16.msra.mxu0 %v794_v61  ;;  %v799_v60 = vld [vmem:[#allocation3 + $0x158] sm:$0xff]  ;;  %v796_v61 = vld [vmem:[#allocation3 + $0x140] sm:$0xff] }
  0x68   :  { %910 = vmatprep.subr.bf16.mxu1 %v802_v62  ;;  %951 = vmatprep.subr.bf16.mxu0 %v804_v63  ;;  %v798_v62 = vld [vmem:[#allocation3 + $0x150] sm:$0xff] }
  0x69   :  { %593 = vmatprep.mubr.bf16.mxu1 %v4829_v28  ;;  %v864_v28 = vld [vmem:[#allocation3 + $0x360] sm:$0xff]  ;;  %v806_v63 = vld [vmem:[#allocation3 + $0x190] sm:$0xff] }
  0x6b   :  { %911 = vmatpush1.bf16.msra.mxu1 %v801_v0  ;;  %952 = vmatpush1.bf16.msra.mxu0 %v803_v1  ;;  %v808_v0 = vld [vmem:[#allocation3 + $0x1a0] sm:$0xff]  ;;  %v805_v1 = vld [vmem:[#allocation3 + $0x188] sm:$0xff] }
  0x6c   :  { %912 = vmatprep.subr.bf16.mxu1 %v811_v2  ;;  %953 = vmatprep.subr.bf16.mxu0 %v813_v3  ;;  %v807_v2 = vld [vmem:[#allocation3 + $0x198] sm:$0xff] }
  0x6d   :  { %v815_v3 = vld [vmem:[#allocation3 + $0x1d8] sm:$0xff] }
  0x6e   :  { %4409 = vmatmul.mubr.msk.bf16.gmra.mrb[36].mxu1 %vm299_vm0, %v4959_v39  ;;  %v894_v39 = vld [vmem:[#allocation3 + $0x450] sm:$0xff] }
  0x6f   :  { %913 = vmatpush1.bf16.msra.mxu1 %v810_v4  ;;  %954 = vmatpush1.bf16.msra.mxu0 %v812_v5  ;;  %v817_v4 = vld [vmem:[#allocation3 + $0x1e8] sm:$0xff]  ;;  %v814_v5 = vld [vmem:[#allocation3 + $0x1d0] sm:$0xff] }
  0x70   :  { %914 = vmatprep.subr.bf16.mxu1 %v820_v6  ;;  %955 = vmatprep.subr.bf16.mxu0 %v822_v7  ;;  %v816_v6 = vld [vmem:[#allocation3 + $0x1e0] sm:$0xff] }
  0x71   :  { %932 = vmatprep.mubr.bf16.mxu1 %v4830_v59  ;;  %v824_v7 = vld [vmem:[#allocation3 + $0x220] sm:$0xff] }
  0x73   :  { %915 = vmatpush1.bf16.msra.mxu1 %v819_v8  ;;  %956 = vmatpush1.bf16.msra.mxu0 %v821_v9  ;;  %v826_v8 = vld [vmem:[#allocation3 + $0x230] sm:$0xff]  ;;  %v823_v9 = vld [vmem:[#allocation3 + $0x218] sm:$0xff] }
  0x74   :  { %916 = vmatprep.subr.bf16.mxu1 %v829_v10  ;;  %957 = vmatprep.subr.bf16.mxu0 %v831_v11  ;;  %v825_v10 = vld [vmem:[#allocation3 + $0x228] sm:$0xff] }
  0x75   :  { %v833_v11 = vld [vmem:[#allocation3 + $0x268] sm:$0xff] }
  0x77   :  { %917 = vmatpush1.bf16.msra.mxu1 %v828_v12  ;;  %958 = vmatpush1.bf16.msra.mxu0 %v830_v13  ;;  %v835_v12 = vld [vmem:[#allocation3 + $0x278] sm:$0xff]  ;;  %v832_v13 = vld [vmem:[#allocation3 + $0x260] sm:$0xff] }
  0x78   :  { %918 = vmatprep.subr.bf16.mxu1 %v838_v14  ;;  %959 = vmatprep.subr.bf16.mxu0 %v840_v15  ;;  %v834_v14 = vld [vmem:[#allocation3 + $0x270] sm:$0xff] }
  0x79   :  { %v842_v15 = vld [vmem:[#allocation3 + $0x2b0] sm:$0xff] }
  0x7b   :  { %919 = vmatpush1.bf16.msra.mxu1 %v837_v16  ;;  %960 = vmatpush1.bf16.msra.mxu0 %v839_v17  ;;  %v844_v16 = vld [vmem:[#allocation3 + $0x2c0] sm:$0xff]  ;;  %v841_v17 = vld [vmem:[#allocation3 + $0x2a8] sm:$0xff] }
  0x7c   :  { %920 = vmatprep.subr.bf16.mxu1 %v847_v18  ;;  %961 = vmatprep.subr.bf16.mxu0 %v849_v19  ;;  %v843_v18 = vld [vmem:[#allocation3 + $0x2b8] sm:$0xff] }
  0x7d   :  { %v851_v19 = vld [vmem:[#allocation3 + $0x2f8] sm:$0xff] }
  0x7f   :  { %921 = vmatpush1.bf16.msra.mxu1 %v846_v20  ;;  %962 = vmatpush1.bf16.msra.mxu0 %v848_v21  ;;  %v853_v20 = vld [vmem:[#allocation3 + $0x308] sm:$0xff]  ;;  %v850_v21 = vld [vmem:[#allocation3 + $0x2f0] sm:$0xff] }
  0x80   :  { %922 = vmatprep.subr.bf16.mxu1 %v856_v22  ;;  %963 = vmatprep.subr.bf16.mxu0 %v858_v23  ;;  %v852_v22 = vld [vmem:[#allocation3 + $0x300] sm:$0xff] }
  0x81   :  { %v860_v23 = vld [vmem:[#allocation3 + $0x340] sm:$0xff] }
  0x83   :  { %923 = vmatpush1.bf16.msra.mxu1 %v855_v24  ;;  %964 = vmatpush1.bf16.msra.mxu0 %v857_v25  ;;  %v862_v24 = vld [vmem:[#allocation3 + $0x350] sm:$0xff]  ;;  %v859_v25 = vld [vmem:[#allocation3 + $0x338] sm:$0xff] }
  0x84   :  { %924 = vmatprep.subr.bf16.mxu1 %v865_v26  ;;  %965 = vmatprep.subr.bf16.mxu0 %v867_v27  ;;  %v861_v26 = vld [vmem:[#allocation3 + $0x348] sm:$0xff] }
  0x85   :  { %v869_v27 = vld [vmem:[#allocation3 + $0x388] sm:$0xff] }
  0x87   :  { %925 = vmatpush1.bf16.msra.mxu1 %v864_v28  ;;  %966 = vmatpush1.bf16.msra.mxu0 %v866_v29  ;;  %v871_v28 = vld [vmem:[#allocation3 + $0x398] sm:$0xff]  ;;  %v868_v29 = vld [vmem:[#allocation3 + $0x380] sm:$0xff] }
  0x88   :  { %926 = vmatprep.subr.bf16.mxu1 %v874_v30  ;;  %967 = vmatprep.subr.bf16.mxu0 %v876_v31  ;;  %v870_v30 = vld [vmem:[#allocation3 + $0x390] sm:$0xff] }
  0x89   :  { %v878_v31 = vld [vmem:[#allocation3 + $0x3d0] sm:$0xff] }
  0x8b   :  { %927 = vmatpush1.bf16.msra.mxu1 %v873_v32  ;;  %968 = vmatpush1.bf16.msra.mxu0 %v875_v33  ;;  %v880_v32 = vld [vmem:[#allocation3 + $0x3e0] sm:$0xff]  ;;  %v877_v33 = vld [vmem:[#allocation3 + $0x3c8] sm:$0xff] }
  0x8c   :  { %928 = vmatprep.subr.bf16.mxu1 %v883_v34  ;;  %969 = vmatprep.subr.bf16.mxu0 %v885_v35  ;;  %v879_v34 = vld [vmem:[#allocation3 + $0x3d8] sm:$0xff] }
  0x8d   :  { %v887_v35 = vld [vmem:[#allocation3 + $0x418] sm:$0xff] }
  0x8f   :  { %929 = vmatpush1.bf16.msra.mxu1 %v882_v36  ;;  %970 = vmatpush1.bf16.msra.mxu0 %v884_v37  ;;  %v889_v36 = vld [vmem:[#allocation3 + $0x428] sm:$0xff]  ;;  %v886_v37 = vld [vmem:[#allocation3 + $0x410] sm:$0xff] }
  0x90   :  { %930 = vmatprep.subr.bf16.mxu1 %v892_v38  ;;  %971 = vmatprep.subr.bf16.mxu0 %v894_v39  ;;  %v888_v38 = vld [vmem:[#allocation3 + $0x420] sm:$0xff] }
  0x91   :  { %v896_v39 = vld [vmem:[#allocation3 + $0x460] sm:$0xff] }
  0x93   :  { %931 = vmatpush1.bf16.msra.mxu1 %v891_v40  ;;  %972 = vmatpush1.bf16.msra.mxu0 %v893_v41  ;;  %v898_v40 = vld [vmem:[#allocation3 + $0x470] sm:$0xff]  ;;  %v895_v41 = vld [vmem:[#allocation3 + $0x458] sm:$0xff] }
  0x94   :  { %982 = vmatprep.subr.bf16.mxu1 %v761_v42  ;;  %1023 = vmatprep.subr.bf16.mxu0 %v763_v43  ;;  %v897_v42 = vld [vmem:[#allocation3 + $0x468] sm:$0xff]  ;;  %v836_v43 = vld [vmem:[#allocation3 + $0x280] sm:$0xff] }
  0x96   :  { %933 = vmatmul.mubr.bf16.vlgmr.msra.gmra.mrb[40].mxu1 %v4830_v59  ;;  %974 = vmatmul.mubr.bf16.vlgmr.msra.gmra.mrb[32].mxu0 %v4830_v59 }
  0x97   :  { %983 = vmatpush1.bf16.msra.mxu1 %v760_v44  ;;  %1024 = vmatpush1.bf16.msra.mxu0 %v762_v45  ;;  %v764_v44 = vld [vmem:[#allocation3 + $0x40] sm:$0xff]  ;;  %v845_v45 = vld [vmem:[#allocation3 + $0x2c8] sm:$0xff] }
  0x98   :  { %984 = vmatprep.subr.bf16.mxu1 %v770_v46  ;;  %1025 = vmatprep.subr.bf16.mxu0 %v772_v47  ;;  %v773_v46 = vld [vmem:[#allocation3 + $0x88] sm:$0xff]  ;;  %v854_v47 = vld [vmem:[#allocation3 + $0x310] sm:$0xff] }
  0x99   :  { %1014 = vmatprep.mubr.bf16.mxu1 %v4830_v59  ;;  %1055 = vmatprep.mubr.bf16.mxu0 %v4830_v59 }
  0x9b   :  { %985 = vmatpush1.bf16.msra.mxu1 %v769_v48  ;;  %1026 = vmatpush1.bf16.msra.mxu0 %v771_v49  ;;  %v782_v48 = vld [vmem:[#allocation3 + $0xd0] sm:$0xff]  ;;  %v863_v49 = vld [vmem:[#allocation3 + $0x358] sm:$0xff] }
  0x9c   :  { %986 = vmatprep.subr.bf16.mxu1 %v779_v50  ;;  %1027 = vmatprep.subr.bf16.mxu0 %v781_v51  ;;  %v791_v50 = vld [vmem:[#allocation3 + $0x118] sm:$0xff]  ;;  %v872_v51 = vld [vmem:[#allocation3 + $0x3a0] sm:$0xff] }
  0x9f   :  { %987 = vmatpush1.bf16.msra.mxu1 %v778_v52  ;;  %1028 = vmatpush1.bf16.msra.mxu0 %v780_v53  ;;  %v800_v52 = vld [vmem:[#allocation3 + $0x160] sm:$0xff]  ;;  %v881_v53 = vld [vmem:[#allocation3 + $0x3e8] sm:$0xff] }
  0xa0   :  { %988 = vmatprep.subr.bf16.mxu1 %v788_v54  ;;  %1029 = vmatprep.subr.bf16.mxu0 %v790_v55  ;;  %v809_v54 = vld [vmem:[#allocation3 + $0x1a8] sm:$0xff]  ;;  %v890_v55 = vld [vmem:[#allocation3 + $0x430] sm:$0xff] }
  0xa3   :  { %989 = vmatpush1.bf16.msra.mxu1 %v787_v56  ;;  %1030 = vmatpush1.bf16.msra.mxu0 %v789_v57  ;;  %v254_v56 = vlaneseq  ;;  %v818_v57 = vld [vmem:[#allocation3 + $0x1f0] sm:$0xff] }
  0xa4   :  { %990 = vmatprep.subr.bf16.mxu1 %v797_v58  ;;  %1031 = vmatprep.subr.bf16.mxu0 %v799_v60  ;;  %v899_v58 = vld [vmem:[#allocation3 + $0x478] sm:$0xff] }
  0xa5   :  { %v5009_v60 = vshrl.u32 %v254_v56, 7 }
  0xa7   :  { %991 = vmatpush1.bf16.msra.mxu1 %v796_v61  ;;  %1032 = vmatpush1.bf16.msra.mxu0 %v798_v62  ;;  %v827_v61 = vld [vmem:[#allocation3 + $0x238] sm:$0xff]  ;;  %v7393_v62 = vsub.s32 0, %v5009_v60 }
  0xa8   :  { %992 = vmatprep.subr.bf16.mxu1 %v806_v63  ;;  %1033 = vmatprep.subr.bf16.mxu0 %v808_v0  ;;  %v5015_v63 = vld [vmem:[%s7388_s3] sm:$0xff]  ;;  %v7392_v0 = vsub.s32 1, %v5009_v60 }
  0xab   :  { %993 = vmatpush1.bf16.msra.mxu1 %v805_v1  ;;  %1034 = vmatpush1.bf16.msra.mxu0 %v807_v2  ;;  %v5022_v1 = vrot.slane %v5015_v63, %v7393_v62  ;;  %v5027_v2 = vrot.slane %v5015_v63, %v7392_v0 }
  0xac   :  { %994 = vmatprep.subr.bf16.mxu1 %v815_v3  ;;  %1035 = vmatprep.subr.bf16.mxu0 %v817_v4 }
  0xaf   :  { %995 = vmatpush1.bf16.msra.mxu1 %v814_v5  ;;  %1036 = vmatpush1.bf16.msra.mxu0 %v816_v6 }
  0xb0   :  { %996 = vmatprep.subr.bf16.mxu1 %v824_v7  ;;  %1037 = vmatprep.subr.bf16.mxu0 %v826_v8 }
  0xb3   :  { %997 = vmatpush1.bf16.msra.mxu1 %v823_v9  ;;  %1038 = vmatpush1.bf16.msra.mxu0 %v825_v10 }
  0xb4   :  { %998 = vmatprep.subr.bf16.mxu1 %v833_v11  ;;  %1039 = vmatprep.subr.bf16.mxu0 %v835_v12 }
  0xb7   :  { %999 = vmatpush1.bf16.msra.mxu1 %v832_v13  ;;  %1040 = vmatpush1.bf16.msra.mxu0 %v834_v14 }
  0xb8   :  { %1000 = vmatprep.subr.bf16.mxu1 %v842_v15  ;;  %1041 = vmatprep.subr.bf16.mxu0 %v844_v16 }
  0xbb   :  { %1001 = vmatpush1.bf16.msra.mxu1 %v841_v17  ;;  %1042 = vmatpush1.bf16.msra.mxu0 %v843_v18 }
  0xbc   :  { %1002 = vmatprep.subr.bf16.mxu1 %v851_v19  ;;  %1043 = vmatprep.subr.bf16.mxu0 %v853_v20 }
  0xbf   :  { %1003 = vmatpush1.bf16.msra.mxu1 %v850_v21  ;;  %1044 = vmatpush1.bf16.msra.mxu0 %v852_v22 }
  0xc0   :  { %1004 = vmatprep.subr.bf16.mxu1 %v860_v23  ;;  %1045 = vmatprep.subr.bf16.mxu0 %v862_v24 }
  0xc3   :  { %1005 = vmatpush1.bf16.msra.mxu1 %v859_v25  ;;  %1046 = vmatpush1.bf16.msra.mxu0 %v861_v26 }
  0xc4   :  { %1006 = vmatprep.subr.bf16.mxu1 %v869_v27  ;;  %1047 = vmatprep.subr.bf16.mxu0 %v871_v28 }
  0xc7   :  { %1007 = vmatpush1.bf16.msra.mxu1 %v868_v29  ;;  %1048 = vmatpush1.bf16.msra.mxu0 %v870_v30  ;;  %v272_v30 = vsub.s32 4, %v5009_v60 }
  0xc8   :  { %1008 = vmatprep.subr.bf16.mxu1 %v878_v31  ;;  %1049 = vmatprep.subr.bf16.mxu0 %v880_v32 }
  0xcb   :  { %1009 = vmatpush1.bf16.msra.mxu1 %v877_v33  ;;  %1050 = vmatpush1.bf16.msra.mxu0 %v879_v34  ;;  %v276_v33 = vsub.s32 5, %v5009_v60  ;;  %v264_v34 = vsub.s32 2, %v5009_v60 }
  0xcc   :  { %1010 = vmatprep.subr.bf16.mxu1 %v887_v35  ;;  %1051 = vmatprep.subr.bf16.mxu0 %v889_v36  ;;  %v268_v35 = vsub.s32 3, %v5009_v60  ;;  %v5080_v36 = vrot.slane %v5015_v63, %v272_v30 }
  0xcf   :  { %1011 = vmatpush1.bf16.msra.mxu1 %v886_v37  ;;  %1052 = vmatpush1.bf16.msra.mxu0 %v888_v38 }
  0xd0   :  { %1012 = vmatprep.subr.bf16.mxu1 %v896_v39  ;;  %1053 = vmatprep.subr.bf16.mxu0 %v898_v40  ;;  %v5087_v39 = vrot.slane %v5015_v63, %v276_v33  ;;  %v5090_v40 = vrot.slane %v5015_v63, %v264_v34 }
  0xd3   :  { %1013 = vmatpush1.bf16.msra.mxu1 %v895_v41  ;;  %1054 = vmatpush1.bf16.msra.mxu0 %v897_v42 }
  0xd4   :  { %4420 = vmatprep.subr.bf16.mxu1 %v836_v43  ;;  %v5097_v43 = vrot.slane %v5015_v63, %v268_v35 }
  0xd6   :  { %1015 = vmatmul.mubr.bf16.vlgmr.msra.gmra.mrb[44].mxu1 %v4830_v59  ;;  %1056 = vmatmul.mubr.bf16.vlgmr.msra.gmra.mrb[36].mxu0 %v4830_v59 }
  0xd7   :  { %4421 = vmatpush3.bf16.msra.mxu1 %v764_v44  ;;  %1096 = vmatprep.mubr.bf16.mxu1 %v4830_v59 }
  0xd8   :  { %4422 = vmatprep.subr.bf16.mxu1 %v845_v45 }
  0xdb   :  { %4423 = vmatpush3.bf16.msra.mxu1 %v773_v46 }
  0xdc   :  { %4424 = vmatprep.subr.bf16.mxu1 %v854_v47 }
  0xdf   :  { %4425 = vmatpush3.bf16.msra.mxu1 %v782_v48 }
  0xe0   :  { %4426 = vmatprep.subr.bf16.mxu1 %v863_v49 }
  0xe3   :  { %4427 = vmatpush3.bf16.msra.mxu1 %v791_v50 }
  0xe4   :  { %4428 = vmatprep.subr.bf16.mxu1 %v872_v51 }
  0xe7   :  { %4429 = vmatpush3.bf16.msra.mxu1 %v800_v52 }
  0xe8   :  { %4430 = vmatprep.subr.bf16.mxu1 %v881_v53 }
  0xeb   :  { %4431 = vmatpush3.bf16.msra.mxu1 %v809_v54 }
  0xec   :  { %4432 = vmatprep.subr.bf16.mxu1 %v890_v55 }
  0xef   :  { %4433 = vmatpush3.bf16.msra.mxu1 %v818_v57 }
  0xf0   :  { %4434 = vmatprep.subr.bf16.mxu1 %v899_v58 }
  0xf3   :  { %4435 = vmatpush3.bf16.msra.mxu1 %v827_v61 }
  0xf6   :  { %1097 = vmatmul.mubr.bf16.vlgmr.msra.gmra.mrb[48].mxu1 %v4830_v59 }
  0xf9   :  { %v366_v3 = vpop.f32.mrb[0].mxu1  ;;  %v5029_v4 = vpop.f32.mrb[0].mxu0 }
  0xfa   :  { %v5032_v5 = vadd.f32 %v366_v3, %v5022_v1  ;;  %v368_v6 = vpop.f32.mrb[1].mxu1  ;;  %v5034_v7 = vpop.f32.mrb[1].mxu0 }
  0xfb   :  { %v5037_v59 = vadd.f32 %v368_v6, %v5027_v2  ;;  %v370_v8 = vpop.f32.mrb[2].mxu1  ;;  %v350_v9 = vpop.f32.mrb[2].mxu0 }
  0xfc   :  { %7632 = vst [vmem:[#allocation17_spill] sm:$0xff] %v5032_v5  ;;  %v5040_v10 = vadd.f32 %v370_v8, %v5022_v1  ;;  %v372_v11 = vpop.f32.mrb[3].mxu1  ;;  %v5043_v12 = vadd.f32 %v350_v9, %v5022_v1  ;;  %v352_v13 = vpop.f32.mrb[3].mxu0  ;;  %v5315_v5 = vld [vmem:[#allocation3 + $0x138] sm:$0xff] }
  0xfd   :  { %7633 = vst [vmem:[#allocation18_spill] sm:$0xff] %v5037_v59  ;;  %v5046_v14 = vadd.f32 %v372_v11, %v5027_v2  ;;  %v5049_v15 = vadd.f32 %v352_v13, %v5027_v2  ;;  %v5309_v59 = vld [vmem:[#allocation3 + $0xe8] sm:$0xff] }
  0xfe   :  { %7634 = vst [vmem:[#allocation19_spill] sm:$0xff] %v5040_v10  ;;  %7635 = vst [vmem:[#allocation20_spill] sm:$0xff] %v5043_v12 }
  0xff   :  { %7636 = vst [vmem:[#allocation21_spill] sm:$0xff] %v5046_v14  ;;  %7637 = vst [vmem:[#allocation22_spill] sm:$0xff] %v5049_v15  ;;  %v5381_v15 = vld [vmem:[#allocation3 + $0x290] sm:$0xff] }
 0x101   :  { %v376_v16 = vpop.f32.mrb[4].mxu1  ;;  %v356_v17 = vpop.f32.mrb[4].mxu0 }
 0x102   :  { %v5052_v18 = vadd.f32 %v376_v16, %v5022_v1  ;;  %v378_v19 = vpop.f32.mrb[5].mxu1  ;;  %v5055_v20 = vadd.f32 %v356_v17, %v5022_v1  ;;  %v358_v21 = vpop.f32.mrb[5].mxu0 }
 0x103   :  { %v5058_v22 = vadd.f32 %v378_v19, %v5027_v2  ;;  %v380_v23 = vpop.f32.mrb[6].mxu1  ;;  %v5061_v24 = vadd.f32 %v358_v21, %v5027_v2  ;;  %v360_v25 = vpop.f32.mrb[6].mxu0 }
 0x104   :  { %7638 = vst [vmem:[#allocation23_spill] sm:$0xff] %v5052_v18  ;;  %7639 = vst [vmem:[#allocation24_spill] sm:$0xff] %v5055_v20  ;;  %v5064_v26 = vadd.f32 %v380_v23, %v5022_v1  ;;  %v382_v27 = vpop.f32.mrb[7].mxu1  ;;  %v5067_v28 = vadd.f32 %v360_v25, %v5022_v1  ;;  %v362_v29 = vpop.f32.mrb[7].mxu0  ;;  %v5369_v20 = vld [vmem:[#allocation3 + $0x250] sm:$0xff] }
 0x105   :  { %7640 = vst [vmem:[#allocation25_spill] sm:$0xff] %v5058_v22  ;;  %7641 = vst [vmem:[#allocation26_spill] sm:$0xff] %v5061_v24  ;;  %v5071_v31 = vadd.f32 %v382_v27, %v5027_v2  ;;  %v5074_v32 = vadd.f32 %v362_v29, %v5027_v2  ;;  %v5363_v24 = vld [vmem:[#allocation3 + $0x258] sm:$0xff] }
 0x106   :  { %7642 = vst [vmem:[#allocation27_spill] sm:$0xff] %v5064_v26  ;;  %7643 = vst [vmem:[#allocation28_spill] sm:$0xff] %v5067_v28  ;;  %v5343_v28 = vld [vmem:[#allocation3 + $0x1b0] sm:$0xff] }
 0x107   :  { %7644 = vst [vmem:[#allocation29_spill] sm:$0xff] %v5071_v31  ;;  %7645 = vst [vmem:[#allocation30_spill] sm:$0xff] %v5074_v32  ;;  %v5337_v32 = vld [vmem:[#allocation3 + $0x1b8] sm:$0xff] }
 0x108   :  { %7702 = vst [vmem:[#allocation87_spill] sm:$0xff] %v5363_v24  ;;  %7703 = vst [vmem:[#allocation88_spill] sm:$0xff] %v5369_v20 }
 0x109   :  { %v5082_v37 = vpop.f32.mrb[8].mxu1  ;;  %v5084_v38 = vpop.f32.mrb[8].mxu0 }
 0x10a   :  { %v5092_v41 = vpop.f32.mrb[9].mxu1  ;;  %v5094_v42 = vpop.f32.mrb[9].mxu0 }
 0x10b   :  { %v423_v44 = vpop.f32.mrb[10].mxu1  ;;  %v496_v45 = vpop.f32.mrb[10].mxu0 }
 0x10c   :  { %v5100_v46 = vadd.f32 %v423_v44, %v5090_v40  ;;  %v425_v47 = vpop.f32.mrb[11].mxu1  ;;  %v5103_v48 = vadd.f32 %v496_v45, %v5080_v36  ;;  %v498_v49 = vpop.f32.mrb[11].mxu0 }
 0x10d   :  { %v5106_v50 = vadd.f32 %v425_v47, %v5097_v43  ;;  %v5109_v51 = vadd.f32 %v498_v49, %v5087_v39 }
 0x10e   :  { %7646 = vst [vmem:[#allocation31_spill] sm:$0xff] %v5100_v46  ;;  %7647 = vst [vmem:[#allocation32_spill] sm:$0xff] %v5103_v48  ;;  %v5383_v46 = vld [vmem:[#allocation3 + $0x2a0] sm:$0xff] }
 0x10f   :  { %7648 = vst [vmem:[#allocation33_spill] sm:$0xff] %v5106_v50  ;;  %7649 = vst [vmem:[#allocation34_spill] sm:$0xff] %v5109_v51  ;;  %v422_v51 = vadd.f32 %v5092_v41, %v5097_v43 }
 0x110   :  { %7704 = vst [vmem:[#allocation89_spill] sm:$0xff] %v5383_v46 }
 0x111   :  { %v429_v52 = vpop.f32.mrb[12].mxu1  ;;  %v502_v53 = vpop.f32.mrb[12].mxu0 }
 0x112   :  { %v5112_v54 = vadd.f32 %v429_v52, %v5090_v40  ;;  %v431_v55 = vpop.f32.mrb[13].mxu1  ;;  %v5115_v56 = vadd.f32 %v502_v53, %v5080_v36  ;;  %v504_v57 = vpop.f32.mrb[13].mxu0 }
 0x113   :  { %v5118_v58 = vadd.f32 %v431_v55, %v5097_v43  ;;  %v433_v61 = vpop.f32.mrb[14].mxu1  ;;  %v5121_v3 = vadd.f32 %v504_v57, %v5087_v39  ;;  %v506_v6 = vpop.f32.mrb[14].mxu0 }
 0x114   :  { %7650 = vst [vmem:[#allocation35_spill] sm:$0xff] %v5112_v54  ;;  %7651 = vst [vmem:[#allocation36_spill] sm:$0xff] %v5115_v56  ;;  %v5124_v8 = vadd.f32 %v433_v61, %v5090_v40  ;;  %v435_v9 = vpop.f32.mrb[15].mxu1  ;;  %v5127_v11 = vadd.f32 %v506_v6, %v5080_v36  ;;  %v508_v13 = vpop.f32.mrb[15].mxu0  ;;  %v5357_v56 = vld [vmem:[#allocation3 + $0x208] sm:$0xff]  ;;  %v5367_v54 = vld [vmem:[#allocation3 + $0x240] sm:$0xff] }
 0x115   :  { %7652 = vst [vmem:[#allocation37_spill] sm:$0xff] %v5118_v58  ;;  %7653 = vst [vmem:[#allocation38_spill] sm:$0xff] %v5121_v3  ;;  %v5130_v16 = vadd.f32 %v435_v9, %v5097_v43  ;;  %v5133_v17 = vadd.f32 %v508_v13, %v5087_v39  ;;  %v5351_v3 = vld [vmem:[#allocation3 + $0x210] sm:$0xff]  ;;  %v5361_v58 = vld [vmem:[#allocation3 + $0x248] sm:$0xff] }
 0x116   :  { %7654 = vst [vmem:[#allocation39_spill] sm:$0xff] %v5124_v8  ;;  %7655 = vst [vmem:[#allocation40_spill] sm:$0xff] %v5127_v11  ;;  %v5331_v11 = vld [vmem:[#allocation3 + $0x168] sm:$0xff] }
 0x117   :  { %7656 = vst [vmem:[#allocation41_spill] sm:$0xff] %v5130_v16  ;;  %7657 = vst [vmem:[#allocation42_spill] sm:$0xff] %v5133_v17  ;;  %v5325_v17 = vld [vmem:[#allocation3 + $0x170] sm:$0xff]  ;;  %v5333_v16 = vld [vmem:[#allocation3 + $0x178] sm:$0xff] }
 0x118   :  { %7697 = vst [vmem:[#allocation82_spill] sm:$0xff] %v5333_v16  ;;  %v5339_v8 = vld [vmem:[#allocation3 + $0x1c8] sm:$0xff]  ;;  %7700 = vst [vmem:[#allocation85_spill] sm:$0xff] %v5351_v3 }
 0x119   :  { %v439_v19 = vpop.f32.mrb[16].mxu1  ;;  %v512_v21 = vpop.f32.mrb[16].mxu0  ;;  %7698 = vst [vmem:[#allocation83_spill] sm:$0xff] %v5339_v8  ;;  %7701 = vst [vmem:[#allocation86_spill] sm:$0xff] %v5357_v56 }
 0x11a   :  { %v5136_v23 = vadd.f32 %v439_v19, %v5090_v40  ;;  %v441_v25 = vpop.f32.mrb[17].mxu1  ;;  %v5139_v27 = vadd.f32 %v512_v21, %v5080_v36  ;;  %v514_v29 = vpop.f32.mrb[17].mxu0 }
 0x11b   :  { %v5142_v30 = vadd.f32 %v441_v25, %v5097_v43  ;;  %v443_v33 = vpop.f32.mrb[18].mxu1  ;;  %v5145_v34 = vadd.f32 %v514_v29, %v5087_v39  ;;  %v516_v35 = vpop.f32.mrb[18].mxu0 }
 0x11c   :  { %7658 = vst [vmem:[#allocation43_spill] sm:$0xff] %v5136_v23  ;;  %7659 = vst [vmem:[#allocation44_spill] sm:$0xff] %v5139_v27  ;;  %v5148_v44 = vadd.f32 %v443_v33, %v5090_v40  ;;  %v445_v45 = vpop.f32.mrb[19].mxu1  ;;  %v5151_v47 = vadd.f32 %v516_v35, %v5080_v36  ;;  %v518_v49 = vpop.f32.mrb[19].mxu0  ;;  %v5279_v27 = vld [vmem:[#allocation3 + $0x60] sm:$0xff]  ;;  %v5313_v23 = vld [vmem:[#allocation3 + $0x128] sm:$0xff] }
 0x11d   :  { %7660 = vst [vmem:[#allocation45_spill] sm:$0xff] %v5142_v30  ;;  %7661 = vst [vmem:[#allocation46_spill] sm:$0xff] %v5145_v34  ;;  %v5154_v52 = vadd.f32 %v445_v45, %v5097_v43  ;;  %v5157_v53 = vadd.f32 %v518_v49, %v5087_v39  ;;  %v5307_v30 = vld [vmem:[#allocation3 + $0xd8] sm:$0xff] }
 0x11e   :  { %7662 = vst [vmem:[#allocation47_spill] sm:$0xff] %v5148_v44  ;;  %7663 = vst [vmem:[#allocation48_spill] sm:$0xff] %v5151_v47 }
 0x11f   :  { %7664 = vst [vmem:[#allocation49_spill] sm:$0xff] %v5154_v52  ;;  %7665 = vst [vmem:[#allocation50_spill] sm:$0xff] %v5157_v53 }
 0x121   :  { %v449_v55 = vpop.f32.mrb[20].mxu1  ;;  %v522_v57 = vpop.f32.mrb[20].mxu0 }
 0x122   :  { %v5160_v61 = vadd.f32 %v449_v55, %v5090_v40  ;;  %v451_v6 = vpop.f32.mrb[21].mxu1  ;;  %v5163_v9 = vadd.f32 %v522_v57, %v5080_v36  ;;  %v524_v13 = vpop.f32.mrb[21].mxu0 }
 0x123   :  { %v5166_v19 = vadd.f32 %v451_v6, %v5097_v43  ;;  %v453_v21 = vpop.f32.mrb[22].mxu1  ;;  %v5169_v25 = vadd.f32 %v524_v13, %v5087_v39  ;;  %v526_v29 = vpop.f32.mrb[22].mxu0  ;;  %v280_v6 = vsub.s32 6, %v5009_v60  ;;  %v284_v13 = vsub.s32 7, %v5009_v60 }
 0x124   :  { %7666 = vst [vmem:[#allocation51_spill] sm:$0xff] %v5160_v61  ;;  %7667 = vst [vmem:[#allocation52_spill] sm:$0xff] %v5163_v9  ;;  %v5172_v33 = vadd.f32 %v453_v21, %v5090_v40  ;;  %v455_v35 = vpop.f32.mrb[23].mxu1  ;;  %v5175_v45 = vadd.f32 %v526_v29, %v5080_v36  ;;  %v528_v49 = vpop.f32.mrb[23].mxu0  ;;  %v5188_v21 = vld [vmem:[%s7388_s3 + $0x8] ss:$0 sm:$0xff] }
 0x125   :  { %7668 = vst [vmem:[#allocation53_spill] sm:$0xff] %v5166_v19  ;;  %7669 = vst [vmem:[#allocation54_spill] sm:$0xff] %v5169_v25  ;;  %v5178_v55 = vadd.f32 %v455_v35, %v5097_v43  ;;  %v5181_v57 = vadd.f32 %v528_v49, %v5087_v39  ;;  %v5193_v62 = vrot.slane %v5015_v63, %v280_v6 }
 0x126   :  { %7670 = vst [vmem:[#allocation55_spill] sm:$0xff] %v5172_v33  ;;  %7671 = vst [vmem:[#allocation56_spill] sm:$0xff] %v5175_v45  ;;  %v5203_v45 = vrot.slane %v5015_v63, %v284_v13 }
 0x127   :  { %7672 = vst [vmem:[#allocation57_spill] sm:$0xff] %v5178_v55  ;;  %7673 = vst [vmem:[#allocation58_spill] sm:$0xff] %v5181_v57 }
 0x129   :  { %v5190_v0 = vpop.f32.mrb[24].mxu1  ;;  %v4600_v29 = vpop.f32.mrb[24].mxu0 }
 0x12a   :  { %v5195_v35 = vpop.f32.mrb[25].mxu1  ;;  %v5198_v49 = vadd.f32 %v4600_v29, %v5188_v21  ;;  %v5200_v57 = vpop.f32.mrb[25].mxu0 }
 0x12b   :  { %v569_v55 = vpop.f32.mrb[26].mxu1  ;;  %v4601_v31 = vpop.f32.mrb[26].mxu0 }
 0x12c   :  { %7674 = vst [vmem:[#allocation59_spill] sm:$0xff] %v5198_v49  ;;  %v5206_v33 = vadd.f32 %v569_v55, %v5193_v62  ;;  %v571_v26 = vpop.f32.mrb[27].mxu1  ;;  %v5209_v25 = vadd.f32 %v4601_v31, %v5188_v21  ;;  %v641_v6 = vpop.f32.mrb[27].mxu0  ;;  %v5345_v49 = vld [vmem:[#allocation3 + $0x1c0] sm:$0xff] }
 0x12d   :  { %v5212_v9 = vadd.f32 %v571_v26, %v5203_v45  ;;  %v5215_v29 = vadd.f32 %v5188_v21, %v641_v6  ;;  %7699 = vst [vmem:[#allocation84_spill] sm:$0xff] %v5345_v49 }
 0x12e   :  { %7675 = vst [vmem:[#allocation60_spill] sm:$0xff] %v5206_v33  ;;  %7676 = vst [vmem:[#allocation61_spill] sm:$0xff] %v5209_v25  ;;  %v5319_v25 = vld [vmem:[#allocation3 + $0x120] sm:$0xff]  ;;  %v349_v33 = vadd.f32 %v5034_v7, %v5027_v2 }
 0x12f   :  { %7677 = vst [vmem:[#allocation62_spill] sm:$0xff] %v5212_v9  ;;  %7678 = vst [vmem:[#allocation63_spill] sm:$0xff] %v5215_v29  ;;  %v420_v29 = vadd.f32 %v5082_v37, %v5090_v40  ;;  %v347_v9 = vadd.f32 %v5029_v4, %v5022_v1  ;;  %v5391_v1 = vld [vmem:[#allocation3 + $0x288] sm:$0xff]  ;;  %v5393_v4 = vld [vmem:[#allocation3 + $0x298] sm:$0xff] }
 0x130   :  { %7705 = vst [vmem:[#allocation90_spill] sm:$0xff] %v5393_v4 }
 0x131   :  { %v575_v19 = vpop.f32.mrb[28].mxu1  ;;  %v4604_v22 = vpop.f32.mrb[28].mxu0 }
 0x132   :  { %v5218_v63 = vadd.f32 %v575_v19, %v5193_v62  ;;  %v577_v13 = vpop.f32.mrb[29].mxu1  ;;  %v5221_v55 = vadd.f32 %v4604_v22, %v5188_v21  ;;  %v654_v61 = vpop.f32.mrb[29].mxu0 }
 0x133   :  { %v5224_v31 = vadd.f32 %v577_v13, %v5203_v45  ;;  %v579_v18 = vpop.f32.mrb[30].mxu1  ;;  %v5227_v26 = vadd.f32 %v5188_v21, %v654_v61  ;;  %v4605_v53 = vpop.f32.mrb[30].mxu0 }
 0x134   :  { %7679 = vst [vmem:[#allocation64_spill] sm:$0xff] %v5218_v63  ;;  %7680 = vst [vmem:[#allocation65_spill] sm:$0xff] %v5221_v55  ;;  %v5230_v6 = vadd.f32 %v579_v18, %v5193_v62  ;;  %v581_v47 = vpop.f32.mrb[31].mxu1  ;;  %v5233_v19 = vadd.f32 %v4605_v53, %v5188_v21  ;;  %v657_v52 = vpop.f32.mrb[31].mxu0  ;;  %v5355_v63 = vld [vmem:[#allocation3 + $0x1f8] sm:$0xff] }
 0x135   :  { %7681 = vst [vmem:[#allocation66_spill] sm:$0xff] %v5224_v31  ;;  %7682 = vst [vmem:[#allocation67_spill] sm:$0xff] %v5227_v26  ;;  %v5236_v22 = vadd.f32 %v581_v47, %v5203_v45  ;;  %v5239_v55 = vadd.f32 %v5188_v21, %v657_v52  ;;  %v5253_v47 = vld [vmem:[#allocation3 + $0x8] sm:$0xff]  ;;  %v5255_v52 = vld [vmem:[#allocation3 + $0x18] sm:$0xff] }
 0x136   :  { %7683 = vst [vmem:[#allocation68_spill] sm:$0xff] %v5230_v6  ;;  %7684 = vst [vmem:[#allocation69_spill] sm:$0xff] %v5233_v19  ;;  %1333 = vmatprep.subr.bf16.mxu0 %v5253_v47  ;;  %1374 = vmatprep.subr.bf16.mxu1 %v5255_v52  ;;  %v5327_v6 = vld [vmem:[#allocation3 + $0x180] sm:$0xff] }
 0x137   :  { %7685 = vst [vmem:[#allocation70_spill] sm:$0xff] %v5236_v22  ;;  %7686 = vst [vmem:[#allocation71_spill] sm:$0xff] %v5239_v55  ;;  %v5257_v55 = vld [vmem:[#allocation3] sm:$0xff]  ;;  %v5321_v22 = vld [vmem:[#allocation3 + $0x130] sm:$0xff] }
 0x138   :  { %1334 = vmatpush1.bf16.msra.mxu0 %v5257_v55  ;;  %7695 = vst [vmem:[#allocation80_spill] sm:$0xff] %v5321_v22  ;;  %7696 = vst [vmem:[#allocation81_spill] sm:$0xff] %v5327_v6  ;;  %v5349_v31 = vld [vmem:[#allocation3 + $0x200] sm:$0xff] }
 0x139   :  { %v585_v13 = vpop.f32.mrb[32].mxu1 }
 0x13a   :  { %v5242_v14 = vadd.f32 %v585_v13, %v5193_v62  ;;  %v587_v61 = vpop.f32.mrb[33].mxu1  ;;  %v5261_v13 = vld [vmem:[#allocation3 + $0x10] sm:$0xff] }
 0x13b   :  { %v5245_v44 = vadd.f32 %v587_v61, %v5203_v45  ;;  %v589_v18 = vpop.f32.mrb[34].mxu1  ;;  %1375 = vmatpush1.bf16.msra.mxu1 %v5261_v13 }
 0x13c   :  { %7687 = vst [vmem:[#allocation72_spill] sm:$0xff] %v5242_v14  ;;  %v5248_v10 = vadd.f32 %v589_v18, %v5193_v62  ;;  %v591_v53 = vpop.f32.mrb[35].mxu1  ;;  %v5277_v14 = vld [vmem:[#allocation3 + $0x50] sm:$0xff]  ;;  %1376 = vmatprep.subr.bf16.mxu1 %v5279_v27 }
 0x13d   :  { %7688 = vst [vmem:[#allocation73_spill] sm:$0xff] %v5245_v44  ;;  %v5251_v19 = vadd.f32 %v591_v53, %v5203_v45  ;;  %1335 = vmatprep.subr.bf16.mxu0 %v5277_v14 }
 0x13e   :  { %7689 = vst [vmem:[#allocation74_spill] sm:$0xff] %v5248_v10 }
 0x13f   :  { %7690 = vst [vmem:[#allocation75_spill] sm:$0xff] %v5251_v19 }
 0x141   :  { %v595_v61 = vpop.f32.mrb[36].mxu1 }
 0x142   :  { %v5266_v18 = vadd.f32 %v595_v61, %v5193_v62  ;;  %v597_v53 = vpop.f32.mrb[37].mxu1  ;;  %v5283_v61 = vld [vmem:[#allocation3 + $0x48] sm:$0xff] }
 0x143   :  { %v5269_v19 = vadd.f32 %v597_v53, %v5203_v45  ;;  %v599_v10 = vpop.f32.mrb[38].mxu1  ;;  %v5285_v53 = vld [vmem:[#allocation3 + $0x58] sm:$0xff]  ;;  %1336 = vmatpush1.bf16.msra.mxu0 %v5283_v61 }
 0x144   :  { %7691 = vst [vmem:[#allocation76_spill] sm:$0xff] %v5266_v18  ;;  %v5272_v26 = vadd.f32 %v599_v10, %v5193_v62  ;;  %v601_v44 = vpop.f32.mrb[39].mxu1  ;;  %1377 = vmatpush1.bf16.msra.mxu1 %v5285_v53  ;;  %v5289_v10 = vld [vmem:[#allocation3 + $0x98] sm:$0xff]  ;;  %v5303_v18 = vld [vmem:[#allocation3 + $0xf0] sm:$0xff] }
 0x145   :  { %7692 = vst [vmem:[#allocation77_spill] sm:$0xff] %v5269_v19  ;;  %v5275_v34 = vadd.f32 %v601_v44, %v5203_v45  ;;  %v5291_v44 = vld [vmem:[#allocation3 + $0xa8] sm:$0xff]  ;;  %1337 = vmatprep.subr.bf16.mxu0 %v5289_v10  ;;  %v5301_v19 = vld [vmem:[#allocation3 + $0xe0] sm:$0xff] }
 0x146   :  { %7693 = vst [vmem:[#allocation78_spill] sm:$0xff] %v5272_v26  ;;  %1378 = vmatprep.subr.bf16.mxu1 %v5291_v44  ;;  %v5297_v26 = vld [vmem:[#allocation3 + $0xa0] sm:$0xff] }
 0x147   :  { %7694 = vst [vmem:[#allocation79_spill] sm:$0xff] %v5275_v34  ;;  %v5295_v34 = vld [vmem:[#allocation3 + $0x90] sm:$0xff] }
 0x148   :  { %1338 = vmatpush1.bf16.msra.mxu0 %v5295_v34  ;;  %1379 = vmatpush1.bf16.msra.mxu1 %v5297_v26 }
 0x149   :  { %1339 = vmatprep.subr.bf16.mxu0 %v5301_v19  ;;  %1380 = vmatprep.subr.bf16.mxu1 %v5303_v18 }
 0x14c   :  { %1340 = vmatpush1.bf16.msra.mxu0 %v5307_v30  ;;  %1381 = vmatpush1.bf16.msra.mxu1 %v5309_v59 }
 0x14d   :  { %1341 = vmatprep.subr.bf16.mxu0 %v5313_v23  ;;  %1382 = vmatprep.subr.bf16.mxu1 %v5315_v5 }
 0x150   :  { %1342 = vmatpush1.bf16.msra.mxu0 %v5319_v25  ;;  %1383 = vmatpush1.bf16.msra.mxu1 %v5321_v22 }
 0x151   :  { %1343 = vmatprep.subr.bf16.mxu0 %v5325_v17  ;;  %1384 = vmatprep.subr.bf16.mxu1 %v5327_v6 }
 0x154   :  { %1344 = vmatpush1.bf16.msra.mxu0 %v5331_v11  ;;  %1385 = vmatpush1.bf16.msra.mxu1 %v5333_v16 }
 0x155   :  { %1345 = vmatprep.subr.bf16.mxu0 %v5337_v32  ;;  %1386 = vmatprep.subr.bf16.mxu1 %v5339_v8 }
 0x158   :  { %1346 = vmatpush1.bf16.msra.mxu0 %v5343_v28  ;;  %1387 = vmatpush1.bf16.msra.mxu1 %v5345_v49  ;;  %v5469_v49 = vld [vmem:[#allocation3 + $0x448] sm:$0xff] }
 0x159   :  { %1347 = vmatprep.subr.bf16.mxu0 %v5349_v31  ;;  %1388 = vmatprep.subr.bf16.mxu1 %v5351_v3  ;;  %v5461_v3 = vld [vmem:[#allocation3 + $0x450] sm:$0xff]  ;;  %7725 = vst [vmem:[#allocation110_spill] sm:$0xff] %v5469_v49 }
 0x15a   :  { %7723 = vst [vmem:[#allocation108_spill] sm:$0xff] %v5461_v3 }
 0x15c   :  { %1348 = vmatpush1.bf16.msra.mxu0 %v5355_v63  ;;  %1389 = vmatpush1.bf16.msra.mxu1 %v5357_v56  ;;  %v5457_v56 = vld [vmem:[#allocation3 + $0x400] sm:$0xff] }
 0x15d   :  { %1349 = vmatprep.subr.bf16.mxu0 %v5361_v58  ;;  %1390 = vmatprep.subr.bf16.mxu1 %v5363_v24  ;;  %v5449_v24 = vld [vmem:[#allocation3 + $0x408] sm:$0xff]  ;;  %7721 = vst [vmem:[#allocation106_spill] sm:$0xff] %v5457_v56 }
 0x15e   :  { %7719 = vst [vmem:[#allocation104_spill] sm:$0xff] %v5449_v24 }
 0x160   :  { %1350 = vmatpush1.bf16.msra.mxu0 %v5367_v54  ;;  %1391 = vmatpush1.bf16.msra.mxu1 %v5369_v20 }
 0x161   :  { %1351 = vmatprep.subr.bf16.mxu0 %v5381_v15  ;;  %1392 = vmatprep.subr.bf16.mxu1 %v5383_v46  ;;  %v5445_v46 = vld [vmem:[#allocation3 + $0x3b8] sm:$0xff] }
 0x162   :  { %7717 = vst [vmem:[#allocation102_spill] sm:$0xff] %v5445_v46 }
 0x164   :  { %1352 = vmatpush1.bf16.msra.mxu0 %v5391_v1  ;;  %1393 = vmatpush1.bf16.msra.mxu1 %v5393_v4  ;;  %v5437_v4 = vld [vmem:[#allocation3 + $0x3c0] sm:$0xff] }
 0x165   :  { %7715 = vst [vmem:[#allocation100_spill] sm:$0xff] %v5437_v4 }
 0x169   :  { %v934_v48 = vpop.f32.mrb[40].mxu1  ;;  %v975_v50 = vpop.f32.mrb[32].mxu0 }
 0x16a   :  { %v5385_v12 = vadd.f32 %v934_v48, %v347_v9  ;;  %v5387_v20 = vadd.f32 %v975_v50, %v420_v29  ;;  %v936_v37 = vpop.f32.mrb[41].mxu1  ;;  %v977_v40 = vpop.f32.mrb[33].mxu0  ;;  %v5401_v9 = vld [vmem:[#allocation3 + $0x2d8] sm:$0xff]  ;;  %v5403_v29 = vld [vmem:[#allocation3 + $0x2e8] sm:$0xff] }
 0x16b   :  { %v5395_v2 = vadd.f32 %v936_v37, %v349_v33  ;;  %v5397_v7 = vadd.f32 %v977_v40, %v422_v51  ;;  %v938_v41 = vpop.f32.mrb[42].mxu1  ;;  %v979_v43 = vpop.f32.mrb[34].mxu0  ;;  %7706 = vst [vmem:[#allocation91_spill] sm:$0xff] %v5403_v29  ;;  %1353 = vmatprep.subr.bf16.mxu0 %v5401_v9  ;;  %1394 = vmatprep.subr.bf16.mxu1 %v5403_v29  ;;  %v5407_v33 = vld [vmem:[#allocation3 + $0x2d0] sm:$0xff]  ;;  %v5409_v51 = vld [vmem:[#allocation3 + $0x2e0] sm:$0xff] }
 0x16c   :  { %v939_v48 = vpop.f32.mrb[43].mxu1  ;;  %v980_v50 = vpop.f32.mrb[35].mxu0  ;;  %7707 = vst [vmem:[#allocation92_spill] sm:$0xff] %v5409_v51  ;;  %1354 = vmatpush1.bf16.msra.mxu0 %v5407_v33  ;;  %1395 = vmatpush1.bf16.msra.mxu1 %v5409_v51  ;;  %v5413_v37 = vld [vmem:[#allocation3 + $0x320] sm:$0xff]  ;;  %v5415_v40 = vld [vmem:[#allocation3 + $0x330] sm:$0xff]  ;;  %v5419_v41 = vld [vmem:[#allocation3 + $0x318] sm:$0xff] }
 0x16d   :  { %7708 = vst [vmem:[#allocation93_spill] sm:$0xff] %v5415_v40  ;;  %1355 = vmatprep.subr.bf16.mxu0 %v5413_v37  ;;  %1396 = vmatprep.subr.bf16.mxu1 %v5415_v40  ;;  %v5421_v43 = vld [vmem:[#allocation3 + $0x328] sm:$0xff]  ;;  %v5425_v50 = vld [vmem:[#allocation3 + $0x378] sm:$0xff]  ;;  %v5431_v51 = vld [vmem:[#allocation3 + $0x360] sm:$0xff] }
 0x16e   :  { %7709 = vst [vmem:[#allocation94_spill] sm:$0xff] %v5421_v43  ;;  %v5423_v48 = vld [vmem:[#allocation3 + $0x368] sm:$0xff]  ;;  %7711 = vst [vmem:[#allocation96_spill] sm:$0xff] %v5425_v50  ;;  %v5433_v29 = vld [vmem:[#allocation3 + $0x370] sm:$0xff] }
 0x16f   :  { %7710 = vst [vmem:[#allocation95_spill] sm:$0xff] %v5423_v48  ;;  %7712 = vst [vmem:[#allocation97_spill] sm:$0xff] %v5431_v51  ;;  %v5435_v40 = vld [vmem:[#allocation3 + $0x3b0] sm:$0xff] }
 0x170   :  { %1356 = vmatpush1.bf16.msra.mxu0 %v5419_v41  ;;  %1397 = vmatpush1.bf16.msra.mxu1 %v5421_v43  ;;  %7713 = vst [vmem:[#allocation98_spill] sm:$0xff] %v5433_v29  ;;  %7714 = vst [vmem:[#allocation99_spill] sm:$0xff] %v5435_v40  ;;  %v5443_v43 = vld [vmem:[#allocation3 + $0x3a8] sm:$0xff] }
 0x171   :  { %1357 = vmatprep.subr.bf16.mxu0 %v5423_v48  ;;  %1398 = vmatprep.subr.bf16.mxu1 %v5425_v50  ;;  %7716 = vst [vmem:[#allocation101_spill] sm:$0xff] %v5443_v43  ;;  %v5447_v50 = vld [vmem:[#allocation3 + $0x3f8] sm:$0xff] }
 0x172   :  { %7718 = vst [vmem:[#allocation103_spill] sm:$0xff] %v5447_v50 }
 0x174   :  { %1358 = vmatpush1.bf16.msra.mxu0 %v5431_v51  ;;  %1399 = vmatpush1.bf16.msra.mxu1 %v5433_v29  ;;  %v5455_v29 = vld [vmem:[#allocation3 + $0x3f0] sm:$0xff] }
 0x175   :  { %1359 = vmatprep.subr.bf16.mxu0 %v5435_v40  ;;  %1400 = vmatprep.subr.bf16.mxu1 %v5437_v4  ;;  %7720 = vst [vmem:[#allocation105_spill] sm:$0xff] %v5455_v29  ;;  %v5459_v4 = vld [vmem:[#allocation3 + $0x440] sm:$0xff] }
 0x176   :  { %7722 = vst [vmem:[#allocation107_spill] sm:$0xff] %v5459_v4 }
 0x178   :  { %1360 = vmatpush1.bf16.msra.mxu0 %v5443_v43  ;;  %1401 = vmatpush1.bf16.msra.mxu1 %v5445_v46  ;;  %v5467_v46 = vld [vmem:[#allocation3 + $0x438] sm:$0xff] }
 0x179   :  { %1361 = vmatprep.subr.bf16.mxu0 %v5447_v50  ;;  %1402 = vmatprep.subr.bf16.mxu1 %v5449_v24  ;;  %7724 = vst [vmem:[#allocation109_spill] sm:$0xff] %v5467_v46  ;;  %v5473_v24 = vld [vmem:[#allocation3 + $0x28] sm:$0xff]  ;;  %v5475_v50 = vld [vmem:[#allocation3 + $0x38] sm:$0xff] }
 0x17a   :  { %7726 = vst [vmem:[#allocation111_spill] sm:$0xff] %v5473_v24  ;;  %7727 = vst [vmem:[#allocation112_spill] sm:$0xff] %v5475_v50 }
 0x17c   :  { %1362 = vmatpush1.bf16.msra.mxu0 %v5455_v29  ;;  %1403 = vmatpush1.bf16.msra.mxu1 %v5457_v56  ;;  %v493_v56 = vadd.f32 %v5084_v38, %v5080_v36  ;;  %v1128_v36 = vmul.f32 %v5397_v7, %v5397_v7 }
 0x17d   :  { %1363 = vmatprep.subr.bf16.mxu0 %v5459_v4  ;;  %1404 = vmatprep.subr.bf16.mxu1 %v5461_v3  ;;  %v566_v3 = vadd.f32 %v5190_v0, %v5193_v62  ;;  %v495_v4 = vadd.f32 %v5094_v42, %v5087_v39 }
 0x180   :  { %1364 = vmatpush1.bf16.msra.mxu0 %v5467_v46  ;;  %1405 = vmatpush1.bf16.msra.mxu1 %v5469_v49  ;;  %v568_v49 = vadd.f32 %v5195_v35, %v5203_v45 }
 0x181   :  { %1415 = vmatprep.subr.bf16.mxu0 %v5473_v24  ;;  %1456 = vmatprep.subr.bf16.mxu1 %v5475_v50 }
 0x1a9   :  { %v1016_v46 = vpop.f32.mrb[44].mxu1  ;;  %v1057_v29 = vpop.f32.mrb[36].mxu0 }
 0x1aa   :  { %v1108_v43 = vadd.f32 %v1016_v46, %v493_v56  ;;  %v1110_v8 = vadd.f32 %v1057_v29, %v566_v3  ;;  %v1018_v16 = vpop.f32.mrb[45].mxu1  ;;  %v1059_v24 = vpop.f32.mrb[37].mxu0 }
 0x1ab   :  { %v1109_v40 = vadd.f32 %v1018_v16, %v495_v4  ;;  %v1111_v50 = vadd.f32 %v1059_v24, %v568_v49  ;;  %v1020_v51 = vpop.f32.mrb[46].mxu1  ;;  %v1061_v6 = vpop.f32.mrb[38].mxu0  ;;  %v1118_v16 = vsub.f32 0.0, %v5395_v2  ;;  %v1113_v4 = vsub.f32 0.0, %v5385_v12 }
 0x1ac   :  { %v1129_v62 = vmul.f32 %v1108_v43, %v1108_v43  ;;  %v1136_v0 = vmul.f32 %v1110_v8, %v1110_v8  ;;  %v1021_v38 = vpop.f32.mrb[47].mxu1  ;;  %v1062_v39 = vpop.f32.mrb[39].mxu0 }
 0x1ad   :  { %v1135_v42 = vmul.f32 %v1109_v40, %v1109_v40  ;;  %v1119_v29 = vmul.f32 1.442695, %v1118_v16  ;;  %v1114_v51 = vmul.f32 1.442695, %v1113_v4 }
 0x1ae   :  { %v1130_v22 = vadd.f32 %v1129_v62, %v1128_v36 }
 0x1af   :  { %v1137_v45 = vadd.f32 %v1136_v0, %v1135_v42 }
 0x1b0   :  { %v1131_v35 = vmax.f32 %v1130_v22, 1.0 }
 0x1b1   :  { %v1138_v48 = vmax.f32 %v1137_v45, 1.0 }
 0x1b2   :  { %4620 = vrsqrt.f32 %v1131_v35  ;;  %v1123_v35 = vsub.f32 0.0, %v5387_v20 }
 0x1b3   :  { %4622 = vrsqrt.f32 %v1138_v48  ;;  %v639_v48 = vadd.f32 %v5188_v21, %v5200_v57 }
 0x1b4   :  { %4624 = vpow2.f32 %v1119_v29  ;;  %v1124_v16 = vmul.f32 1.442695, %v1123_v35 }
 0x1b5   :  { %4626 = vpow2.f32 %v1114_v51 }
 0x1bc   :  { %v4621_v46 = vpop.eup %4620 }
 0x1bd   :  { %v4623_v56 = vpop.eup %4622  ;;  %v1134_v3 = vmul.f32 %v4621_v46, %v1108_v43  ;;  %v1133_v24 = vmul.f32 %v4621_v46, %v5397_v7  ;;  %v1142_v7 = vmul.f32 %v1111_v50, %v1111_v50 }
 0x1be   :  { %v1140_v49 = vmul.f32 %v4623_v56, %v1109_v40  ;;  %v1141_v6 = vmul.f32 %v4623_v56, %v1110_v8  ;;  %v4625_v2 = vpop.eup %4624 }
 0x1bf   :  { %v4627_v8 = vpop.eup %4626  ;;  %v1121_v42 = vadd.f32 1.0, %v4625_v2 }
 0x1c0   :  { %v1116_v45 = vadd.f32 1.0, %v4627_v8 }
 0x1c9   :  { %v4436_v36 = vpop.f32.mrb[48].mxu1 }
 0x1ca   :  { %v4437_v22 = vpop.f32.mrb[49].mxu1 }
 0x1cb   :  { %v4438_v62 = vadd.f32 %v4437_v22, %v4436_v36  ;;  %v4439_v0 = vpop.f32.mrb[50].mxu1 }
 0x1cc   :  { %v4440_v43 = vpop.f32.mrb[51].mxu1 }
 0x1cd   :  { %v1112_v38 = vadd.f32 %v4438_v62, %v639_v48 }
 0x1cf   :  { %v1143_v39 = vmul.f32 %v1112_v38, %v1112_v38 }
 0x1d1   :  { %v1144_v40 = vadd.f32 %v1143_v39, %v1142_v7 }
 0x1d3   :  { %v1145_v12 = vmax.f32 %v1144_v40, 1.0 }
 0x1d5   :  { %4628 = vrsqrt.f32 %v1145_v12 }
 0x1d6   :  { %4630 = vrcp.f32 %v1121_v42 }
 0x1d7   :  { %4632 = vrcp.f32 %v1116_v45 }
 0x1d8   :  { %4634 = vpow2.f32 %v1124_v16 }
 0x1df   :  { %v4629_v46 = vpop.eup %4628 }
 0x1e0   :  { %v1147_v56 = vmul.f32 %v4629_v46, %v1111_v50  ;;  %v1148_v57 = vmul.f32 %v4629_v46, %v1112_v38  ;;  %v4631_v21 = vpop.eup %4630 }
 0x1e1   :  { %v4633_v51 = vpop.eup %4632 }
 0x1e2   :  { %v1149_v4 = vmul.f32 %v4631_v21, %v1147_v56  ;;  %v1150_v29 = vmul.f32 %v4631_v21, %v1148_v57  ;;  %v1151_v0 = vmul.f32 0.0, %v4633_v51  ;;  %v4635_v12 = vpop.eup %4634  ;;  %v4229_v56 = vld [vmem:[%s7389_s4] sm:$0x3] }
 0x1e3   :  { %v1126_v35 = vadd.f32 1.0, %v4635_v12  ;;  %v5552_v12 = vld [vmem:[#allocation3 + $0xc0] sm:$0xff] }
 0x1e4   :  { %v1152_v36 = vmul.f32 %v1149_v4, %v1133_v24  ;;  %v1153_v22 = vmul.f32 %v1150_v29, %v1134_v3  ;;  %v1157_v48 = vmul.f32 %v1150_v29, %v1133_v24  ;;  %v1158_v62 = vmul.f32 %v1149_v4, %v1134_v3 }
 0x1e5   :  { %v7729_v4 = vsub.s32 1, %v5009_v60 }
 0x1e6   :  { %v1154_v43 = vsub.f32 %v1152_v36, %v1153_v22  ;;  %v1159_v7 = vadd.f32 %v1158_v62, %v1157_v48 }
 0x1e7   :  { %v5512_v29 = vrot.slane %v4229_v56, %v7729_v4  ;;  %v5578_v4 = vld [vmem:[#allocation3 + $0x190] sm:$0xff] }
 0x1e8   :  { %v5495_v39 = vadd.f32 %v1154_v43, %v1151_v0  ;;  %v5497_v2 = vadd.f32 %v1159_v7, %v1151_v0  ;;  %v5520_v7 = vld [vmem:[#allocation3 + $0x20] sm:$0xff]  ;;  %7731 = vst [vmem:[#allocation114_spill] sm:$0xff] %v5578_v4 }
 0x1ea   :  { %v1161_v20 = vmul.f32 %v5495_v39, %v1140_v49  ;;  %v1162_v50 = vmul.f32 %v5497_v2, %v1141_v6  ;;  %v1164_v38 = vmul.f32 %v5497_v2, %v1140_v49  ;;  %v1165_v40 = vmul.f32 %v5495_v39, %v1141_v6 }
 0x1eb   :  { %v7728_v49 = vsub.s32 0, %v5009_v60 }
 0x1ec   :  { %v1163_v8 = vsub.f32 %v1161_v20, %v1162_v50  ;;  %v1166_v42 = vadd.f32 %v1165_v40, %v1164_v38  ;;  %v5522_v20 = vld [vmem:[#allocation3 + $0x30] sm:$0xff]  ;;  %v5532_v38 = vld [vmem:[#allocation3 + $0x80] sm:$0xff]  ;;  %v5535_v40 = vld [vmem:[#allocation3 + $0x68] sm:$0xff] }
 0x1ed   :  { %v5508_v6 = vrot.slane %v4229_v56, %v7728_v49  ;;  %v5528_v50 = vld [vmem:[#allocation3 + $0x70] sm:$0xff]  ;;  %v5564_v56 = vld [vmem:[#allocation3 + $0x108] sm:$0xff] }
 0x1ee   :  { %v1167_v24 = vmul.f32 %v1163_v8, %v1163_v8  ;;  %v1168_v3 = vmul.f32 %v1166_v42, %v1166_v42  ;;  %v5576_v49 = vld [vmem:[#allocation3 + $0x150] sm:$0xff] }
 0x1ef   :  { %7730 = vst [vmem:[#allocation113_spill] sm:$0xff] %v5576_v49 }
 0x1f0   :  { %v1169_v45 = vadd.f32 %v1168_v3, %v1167_v24  ;;  %v5543_v24 = vld [vmem:[#allocation3 + $0xc8] sm:$0xff]  ;;  %v5550_v3 = vld [vmem:[#allocation3 + $0xb0] sm:$0xff] }
 0x1f2   :  { %v1170_v46 = vmax.f32 %v1169_v45, 1.0  ;;  %v5554_v45 = vld [vmem:[#allocation3 + $0x100] sm:$0xff] }
 0x1f4   :  { %4636 = vrsqrt.f32 %v1170_v46  ;;  %v5562_v46 = vld [vmem:[#allocation3 + $0xf8] sm:$0xff] }
 0x1f5   :  { %4638 = vrcp.f32 %v1126_v35  ;;  %v5556_v35 = vld [vmem:[#allocation3 + $0x110] sm:$0xff] }
 0x1fe   :  { %v4637_v57 = vpop.eup %4636 }
 0x1ff   :  { %v1173_v21 = vmul.f32 %v4637_v57, %v1166_v42  ;;  %v1172_v16 = vmul.f32 %v4637_v57, %v1163_v8  ;;  %v4639_v51 = vpop.eup %4638  ;;  %v5537_v8 = vld [vmem:[#allocation3 + $0x78] sm:$0xff]  ;;  %v5566_v57 = vld [vmem:[#allocation3 + $0x148] sm:$0xff] }
 0x200   :  { %v5541_v42 = vld [vmem:[#allocation3 + $0xb8] sm:$0xff] }
 0x201   :  { %v1175_v36 = vmul.f32 %v4639_v51, %v1173_v21  ;;  %v1174_v22 = vmul.f32 %v4639_v51, %v1172_v16  ;;  %v5568_v21 = vld [vmem:[#allocation3 + $0x158] sm:$0xff]  ;;  %v5574_v16 = vld [vmem:[#allocation3 + $0x140] sm:$0xff] }
 0x202   :  { %v5580_v51 = vld [vmem:[#allocation3 + $0x1a0] sm:$0xff] }
 0x203   :  { %v5514_v48 = vpack.c.bf16 %v1175_v36, %v1175_v36  ;;  %v5516_v62 = vpack.c.bf16 %v1174_v22, %v1174_v22  ;;  %v4241_v0 = vmul.f32 %v5508_v6, %v1174_v22  ;;  %v4242_v43 = vmul.f32 %v5512_v29, %v1175_v36  ;;  %7732 = vst [vmem:[#allocation115_spill] sm:$0xff] %v5580_v51  ;;  %v5586_v36 = vld [vmem:[#allocation3 + $0x188] sm:$0xff]  ;;  %v5588_v22 = vld [vmem:[#allocation3 + $0x198] sm:$0xff] }
 0x204   :  { %7733 = vst [vmem:[#allocation116_spill] sm:$0xff] %v5586_v36  ;;  %7734 = vst [vmem:[#allocation117_spill] sm:$0xff] %v5588_v22 }
 0x205   :  { %1365 = vmatprep.mubr.bf16.mxu0 %v5514_v48  ;;  %1406 = vmatprep.mubr.bf16.mxu1 %v5514_v48  ;;  %v4257_v60 = vadd.f32 %v4242_v43, %v4241_v0  ;;  %v5590_v0 = vld [vmem:[#allocation3 + $0x1d8] sm:$0xff]  ;;  %v5592_v43 = vld [vmem:[#allocation3 + $0x1e8] sm:$0xff] }
 0x206   :  { %1366 = vmatmul.mubr.bf16.vlgmr.msra.gmra.mrb[40].mxu0 %v5516_v62  ;;  %1407 = vmatmul.mubr.bf16.vlgmr.msra.gmra.mrb[52].mxu1 %v5516_v62  ;;  %7735 = vst [vmem:[#allocation118_spill] sm:$0xff] %v5590_v0  ;;  %7736 = vst [vmem:[#allocation119_spill] sm:$0xff] %v5592_v43 }
 0x207   :  { %1416 = vmatpush1.bf16.msra.mxu0 %v5520_v7  ;;  %1457 = vmatpush1.bf16.msra.mxu1 %v5522_v20 }
 0x208   :  { %4258 = vadd.xlane.f32.xlu0 %v4257_v60  ;;  %1447 = vmatprep.mubr.bf16.mxu0 %v5514_v48  ;;  %v5598_v60 = vld [vmem:[#allocation3 + $0x1d0] sm:$0xff] }
 0x209   :  { %1488 = vmatprep.mubr.bf16.mxu1 %v5514_v48  ;;  %1417 = vmatprep.subr.bf16.mxu0 %v5528_v50  ;;  %7737 = vst [vmem:[#allocation120_spill] sm:$0xff] %v5598_v60 }
 0x20a   :  { %1458 = vmatprep.subr.bf16.mxu1 %v5532_v38 }
 0x20b   :  { %1418 = vmatpush1.bf16.msra.mxu0 %v5535_v40  ;;  %1459 = vmatpush1.bf16.msra.mxu1 %v5537_v8 }
 0x20c   :  { %1419 = vmatprep.subr.bf16.mxu0 %v5541_v42  ;;  %1460 = vmatprep.subr.bf16.mxu1 %v5543_v24 }
 0x20f   :  { %1420 = vmatpush1.bf16.msra.mxu0 %v5550_v3  ;;  %1461 = vmatpush1.bf16.msra.mxu1 %v5552_v12 }
 0x210   :  { %1421 = vmatprep.subr.bf16.mxu0 %v5554_v45  ;;  %1462 = vmatprep.subr.bf16.mxu1 %v5556_v35 }
 0x213   :  { %1422 = vmatpush1.bf16.msra.mxu0 %v5562_v46  ;;  %1463 = vmatpush1.bf16.msra.mxu1 %v5564_v56 }
 0x214   :  { %1423 = vmatprep.subr.bf16.mxu0 %v5566_v57  ;;  %1464 = vmatprep.subr.bf16.mxu1 %v5568_v21 }
 0x217   :  { %1424 = vmatpush1.bf16.msra.mxu0 %v5574_v16  ;;  %1465 = vmatpush1.bf16.msra.mxu1 %v5576_v49  ;;  %v5604_v49 = vld [vmem:[#allocation3 + $0x230] sm:$0xff] }
 0x218   :  { %1425 = vmatprep.subr.bf16.mxu0 %v5578_v4  ;;  %1466 = vmatprep.subr.bf16.mxu1 %v5580_v51  ;;  %v5600_v4 = vld [vmem:[#allocation3 + $0x1e0] sm:$0xff]  ;;  %7740 = vst [vmem:[#allocation123_spill] sm:$0xff] %v5604_v49 }
 0x219   :  { %7738 = vst [vmem:[#allocation121_spill] sm:$0xff] %v5600_v4  ;;  %v5602_v51 = vld [vmem:[#allocation3 + $0x220] sm:$0xff] }
 0x21a   :  { %7739 = vst [vmem:[#allocation122_spill] sm:$0xff] %v5602_v51 }
 0x21b   :  { %1426 = vmatpush1.bf16.msra.mxu0 %v5586_v36  ;;  %1467 = vmatpush1.bf16.msra.mxu1 %v5588_v22  ;;  %v5610_v22 = vld [vmem:[#allocation3 + $0x218] sm:$0xff] }
 0x21c   :  { %1427 = vmatprep.subr.bf16.mxu0 %v5590_v0  ;;  %1468 = vmatprep.subr.bf16.mxu1 %v5592_v43  ;;  %7741 = vst [vmem:[#allocation124_spill] sm:$0xff] %v5610_v22  ;;  %v5612_v0 = vld [vmem:[#allocation3 + $0x228] sm:$0xff]  ;;  %v5616_v36 = vld [vmem:[#allocation3 + $0x278] sm:$0xff] }
 0x21d   :  { %7742 = vst [vmem:[#allocation125_spill] sm:$0xff] %v5612_v0  ;;  %v5614_v43 = vld [vmem:[#allocation3 + $0x268] sm:$0xff]  ;;  %7744 = vst [vmem:[#allocation127_spill] sm:$0xff] %v5616_v36 }
 0x21e   :  { %7743 = vst [vmem:[#allocation126_spill] sm:$0xff] %v5614_v43 }
 0x21f   :  { %1428 = vmatpush1.bf16.msra.mxu0 %v5598_v60  ;;  %1469 = vmatpush1.bf16.msra.mxu1 %v5600_v4  ;;  %v5622_v4 = vld [vmem:[#allocation3 + $0x260] sm:$0xff] }
 0x220   :  { %1429 = vmatprep.subr.bf16.mxu0 %v5602_v51  ;;  %1470 = vmatprep.subr.bf16.mxu1 %v5604_v49  ;;  %7745 = vst [vmem:[#allocation128_spill] sm:$0xff] %v5622_v4  ;;  %v5624_v51 = vld [vmem:[#allocation3 + $0x270] sm:$0xff]  ;;  %v5628_v60 = vld [vmem:[#allocation3 + $0x2c0] sm:$0xff] }
 0x221   :  { %7746 = vst [vmem:[#allocation129_spill] sm:$0xff] %v5624_v51  ;;  %v5626_v49 = vld [vmem:[#allocation3 + $0x2b0] sm:$0xff]  ;;  %7748 = vst [vmem:[#allocation131_spill] sm:$0xff] %v5628_v60 }
 0x222   :  { %7747 = vst [vmem:[#allocation130_spill] sm:$0xff] %v5626_v49 }
 0x223   :  { %1430 = vmatpush1.bf16.msra.mxu0 %v5610_v22  ;;  %1471 = vmatpush1.bf16.msra.mxu1 %v5612_v0  ;;  %v5634_v0 = vld [vmem:[#allocation3 + $0x2a8] sm:$0xff] }
 0x224   :  { %1431 = vmatprep.subr.bf16.mxu0 %v5614_v43  ;;  %1472 = vmatprep.subr.bf16.mxu1 %v5616_v36  ;;  %7749 = vst [vmem:[#allocation132_spill] sm:$0xff] %v5634_v0  ;;  %v5636_v43 = vld [vmem:[#allocation3 + $0x2b8] sm:$0xff]  ;;  %v5640_v22 = vld [vmem:[#allocation3 + $0x308] sm:$0xff] }
 0x225   :  { %7750 = vst [vmem:[#allocation133_spill] sm:$0xff] %v5636_v43  ;;  %v5638_v36 = vld [vmem:[#allocation3 + $0x2f8] sm:$0xff]  ;;  %7752 = vst [vmem:[#allocation135_spill] sm:$0xff] %v5640_v22 }
 0x226   :  { %7751 = vst [vmem:[#allocation134_spill] sm:$0xff] %v5638_v36 }
 0x227   :  { %1432 = vmatpush1.bf16.msra.mxu0 %v5622_v4  ;;  %1473 = vmatpush1.bf16.msra.mxu1 %v5624_v51  ;;  %v5646_v51 = vld [vmem:[#allocation3 + $0x2f0] sm:$0xff] }
 0x228   :  { %1433 = vmatprep.subr.bf16.mxu0 %v5626_v49  ;;  %1474 = vmatprep.subr.bf16.mxu1 %v5628_v60  ;;  %7753 = vst [vmem:[#allocation136_spill] sm:$0xff] %v5646_v51  ;;  %v5648_v49 = vld [vmem:[#allocation3 + $0x300] sm:$0xff]  ;;  %v5652_v4 = vld [vmem:[#allocation3 + $0x350] sm:$0xff] }
 0x229   :  { %7754 = vst [vmem:[#allocation137_spill] sm:$0xff] %v5648_v49  ;;  %v5650_v60 = vld [vmem:[#allocation3 + $0x340] sm:$0xff]  ;;  %7756 = vst [vmem:[#allocation139_spill] sm:$0xff] %v5652_v4 }
 0x22a   :  { %7755 = vst [vmem:[#allocation138_spill] sm:$0xff] %v5650_v60 }
 0x22b   :  { %1434 = vmatpush1.bf16.msra.mxu0 %v5634_v0  ;;  %1475 = vmatpush1.bf16.msra.mxu1 %v5636_v43  ;;  %v5658_v43 = vld [vmem:[#allocation3 + $0x338] sm:$0xff] }
 0x22c   :  { %1435 = vmatprep.subr.bf16.mxu0 %v5638_v36  ;;  %1476 = vmatprep.subr.bf16.mxu1 %v5640_v22  ;;  %7757 = vst [vmem:[#allocation140_spill] sm:$0xff] %v5658_v43  ;;  %v5660_v36 = vld [vmem:[#allocation3 + $0x348] sm:$0xff]  ;;  %v5664_v0 = vld [vmem:[#allocation3 + $0x398] sm:$0xff] }
 0x22d   :  { %7758 = vst [vmem:[#allocation141_spill] sm:$0xff] %v5660_v36  ;;  %v5662_v22 = vld [vmem:[#allocation3 + $0x388] sm:$0xff]  ;;  %7760 = vst [vmem:[#allocation143_spill] sm:$0xff] %v5664_v0 }
 0x22e   :  { %7759 = vst [vmem:[#allocation142_spill] sm:$0xff] %v5662_v22 }
 0x22f   :  { %1436 = vmatpush1.bf16.msra.mxu0 %v5646_v51  ;;  %1477 = vmatpush1.bf16.msra.mxu1 %v5648_v49  ;;  %v5670_v49 = vld [vmem:[#allocation3 + $0x380] sm:$0xff] }
 0x230   :  { %1437 = vmatprep.subr.bf16.mxu0 %v5650_v60  ;;  %1478 = vmatprep.subr.bf16.mxu1 %v5652_v4  ;;  %7761 = vst [vmem:[#allocation144_spill] sm:$0xff] %v5670_v49  ;;  %v5672_v60 = vld [vmem:[#allocation3 + $0x390] sm:$0xff]  ;;  %v5676_v51 = vld [vmem:[#allocation3 + $0x3e0] sm:$0xff] }
 0x231   :  { %7762 = vst [vmem:[#allocation145_spill] sm:$0xff] %v5672_v60  ;;  %v5674_v4 = vld [vmem:[#allocation3 + $0x3d0] sm:$0xff]  ;;  %7764 = vst [vmem:[#allocation147_spill] sm:$0xff] %v5676_v51 }
 0x232   :  { %7763 = vst [vmem:[#allocation146_spill] sm:$0xff] %v5674_v4 }
 0x233   :  { %1438 = vmatpush1.bf16.msra.mxu0 %v5658_v43  ;;  %1479 = vmatpush1.bf16.msra.mxu1 %v5660_v36  ;;  %v5682_v36 = vld [vmem:[#allocation3 + $0x3c8] sm:$0xff] }
 0x234   :  { %1439 = vmatprep.subr.bf16.mxu0 %v5662_v22  ;;  %1480 = vmatprep.subr.bf16.mxu1 %v5664_v0  ;;  %7765 = vst [vmem:[#allocation148_spill] sm:$0xff] %v5682_v36  ;;  %v5684_v22 = vld [vmem:[#allocation3 + $0x3d8] sm:$0xff]  ;;  %v5688_v43 = vld [vmem:[#allocation3 + $0x428] sm:$0xff] }
 0x235   :  { %7766 = vst [vmem:[#allocation149_spill] sm:$0xff] %v5684_v22  ;;  %v5686_v0 = vld [vmem:[#allocation3 + $0x418] sm:$0xff]  ;;  %7768 = vst [vmem:[#allocation151_spill] sm:$0xff] %v5688_v43 }
 0x236   :  { %7767 = vst [vmem:[#allocation150_spill] sm:$0xff] %v5686_v0 }
 0x237   :  { %1440 = vmatpush1.bf16.msra.mxu0 %v5670_v49  ;;  %1481 = vmatpush1.bf16.msra.mxu1 %v5672_v60  ;;  %v5694_v60 = vld [vmem:[#allocation3 + $0x410] sm:$0xff] }
 0x238   :  { %1441 = vmatprep.subr.bf16.mxu0 %v5674_v4  ;;  %1482 = vmatprep.subr.bf16.mxu1 %v5676_v51  ;;  %v5696_v4 = vld [vmem:[#allocation3 + $0x420] sm:$0xff]  ;;  %v5700_v49 = vld [vmem:[#allocation3 + $0x470] sm:$0xff] }
 0x239   :  { %7769 = vst [vmem:[#allocation152_spill] sm:$0xff] %v5696_v4  ;;  %v5698_v51 = vld [vmem:[#allocation3 + $0x460] sm:$0xff] }
 0x23b   :  { %1442 = vmatpush1.bf16.msra.mxu0 %v5682_v36  ;;  %1483 = vmatpush1.bf16.msra.mxu1 %v5684_v22  ;;  %v5706_v22 = vld [vmem:[#allocation3 + $0x458] sm:$0xff]  ;;  %v5715_v36 = vld [vmem:[#allocation3 + $0x40] sm:$0xff] }
 0x23c   :  { %1443 = vmatprep.subr.bf16.mxu0 %v5686_v0  ;;  %1484 = vmatprep.subr.bf16.mxu1 %v5688_v43  ;;  %7770 = vst [vmem:[#allocation153_spill] sm:$0xff] %v5706_v22  ;;  %v5708_v0 = vld [vmem:[#allocation3 + $0x468] sm:$0xff]  ;;  %v5710_v43 = vld [vmem:[#allocation3 + $0x280] sm:$0xff]  ;;  %7772 = vst [vmem:[#allocation155_spill] sm:$0xff] %v5715_v36 }
 0x23d   :  { %7771 = vst [vmem:[#allocation154_spill] sm:$0xff] %v5710_v43 }
 0x23f   :  { %1444 = vmatpush1.bf16.msra.mxu0 %v5694_v60  ;;  %1485 = vmatpush1.bf16.msra.mxu1 %v5696_v4  ;;  %v5718_v4 = vld [vmem:[#allocation3 + $0x2c8] sm:$0xff] }
 0x240   :  { %1445 = vmatprep.subr.bf16.mxu0 %v5698_v51  ;;  %1486 = vmatprep.subr.bf16.mxu1 %v5700_v49 }
 0x243   :  { %1446 = vmatpush1.bf16.msra.mxu0 %v5706_v22  ;;  %1487 = vmatpush1.bf16.msra.mxu1 %v5708_v0  ;;  %v5725_v22 = vld [vmem:[#allocation3 + $0x88] sm:$0xff] }
 0x244   :  { %4442 = vmatprep.subr.bf16.mxu0 %v5710_v43  ;;  %1766 = vmatprep.subr.bf16.mxu1 %v5253_v47  ;;  %v5728_v43 = vld [vmem:[#allocation3 + $0x310] sm:$0xff] }
 0x245   :  { %v5733_v47 = vld [vmem:[#allocation3 + $0xd0] sm:$0xff] }
 0x246   :  { %1448 = vmatmul.mubr.bf16.vlgmr.msra.gmra.mrb[44].mxu0 %v5516_v62  ;;  %1489 = vmatmul.mubr.bf16.vlgmr.msra.gmra.mrb[56].mxu1 %v5516_v62 }
 0x247   :  { %4443 = vmatpush3.bf16.msra.mxu0 %v5715_v36  ;;  %1529 = vmatprep.mubr.bf16.mxu0 %v5514_v48  ;;  %v5736_v36 = vld [vmem:[#allocation3 + $0x358] sm:$0xff]  ;;  %v5820_v48 = vld [vmem:[#allocation9] ss:$0 sm:$0xff] }
 0x248   :  { %4444 = vmatprep.subr.bf16.mxu0 %v5718_v4  ;;  %1767 = vmatpush1.bf16.msra.mxu1 %v5257_v55  ;;  %v5741_v55 = vld [vmem:[#allocation3 + $0x118] sm:$0xff] }
 0x249   :  { %1768 = vmatprep.subr.bf16.mxu1 %v5277_v14  ;;  %v5744_v14 = vld [vmem:[#allocation3 + $0x3a0] sm:$0xff] }
 0x24b   :  { %4445 = vmatpush3.bf16.msra.mxu0 %v5725_v22 }
 0x24c   :  { %4446 = vmatprep.subr.bf16.mxu0 %v5728_v43  ;;  %1769 = vmatpush1.bf16.msra.mxu1 %v5283_v61  ;;  %v5749_v61 = vld [vmem:[#allocation3 + $0x160] sm:$0xff] }
 0x24d   :  { %1770 = vmatprep.subr.bf16.mxu1 %v5289_v10  ;;  %v5752_v10 = vld [vmem:[#allocation3 + $0x3e8] sm:$0xff] }
 0x24f   :  { %4447 = vmatpush3.bf16.msra.mxu0 %v5733_v47 }
 0x250   :  { %4448 = vmatprep.subr.bf16.mxu0 %v5736_v36  ;;  %1771 = vmatpush1.bf16.msra.mxu1 %v5295_v34  ;;  %v5757_v34 = vld [vmem:[#allocation3 + $0x1a8] sm:$0xff] }
 0x251   :  { %1772 = vmatprep.subr.bf16.mxu1 %v5301_v19  ;;  %v5760_v19 = vld [vmem:[#allocation3 + $0x430] sm:$0xff] }
 0x253   :  { %4449 = vmatpush3.bf16.msra.mxu0 %v5741_v55 }
 0x254   :  { %4450 = vmatprep.subr.bf16.mxu0 %v5744_v14  ;;  %1773 = vmatpush1.bf16.msra.mxu1 %v5307_v30  ;;  %v5765_v30 = vld [vmem:[#allocation3 + $0x1f0] sm:$0xff] }
 0x255   :  { %1774 = vmatprep.subr.bf16.mxu1 %v5313_v23  ;;  %7773 = vst [vmem:[#allocation156_spill] sm:$0xff] %v5765_v30  ;;  %v5768_v23 = vld [vmem:[#allocation3 + $0x478] sm:$0xff] }
 0x256   :  { %7774 = vst [vmem:[#allocation157_spill] sm:$0xff] %v5768_v23 }
 0x257   :  { %4451 = vmatpush3.bf16.msra.mxu0 %v5749_v61 }
 0x258   :  { %4452 = vmatprep.subr.bf16.mxu0 %v5752_v10  ;;  %1775 = vmatpush1.bf16.msra.mxu1 %v5319_v25  ;;  %v5773_v25 = vld [vmem:[#allocation3 + $0x238] sm:$0xff] }
 0x259   :  { %1776 = vmatprep.subr.bf16.mxu1 %v5325_v17  ;;  %7775 = vst [vmem:[#allocation158_spill] sm:$0xff] %v5773_v25  ;;  %v7782_v17 = vld [vmem:[#allocation83_spill] sm:$0xff] }
 0x25b   :  { %4453 = vmatpush3.bf16.msra.mxu0 %v5757_v34 }
 0x25c   :  { %4454 = vmatprep.subr.bf16.mxu0 %v5760_v19  ;;  %1777 = vmatpush1.bf16.msra.mxu1 %v5331_v11  ;;  %v7781_v11 = vld [vmem:[#allocation82_spill] sm:$0xff] }
 0x25d   :  { %1778 = vmatprep.subr.bf16.mxu1 %v5337_v32  ;;  %v7778_v32 = vld [vmem:[#allocation81_spill] sm:$0xff] }
 0x25f   :  { %4455 = vmatpush3.bf16.msra.mxu0 %v5765_v30 }
 0x260   :  { %4456 = vmatprep.subr.bf16.mxu0 %v5768_v23  ;;  %1779 = vmatpush1.bf16.msra.mxu1 %v5343_v28  ;;  %v7777_v28 = vld [vmem:[#allocation80_spill] sm:$0xff] }
 0x261   :  { %1780 = vmatprep.subr.bf16.mxu1 %v5349_v31  ;;  %v7787_v31 = vld [vmem:[#allocation105_spill] sm:$0xff] }
 0x263   :  { %4457 = vmatpush3.bf16.msra.mxu0 %v5773_v25 }
 0x264   :  { %1807 = vmatprep.subr.bf16.mxu0 %v5255_v52  ;;  %1781 = vmatpush1.bf16.msra.mxu1 %v5355_v63  ;;  %v7786_v63 = vld [vmem:[#allocation85_spill] sm:$0xff]  ;;  %v7789_v52 = vld [vmem:[#allocation86_spill] sm:$0xff] }
 0x265   :  { %1782 = vmatprep.subr.bf16.mxu1 %v5361_v58  ;;  %v7780_v58 = vld [vmem:[#allocation99_spill] sm:$0xff] }
 0x266   :  { %1530 = vmatmul.mubr.bf16.vlgmr.msra.gmra.mrb[48].mxu0 %v5516_v62  ;;  %v7800_v62 = vld [vmem:[#allocation94_spill] sm:$0xff] }
 0x267   :  { %1808 = vmatpush1.bf16.msra.mxu0 %v5261_v13  ;;  %v7790_v13 = vld [vmem:[#allocation87_spill] sm:$0xff] }
 0x268   :  { %1809 = vmatprep.subr.bf16.mxu0 %v5279_v27  ;;  %1783 = vmatpush1.bf16.msra.mxu1 %v5367_v54  ;;  %v7779_v54 = vld [vmem:[#allocation97_spill] sm:$0xff] }
 0x269   :  { %1784 = vmatprep.subr.bf16.mxu1 %v5381_v15  ;;  %v7776_v15 = vld [vmem:[#allocation95_spill] sm:$0xff]  ;;  %v7783_v27 = vld [vmem:[#allocation101_spill] sm:$0xff] }
 0x26a   :  { %7799 = vst [vmem:[#allocation95_spill] sm:$0xff] %v5820_v48 }
 0x26b   :  { %1810 = vmatpush1.bf16.msra.mxu0 %v5285_v53  ;;  %v7792_v53 = vld [vmem:[#allocation111_spill] sm:$0xff] }
 0x26c   :  { %1811 = vmatprep.subr.bf16.mxu0 %v5291_v44  ;;  %1785 = vmatpush1.bf16.msra.mxu1 %v5391_v1  ;;  %v7793_v44 = vld [vmem:[#allocation88_spill] sm:$0xff]  ;;  %v7794_v1 = vld [vmem:[#allocation89_spill] sm:$0xff] }
 0x26d   :  { %1786 = vmatprep.subr.bf16.mxu1 %v5401_v9  ;;  %v7795_v9 = vld [vmem:[#allocation90_spill] sm:$0xff] }
 0x26f   :  { %1812 = vmatpush1.bf16.msra.mxu0 %v5297_v26  ;;  %v7788_v26 = vld [vmem:[#allocation107_spill] sm:$0xff] }
 0x270   :  { %1813 = vmatprep.subr.bf16.mxu0 %v5303_v18  ;;  %1787 = vmatpush1.bf16.msra.mxu1 %v5407_v33  ;;  %v7791_v18 = vld [vmem:[#allocation109_spill] sm:$0xff]  ;;  %v7796_v33 = vld [vmem:[#allocation91_spill] sm:$0xff] }
 0x271   :  { %1788 = vmatprep.subr.bf16.mxu1 %v5413_v37  ;;  %v7797_v37 = vld [vmem:[#allocation92_spill] sm:$0xff] }
 0x273   :  { %1814 = vmatpush1.bf16.msra.mxu0 %v5309_v59  ;;  %v7784_v59 = vld [vmem:[#allocation103_spill] sm:$0xff] }
 0x274   :  { %1815 = vmatprep.subr.bf16.mxu0 %v5315_v5  ;;  %1789 = vmatpush1.bf16.msra.mxu1 %v5419_v41  ;;  %v7785_v5 = vld [vmem:[#allocation84_spill] sm:$0xff]  ;;  %v7798_v41 = vld [vmem:[#allocation93_spill] sm:$0xff] }
 0x275   :  { %1790 = vmatprep.subr.bf16.mxu1 %v7776_v15  ;;  %v7801_v15 = vld [vmem:[#allocation96_spill] sm:$0xff] }
 0x277   :  { %1816 = vmatpush1.bf16.msra.mxu0 %v7777_v28 }
 0x278   :  { %1817 = vmatprep.subr.bf16.mxu0 %v7778_v32  ;;  %1791 = vmatpush1.bf16.msra.mxu1 %v7779_v54  ;;  %v7802_v54 = vld [vmem:[#allocation98_spill] sm:$0xff] }
 0x279   :  { %1792 = vmatprep.subr.bf16.mxu1 %v7780_v58 }
 0x27b   :  { %1818 = vmatpush1.bf16.msra.mxu0 %v7781_v11  ;;  %v7803_v11 = vld [vmem:[#allocation100_spill] sm:$0xff] }
 0x27c   :  { %1819 = vmatprep.subr.bf16.mxu0 %v7782_v17  ;;  %1793 = vmatpush1.bf16.msra.mxu1 %v7783_v27  ;;  %v7804_v27 = vld [vmem:[#allocation102_spill] sm:$0xff] }
 0x27d   :  { %1794 = vmatprep.subr.bf16.mxu1 %v7784_v59  ;;  %v7805_v59 = vld [vmem:[#allocation104_spill] sm:$0xff] }
 0x27f   :  { %1820 = vmatpush1.bf16.msra.mxu0 %v7785_v5  ;;  %v7806_v5 = vld [vmem:[#allocation106_spill] sm:$0xff] }
 0x280   :  { %1821 = vmatprep.subr.bf16.mxu0 %v7786_v63  ;;  %1795 = vmatpush1.bf16.msra.mxu1 %v7787_v31  ;;  %v7807_v63 = vld [vmem:[#allocation108_spill] sm:$0xff]  ;;  %v7808_v31 = vld [vmem:[#allocation110_spill] sm:$0xff] }
 0x281   :  { %1796 = vmatprep.subr.bf16.mxu1 %v7788_v26  ;;  %v7809_v26 = vld [vmem:[#allocation112_spill] sm:$0xff] }
 0x283   :  { %1822 = vmatpush1.bf16.msra.mxu0 %v7789_v52 }
 0x284   :  { %1823 = vmatprep.subr.bf16.mxu0 %v7790_v13  ;;  %1797 = vmatpush1.bf16.msra.mxu1 %v7791_v18 }
 0x285   :  { %1848 = vmatprep.subr.bf16.mxu1 %v7792_v53 }
 0x287   :  { %1824 = vmatpush1.bf16.msra.mxu0 %v7793_v44 }
 0x288   :  { %1825 = vmatprep.subr.bf16.mxu0 %v7794_v1  ;;  %v7810_v1 = vld [vmem:[#allocation20_spill] sm:$0xff] }
 0x28b   :  { %1826 = vmatpush1.bf16.msra.mxu0 %v7795_v9 }
 0x28c   :  { %1827 = vmatprep.subr.bf16.mxu0 %v7796_v33  ;;  %v7811_v33 = vld [vmem:[#allocation31_spill] sm:$0xff] }
 0x28f   :  { %1828 = vmatpush1.bf16.msra.mxu0 %v7797_v37 }
 0x290   :  { %1829 = vmatprep.subr.bf16.mxu0 %v7798_v41 }
 0x293   :  { %1830 = vmatpush1.bf16.msra.mxu0 %v7800_v62 }
 0x294   :  { %1831 = vmatprep.subr.bf16.mxu0 %v7801_v15  ;;  %v7812_v15 = vld [vmem:[#allocation22_spill] sm:$0xff] }
 0x295   :  { %v4259_v28 = vpop.xlane.xlu0 %4258 }
 0x296   :  { %v4288_v32 = vadd.f32 %v5820_v48, %v4259_v28 }
 0x297   :  { %1832 = vmatpush1.bf16.msra.mxu0 %v7802_v54 }
 0x298   :  { %v4296_v58 = vsub.f32 0.0, %v4288_v32  ;;  %1833 = vmatprep.subr.bf16.mxu0 %v7803_v11  ;;  %v7813_v32 = vld [vmem:[#allocation33_spill] sm:$0xff] }
 0x29a   :  { %v4304_v17 = vmul.f32 1.442695, %v4296_v58 }
 0x29b   :  { %1834 = vmatpush1.bf16.msra.mxu0 %v7804_v27 }
 0x29c   :  { %4640 = vpow2.f32 %v4304_v17  ;;  %1835 = vmatprep.subr.bf16.mxu0 %v7805_v59 }
 0x29f   :  { %1836 = vmatpush1.bf16.msra.mxu0 %v7806_v5 }
 0x2a0   :  { %1837 = vmatprep.subr.bf16.mxu0 %v7807_v63  ;;  %v7814_v63 = vld [vmem:[#allocation32_spill] sm:$0xff] }
 0x2a3   :  { %1838 = vmatpush1.bf16.msra.mxu0 %v7808_v31 }
 0x2a4   :  { %1889 = vmatprep.subr.bf16.mxu0 %v7809_v26  ;;  %v7815_v26 = vld [vmem:[#allocation60_spill] sm:$0xff] }
 0x2a6   :  { %v4641_v52 = vpop.eup %4640 }
 0x2a7   :  { %v4320_v13 = vadd.f32 1.0, %v4641_v52 }
 0x2a9   :  { %4642 = vrcp.f32 %v4320_v13 }
 0x2b3   :  { %v4643_v18 = vpop.eup %4642 }
 0x2b4   :  { %4337 = vst.msk [vmem:[%s7391_s6] sm:$0xff] %vm4336_vm1, %v4643_v18 }
 0x2d9   :  { %v1367_v53 = vpop.f32.mrb[40].mxu0  ;;  %v1408_v44 = vpop.f32.mrb[52].mxu1 }
 0x2da   :  { %v1537_v9 = vadd.f32 %v1367_v53, %v7810_v1  ;;  %v5839_v37 = vadd.f32 %v1408_v44, %v7811_v33  ;;  %v1369_v41 = vpop.f32.mrb[41].mxu0  ;;  %v1410_v62 = vpop.f32.mrb[53].mxu1  ;;  %v7816_v53 = vld [vmem:[#allocation34_spill] sm:$0xff] }
 0x2db   :  { %v1538_v28 = vadd.f32 %v1369_v41, %v7812_v15  ;;  %v1540_v54 = vadd.f32 %v1410_v62, %v7813_v32  ;;  %v1371_v58 = vpop.f32.mrb[42].mxu0  ;;  %v1412_v11 = vpop.f32.mrb[54].mxu1  ;;  %v7817_v1 = vld [vmem:[#allocation62_spill] sm:$0xff] }
 0x2dc   :  { %v1372_v17 = vpop.f32.mrb[43].mxu0  ;;  %v1413_v27 = vpop.f32.mrb[55].mxu1 }
 0x2dd   :  { %v1561_v15 = vmul.f32 %v1540_v54, %v1540_v54 }
 0x319   :  { %v1449_v59 = vpop.f32.mrb[44].mxu0  ;;  %v1490_v5 = vpop.f32.mrb[56].mxu1 }
 0x31a   :  { %v1541_v31 = vadd.f32 %v1449_v59, %v7814_v63  ;;  %v1543_v52 = vadd.f32 %v1490_v5, %v7815_v26  ;;  %v1451_v13 = vpop.f32.mrb[45].mxu0  ;;  %v1492_v18 = vpop.f32.mrb[57].mxu1 }
 0x31b   :  { %v1542_v44 = vadd.f32 %v1451_v13, %v7816_v53  ;;  %v1544_v33 = vadd.f32 %v1492_v18, %v7817_v1  ;;  %v1453_v48 = vpop.f32.mrb[46].mxu0  ;;  %v1494_v41 = vpop.f32.mrb[58].mxu1  ;;  %v1551_v53 = vsub.f32 0.0, %v1538_v28  ;;  %v1546_v1 = vsub.f32 0.0, %v1537_v9 }
 0x31c   :  { %v1562_v62 = vmul.f32 %v1541_v31, %v1541_v31  ;;  %v1569_v32 = vmul.f32 %v1543_v52, %v1543_v52  ;;  %v1454_v58 = vpop.f32.mrb[47].mxu0  ;;  %v1495_v11 = vpop.f32.mrb[59].mxu1 }
 0x31d   :  { %v1568_v17 = vmul.f32 %v1542_v44, %v1542_v44  ;;  %v1552_v41 = vmul.f32 1.442695, %v1551_v53  ;;  %v1547_v30 = vmul.f32 1.442695, %v1546_v1 }
 0x31e   :  { %v1563_v27 = vadd.f32 %v1562_v62, %v1561_v15 }
 0x31f   :  { %v1570_v25 = vadd.f32 %v1569_v32, %v1568_v17  ;;  %v1575_v17 = vmul.f32 %v1544_v33, %v1544_v33 }
 0x320   :  { %v1564_v23 = vmax.f32 %v1563_v27, 1.0 }
 0x321   :  { %v1571_v59 = vmax.f32 %v1570_v25, 1.0  ;;  %v7818_v25 = vld [vmem:[#allocation63_spill] sm:$0xff] }
 0x322   :  { %4644 = vrsqrt.f32 %v1564_v23 }
 0x323   :  { %4646 = vrsqrt.f32 %v1571_v59 }
 0x324   :  { %4648 = vpow2.f32 %v1552_v41 }
 0x325   :  { %4650 = vpow2.f32 %v1547_v30  ;;  %v1556_v30 = vsub.f32 0.0, %v5839_v37 }
 0x327   :  { %v1557_v1 = vmul.f32 1.442695, %v1556_v30 }
 0x32c   :  { %v4645_v5 = vpop.eup %4644 }
 0x32d   :  { %v4647_v63 = vpop.eup %4646  ;;  %v1567_v26 = vmul.f32 %v4645_v5, %v1541_v31  ;;  %v1566_v13 = vmul.f32 %v4645_v5, %v1540_v54 }
 0x32e   :  { %v1573_v18 = vmul.f32 %v4647_v63, %v1542_v44  ;;  %v1574_v48 = vmul.f32 %v4647_v63, %v1543_v52  ;;  %v4649_v59 = vpop.eup %4648 }
 0x32f   :  { %v4651_v54 = vpop.eup %4650  ;;  %v1554_v28 = vadd.f32 1.0, %v4649_v59 }
 0x330   :  { %v1549_v52 = vadd.f32 1.0, %v4651_v54 }
 0x339   :  { %v4458_v58 = vpop.f32.mrb[48].mxu0 }
 0x33a   :  { %v4459_v11 = vpop.f32.mrb[49].mxu0 }
 0x33b   :  { %v4460_v15 = vadd.f32 %v4459_v11, %v4458_v58  ;;  %v4461_v62 = vpop.f32.mrb[50].mxu0 }
 0x33c   :  { %v4462_v32 = vpop.f32.mrb[51].mxu0 }
 0x33d   :  { %v1545_v23 = vadd.f32 %v4460_v15, %v7818_v25 }
 0x33f   :  { %v1576_v27 = vmul.f32 %v1545_v23, %v1545_v23 }
 0x341   :  { %v1577_v31 = vadd.f32 %v1576_v27, %v1575_v17 }
 0x343   :  { %v1578_v44 = vmax.f32 %v1577_v31, 1.0 }
 0x345   :  { %4652 = vrsqrt.f32 %v1578_v44 }
 0x346   :  { %4654 = vrcp.f32 %v1554_v28 }
 0x347   :  { %4656 = vrcp.f32 %v1549_v52 }
 0x348   :  { %4658 = vpow2.f32 %v1557_v1 }
 0x34f   :  { %v4653_v9 = vpop.eup %4652 }
 0x350   :  { %v1580_v5 = vmul.f32 %v4653_v9, %v1544_v33  ;;  %v1581_v63 = vmul.f32 %v4653_v9, %v1545_v23  ;;  %v4655_v53 = vpop.eup %4654 }
 0x351   :  { %v4657_v11 = vpop.eup %4656 }
 0x352   :  { %v1582_v41 = vmul.f32 %v4655_v53, %v1580_v5  ;;  %v1583_v58 = vmul.f32 %v4655_v53, %v1581_v63  ;;  %v1584_v17 = vmul.f32 %v4657_v11, %v5495_v39  ;;  %v1589_v59 = vmul.f32 %v4657_v11, %v5497_v2  ;;  %v4659_v30 = vpop.eup %4658 }
 0x353   :  { %v1559_v2 = vadd.f32 1.0, %v4659_v30  ;;  %v7849_v30 = vld [vmem:[#allocation143_spill] sm:$0xff] }
 0x354   :  { %v1585_v15 = vmul.f32 %v1582_v41, %v1566_v13  ;;  %v1586_v62 = vmul.f32 %v1583_v58, %v1567_v26  ;;  %v1590_v32 = vmul.f32 %v1583_v58, %v1566_v13  ;;  %v1591_v25 = vmul.f32 %v1582_v41, %v1567_v26 }
 0x356   :  { %v1587_v27 = vsub.f32 %v1585_v15, %v1586_v62  ;;  %v1592_v31 = vadd.f32 %v1591_v25, %v1590_v32  ;;  %v7836_v25 = vld [vmem:[#allocation130_spill] sm:$0xff] }
 0x358   :  { %v5851_v37 = vadd.f32 %v1587_v27, %v1584_v17  ;;  %v5853_v33 = vadd.f32 %v1592_v31, %v1589_v59  ;;  %v7837_v17 = vld [vmem:[#allocation131_spill] sm:$0xff]  ;;  %v7838_v27 = vld [vmem:[#allocation132_spill] sm:$0xff]  ;;  %v7839_v59 = vld [vmem:[#allocation133_spill] sm:$0xff] }
 0x359   :  { %v7840_v31 = vld [vmem:[#allocation134_spill] sm:$0xff] }
 0x35a   :  { %v1594_v23 = vmul.f32 %v5851_v37, %v1573_v18  ;;  %v1595_v54 = vmul.f32 %v5853_v33, %v1574_v48  ;;  %v1597_v28 = vmul.f32 %v5853_v33, %v1573_v18  ;;  %v1598_v13 = vmul.f32 %v5851_v37, %v1574_v48 }
 0x35c   :  { %v1596_v26 = vsub.f32 %v1594_v23, %v1595_v54  ;;  %v1599_v44 = vadd.f32 %v1598_v13, %v1597_v28  ;;  %v7841_v23 = vld [vmem:[#allocation135_spill] sm:$0xff]  ;;  %v7842_v54 = vld [vmem:[#allocation136_spill] sm:$0xff]  ;;  %v7843_v28 = vld [vmem:[#allocation137_spill] sm:$0xff] }
 0x35d   :  { %v7844_v13 = vld [vmem:[#allocation138_spill] sm:$0xff] }
 0x35e   :  { %v1600_v52 = vmul.f32 %v1596_v26, %v1596_v26  ;;  %v1601_v39 = vmul.f32 %v1599_v44, %v1599_v44 }
 0x360   :  { %v1602_v9 = vadd.f32 %v1601_v39, %v1600_v52  ;;  %v7847_v52 = vld [vmem:[#allocation141_spill] sm:$0xff]  ;;  %v7848_v39 = vld [vmem:[#allocation142_spill] sm:$0xff] }
 0x362   :  { %v1603_v5 = vmax.f32 %v1602_v9, 1.0  ;;  %v7850_v9 = vld [vmem:[#allocation144_spill] sm:$0xff] }
 0x364   :  { %4660 = vrsqrt.f32 %v1603_v5  ;;  %v7852_v5 = vld [vmem:[#allocation146_spill] sm:$0xff] }
 0x365   :  { %4662 = vrcp.f32 %v1559_v2  ;;  %v7851_v2 = vld [vmem:[#allocation145_spill] sm:$0xff] }
 0x36e   :  { %v4661_v63 = vpop.eup %4660 }
 0x36f   :  { %v1606_v53 = vmul.f32 %v4661_v63, %v1599_v44  ;;  %v1605_v1 = vmul.f32 %v4661_v63, %v1596_v26  ;;  %v4663_v41 = vpop.eup %4662  ;;  %v7845_v26 = vld [vmem:[#allocation139_spill] sm:$0xff]  ;;  %v7846_v44 = vld [vmem:[#allocation140_spill] sm:$0xff] }
 0x370   :  { %v7853_v63 = vld [vmem:[#allocation147_spill] sm:$0xff] }
 0x371   :  { %v1608_v58 = vmul.f32 %v4663_v41, %v1606_v53  ;;  %v1607_v11 = vmul.f32 %v4663_v41, %v1605_v1  ;;  %v7854_v53 = vld [vmem:[#allocation148_spill] sm:$0xff]  ;;  %v7855_v1 = vld [vmem:[#allocation149_spill] sm:$0xff]  ;;  %v7856_v41 = vld [vmem:[#allocation150_spill] sm:$0xff] }
 0x373   :  { %v5859_v15 = vpack.c.bf16 %v1608_v58, %v1608_v58  ;;  %v5861_v18 = vpack.c.bf16 %v1607_v11, %v1607_v11  ;;  %v4243_v48 = vmul.f32 %v5508_v6, %v1607_v11  ;;  %v4244_v62 = vmul.f32 %v5512_v29, %v1608_v58  ;;  %v7857_v58 = vld [vmem:[#allocation151_spill] sm:$0xff]  ;;  %v7858_v11 = vld [vmem:[#allocation152_spill] sm:$0xff] }
 0x375   :  { %1798 = vmatprep.mubr.bf16.mxu1 %v5859_v15  ;;  %1839 = vmatprep.mubr.bf16.mxu0 %v5859_v15  ;;  %v4260_v32 = vadd.f32 %v4244_v62, %v4243_v48  ;;  %v7859_v48 = vld [vmem:[#allocation153_spill] sm:$0xff]  ;;  %v7860_v62 = vld [vmem:[#allocation154_spill] sm:$0xff] }
 0x376   :  { %1799 = vmatmul.mubr.bf16.vlgmr.msra.gmra.mrb[60].mxu1 %v5861_v18  ;;  %1840 = vmatmul.mubr.bf16.vlgmr.msra.gmra.mrb[52].mxu0 %v5861_v18 }
 0x377   :  { %1849 = vmatpush1.bf16.msra.mxu1 %v5520_v7  ;;  %1890 = vmatpush1.bf16.msra.mxu0 %v5522_v20  ;;  %v7819_v7 = vld [vmem:[#allocation113_spill] sm:$0xff]  ;;  %v7820_v20 = vld [vmem:[#allocation114_spill] sm:$0xff] }
 0x378   :  { %4261 = vadd.xlane.f32.xlu0 %v4260_v32  ;;  %1880 = vmatprep.mubr.bf16.mxu1 %v5859_v15  ;;  %v7861_v32 = vld [vmem:[#allocation155_spill] sm:$0xff] }
 0x379   :  { %1921 = vmatprep.mubr.bf16.mxu0 %v5859_v15  ;;  %1850 = vmatprep.subr.bf16.mxu1 %v5528_v50  ;;  %v7821_v50 = vld [vmem:[#allocation115_spill] sm:$0xff] }
 0x37a   :  { %1891 = vmatprep.subr.bf16.mxu0 %v5532_v38  ;;  %v7822_v38 = vld [vmem:[#allocation116_spill] sm:$0xff] }
 0x37b   :  { %1851 = vmatpush1.bf16.msra.mxu1 %v5535_v40  ;;  %1892 = vmatpush1.bf16.msra.mxu0 %v5537_v8  ;;  %v7823_v40 = vld [vmem:[#allocation117_spill] sm:$0xff]  ;;  %v7824_v8 = vld [vmem:[#allocation118_spill] sm:$0xff] }
 0x37c   :  { %1852 = vmatprep.subr.bf16.mxu1 %v5541_v42  ;;  %1893 = vmatprep.subr.bf16.mxu0 %v5543_v24  ;;  %v7825_v42 = vld [vmem:[#allocation119_spill] sm:$0xff]  ;;  %v7826_v24 = vld [vmem:[#allocation120_spill] sm:$0xff] }
 0x37f   :  { %1853 = vmatpush1.bf16.msra.mxu1 %v5550_v3  ;;  %1894 = vmatpush1.bf16.msra.mxu0 %v5552_v12  ;;  %v7827_v3 = vld [vmem:[#allocation121_spill] sm:$0xff]  ;;  %v7828_v12 = vld [vmem:[#allocation122_spill] sm:$0xff] }
 0x380   :  { %1854 = vmatprep.subr.bf16.mxu1 %v5554_v45  ;;  %1895 = vmatprep.subr.bf16.mxu0 %v5556_v35  ;;  %v7829_v45 = vld [vmem:[#allocation123_spill] sm:$0xff]  ;;  %v7830_v35 = vld [vmem:[#allocation124_spill] sm:$0xff] }
 0x383   :  { %1855 = vmatpush1.bf16.msra.mxu1 %v5562_v46  ;;  %1896 = vmatpush1.bf16.msra.mxu0 %v5564_v56  ;;  %v7831_v46 = vld [vmem:[#allocation125_spill] sm:$0xff]  ;;  %v7832_v56 = vld [vmem:[#allocation126_spill] sm:$0xff] }
 0x384   :  { %1856 = vmatprep.subr.bf16.mxu1 %v5566_v57  ;;  %1897 = vmatprep.subr.bf16.mxu0 %v5568_v21  ;;  %v7833_v57 = vld [vmem:[#allocation127_spill] sm:$0xff]  ;;  %v7834_v21 = vld [vmem:[#allocation128_spill] sm:$0xff] }
 0x387   :  { %1857 = vmatpush1.bf16.msra.mxu1 %v5574_v16  ;;  %1898 = vmatpush1.bf16.msra.mxu0 %v7819_v7  ;;  %v7835_v16 = vld [vmem:[#allocation129_spill] sm:$0xff] }
 0x388   :  { %1858 = vmatprep.subr.bf16.mxu1 %v7820_v20  ;;  %1899 = vmatprep.subr.bf16.mxu0 %v7821_v50  ;;  %v5976_v7 = vld [vmem:[#allocation3 + $0x48] sm:$0xff]  ;;  %v5978_v20 = vld [vmem:[#allocation3 + $0x58] sm:$0xff] }
 0x389   :  { %v5982_v50 = vld [vmem:[#allocation3 + $0x98] sm:$0xff] }
 0x38b   :  { %1859 = vmatpush1.bf16.msra.mxu1 %v7822_v38  ;;  %1900 = vmatpush1.bf16.msra.mxu0 %v7823_v40  ;;  %v5984_v38 = vld [vmem:[#allocation3 + $0xa8] sm:$0xff]  ;;  %v5988_v40 = vld [vmem:[#allocation3 + $0x90] sm:$0xff] }
 0x38c   :  { %1860 = vmatprep.subr.bf16.mxu1 %v7824_v8  ;;  %1901 = vmatprep.subr.bf16.mxu0 %v7825_v42  ;;  %v5990_v8 = vld [vmem:[#allocation3 + $0xa0] sm:$0xff] }
 0x38d   :  { %v5994_v42 = vld [vmem:[#allocation3 + $0xe0] sm:$0xff] }
 0x38f   :  { %1861 = vmatpush1.bf16.msra.mxu1 %v7826_v24  ;;  %1902 = vmatpush1.bf16.msra.mxu0 %v7827_v3  ;;  %v5996_v24 = vld [vmem:[#allocation3 + $0xf0] sm:$0xff]  ;;  %v6000_v3 = vld [vmem:[#allocation3 + $0xd8] sm:$0xff] }
 0x390   :  { %1862 = vmatprep.subr.bf16.mxu1 %v7828_v12  ;;  %1903 = vmatprep.subr.bf16.mxu0 %v7829_v45  ;;  %v6002_v12 = vld [vmem:[#allocation3 + $0xe8] sm:$0xff] }
 0x391   :  { %v6006_v45 = vld [vmem:[#allocation3 + $0x128] sm:$0xff] }
 0x393   :  { %1863 = vmatpush1.bf16.msra.mxu1 %v7830_v35  ;;  %1904 = vmatpush1.bf16.msra.mxu0 %v7831_v46  ;;  %v6008_v35 = vld [vmem:[#allocation3 + $0x138] sm:$0xff]  ;;  %v6012_v46 = vld [vmem:[#allocation3 + $0x120] sm:$0xff] }
 0x394   :  { %1864 = vmatprep.subr.bf16.mxu1 %v7832_v56  ;;  %1905 = vmatprep.subr.bf16.mxu0 %v7833_v57  ;;  %v6014_v56 = vld [vmem:[#allocation3 + $0x130] sm:$0xff] }
 0x395   :  { %7866 = vst [vmem:[#allocation80_spill] sm:$0xff] %v6014_v56  ;;  %v6018_v57 = vld [vmem:[#allocation3 + $0x170] sm:$0xff] }
 0x397   :  { %1865 = vmatpush1.bf16.msra.mxu1 %v7834_v21  ;;  %1906 = vmatpush1.bf16.msra.mxu0 %v7835_v16  ;;  %v6020_v21 = vld [vmem:[#allocation3 + $0x180] sm:$0xff]  ;;  %v6024_v16 = vld [vmem:[#allocation3 + $0x168] sm:$0xff] }
 0x398   :  { %1866 = vmatprep.subr.bf16.mxu1 %v7836_v25  ;;  %1907 = vmatprep.subr.bf16.mxu0 %v7837_v17  ;;  %7867 = vst [vmem:[#allocation81_spill] sm:$0xff] %v6020_v21  ;;  %v6026_v25 = vld [vmem:[#allocation3 + $0x178] sm:$0xff] }
 0x399   :  { %7868 = vst [vmem:[#allocation97_spill] sm:$0xff] %v6026_v25  ;;  %v6030_v17 = vld [vmem:[#allocation3 + $0x1b8] sm:$0xff] }
 0x39b   :  { %1867 = vmatpush1.bf16.msra.mxu1 %v7838_v27  ;;  %1908 = vmatpush1.bf16.msra.mxu0 %v7839_v59  ;;  %v6032_v27 = vld [vmem:[#allocation3 + $0x1c8] sm:$0xff]  ;;  %v6036_v59 = vld [vmem:[#allocation3 + $0x1b0] sm:$0xff] }
 0x39c   :  { %1868 = vmatprep.subr.bf16.mxu1 %v7840_v31  ;;  %1909 = vmatprep.subr.bf16.mxu0 %v7841_v23  ;;  %7869 = vst [vmem:[#allocation99_spill] sm:$0xff] %v6032_v27  ;;  %v6038_v31 = vld [vmem:[#allocation3 + $0x1c0] sm:$0xff] }
 0x39d   :  { %7870 = vst [vmem:[#allocation82_spill] sm:$0xff] %v6038_v31  ;;  %v6042_v23 = vld [vmem:[#allocation3 + $0x200] sm:$0xff] }
 0x39f   :  { %1869 = vmatpush1.bf16.msra.mxu1 %v7842_v54  ;;  %1910 = vmatpush1.bf16.msra.mxu0 %v7843_v28  ;;  %v6044_v54 = vld [vmem:[#allocation3 + $0x210] sm:$0xff]  ;;  %v6048_v28 = vld [vmem:[#allocation3 + $0x1f8] sm:$0xff] }
 0x3a0   :  { %1870 = vmatprep.subr.bf16.mxu1 %v7844_v13  ;;  %1911 = vmatprep.subr.bf16.mxu0 %v7845_v26  ;;  %7871 = vst [vmem:[#allocation83_spill] sm:$0xff] %v6044_v54  ;;  %v6050_v13 = vld [vmem:[#allocation3 + $0x208] sm:$0xff] }
 0x3a1   :  { %7872 = vst [vmem:[#allocation101_spill] sm:$0xff] %v6050_v13  ;;  %v6054_v26 = vld [vmem:[#allocation3 + $0x248] sm:$0xff] }
 0x3a3   :  { %1871 = vmatpush1.bf16.msra.mxu1 %v7846_v44  ;;  %1912 = vmatpush1.bf16.msra.mxu0 %v7847_v52  ;;  %v6056_v44 = vld [vmem:[#allocation3 + $0x258] sm:$0xff]  ;;  %v6060_v52 = vld [vmem:[#allocation3 + $0x240] sm:$0xff] }
 0x3a4   :  { %1872 = vmatprep.subr.bf16.mxu1 %v7848_v39  ;;  %1913 = vmatprep.subr.bf16.mxu0 %v7849_v30  ;;  %7873 = vst [vmem:[#allocation103_spill] sm:$0xff] %v6056_v44  ;;  %v6062_v39 = vld [vmem:[#allocation3 + $0x250] sm:$0xff] }
 0x3a5   :  { %7874 = vst [vmem:[#allocation84_spill] sm:$0xff] %v6062_v39 }
 0x3a7   :  { %1873 = vmatpush1.bf16.msra.mxu1 %v7850_v9  ;;  %1914 = vmatpush1.bf16.msra.mxu0 %v7851_v2  ;;  %v6066_v2 = vld [vmem:[#allocation3 + $0x290] sm:$0xff] }
 0x3a8   :  { %1874 = vmatprep.subr.bf16.mxu1 %v7852_v5  ;;  %1915 = vmatprep.subr.bf16.mxu0 %v7853_v63  ;;  %v6068_v5 = vld [vmem:[#allocation3 + $0x2a0] sm:$0xff] }
 0x3a9   :  { %7875 = vst [vmem:[#allocation85_spill] sm:$0xff] %v6068_v5  ;;  %v7876_v63 = vld [vmem:[#allocation24_spill] sm:$0xff] }
 0x3ab   :  { %1875 = vmatpush1.bf16.msra.mxu1 %v7854_v53  ;;  %1916 = vmatpush1.bf16.msra.mxu0 %v7855_v1  ;;  %v7877_v1 = vld [vmem:[#allocation35_spill] sm:$0xff] }
 0x3ac   :  { %1876 = vmatprep.subr.bf16.mxu1 %v7856_v41  ;;  %1917 = vmatprep.subr.bf16.mxu0 %v7857_v58 }
 0x3af   :  { %1877 = vmatpush1.bf16.msra.mxu1 %v5694_v60  ;;  %1918 = vmatpush1.bf16.msra.mxu0 %v7858_v11 }
 0x3b0   :  { %1878 = vmatprep.subr.bf16.mxu1 %v5698_v51  ;;  %1919 = vmatprep.subr.bf16.mxu0 %v5700_v49  ;;  %v7862_v49 = vld [vmem:[#allocation156_spill] sm:$0xff]  ;;  %v7864_v51 = vld [vmem:[#allocation158_spill] sm:$0xff] }
 0x3b3   :  { %1879 = vmatpush1.bf16.msra.mxu1 %v7859_v48  ;;  %1920 = vmatpush1.bf16.msra.mxu0 %v5708_v0  ;;  %v6078_v48 = vld [vmem:[#allocation3 + $0x288] sm:$0xff] }
 0x3b4   :  { %4464 = vmatprep.subr.bf16.mxu1 %v7860_v62  ;;  %v6080_v62 = vld [vmem:[#allocation3 + $0x298] sm:$0xff] }
 0x3b5   :  { %7878 = vst [vmem:[#allocation105_spill] sm:$0xff] %v6080_v62 }
 0x3b6   :  { %1881 = vmatmul.mubr.bf16.vlgmr.msra.gmra.mrb[64].mxu1 %v5861_v18  ;;  %1922 = vmatmul.mubr.bf16.vlgmr.msra.gmra.mrb[56].mxu0 %v5861_v18 }
 0x3b7   :  { %4465 = vmatpush3.bf16.msra.mxu1 %v7861_v32  ;;  %1962 = vmatprep.mubr.bf16.mxu1 %v5859_v15  ;;  %v5970_v15 = vld [vmem:[#allocation3 + $0x50] sm:$0xff] }
 0x3b8   :  { %4466 = vmatprep.subr.bf16.mxu1 %v5718_v4  ;;  %v7863_v4 = vld [vmem:[#allocation157_spill] sm:$0xff]  ;;  %v7879_v32 = vld [vmem:[#allocation26_spill] sm:$0xff] }
 0x3bb   :  { %4467 = vmatpush3.bf16.msra.mxu1 %v5725_v22  ;;  %v7865_v22 = vld [vmem:[#allocation95_spill] sm:$0xff] }
 0x3bc   :  { %4468 = vmatprep.subr.bf16.mxu1 %v5728_v43 }
 0x3bf   :  { %4469 = vmatpush3.bf16.msra.mxu1 %v5733_v47 }
 0x3c0   :  { %4470 = vmatprep.subr.bf16.mxu1 %v5736_v36 }
 0x3c3   :  { %4471 = vmatpush3.bf16.msra.mxu1 %v5741_v55 }
 0x3c4   :  { %4472 = vmatprep.subr.bf16.mxu1 %v5744_v14  ;;  %v5954_v14 = vld [vmem:[#allocation3 + $0x8] sm:$0xff] }
 0x3c5   :  { %2199 = vmatprep.subr.bf16.mxu0 %v5954_v14 }
 0x3c7   :  { %4473 = vmatpush3.bf16.msra.mxu1 %v5749_v61  ;;  %v5956_v61 = vld [vmem:[#allocation3 + $0x18] sm:$0xff] }
 0x3c8   :  { %4474 = vmatprep.subr.bf16.mxu1 %v5752_v10  ;;  %v5958_v10 = vld [vmem:[#allocation3] sm:$0xff] }
 0x3c9   :  { %2200 = vmatpush1.bf16.msra.mxu0 %v5958_v10 }
 0x3ca   :  { %2201 = vmatprep.subr.bf16.mxu0 %v5970_v15 }
 0x3cb   :  { %4475 = vmatpush3.bf16.msra.mxu1 %v5757_v34  ;;  %v5962_v34 = vld [vmem:[#allocation3 + $0x10] sm:$0xff] }
 0x3cc   :  { %4476 = vmatprep.subr.bf16.mxu1 %v5760_v19 }
 0x3cd   :  { %2202 = vmatpush1.bf16.msra.mxu0 %v5976_v7 }
 0x3ce   :  { %2203 = vmatprep.subr.bf16.mxu0 %v5982_v50 }
 0x3cf   :  { %4477 = vmatpush3.bf16.msra.mxu1 %v7862_v49 }
 0x3d0   :  { %4478 = vmatprep.subr.bf16.mxu1 %v7863_v4  ;;  %v7880_v4 = vld [vmem:[#allocation37_spill] sm:$0xff] }
 0x3d1   :  { %2204 = vmatpush1.bf16.msra.mxu0 %v5988_v40 }
 0x3d2   :  { %2205 = vmatprep.subr.bf16.mxu0 %v5994_v42 }
 0x3d3   :  { %4479 = vmatpush3.bf16.msra.mxu1 %v7864_v51 }
 0x3d4   :  { %2240 = vmatprep.subr.bf16.mxu1 %v5956_v61 }
 0x3d5   :  { %2206 = vmatpush1.bf16.msra.mxu0 %v6000_v3 }
 0x3d6   :  { %1963 = vmatmul.mubr.bf16.vlgmr.msra.gmra.mrb[68].mxu1 %v5861_v18  ;;  %v5972_v18 = vld [vmem:[#allocation3 + $0x60] sm:$0xff]  ;;  %2207 = vmatprep.subr.bf16.mxu0 %v6006_v45 }
 0x3d7   :  { %2241 = vmatpush1.bf16.msra.mxu1 %v5962_v34 }
 0x3d8   :  { %2242 = vmatprep.subr.bf16.mxu1 %v5972_v18 }
 0x3d9   :  { %2208 = vmatpush1.bf16.msra.mxu0 %v6012_v46 }
 0x3da   :  { %2209 = vmatprep.subr.bf16.mxu0 %v6018_v57 }
 0x3db   :  { %2243 = vmatpush1.bf16.msra.mxu1 %v5978_v20 }
 0x3dc   :  { %2244 = vmatprep.subr.bf16.mxu1 %v5984_v38 }
 0x3dd   :  { %2210 = vmatpush1.bf16.msra.mxu0 %v6024_v16 }
 0x3de   :  { %2211 = vmatprep.subr.bf16.mxu0 %v6030_v17 }
 0x3df   :  { %2245 = vmatpush1.bf16.msra.mxu1 %v5990_v8 }
 0x3e0   :  { %2246 = vmatprep.subr.bf16.mxu1 %v5996_v24 }
 0x3e1   :  { %2212 = vmatpush1.bf16.msra.mxu0 %v6036_v59 }
 0x3e2   :  { %2213 = vmatprep.subr.bf16.mxu0 %v6042_v23 }
 0x3e3   :  { %2247 = vmatpush1.bf16.msra.mxu1 %v6002_v12 }
 0x3e4   :  { %2248 = vmatprep.subr.bf16.mxu1 %v6008_v35 }
 0x3e5   :  { %2214 = vmatpush1.bf16.msra.mxu0 %v6048_v28 }
 0x3e6   :  { %2215 = vmatprep.subr.bf16.mxu0 %v6054_v26 }
 0x3e7   :  { %2249 = vmatpush1.bf16.msra.mxu1 %v6014_v56 }
 0x3e8   :  { %2250 = vmatprep.subr.bf16.mxu1 %v6020_v21 }
 0x3e9   :  { %2216 = vmatpush1.bf16.msra.mxu0 %v6060_v52 }
 0x3ea   :  { %2217 = vmatprep.subr.bf16.mxu0 %v6066_v2 }
 0x3eb   :  { %2251 = vmatpush1.bf16.msra.mxu1 %v6026_v25 }
 0x3ec   :  { %2252 = vmatprep.subr.bf16.mxu1 %v6032_v27 }
 0x3ed   :  { %2218 = vmatpush1.bf16.msra.mxu0 %v6078_v48 }
 0x3ef   :  { %2253 = vmatpush1.bf16.msra.mxu1 %v6038_v31  ;;  %v7905_v31 = vld [vmem:[#allocation66_spill] sm:$0xff] }
 0x3f0   :  { %2254 = vmatprep.subr.bf16.mxu1 %v6044_v54  ;;  %v7904_v54 = vld [vmem:[#allocation38_spill] sm:$0xff] }
 0x3f3   :  { %2255 = vmatpush1.bf16.msra.mxu1 %v6050_v13 }
 0x3f4   :  { %2256 = vmatprep.subr.bf16.mxu1 %v6056_v44  ;;  %v7903_v44 = vld [vmem:[#allocation64_spill] sm:$0xff] }
 0x3f7   :  { %2257 = vmatpush1.bf16.msra.mxu1 %v6062_v39  ;;  %v7902_v39 = vld [vmem:[#allocation36_spill] sm:$0xff] }
 0x3f8   :  { %2258 = vmatprep.subr.bf16.mxu1 %v6068_v5 }
 0x3fb   :  { %2259 = vmatpush1.bf16.msra.mxu1 %v6080_v62  ;;  %v6164_v62 = vld [vmem:[#allocation3 + $0x38] sm:$0xff] }
 0x3fc   :  { %7901 = vst [vmem:[#allocation112_spill] sm:$0xff] %v6164_v62 }
 0x405   :  { %v4262_v36 = vpop.xlane.xlu0 %4261 }
 0x406   :  { %v4289_v0 = vadd.f32 %v7865_v22, %v4262_v36 }
 0x408   :  { %v4297_v43 = vsub.f32 0.0, %v4289_v0 }
 0x40a   :  { %v4306_v60 = vmul.f32 1.442695, %v4297_v43 }
 0x40c   :  { %4664 = vpow2.f32 %v4306_v60  ;;  %v6090_v60 = vld [vmem:[#allocation3 + $0x2d8] sm:$0xff] }
 0x40d   :  { %2219 = vmatprep.subr.bf16.mxu0 %v6090_v60 }
 0x416   :  { %v4665_v47 = vpop.eup %4664 }
 0x417   :  { %v4321_v55 = vadd.f32 1.0, %v4665_v47  ;;  %v6092_v47 = vld [vmem:[#allocation3 + $0x2e8] sm:$0xff] }
 0x418   :  { %7881 = vst [vmem:[#allocation107_spill] sm:$0xff] %v6092_v47  ;;  %2260 = vmatprep.subr.bf16.mxu1 %v6092_v47  ;;  %v6158_v47 = vld [vmem:[#allocation3 + $0x448] sm:$0xff] }
 0x419   :  { %4666 = vrcp.f32 %v4321_v55  ;;  %v6096_v55 = vld [vmem:[#allocation3 + $0x2d0] sm:$0xff]  ;;  %7899 = vst [vmem:[#allocation108_spill] sm:$0xff] %v6158_v47 }
 0x41a   :  { %2220 = vmatpush1.bf16.msra.mxu0 %v6096_v55 }
 0x423   :  { %v4667_v19 = vpop.eup %4666 }
 0x424   :  { %4338 = vst.msk [vmem:[%s7391_s6 + $0x8] sm:$0xff] %vm4336_vm1, %v4667_v19  ;;  %v6098_v19 = vld [vmem:[#allocation3 + $0x2e0] sm:$0xff] }
 0x425   :  { %7882 = vst [vmem:[#allocation86_spill] sm:$0xff] %v6098_v19  ;;  %2261 = vmatpush1.bf16.msra.mxu1 %v6098_v19  ;;  %v6150_v19 = vld [vmem:[#allocation3 + $0x450] sm:$0xff] }
 0x426   :  { %7897 = vst [vmem:[#allocation104_spill] sm:$0xff] %v6150_v19 }
 0x449   :  { %v1800_v30 = vpop.f32.mrb[60].mxu1  ;;  %v1841_v9 = vpop.f32.mrb[52].mxu0 }
 0x44a   :  { %v6071_v53 = vadd.f32 %v1800_v30, %v7876_v63  ;;  %v6074_v41 = vadd.f32 %v1841_v9, %v7877_v1  ;;  %v1802_v58 = vpop.f32.mrb[61].mxu1  ;;  %v1843_v11 = vpop.f32.mrb[53].mxu0  ;;  %v6102_v30 = vld [vmem:[#allocation3 + $0x320] sm:$0xff]  ;;  %v6104_v9 = vld [vmem:[#allocation3 + $0x330] sm:$0xff]  ;;  %v6108_v63 = vld [vmem:[#allocation3 + $0x318] sm:$0xff] }
 0x44b   :  { %v6083_v49 = vadd.f32 %v1802_v58, %v7879_v32  ;;  %v6086_v51 = vadd.f32 %v1843_v11, %v7880_v4  ;;  %v1804_v36 = vpop.f32.mrb[62].mxu1  ;;  %v1845_v22 = vpop.f32.mrb[54].mxu0  ;;  %7883 = vst [vmem:[#allocation87_spill] sm:$0xff] %v6104_v9  ;;  %2221 = vmatprep.subr.bf16.mxu0 %v6102_v30  ;;  %2262 = vmatprep.subr.bf16.mxu1 %v6104_v9  ;;  %v6110_v1 = vld [vmem:[#allocation3 + $0x328] sm:$0xff]  ;;  %v6114_v11 = vld [vmem:[#allocation3 + $0x378] sm:$0xff]  ;;  %v6120_v32 = vld [vmem:[#allocation3 + $0x360] sm:$0xff] }
 0x44c   :  { %v1805_v0 = vpop.f32.mrb[63].mxu1  ;;  %v1846_v43 = vpop.f32.mrb[55].mxu0  ;;  %7884 = vst [vmem:[#allocation109_spill] sm:$0xff] %v6110_v1  ;;  %v6112_v58 = vld [vmem:[#allocation3 + $0x368] sm:$0xff]  ;;  %7885 = vst [vmem:[#allocation111_spill] sm:$0xff] %v6114_v11  ;;  %2222 = vmatpush1.bf16.msra.mxu0 %v6108_v63  ;;  %2263 = vmatpush1.bf16.msra.mxu1 %v6110_v1  ;;  %v6122_v4 = vld [vmem:[#allocation3 + $0x370] sm:$0xff] }
 0x44d   :  { %2223 = vmatprep.subr.bf16.mxu0 %v6112_v58  ;;  %2264 = vmatprep.subr.bf16.mxu1 %v6114_v11  ;;  %7886 = vst [vmem:[#allocation88_spill] sm:$0xff] %v6120_v32  ;;  %7887 = vst [vmem:[#allocation89_spill] sm:$0xff] %v6122_v4  ;;  %v6124_v36 = vld [vmem:[#allocation3 + $0x3b0] sm:$0xff]  ;;  %v6126_v22 = vld [vmem:[#allocation3 + $0x3c0] sm:$0xff]  ;;  %v1994_v27 = vmul.f32 %v6086_v51, %v6086_v51  ;;  %v1979_v56 = vsub.f32 0.0, %v6071_v53 }
 0x44e   :  { %7888 = vst [vmem:[#allocation90_spill] sm:$0xff] %v6124_v36  ;;  %7889 = vst [vmem:[#allocation91_spill] sm:$0xff] %v6126_v22  ;;  %v6132_v0 = vld [vmem:[#allocation3 + $0x3a8] sm:$0xff]  ;;  %v6134_v43 = vld [vmem:[#allocation3 + $0x3b8] sm:$0xff] }
 0x44f   :  { %7890 = vst [vmem:[#allocation92_spill] sm:$0xff] %v6132_v0  ;;  %7891 = vst [vmem:[#allocation93_spill] sm:$0xff] %v6134_v43  ;;  %v6136_v11 = vld [vmem:[#allocation3 + $0x3f8] sm:$0xff]  ;;  %v6138_v1 = vld [vmem:[#allocation3 + $0x408] sm:$0xff] }
 0x450   :  { %2224 = vmatpush1.bf16.msra.mxu0 %v6120_v32  ;;  %2265 = vmatpush1.bf16.msra.mxu1 %v6122_v4  ;;  %7892 = vst [vmem:[#allocation94_spill] sm:$0xff] %v6136_v11  ;;  %7893 = vst [vmem:[#allocation96_spill] sm:$0xff] %v6138_v1  ;;  %v6144_v4 = vld [vmem:[#allocation3 + $0x3f0] sm:$0xff]  ;;  %v6146_v9 = vld [vmem:[#allocation3 + $0x400] sm:$0xff] }
 0x451   :  { %2225 = vmatprep.subr.bf16.mxu0 %v6124_v36  ;;  %2266 = vmatprep.subr.bf16.mxu1 %v6126_v22  ;;  %7894 = vst [vmem:[#allocation98_spill] sm:$0xff] %v6144_v4  ;;  %7895 = vst [vmem:[#allocation100_spill] sm:$0xff] %v6146_v9  ;;  %v6148_v22 = vld [vmem:[#allocation3 + $0x440] sm:$0xff] }
 0x452   :  { %7896 = vst [vmem:[#allocation102_spill] sm:$0xff] %v6148_v22 }
 0x454   :  { %2226 = vmatpush1.bf16.msra.mxu0 %v6132_v0  ;;  %2267 = vmatpush1.bf16.msra.mxu1 %v6134_v43  ;;  %v6156_v43 = vld [vmem:[#allocation3 + $0x438] sm:$0xff] }
 0x455   :  { %2227 = vmatprep.subr.bf16.mxu0 %v6136_v11  ;;  %2268 = vmatprep.subr.bf16.mxu1 %v6138_v1  ;;  %7898 = vst [vmem:[#allocation106_spill] sm:$0xff] %v6156_v43  ;;  %v6162_v1 = vld [vmem:[#allocation3 + $0x28] sm:$0xff] }
 0x456   :  { %7900 = vst [vmem:[#allocation110_spill] sm:$0xff] %v6162_v1 }
 0x458   :  { %2228 = vmatpush1.bf16.msra.mxu0 %v6144_v4  ;;  %2269 = vmatpush1.bf16.msra.mxu1 %v6146_v9 }
 0x459   :  { %2229 = vmatprep.subr.bf16.mxu0 %v6148_v22  ;;  %2270 = vmatprep.subr.bf16.mxu1 %v6150_v19 }
 0x45c   :  { %2230 = vmatpush1.bf16.msra.mxu0 %v6156_v43  ;;  %2271 = vmatpush1.bf16.msra.mxu1 %v6158_v47 }
 0x45d   :  { %2281 = vmatprep.subr.bf16.mxu0 %v6162_v1  ;;  %2322 = vmatprep.subr.bf16.mxu1 %v6164_v62 }
 0x489   :  { %v1882_v9 = vpop.f32.mrb[64].mxu1  ;;  %v1923_v5 = vpop.f32.mrb[56].mxu0 }
 0x48a   :  { %v1974_v19 = vadd.f32 %v1882_v9, %v7902_v39  ;;  %v1976_v13 = vadd.f32 %v1923_v5, %v7903_v44  ;;  %v1884_v22 = vpop.f32.mrb[65].mxu1  ;;  %v1925_v4 = vpop.f32.mrb[57].mxu0 }
 0x48b   :  { %v1975_v43 = vadd.f32 %v1884_v22, %v7904_v54  ;;  %v1977_v47 = vadd.f32 %v1925_v4, %v7905_v31  ;;  %v1886_v11 = vpop.f32.mrb[66].mxu1  ;;  %v1927_v0 = vpop.f32.mrb[58].mxu0 }
 0x48c   :  { %v1995_v1 = vmul.f32 %v1974_v19, %v1974_v19  ;;  %v2002_v25 = vmul.f32 %v1976_v13, %v1976_v13  ;;  %v1887_v62 = vpop.f32.mrb[67].mxu1  ;;  %v1928_v36 = vpop.f32.mrb[59].mxu0  ;;  %v1984_v11 = vsub.f32 0.0, %v6083_v49 }
 0x48d   :  { %v2001_v32 = vmul.f32 %v1975_v43, %v1975_v43  ;;  %v1980_v36 = vmul.f32 1.442695, %v1979_v56  ;;  %v1989_v56 = vsub.f32 0.0, %v6074_v41 }
 0x48e   :  { %v1996_v21 = vadd.f32 %v1995_v1, %v1994_v27  ;;  %v1985_v62 = vmul.f32 1.442695, %v1984_v11 }
 0x48f   :  { %v2003_v39 = vadd.f32 %v2002_v25, %v2001_v32 }
 0x490   :  { %v1997_v9 = vmax.f32 %v1996_v21, 1.0 }
 0x491   :  { %v2004_v44 = vmax.f32 %v2003_v39, 1.0  ;;  %v7906_v39 = vld [vmem:[#allocation59_spill] sm:$0xff] }
 0x492   :  { %4668 = vrsqrt.f32 %v1997_v9 }
 0x493   :  { %4670 = vrsqrt.f32 %v2004_v44 }
 0x494   :  { %4672 = vpow2.f32 %v1985_v62 }
 0x495   :  { %4674 = vpow2.f32 %v1980_v36 }
 0x49c   :  { %v4669_v5 = vpop.eup %4668 }
 0x49d   :  { %v4671_v54 = vpop.eup %4670  ;;  %v2000_v22 = vmul.f32 %v4669_v5, %v1974_v19  ;;  %v1999_v31 = vmul.f32 %v4669_v5, %v6086_v51  ;;  %v2008_v19 = vmul.f32 %v1977_v47, %v1977_v47 }
 0x49e   :  { %v2006_v4 = vmul.f32 %v4671_v54, %v1975_v43  ;;  %v2007_v0 = vmul.f32 %v4671_v54, %v1976_v13  ;;  %v4673_v51 = vpop.eup %4672 }
 0x49f   :  { %v4675_v49 = vpop.eup %4674  ;;  %v1987_v43 = vadd.f32 1.0, %v4673_v51 }
 0x4a0   :  { %v1982_v54 = vadd.f32 1.0, %v4675_v49 }
 0x4a9   :  { %v4480_v25 = vpop.f32.mrb[68].mxu1 }
 0x4aa   :  { %v4481_v21 = vpop.f32.mrb[69].mxu1 }
 0x4ab   :  { %v4482_v27 = vadd.f32 %v4481_v21, %v4480_v25  ;;  %v4483_v1 = vpop.f32.mrb[70].mxu1  ;;  %v1990_v25 = vmul.f32 1.442695, %v1989_v56 }
 0x4ac   :  { %v4484_v32 = vpop.f32.mrb[71].mxu1 }
 0x4ad   :  { %v1978_v9 = vadd.f32 %v4482_v27, %v7906_v39 }
 0x4af   :  { %v2009_v44 = vmul.f32 %v1978_v9, %v1978_v9 }
 0x4b1   :  { %v2010_v5 = vadd.f32 %v2009_v44, %v2008_v19 }
 0x4b3   :  { %v2011_v13 = vmax.f32 %v2010_v5, 1.0 }
 0x4b5   :  { %4676 = vrsqrt.f32 %v2011_v13 }
 0x4b6   :  { %4678 = vrcp.f32 %v1987_v43 }
 0x4b7   :  { %4680 = vrcp.f32 %v1982_v54 }
 0x4b8   :  { %4682 = vpow2.f32 %v1990_v25 }
 0x4bf   :  { %v4677_v53 = vpop.eup %4676 }
 0x4c0   :  { %v2013_v11 = vmul.f32 %v4677_v53, %v1977_v47  ;;  %v2014_v62 = vmul.f32 %v4677_v53, %v1978_v9  ;;  %v4679_v36 = vpop.eup %4678 }
 0x4c1   :  { %v4681_v1 = vpop.eup %4680 }
 0x4c2   :  { %v2015_v21 = vmul.f32 %v4679_v36, %v2013_v11  ;;  %v2016_v27 = vmul.f32 %v4679_v36, %v2014_v62  ;;  %v2017_v51 = vmul.f32 %v4681_v1, %v5851_v37  ;;  %v2022_v49 = vmul.f32 %v4681_v1, %v5853_v33  ;;  %v4683_v11 = vpop.eup %4682 }
 0x4c3   :  { %v1992_v33 = vadd.f32 1.0, %v4683_v11  ;;  %v6231_v11 = vld [vmem:[#allocation3 + $0x110] sm:$0xff] }
 0x4c4   :  { %v2018_v32 = vmul.f32 %v2015_v21, %v1999_v31  ;;  %v2019_v39 = vmul.f32 %v2016_v27, %v2000_v22  ;;  %v2023_v19 = vmul.f32 %v2016_v27, %v1999_v31  ;;  %v2024_v44 = vmul.f32 %v2015_v21, %v2000_v22 }
 0x4c6   :  { %v2020_v5 = vsub.f32 %v2018_v32, %v2019_v39  ;;  %v2025_v43 = vadd.f32 %v2024_v44, %v2023_v19 }
 0x4c8   :  { %v6181_v41 = vadd.f32 %v2020_v5, %v2017_v51  ;;  %v6183_v47 = vadd.f32 %v2025_v43, %v2022_v49  ;;  %v6195_v51 = vld [vmem:[#allocation3 + $0x20] sm:$0xff]  ;;  %v6197_v5 = vld [vmem:[#allocation3 + $0x30] sm:$0xff] }
 0x4c9   :  { %v6203_v43 = vld [vmem:[#allocation3 + $0x70] sm:$0xff] }
 0x4ca   :  { %v2027_v9 = vmul.f32 %v6181_v41, %v2006_v4  ;;  %v2028_v13 = vmul.f32 %v6183_v47, %v2007_v0  ;;  %v2030_v54 = vmul.f32 %v6183_v47, %v2006_v4  ;;  %v2031_v31 = vmul.f32 %v6181_v41, %v2007_v0 }
 0x4cc   :  { %v2029_v22 = vsub.f32 %v2027_v9, %v2028_v13  ;;  %v2032_v56 = vadd.f32 %v2031_v31, %v2030_v54  ;;  %v6207_v9 = vld [vmem:[#allocation3 + $0x80] sm:$0xff]  ;;  %v6210_v13 = vld [vmem:[#allocation3 + $0x68] sm:$0xff]  ;;  %v6212_v54 = vld [vmem:[#allocation3 + $0x78] sm:$0xff] }
 0x4cd   :  { %v6216_v31 = vld [vmem:[#allocation3 + $0xb8] sm:$0xff] }
 0x4ce   :  { %v2033_v53 = vmul.f32 %v2029_v22, %v2029_v22  ;;  %v2034_v37 = vmul.f32 %v2032_v56, %v2032_v56 }
 0x4d0   :  { %v2035_v62 = vadd.f32 %v2034_v37, %v2033_v53  ;;  %v6227_v53 = vld [vmem:[#allocation3 + $0xc0] sm:$0xff] }
 0x4d1   :  { %v6229_v37 = vld [vmem:[#allocation3 + $0x100] sm:$0xff] }
 0x4d2   :  { %v2036_v36 = vmax.f32 %v2035_v62, 1.0  ;;  %v6237_v62 = vld [vmem:[#allocation3 + $0xf8] sm:$0xff] }
 0x4d4   :  { %4684 = vrsqrt.f32 %v2036_v36  ;;  %v6241_v36 = vld [vmem:[#allocation3 + $0x148] sm:$0xff] }
 0x4d5   :  { %4686 = vrcp.f32 %v1992_v33  ;;  %v6239_v33 = vld [vmem:[#allocation3 + $0x108] sm:$0xff] }
 0x4de   :  { %v4685_v25 = vpop.eup %4684 }
 0x4df   :  { %v2039_v21 = vmul.f32 %v4685_v25, %v2032_v56  ;;  %v2038_v27 = vmul.f32 %v4685_v25, %v2029_v22  ;;  %v4687_v1 = vpop.eup %4686  ;;  %v6218_v22 = vld [vmem:[#allocation3 + $0xc8] sm:$0xff]  ;;  %v6225_v56 = vld [vmem:[#allocation3 + $0xb0] sm:$0xff]  ;;  %v6243_v25 = vld [vmem:[#allocation3 + $0x158] sm:$0xff] }
 0x4e1   :  { %v2041_v32 = vmul.f32 %v4687_v1, %v2039_v21  ;;  %v2040_v39 = vmul.f32 %v4687_v1, %v2038_v27  ;;  %v6249_v21 = vld [vmem:[#allocation3 + $0x140] sm:$0xff]  ;;  %v6251_v27 = vld [vmem:[#allocation3 + $0x150] sm:$0xff] }
 0x4e2   :  { %7907 = vst [vmem:[#allocation20_spill] sm:$0xff] %v6249_v21  ;;  %7908 = vst [vmem:[#allocation31_spill] sm:$0xff] %v6251_v27  ;;  %v6253_v1 = vld [vmem:[#allocation3 + $0x190] sm:$0xff] }
 0x4e3   :  { %v6189_v19 = vpack.c.bf16 %v2041_v32, %v2041_v32  ;;  %v6191_v4 = vpack.c.bf16 %v2040_v39, %v2040_v39  ;;  %v4245_v0 = vmul.f32 %v5508_v6, %v2040_v39  ;;  %v4246_v44 = vmul.f32 %v5512_v29, %v2041_v32  ;;  %7909 = vst [vmem:[#allocation22_spill] sm:$0xff] %v6253_v1  ;;  %v6255_v32 = vld [vmem:[#allocation3 + $0x1a0] sm:$0xff]  ;;  %v6261_v39 = vld [vmem:[#allocation3 + $0x188] sm:$0xff] }
 0x4e4   :  { %7910 = vst [vmem:[#allocation33_spill] sm:$0xff] %v6255_v32  ;;  %7911 = vst [vmem:[#allocation32_spill] sm:$0xff] %v6261_v39 }
 0x4e5   :  { %2231 = vmatprep.mubr.bf16.mxu0 %v6189_v19  ;;  %2272 = vmatprep.mubr.bf16.mxu1 %v6189_v19  ;;  %v4263_v49 = vadd.f32 %v4246_v44, %v4245_v0  ;;  %v6263_v0 = vld [vmem:[#allocation3 + $0x198] sm:$0xff] }
 0x4e6   :  { %2232 = vmatmul.mubr.bf16.vlgmr.msra.gmra.mrb[60].mxu0 %v6191_v4  ;;  %2273 = vmatmul.mubr.bf16.vlgmr.msra.gmra.mrb[72].mxu1 %v6191_v4  ;;  %7912 = vst [vmem:[#allocation60_spill] sm:$0xff] %v6263_v0  ;;  %v6265_v44 = vld [vmem:[#allocation3 + $0x1d8] sm:$0xff] }
 0x4e7   :  { %2282 = vmatpush1.bf16.msra.mxu0 %v6195_v51  ;;  %2323 = vmatpush1.bf16.msra.mxu1 %v6197_v5  ;;  %7913 = vst [vmem:[#allocation34_spill] sm:$0xff] %v6265_v44 }
 0x4e8   :  { %4264 = vadd.xlane.f32.xlu1 %v4263_v49  ;;  %2313 = vmatprep.mubr.bf16.mxu0 %v6189_v19  ;;  %v6267_v49 = vld [vmem:[#allocation3 + $0x1e8] sm:$0xff] }
 0x4e9   :  { %2354 = vmatprep.mubr.bf16.mxu1 %v6189_v19  ;;  %2283 = vmatprep.subr.bf16.mxu0 %v6203_v43  ;;  %7914 = vst [vmem:[#allocation62_spill] sm:$0xff] %v6267_v49 }
 0x4ea   :  { %2324 = vmatprep.subr.bf16.mxu1 %v6207_v9 }
 0x4eb   :  { %2284 = vmatpush1.bf16.msra.mxu0 %v6210_v13  ;;  %2325 = vmatpush1.bf16.msra.mxu1 %v6212_v54 }
 0x4ec   :  { %2285 = vmatprep.subr.bf16.mxu0 %v6216_v31  ;;  %2326 = vmatprep.subr.bf16.mxu1 %v6218_v22 }
 0x4ef   :  { %2286 = vmatpush1.bf16.msra.mxu0 %v6225_v56  ;;  %2327 = vmatpush1.bf16.msra.mxu1 %v6227_v53 }
 0x4f0   :  { %2287 = vmatprep.subr.bf16.mxu0 %v6229_v37  ;;  %2328 = vmatprep.subr.bf16.mxu1 %v6231_v11 }
 0x4f3   :  { %2288 = vmatpush1.bf16.msra.mxu0 %v6237_v62  ;;  %2329 = vmatpush1.bf16.msra.mxu1 %v6239_v33 }
 0x4f4   :  { %2289 = vmatprep.subr.bf16.mxu0 %v6241_v36  ;;  %2330 = vmatprep.subr.bf16.mxu1 %v6243_v25 }
 0x4f7   :  { %2290 = vmatpush1.bf16.msra.mxu0 %v6249_v21  ;;  %2331 = vmatpush1.bf16.msra.mxu1 %v6251_v27  ;;  %v6273_v27 = vld [vmem:[#allocation3 + $0x1d0] sm:$0xff] }
 0x4f8   :  { %2291 = vmatprep.subr.bf16.mxu0 %v6253_v1  ;;  %2332 = vmatprep.subr.bf16.mxu1 %v6255_v32  ;;  %7915 = vst [vmem:[#allocation63_spill] sm:$0xff] %v6273_v27  ;;  %v6275_v1 = vld [vmem:[#allocation3 + $0x1e0] sm:$0xff]  ;;  %v6279_v21 = vld [vmem:[#allocation3 + $0x230] sm:$0xff] }
 0x4f9   :  { %7916 = vst [vmem:[#allocation113_spill] sm:$0xff] %v6275_v1  ;;  %v6277_v32 = vld [vmem:[#allocation3 + $0x220] sm:$0xff]  ;;  %7918 = vst [vmem:[#allocation115_spill] sm:$0xff] %v6279_v21 }
 0x4fa   :  { %7917 = vst [vmem:[#allocation114_spill] sm:$0xff] %v6277_v32 }
 0x4fb   :  { %2292 = vmatpush1.bf16.msra.mxu0 %v6261_v39  ;;  %2333 = vmatpush1.bf16.msra.mxu1 %v6263_v0  ;;  %v6285_v0 = vld [vmem:[#allocation3 + $0x218] sm:$0xff] }
 0x4fc   :  { %2293 = vmatprep.subr.bf16.mxu0 %v6265_v44  ;;  %2334 = vmatprep.subr.bf16.mxu1 %v6267_v49  ;;  %7919 = vst [vmem:[#allocation116_spill] sm:$0xff] %v6285_v0  ;;  %v6287_v44 = vld [vmem:[#allocation3 + $0x228] sm:$0xff]  ;;  %v6291_v39 = vld [vmem:[#allocation3 + $0x278] sm:$0xff] }
 0x4fd   :  { %7920 = vst [vmem:[#allocation117_spill] sm:$0xff] %v6287_v44  ;;  %v6289_v49 = vld [vmem:[#allocation3 + $0x268] sm:$0xff]  ;;  %7922 = vst [vmem:[#allocation119_spill] sm:$0xff] %v6291_v39 }
 0x4fe   :  { %7921 = vst [vmem:[#allocation118_spill] sm:$0xff] %v6289_v49 }
 0x4ff   :  { %2294 = vmatpush1.bf16.msra.mxu0 %v6273_v27  ;;  %2335 = vmatpush1.bf16.msra.mxu1 %v6275_v1  ;;  %v6297_v1 = vld [vmem:[#allocation3 + $0x260] sm:$0xff] }
 0x500   :  { %2295 = vmatprep.subr.bf16.mxu0 %v6277_v32  ;;  %2336 = vmatprep.subr.bf16.mxu1 %v6279_v21  ;;  %7923 = vst [vmem:[#allocation120_spill] sm:$0xff] %v6297_v1  ;;  %v6299_v32 = vld [vmem:[#allocation3 + $0x270] sm:$0xff]  ;;  %v6303_v27 = vld [vmem:[#allocation3 + $0x2c0] sm:$0xff] }
 0x501   :  { %7924 = vst [vmem:[#allocation121_spill] sm:$0xff] %v6299_v32  ;;  %v6301_v21 = vld [vmem:[#allocation3 + $0x2b0] sm:$0xff]  ;;  %7926 = vst [vmem:[#allocation123_spill] sm:$0xff] %v6303_v27 }
 0x502   :  { %7925 = vst [vmem:[#allocation122_spill] sm:$0xff] %v6301_v21 }
 0x503   :  { %2296 = vmatpush1.bf16.msra.mxu0 %v6285_v0  ;;  %2337 = vmatpush1.bf16.msra.mxu1 %v6287_v44  ;;  %v6309_v44 = vld [vmem:[#allocation3 + $0x2a8] sm:$0xff] }
 0x504   :  { %2297 = vmatprep.subr.bf16.mxu0 %v6289_v49  ;;  %2338 = vmatprep.subr.bf16.mxu1 %v6291_v39  ;;  %7927 = vst [vmem:[#allocation124_spill] sm:$0xff] %v6309_v44  ;;  %v6311_v49 = vld [vmem:[#allocation3 + $0x2b8] sm:$0xff]  ;;  %v6315_v0 = vld [vmem:[#allocation3 + $0x308] sm:$0xff] }
 0x505   :  { %7928 = vst [vmem:[#allocation125_spill] sm:$0xff] %v6311_v49  ;;  %v6313_v39 = vld [vmem:[#allocation3 + $0x2f8] sm:$0xff]  ;;  %7930 = vst [vmem:[#allocation127_spill] sm:$0xff] %v6315_v0 }
 0x506   :  { %7929 = vst [vmem:[#allocation126_spill] sm:$0xff] %v6313_v39 }
 0x507   :  { %2298 = vmatpush1.bf16.msra.mxu0 %v6297_v1  ;;  %2339 = vmatpush1.bf16.msra.mxu1 %v6299_v32  ;;  %v6321_v32 = vld [vmem:[#allocation3 + $0x2f0] sm:$0xff] }
 0x508   :  { %2299 = vmatprep.subr.bf16.mxu0 %v6301_v21  ;;  %2340 = vmatprep.subr.bf16.mxu1 %v6303_v27  ;;  %7931 = vst [vmem:[#allocation128_spill] sm:$0xff] %v6321_v32  ;;  %v6323_v21 = vld [vmem:[#allocation3 + $0x300] sm:$0xff]  ;;  %v6327_v1 = vld [vmem:[#allocation3 + $0x350] sm:$0xff] }
 0x509   :  { %7932 = vst [vmem:[#allocation129_spill] sm:$0xff] %v6323_v21  ;;  %v6325_v27 = vld [vmem:[#allocation3 + $0x340] sm:$0xff]  ;;  %7934 = vst [vmem:[#allocation131_spill] sm:$0xff] %v6327_v1 }
 0x50a   :  { %7933 = vst [vmem:[#allocation130_spill] sm:$0xff] %v6325_v27 }
 0x50b   :  { %2300 = vmatpush1.bf16.msra.mxu0 %v6309_v44  ;;  %2341 = vmatpush1.bf16.msra.mxu1 %v6311_v49  ;;  %v6333_v49 = vld [vmem:[#allocation3 + $0x338] sm:$0xff] }
 0x50c   :  { %2301 = vmatprep.subr.bf16.mxu0 %v6313_v39  ;;  %2342 = vmatprep.subr.bf16.mxu1 %v6315_v0  ;;  %7935 = vst [vmem:[#allocation132_spill] sm:$0xff] %v6333_v49  ;;  %v6335_v39 = vld [vmem:[#allocation3 + $0x348] sm:$0xff]  ;;  %v6339_v44 = vld [vmem:[#allocation3 + $0x398] sm:$0xff] }
 0x50d   :  { %7936 = vst [vmem:[#allocation133_spill] sm:$0xff] %v6335_v39  ;;  %v6337_v0 = vld [vmem:[#allocation3 + $0x388] sm:$0xff]  ;;  %7938 = vst [vmem:[#allocation135_spill] sm:$0xff] %v6339_v44 }
 0x50e   :  { %7937 = vst [vmem:[#allocation134_spill] sm:$0xff] %v6337_v0 }
 0x50f   :  { %2302 = vmatpush1.bf16.msra.mxu0 %v6321_v32  ;;  %2343 = vmatpush1.bf16.msra.mxu1 %v6323_v21  ;;  %v6345_v21 = vld [vmem:[#allocation3 + $0x380] sm:$0xff] }
 0x510   :  { %2303 = vmatprep.subr.bf16.mxu0 %v6325_v27  ;;  %2344 = vmatprep.subr.bf16.mxu1 %v6327_v1  ;;  %7939 = vst [vmem:[#allocation136_spill] sm:$0xff] %v6345_v21  ;;  %v6347_v27 = vld [vmem:[#allocation3 + $0x390] sm:$0xff]  ;;  %v6351_v32 = vld [vmem:[#allocation3 + $0x3e0] sm:$0xff] }
 0x511   :  { %7940 = vst [vmem:[#allocation137_spill] sm:$0xff] %v6347_v27  ;;  %v6349_v1 = vld [vmem:[#allocation3 + $0x3d0] sm:$0xff]  ;;  %7942 = vst [vmem:[#allocation139_spill] sm:$0xff] %v6351_v32 }
 0x512   :  { %7941 = vst [vmem:[#allocation138_spill] sm:$0xff] %v6349_v1 }
 0x513   :  { %2304 = vmatpush1.bf16.msra.mxu0 %v6333_v49  ;;  %2345 = vmatpush1.bf16.msra.mxu1 %v6335_v39  ;;  %v6357_v39 = vld [vmem:[#allocation3 + $0x3c8] sm:$0xff] }
 0x514   :  { %2305 = vmatprep.subr.bf16.mxu0 %v6337_v0  ;;  %2346 = vmatprep.subr.bf16.mxu1 %v6339_v44  ;;  %7943 = vst [vmem:[#allocation140_spill] sm:$0xff] %v6357_v39  ;;  %v6359_v0 = vld [vmem:[#allocation3 + $0x3d8] sm:$0xff]  ;;  %v6363_v49 = vld [vmem:[#allocation3 + $0x428] sm:$0xff] }
 0x515   :  { %7944 = vst [vmem:[#allocation141_spill] sm:$0xff] %v6359_v0  ;;  %v6361_v44 = vld [vmem:[#allocation3 + $0x418] sm:$0xff]  ;;  %7946 = vst [vmem:[#allocation143_spill] sm:$0xff] %v6363_v49 }
 0x516   :  { %7945 = vst [vmem:[#allocation142_spill] sm:$0xff] %v6361_v44 }
 0x517   :  { %2306 = vmatpush1.bf16.msra.mxu0 %v6345_v21  ;;  %2347 = vmatpush1.bf16.msra.mxu1 %v6347_v27  ;;  %v6369_v27 = vld [vmem:[#allocation3 + $0x410] sm:$0xff] }
 0x518   :  { %2307 = vmatprep.subr.bf16.mxu0 %v6349_v1  ;;  %2348 = vmatprep.subr.bf16.mxu1 %v6351_v32  ;;  %v6371_v1 = vld [vmem:[#allocation3 + $0x420] sm:$0xff]  ;;  %v6375_v21 = vld [vmem:[#allocation3 + $0x470] sm:$0xff] }
 0x519   :  { %7947 = vst [vmem:[#allocation144_spill] sm:$0xff] %v6371_v1  ;;  %v6373_v32 = vld [vmem:[#allocation3 + $0x460] sm:$0xff] }
 0x51b   :  { %2308 = vmatpush1.bf16.msra.mxu0 %v6357_v39  ;;  %2349 = vmatpush1.bf16.msra.mxu1 %v6359_v0  ;;  %v6381_v0 = vld [vmem:[#allocation3 + $0x458] sm:$0xff]  ;;  %v6390_v39 = vld [vmem:[#allocation3 + $0x40] sm:$0xff] }
 0x51c   :  { %2309 = vmatprep.subr.bf16.mxu0 %v6361_v44  ;;  %2350 = vmatprep.subr.bf16.mxu1 %v6363_v49  ;;  %7948 = vst [vmem:[#allocation145_spill] sm:$0xff] %v6381_v0  ;;  %v6383_v44 = vld [vmem:[#allocation3 + $0x468] sm:$0xff]  ;;  %v6385_v49 = vld [vmem:[#allocation3 + $0x280] sm:$0xff]  ;;  %7950 = vst [vmem:[#allocation147_spill] sm:$0xff] %v6390_v39 }
 0x51d   :  { %7949 = vst [vmem:[#allocation146_spill] sm:$0xff] %v6385_v49 }
 0x51f   :  { %2310 = vmatpush1.bf16.msra.mxu0 %v6369_v27  ;;  %2351 = vmatpush1.bf16.msra.mxu1 %v6371_v1  ;;  %v6393_v1 = vld [vmem:[#allocation3 + $0x2c8] sm:$0xff] }
 0x520   :  { %2311 = vmatprep.subr.bf16.mxu0 %v6373_v32  ;;  %2352 = vmatprep.subr.bf16.mxu1 %v6375_v21 }
 0x523   :  { %2312 = vmatpush1.bf16.msra.mxu0 %v6381_v0  ;;  %2353 = vmatpush1.bf16.msra.mxu1 %v6383_v44  ;;  %v6400_v0 = vld [vmem:[#allocation3 + $0x88] sm:$0xff] }
 0x524   :  { %4486 = vmatprep.subr.bf16.mxu0 %v6385_v49  ;;  %2632 = vmatprep.subr.bf16.mxu1 %v5954_v14  ;;  %v6403_v49 = vld [vmem:[#allocation3 + $0x310] sm:$0xff] }
 0x525   :  { %v6408_v14 = vld [vmem:[#allocation3 + $0xd0] sm:$0xff] }
 0x526   :  { %2314 = vmatmul.mubr.bf16.vlgmr.msra.gmra.mrb[64].mxu0 %v6191_v4  ;;  %2355 = vmatmul.mubr.bf16.vlgmr.msra.gmra.mrb[76].mxu1 %v6191_v4 }
 0x527   :  { %4487 = vmatpush3.bf16.msra.mxu0 %v6390_v39  ;;  %2395 = vmatprep.mubr.bf16.mxu0 %v6189_v19  ;;  %v6411_v39 = vld [vmem:[#allocation3 + $0x358] sm:$0xff] }
 0x528   :  { %4488 = vmatprep.subr.bf16.mxu0 %v6393_v1  ;;  %2633 = vmatpush1.bf16.msra.mxu1 %v5958_v10  ;;  %v6416_v10 = vld [vmem:[#allocation3 + $0x118] sm:$0xff] }
 0x529   :  { %2634 = vmatprep.subr.bf16.mxu1 %v5970_v15  ;;  %v6419_v15 = vld [vmem:[#allocation3 + $0x3a0] sm:$0xff] }
 0x52b   :  { %4489 = vmatpush3.bf16.msra.mxu0 %v6400_v0 }
 0x52c   :  { %4490 = vmatprep.subr.bf16.mxu0 %v6403_v49  ;;  %2635 = vmatpush1.bf16.msra.mxu1 %v5976_v7  ;;  %v6424_v7 = vld [vmem:[#allocation3 + $0x160] sm:$0xff] }
 0x52d   :  { %2636 = vmatprep.subr.bf16.mxu1 %v5982_v50  ;;  %v6427_v50 = vld [vmem:[#allocation3 + $0x3e8] sm:$0xff] }
 0x52f   :  { %4491 = vmatpush3.bf16.msra.mxu0 %v6408_v14 }
 0x530   :  { %4492 = vmatprep.subr.bf16.mxu0 %v6411_v39  ;;  %2637 = vmatpush1.bf16.msra.mxu1 %v5988_v40  ;;  %v6432_v40 = vld [vmem:[#allocation3 + $0x1a8] sm:$0xff] }
 0x531   :  { %2638 = vmatprep.subr.bf16.mxu1 %v5994_v42  ;;  %v6435_v42 = vld [vmem:[#allocation3 + $0x430] sm:$0xff] }
 0x533   :  { %4493 = vmatpush3.bf16.msra.mxu0 %v6416_v10 }
 0x534   :  { %4494 = vmatprep.subr.bf16.mxu0 %v6419_v15  ;;  %2639 = vmatpush1.bf16.msra.mxu1 %v6000_v3  ;;  %v6440_v3 = vld [vmem:[#allocation3 + $0x1f0] sm:$0xff] }
 0x535   :  { %2640 = vmatprep.subr.bf16.mxu1 %v6006_v45  ;;  %v6443_v45 = vld [vmem:[#allocation3 + $0x478] sm:$0xff] }
 0x536   :  { %7951 = vst [vmem:[#allocation148_spill] sm:$0xff] %v6443_v45 }
 0x537   :  { %4495 = vmatpush3.bf16.msra.mxu0 %v6424_v7 }
 0x538   :  { %4496 = vmatprep.subr.bf16.mxu0 %v6427_v50  ;;  %2641 = vmatpush1.bf16.msra.mxu1 %v6012_v46  ;;  %v6448_v46 = vld [vmem:[#allocation3 + $0x238] sm:$0xff] }
 0x539   :  { %2642 = vmatprep.subr.bf16.mxu1 %v6018_v57  ;;  %7952 = vst [vmem:[#allocation149_spill] sm:$0xff] %v6448_v46  ;;  %v7962_v57 = vld [vmem:[#allocation83_spill] sm:$0xff] }
 0x53b   :  { %4497 = vmatpush3.bf16.msra.mxu0 %v6432_v40 }
 0x53c   :  { %4498 = vmatprep.subr.bf16.mxu0 %v6435_v42  ;;  %2643 = vmatpush1.bf16.msra.mxu1 %v6024_v16  ;;  %v7963_v16 = vld [vmem:[#allocation98_spill] sm:$0xff] }
 0x53d   :  { %2644 = vmatprep.subr.bf16.mxu1 %v6030_v17  ;;  %v7964_v17 = vld [vmem:[#allocation102_spill] sm:$0xff] }
 0x53f   :  { %4499 = vmatpush3.bf16.msra.mxu0 %v6440_v3 }
 0x540   :  { %4500 = vmatprep.subr.bf16.mxu0 %v6443_v45  ;;  %2645 = vmatpush1.bf16.msra.mxu1 %v6036_v59  ;;  %v7965_v59 = vld [vmem:[#allocation101_spill] sm:$0xff] }
 0x541   :  { %2646 = vmatprep.subr.bf16.mxu1 %v6042_v23  ;;  %v7966_v23 = vld [vmem:[#allocation103_spill] sm:$0xff] }
 0x543   :  { %4501 = vmatpush3.bf16.msra.mxu0 %v6448_v46 }
 0x544   :  { %2673 = vmatprep.subr.bf16.mxu0 %v5956_v61  ;;  %2647 = vmatpush1.bf16.msra.mxu1 %v6048_v28  ;;  %v7953_v61 = vld [vmem:[#allocation80_spill] sm:$0xff]  ;;  %v7967_v28 = vld [vmem:[#allocation106_spill] sm:$0xff] }
 0x545   :  { %2648 = vmatprep.subr.bf16.mxu1 %v6054_v26  ;;  %v7968_v26 = vld [vmem:[#allocation110_spill] sm:$0xff] }
 0x546   :  { %2396 = vmatmul.mubr.bf16.vlgmr.msra.gmra.mrb[68].mxu0 %v6191_v4  ;;  %v6497_v4 = vld [vmem:[#allocation9] ss:$0 sm:$0xff] }
 0x547   :  { %2674 = vmatpush1.bf16.msra.mxu0 %v5962_v34  ;;  %v7954_v34 = vld [vmem:[#allocation81_spill] sm:$0xff]  ;;  %7977 = vst [vmem:[#allocation150_spill] sm:$0xff] %v6497_v4 }
 0x548   :  { %2675 = vmatprep.subr.bf16.mxu0 %v5972_v18  ;;  %2649 = vmatpush1.bf16.msra.mxu1 %v6060_v52  ;;  %v7955_v18 = vld [vmem:[#allocation88_spill] sm:$0xff] }
 0x549   :  { %2650 = vmatprep.subr.bf16.mxu1 %v6066_v2  ;;  %v7969_v52 = vld [vmem:[#allocation84_spill] sm:$0xff]  ;;  %v7970_v2 = vld [vmem:[#allocation85_spill] sm:$0xff] }
 0x54b   :  { %2676 = vmatpush1.bf16.msra.mxu0 %v5978_v20  ;;  %v7956_v20 = vld [vmem:[#allocation90_spill] sm:$0xff] }
 0x54c   :  { %2677 = vmatprep.subr.bf16.mxu0 %v5984_v38  ;;  %2651 = vmatpush1.bf16.msra.mxu1 %v6078_v48  ;;  %v7957_v38 = vld [vmem:[#allocation97_spill] sm:$0xff] }
 0x54d   :  { %2652 = vmatprep.subr.bf16.mxu1 %v6090_v60  ;;  %v7971_v48 = vld [vmem:[#allocation105_spill] sm:$0xff]  ;;  %v7972_v60 = vld [vmem:[#allocation107_spill] sm:$0xff] }
 0x54f   :  { %2678 = vmatpush1.bf16.msra.mxu0 %v5990_v8  ;;  %v7958_v8 = vld [vmem:[#allocation99_spill] sm:$0xff] }
 0x550   :  { %2679 = vmatprep.subr.bf16.mxu0 %v5996_v24  ;;  %2653 = vmatpush1.bf16.msra.mxu1 %v6096_v55  ;;  %v7959_v24 = vld [vmem:[#allocation92_spill] sm:$0xff]  ;;  %v7973_v55 = vld [vmem:[#allocation86_spill] sm:$0xff] }
 0x551   :  { %2654 = vmatprep.subr.bf16.mxu1 %v6102_v30  ;;  %v7974_v30 = vld [vmem:[#allocation87_spill] sm:$0xff] }
 0x553   :  { %2680 = vmatpush1.bf16.msra.mxu0 %v6002_v12  ;;  %v7960_v12 = vld [vmem:[#allocation94_spill] sm:$0xff] }
 0x554   :  { %2681 = vmatprep.subr.bf16.mxu0 %v6008_v35  ;;  %2655 = vmatpush1.bf16.msra.mxu1 %v6108_v63  ;;  %v7961_v35 = vld [vmem:[#allocation82_spill] sm:$0xff]  ;;  %v7975_v63 = vld [vmem:[#allocation109_spill] sm:$0xff] }
 0x555   :  { %2656 = vmatprep.subr.bf16.mxu1 %v6112_v58  ;;  %v7976_v58 = vld [vmem:[#allocation111_spill] sm:$0xff] }
 0x557   :  { %2682 = vmatpush1.bf16.msra.mxu0 %v7953_v61 }
 0x558   :  { %2683 = vmatprep.subr.bf16.mxu0 %v7954_v34  ;;  %2657 = vmatpush1.bf16.msra.mxu1 %v7955_v18  ;;  %v7978_v34 = vld [vmem:[#allocation89_spill] sm:$0xff] }
 0x559   :  { %2658 = vmatprep.subr.bf16.mxu1 %v7956_v20  ;;  %v7979_v20 = vld [vmem:[#allocation91_spill] sm:$0xff] }
 0x55b   :  { %2684 = vmatpush1.bf16.msra.mxu0 %v7957_v38 }
 0x55c   :  { %2685 = vmatprep.subr.bf16.mxu0 %v7958_v8  ;;  %2659 = vmatpush1.bf16.msra.mxu1 %v7959_v24  ;;  %v7980_v8 = vld [vmem:[#allocation93_spill] sm:$0xff]  ;;  %v7981_v24 = vld [vmem:[#allocation96_spill] sm:$0xff] }
 0x55d   :  { %2660 = vmatprep.subr.bf16.mxu1 %v7960_v12  ;;  %v7982_v12 = vld [vmem:[#allocation100_spill] sm:$0xff] }
 0x55f   :  { %2686 = vmatpush1.bf16.msra.mxu0 %v7961_v35  ;;  %v7983_v35 = vld [vmem:[#allocation104_spill] sm:$0xff] }
 0x560   :  { %2687 = vmatprep.subr.bf16.mxu0 %v7962_v57  ;;  %2661 = vmatpush1.bf16.msra.mxu1 %v7963_v16  ;;  %v7984_v57 = vld [vmem:[#allocation108_spill] sm:$0xff] }
 0x561   :  { %2662 = vmatprep.subr.bf16.mxu1 %v7964_v17  ;;  %v7985_v16 = vld [vmem:[#allocation112_spill] sm:$0xff] }
 0x563   :  { %2688 = vmatpush1.bf16.msra.mxu0 %v7965_v59 }
 0x564   :  { %2689 = vmatprep.subr.bf16.mxu0 %v7966_v23  ;;  %2663 = vmatpush1.bf16.msra.mxu1 %v7967_v28 }
 0x565   :  { %2714 = vmatprep.subr.bf16.mxu1 %v7968_v26 }
 0x567   :  { %2690 = vmatpush1.bf16.msra.mxu0 %v7969_v52  ;;  %v7986_v52 = vld [vmem:[#allocation28_spill] sm:$0xff] }
 0x568   :  { %2691 = vmatprep.subr.bf16.mxu0 %v7970_v2 }
 0x56b   :  { %2692 = vmatpush1.bf16.msra.mxu0 %v7971_v48  ;;  %v7987_v48 = vld [vmem:[#allocation39_spill] sm:$0xff] }
 0x56c   :  { %2693 = vmatprep.subr.bf16.mxu0 %v7972_v60 }
 0x56f   :  { %2694 = vmatpush1.bf16.msra.mxu0 %v7973_v55 }
 0x570   :  { %2695 = vmatprep.subr.bf16.mxu0 %v7974_v30 }
 0x573   :  { %2696 = vmatpush1.bf16.msra.mxu0 %v7975_v63  ;;  %v7988_v63 = vld [vmem:[#allocation30_spill] sm:$0xff] }
 0x574   :  { %2697 = vmatprep.subr.bf16.mxu0 %v7976_v58 }
 0x575   :  { %v4265_v19 = vpop.xlane.xlu1 %4264 }
 0x576   :  { %v4290_v61 = vadd.f32 %v6497_v4, %v4265_v19  ;;  %v7989_v19 = vld [vmem:[#allocation41_spill] sm:$0xff] }
 0x577   :  { %2698 = vmatpush1.bf16.msra.mxu0 %v7978_v34 }
 0x578   :  { %v4298_v18 = vsub.f32 0.0, %v4290_v61  ;;  %2699 = vmatprep.subr.bf16.mxu0 %v7979_v20 }
 0x57a   :  { %v4308_v38 = vmul.f32 1.442695, %v4298_v18 }
 0x57b   :  { %2700 = vmatpush1.bf16.msra.mxu0 %v7980_v8 }
 0x57c   :  { %4688 = vpow2.f32 %v4308_v38  ;;  %2701 = vmatprep.subr.bf16.mxu0 %v7981_v24 }
 0x57f   :  { %2702 = vmatpush1.bf16.msra.mxu0 %v7982_v12  ;;  %v7990_v12 = vld [vmem:[#allocation40_spill] sm:$0xff] }
 0x580   :  { %2703 = vmatprep.subr.bf16.mxu0 %v7983_v35 }
 0x583   :  { %2704 = vmatpush1.bf16.msra.mxu0 %v7984_v57  ;;  %v7991_v57 = vld [vmem:[#allocation68_spill] sm:$0xff] }
 0x584   :  { %2755 = vmatprep.subr.bf16.mxu0 %v7985_v16 }
 0x586   :  { %v4689_v17 = vpop.eup %4688 }
 0x587   :  { %v4322_v59 = vadd.f32 1.0, %v4689_v17 }
 0x589   :  { %4690 = vrcp.f32 %v4322_v59 }
 0x593   :  { %v4691_v23 = vpop.eup %4690 }
 0x594   :  { %4339 = vst.msk [vmem:[%s7391_s6 + $0x10] sm:$0xff] %vm4336_vm1, %v4691_v23  ;;  %v7992_v23 = vld [vmem:[#allocation42_spill] sm:$0xff] }
 0x5b9   :  { %v2233_v28 = vpop.f32.mrb[60].mxu0  ;;  %v2274_v26 = vpop.f32.mrb[72].mxu1 }
 0x5ba   :  { %v2403_v2 = vadd.f32 %v2233_v28, %v7986_v52  ;;  %v6514_v60 = vadd.f32 %v2274_v26, %v7987_v48  ;;  %v2235_v55 = vpop.f32.mrb[61].mxu0  ;;  %v2276_v30 = vpop.f32.mrb[73].mxu1  ;;  %v7993_v26 = vld [vmem:[#allocation70_spill] sm:$0xff] }
 0x5bb   :  { %v2404_v58 = vadd.f32 %v2235_v55, %v7988_v63  ;;  %v2406_v61 = vadd.f32 %v2276_v30, %v7989_v19  ;;  %v2237_v34 = vpop.f32.mrb[62].mxu0  ;;  %v2278_v18 = vpop.f32.mrb[74].mxu1 }
 0x5bc   :  { %v2238_v20 = vpop.f32.mrb[63].mxu0  ;;  %v2279_v38 = vpop.f32.mrb[75].mxu1 }
 0x5bd   :  { %v2427_v63 = vmul.f32 %v2406_v61, %v2406_v61 }
 0x5f9   :  { %v2315_v8 = vpop.f32.mrb[64].mxu0  ;;  %v2356_v24 = vpop.f32.mrb[76].mxu1 }
 0x5fa   :  { %v2407_v35 = vadd.f32 %v2315_v8, %v7990_v12  ;;  %v2409_v16 = vadd.f32 %v2356_v24, %v7991_v57  ;;  %v2317_v17 = vpop.f32.mrb[65].mxu0  ;;  %v2358_v59 = vpop.f32.mrb[77].mxu1 }
 0x5fb   :  { %v2408_v28 = vadd.f32 %v2317_v17, %v7992_v23  ;;  %v2410_v52 = vadd.f32 %v2358_v59, %v7993_v26  ;;  %v2319_v48 = vpop.f32.mrb[66].mxu0  ;;  %v2360_v55 = vpop.f32.mrb[78].mxu1  ;;  %v2417_v23 = vsub.f32 0.0, %v2404_v58 }
 0x5fc   :  { %v2428_v30 = vmul.f32 %v2407_v35, %v2407_v35  ;;  %v2435_v19 = vmul.f32 %v2409_v16, %v2409_v16  ;;  %v2320_v34 = vpop.f32.mrb[67].mxu0  ;;  %v2361_v18 = vpop.f32.mrb[79].mxu1  ;;  %v2412_v48 = vsub.f32 0.0, %v2403_v2 }
 0x5fd   :  { %v2434_v20 = vmul.f32 %v2408_v28, %v2408_v28  ;;  %v2418_v55 = vmul.f32 1.442695, %v2417_v23 }
 0x5fe   :  { %v2429_v38 = vadd.f32 %v2428_v30, %v2427_v63  ;;  %v2413_v45 = vmul.f32 1.442695, %v2412_v48 }
 0x5ff   :  { %v2436_v4 = vadd.f32 %v2435_v19, %v2434_v20  ;;  %v2441_v20 = vmul.f32 %v2410_v52, %v2410_v52 }
 0x600   :  { %v2430_v46 = vmax.f32 %v2429_v38, 1.0 }
 0x601   :  { %v2437_v8 = vmax.f32 %v2436_v4, 1.0  ;;  %v7994_v4 = vld [vmem:[#allocation61_spill] sm:$0xff] }
 0x602   :  { %4692 = vrsqrt.f32 %v2430_v46 }
 0x603   :  { %4694 = vrsqrt.f32 %v2437_v8 }
 0x604   :  { %4696 = vpow2.f32 %v2418_v55 }
 0x605   :  { %4698 = vpow2.f32 %v2413_v45  ;;  %v2422_v45 = vsub.f32 0.0, %v6514_v60 }
 0x607   :  { %v2423_v48 = vmul.f32 1.442695, %v2422_v45 }
 0x60c   :  { %v4693_v24 = vpop.eup %4692 }
 0x60d   :  { %v4695_v12 = vpop.eup %4694  ;;  %v2433_v57 = vmul.f32 %v4693_v24, %v2407_v35  ;;  %v2432_v17 = vmul.f32 %v4693_v24, %v2406_v61 }
 0x60e   :  { %v2439_v59 = vmul.f32 %v4695_v12, %v2408_v28  ;;  %v2440_v26 = vmul.f32 %v4695_v12, %v2409_v16  ;;  %v4697_v8 = vpop.eup %4696 }
 0x60f   :  { %v4699_v61 = vpop.eup %4698  ;;  %v2420_v58 = vadd.f32 1.0, %v4697_v8 }
 0x610   :  { %v2415_v16 = vadd.f32 1.0, %v4699_v61 }
 0x619   :  { %v4502_v34 = vpop.f32.mrb[68].mxu0 }
 0x61a   :  { %v4503_v18 = vpop.f32.mrb[69].mxu0 }
 0x61b   :  { %v4504_v63 = vadd.f32 %v4503_v18, %v4502_v34  ;;  %v4505_v30 = vpop.f32.mrb[70].mxu0 }
 0x61c   :  { %v4506_v19 = vpop.f32.mrb[71].mxu0 }
 0x61d   :  { %v2411_v46 = vadd.f32 %v4504_v63, %v7994_v4 }
 0x61f   :  { %v2442_v38 = vmul.f32 %v2411_v46, %v2411_v46 }
 0x621   :  { %v2443_v35 = vadd.f32 %v2442_v38, %v2441_v20 }
 0x623   :  { %v2444_v28 = vmax.f32 %v2443_v35, 1.0 }
 0x625   :  { %4700 = vrsqrt.f32 %v2444_v28 }
 0x626   :  { %4702 = vrcp.f32 %v2420_v58 }
 0x627   :  { %4704 = vrcp.f32 %v2415_v16 }
 0x628   :  { %4706 = vpow2.f32 %v2423_v48 }
 0x62f   :  { %v4701_v2 = vpop.eup %4700 }
 0x630   :  { %v2446_v24 = vmul.f32 %v4701_v2, %v2410_v52  ;;  %v2447_v12 = vmul.f32 %v4701_v2, %v2411_v46  ;;  %v4703_v23 = vpop.eup %4702 }
 0x631   :  { %v4705_v18 = vpop.eup %4704 }
 0x632   :  { %v2448_v55 = vmul.f32 %v4703_v23, %v2446_v24  ;;  %v2449_v34 = vmul.f32 %v4703_v23, %v2447_v12  ;;  %v2450_v20 = vmul.f32 %v4705_v18, %v6181_v41  ;;  %v2455_v8 = vmul.f32 %v4705_v18, %v6183_v47  ;;  %v4707_v45 = vpop.eup %4706 }
 0x633   :  { %v2425_v47 = vadd.f32 1.0, %v4707_v45  ;;  %v8024_v45 = vld [vmem:[#allocation133_spill] sm:$0xff] }
 0x634   :  { %v2451_v63 = vmul.f32 %v2448_v55, %v2432_v17  ;;  %v2452_v30 = vmul.f32 %v2449_v34, %v2433_v57  ;;  %v2456_v19 = vmul.f32 %v2449_v34, %v2432_v17  ;;  %v2457_v4 = vmul.f32 %v2448_v55, %v2433_v57 }
 0x636   :  { %v2453_v38 = vsub.f32 %v2451_v63, %v2452_v30  ;;  %v2458_v35 = vadd.f32 %v2457_v4, %v2456_v19  ;;  %v8011_v4 = vld [vmem:[#allocation120_spill] sm:$0xff] }
 0x638   :  { %v6526_v60 = vadd.f32 %v2453_v38, %v2450_v20  ;;  %v6528_v52 = vadd.f32 %v2458_v35, %v2455_v8  ;;  %v8012_v20 = vld [vmem:[#allocation121_spill] sm:$0xff]  ;;  %v8013_v38 = vld [vmem:[#allocation122_spill] sm:$0xff]  ;;  %v8014_v8 = vld [vmem:[#allocation123_spill] sm:$0xff] }
 0x639   :  { %v8015_v35 = vld [vmem:[#allocation124_spill] sm:$0xff] }
 0x63a   :  { %v2460_v46 = vmul.f32 %v6526_v60, %v2439_v59  ;;  %v2461_v61 = vmul.f32 %v6528_v52, %v2440_v26  ;;  %v2463_v58 = vmul.f32 %v6528_v52, %v2439_v59  ;;  %v2464_v17 = vmul.f32 %v6526_v60, %v2440_v26 }
 0x63c   :  { %v2462_v57 = vsub.f32 %v2460_v46, %v2461_v61  ;;  %v2465_v28 = vadd.f32 %v2464_v17, %v2463_v58  ;;  %v8016_v46 = vld [vmem:[#allocation125_spill] sm:$0xff]  ;;  %v8017_v61 = vld [vmem:[#allocation126_spill] sm:$0xff]  ;;  %v8018_v58 = vld [vmem:[#allocation127_spill] sm:$0xff] }
 0x63d   :  { %v8019_v17 = vld [vmem:[#allocation128_spill] sm:$0xff] }
 0x63e   :  { %v2466_v16 = vmul.f32 %v2462_v57, %v2462_v57  ;;  %v2467_v41 = vmul.f32 %v2465_v28, %v2465_v28 }
 0x640   :  { %v2468_v2 = vadd.f32 %v2467_v41, %v2466_v16  ;;  %v8022_v16 = vld [vmem:[#allocation131_spill] sm:$0xff]  ;;  %v8023_v41 = vld [vmem:[#allocation132_spill] sm:$0xff] }
 0x642   :  { %v2469_v24 = vmax.f32 %v2468_v2, 1.0  ;;  %v8025_v2 = vld [vmem:[#allocation134_spill] sm:$0xff] }
 0x644   :  { %4708 = vrsqrt.f32 %v2469_v24  ;;  %v8027_v24 = vld [vmem:[#allocation136_spill] sm:$0xff] }
 0x645   :  { %4710 = vrcp.f32 %v2425_v47  ;;  %v8026_v47 = vld [vmem:[#allocation135_spill] sm:$0xff] }
 0x64e   :  { %v4709_v12 = vpop.eup %4708 }
 0x64f   :  { %v2472_v23 = vmul.f32 %v4709_v12, %v2465_v28  ;;  %v2471_v48 = vmul.f32 %v4709_v12, %v2462_v57  ;;  %v4711_v55 = vpop.eup %4710  ;;  %v8020_v57 = vld [vmem:[#allocation129_spill] sm:$0xff]  ;;  %v8021_v28 = vld [vmem:[#allocation130_spill] sm:$0xff] }
 0x650   :  { %v8028_v12 = vld [vmem:[#allocation137_spill] sm:$0xff] }
 0x651   :  { %v2474_v34 = vmul.f32 %v4711_v55, %v2472_v23  ;;  %v2473_v18 = vmul.f32 %v4711_v55, %v2471_v48  ;;  %v8029_v23 = vld [vmem:[#allocation138_spill] sm:$0xff]  ;;  %v8030_v48 = vld [vmem:[#allocation139_spill] sm:$0xff]  ;;  %v8031_v55 = vld [vmem:[#allocation140_spill] sm:$0xff] }
 0x653   :  { %v6534_v63 = vpack.c.bf16 %v2474_v34, %v2474_v34  ;;  %v6536_v59 = vpack.c.bf16 %v2473_v18, %v2473_v18  ;;  %v4247_v26 = vmul.f32 %v5508_v6, %v2473_v18  ;;  %v4248_v30 = vmul.f32 %v5512_v29, %v2474_v34  ;;  %v8032_v34 = vld [vmem:[#allocation141_spill] sm:$0xff]  ;;  %v8033_v18 = vld [vmem:[#allocation142_spill] sm:$0xff] }
 0x655   :  { %2664 = vmatprep.mubr.bf16.mxu1 %v6534_v63  ;;  %2705 = vmatprep.mubr.bf16.mxu0 %v6534_v63  ;;  %v4266_v19 = vadd.f32 %v4248_v30, %v4247_v26  ;;  %v8034_v26 = vld [vmem:[#allocation143_spill] sm:$0xff]  ;;  %v8035_v30 = vld [vmem:[#allocation144_spill] sm:$0xff] }
 0x656   :  { %2665 = vmatmul.mubr.bf16.vlgmr.msra.gmra.mrb[80].mxu1 %v6536_v59  ;;  %2706 = vmatmul.mubr.bf16.vlgmr.msra.gmra.mrb[72].mxu0 %v6536_v59 }
 0x657   :  { %2715 = vmatpush1.bf16.msra.mxu1 %v6195_v51  ;;  %2756 = vmatpush1.bf16.msra.mxu0 %v6197_v5  ;;  %v7995_v51 = vld [vmem:[#allocation20_spill] sm:$0xff]  ;;  %v7996_v5 = vld [vmem:[#allocation31_spill] sm:$0xff] }
 0x658   :  { %4267 = vadd.xlane.f32.xlu1 %v4266_v19  ;;  %2746 = vmatprep.mubr.bf16.mxu1 %v6534_v63  ;;  %v8036_v19 = vld [vmem:[#allocation145_spill] sm:$0xff] }
 0x659   :  { %2787 = vmatprep.mubr.bf16.mxu0 %v6534_v63  ;;  %2716 = vmatprep.subr.bf16.mxu1 %v6203_v43  ;;  %v7997_v43 = vld [vmem:[#allocation22_spill] sm:$0xff] }
 0x65a   :  { %2757 = vmatprep.subr.bf16.mxu0 %v6207_v9  ;;  %v7998_v9 = vld [vmem:[#allocation33_spill] sm:$0xff] }
 0x65b   :  { %2717 = vmatpush1.bf16.msra.mxu1 %v6210_v13  ;;  %2758 = vmatpush1.bf16.msra.mxu0 %v6212_v54  ;;  %v7999_v13 = vld [vmem:[#allocation32_spill] sm:$0xff] }
 0x65c   :  { %2718 = vmatprep.subr.bf16.mxu1 %v6216_v31  ;;  %2759 = vmatprep.subr.bf16.mxu0 %v6218_v22  ;;  %v8000_v54 = vld [vmem:[#allocation60_spill] sm:$0xff]  ;;  %v8001_v31 = vld [vmem:[#allocation34_spill] sm:$0xff] }
 0x65d   :  { %v8002_v22 = vld [vmem:[#allocation62_spill] sm:$0xff] }
 0x65f   :  { %2719 = vmatpush1.bf16.msra.mxu1 %v6225_v56  ;;  %2760 = vmatpush1.bf16.msra.mxu0 %v6227_v53  ;;  %v8003_v56 = vld [vmem:[#allocation63_spill] sm:$0xff]  ;;  %v8004_v53 = vld [vmem:[#allocation113_spill] sm:$0xff] }
 0x660   :  { %2720 = vmatprep.subr.bf16.mxu1 %v6229_v37  ;;  %2761 = vmatprep.subr.bf16.mxu0 %v6231_v11  ;;  %v8005_v37 = vld [vmem:[#allocation114_spill] sm:$0xff]  ;;  %v8006_v11 = vld [vmem:[#allocation115_spill] sm:$0xff] }
 0x663   :  { %2721 = vmatpush1.bf16.msra.mxu1 %v6237_v62  ;;  %2762 = vmatpush1.bf16.msra.mxu0 %v6239_v33  ;;  %v8007_v62 = vld [vmem:[#allocation116_spill] sm:$0xff]  ;;  %v8008_v33 = vld [vmem:[#allocation117_spill] sm:$0xff] }
 0x664   :  { %2722 = vmatprep.subr.bf16.mxu1 %v6241_v36  ;;  %2763 = vmatprep.subr.bf16.mxu0 %v6243_v25  ;;  %v8009_v36 = vld [vmem:[#allocation118_spill] sm:$0xff]  ;;  %v8010_v25 = vld [vmem:[#allocation119_spill] sm:$0xff] }
 0x667   :  { %2723 = vmatpush1.bf16.msra.mxu1 %v7995_v51  ;;  %2764 = vmatpush1.bf16.msra.mxu0 %v7996_v5  ;;  %v8037_v51 = vld [vmem:[#allocation146_spill] sm:$0xff]  ;;  %v8038_v5 = vld [vmem:[#allocation147_spill] sm:$0xff] }
 0x668   :  { %2724 = vmatprep.subr.bf16.mxu1 %v7997_v43  ;;  %2765 = vmatprep.subr.bf16.mxu0 %v7998_v9  ;;  %v6657_v43 = vld [vmem:[#allocation3 + $0x98] sm:$0xff]  ;;  %v6659_v9 = vld [vmem:[#allocation3 + $0xa8] sm:$0xff] }
 0x66b   :  { %2725 = vmatpush1.bf16.msra.mxu1 %v7999_v13  ;;  %2766 = vmatpush1.bf16.msra.mxu0 %v8000_v54  ;;  %v6663_v13 = vld [vmem:[#allocation3 + $0x90] sm:$0xff]  ;;  %v6665_v54 = vld [vmem:[#allocation3 + $0xa0] sm:$0xff] }
 0x66c   :  { %2726 = vmatprep.subr.bf16.mxu1 %v8001_v31  ;;  %2767 = vmatprep.subr.bf16.mxu0 %v8002_v22  ;;  %v6669_v31 = vld [vmem:[#allocation3 + $0xe0] sm:$0xff]  ;;  %v6671_v22 = vld [vmem:[#allocation3 + $0xf0] sm:$0xff] }
 0x66f   :  { %2727 = vmatpush1.bf16.msra.mxu1 %v8003_v56  ;;  %2768 = vmatpush1.bf16.msra.mxu0 %v8004_v53  ;;  %v6675_v56 = vld [vmem:[#allocation3 + $0xd8] sm:$0xff]  ;;  %v6677_v53 = vld [vmem:[#allocation3 + $0xe8] sm:$0xff] }
 0x670   :  { %2728 = vmatprep.subr.bf16.mxu1 %v8005_v37  ;;  %2769 = vmatprep.subr.bf16.mxu0 %v8006_v11  ;;  %v6681_v37 = vld [vmem:[#allocation3 + $0x128] sm:$0xff]  ;;  %v6683_v11 = vld [vmem:[#allocation3 + $0x138] sm:$0xff] }
 0x673   :  { %2729 = vmatpush1.bf16.msra.mxu1 %v8007_v62  ;;  %2770 = vmatpush1.bf16.msra.mxu0 %v8008_v33  ;;  %v6687_v62 = vld [vmem:[#allocation3 + $0x120] sm:$0xff]  ;;  %v6689_v33 = vld [vmem:[#allocation3 + $0x130] sm:$0xff] }
 0x674   :  { %2730 = vmatprep.subr.bf16.mxu1 %v8009_v36  ;;  %2771 = vmatprep.subr.bf16.mxu0 %v8010_v25  ;;  %8042 = vst [vmem:[#allocation151_spill] sm:$0xff] %v6689_v33  ;;  %v6693_v36 = vld [vmem:[#allocation3 + $0x170] sm:$0xff]  ;;  %v6695_v25 = vld [vmem:[#allocation3 + $0x180] sm:$0xff] }
 0x675   :  { %8043 = vst [vmem:[#allocation152_spill] sm:$0xff] %v6695_v25 }
 0x677   :  { %2731 = vmatpush1.bf16.msra.mxu1 %v8011_v4  ;;  %2772 = vmatpush1.bf16.msra.mxu0 %v8012_v20  ;;  %v6699_v4 = vld [vmem:[#allocation3 + $0x168] sm:$0xff]  ;;  %v6701_v20 = vld [vmem:[#allocation3 + $0x178] sm:$0xff] }
 0x678   :  { %2732 = vmatprep.subr.bf16.mxu1 %v8013_v38  ;;  %2773 = vmatprep.subr.bf16.mxu0 %v8014_v8  ;;  %8044 = vst [vmem:[#allocation153_spill] sm:$0xff] %v6701_v20  ;;  %v6705_v38 = vld [vmem:[#allocation3 + $0x1b8] sm:$0xff]  ;;  %v6707_v8 = vld [vmem:[#allocation3 + $0x1c8] sm:$0xff] }
 0x679   :  { %8045 = vst [vmem:[#allocation154_spill] sm:$0xff] %v6707_v8 }
 0x67b   :  { %2733 = vmatpush1.bf16.msra.mxu1 %v8015_v35  ;;  %2774 = vmatpush1.bf16.msra.mxu0 %v8016_v46  ;;  %v6711_v35 = vld [vmem:[#allocation3 + $0x1b0] sm:$0xff]  ;;  %v6713_v46 = vld [vmem:[#allocation3 + $0x1c0] sm:$0xff] }
 0x67c   :  { %2734 = vmatprep.subr.bf16.mxu1 %v8017_v61  ;;  %2775 = vmatprep.subr.bf16.mxu0 %v8018_v58  ;;  %8046 = vst [vmem:[#allocation155_spill] sm:$0xff] %v6713_v46  ;;  %v6717_v61 = vld [vmem:[#allocation3 + $0x200] sm:$0xff]  ;;  %v6719_v58 = vld [vmem:[#allocation3 + $0x210] sm:$0xff] }
 0x67d   :  { %8047 = vst [vmem:[#allocation156_spill] sm:$0xff] %v6719_v58 }
 0x67f   :  { %2735 = vmatpush1.bf16.msra.mxu1 %v8019_v17  ;;  %2776 = vmatpush1.bf16.msra.mxu0 %v8020_v57  ;;  %v6723_v17 = vld [vmem:[#allocation3 + $0x1f8] sm:$0xff]  ;;  %v6725_v57 = vld [vmem:[#allocation3 + $0x208] sm:$0xff] }
 0x680   :  { %2736 = vmatprep.subr.bf16.mxu1 %v8021_v28  ;;  %2777 = vmatprep.subr.bf16.mxu0 %v8022_v16  ;;  %8048 = vst [vmem:[#allocation157_spill] sm:$0xff] %v6725_v57  ;;  %v6729_v28 = vld [vmem:[#allocation3 + $0x248] sm:$0xff]  ;;  %v6731_v16 = vld [vmem:[#allocation3 + $0x258] sm:$0xff] }
 0x681   :  { %8049 = vst [vmem:[#allocation158_spill] sm:$0xff] %v6731_v16 }
 0x683   :  { %2737 = vmatpush1.bf16.msra.mxu1 %v8023_v41  ;;  %2778 = vmatpush1.bf16.msra.mxu0 %v8024_v45  ;;  %v6735_v41 = vld [vmem:[#allocation3 + $0x240] sm:$0xff]  ;;  %v6737_v45 = vld [vmem:[#allocation3 + $0x250] sm:$0xff] }
 0x684   :  { %2738 = vmatprep.subr.bf16.mxu1 %v8025_v2  ;;  %2779 = vmatprep.subr.bf16.mxu0 %v8026_v47  ;;  %8050 = vst [vmem:[#allocation95_spill] sm:$0xff] %v6737_v45 }
 0x687   :  { %2739 = vmatpush1.bf16.msra.mxu1 %v8027_v24  ;;  %2780 = vmatpush1.bf16.msra.mxu0 %v8028_v12  ;;  %v6741_v24 = vld [vmem:[#allocation3 + $0x290] sm:$0xff]  ;;  %v6743_v12 = vld [vmem:[#allocation3 + $0x2a0] sm:$0xff] }
 0x688   :  { %2740 = vmatprep.subr.bf16.mxu1 %v8029_v23  ;;  %2781 = vmatprep.subr.bf16.mxu0 %v8030_v48  ;;  %8051 = vst [vmem:[#allocation24_spill] sm:$0xff] %v6743_v12  ;;  %v8052_v23 = vld [vmem:[#allocation17_spill] sm:$0xff] }
 0x68b   :  { %2741 = vmatpush1.bf16.msra.mxu1 %v8031_v55  ;;  %2782 = vmatpush1.bf16.msra.mxu0 %v8032_v34  ;;  %v8053_v55 = vld [vmem:[#allocation43_spill] sm:$0xff] }
 0x68c   :  { %2742 = vmatprep.subr.bf16.mxu1 %v8033_v18  ;;  %2783 = vmatprep.subr.bf16.mxu0 %v8034_v26 }
 0x68f   :  { %2743 = vmatpush1.bf16.msra.mxu1 %v6369_v27  ;;  %2784 = vmatpush1.bf16.msra.mxu0 %v8035_v30  ;;  %v8040_v27 = vld [vmem:[#allocation149_spill] sm:$0xff] }
 0x690   :  { %2744 = vmatprep.subr.bf16.mxu1 %v6373_v32  ;;  %2785 = vmatprep.subr.bf16.mxu0 %v6375_v21  ;;  %v8039_v21 = vld [vmem:[#allocation148_spill] sm:$0xff]  ;;  %v8041_v32 = vld [vmem:[#allocation150_spill] sm:$0xff] }
 0x691   :  { %v6753_v30 = vld [vmem:[#allocation3 + $0x288] sm:$0xff] }
 0x693   :  { %2745 = vmatpush1.bf16.msra.mxu1 %v8036_v19  ;;  %2786 = vmatpush1.bf16.msra.mxu0 %v6383_v44  ;;  %v6755_v19 = vld [vmem:[#allocation3 + $0x298] sm:$0xff] }
 0x694   :  { %4508 = vmatprep.subr.bf16.mxu1 %v8037_v51  ;;  %8054 = vst [vmem:[#allocation35_spill] sm:$0xff] %v6755_v19  ;;  %v8055_v51 = vld [vmem:[#allocation18_spill] sm:$0xff] }
 0x696   :  { %2747 = vmatmul.mubr.bf16.vlgmr.msra.gmra.mrb[84].mxu1 %v6536_v59  ;;  %2788 = vmatmul.mubr.bf16.vlgmr.msra.gmra.mrb[76].mxu0 %v6536_v59 }
 0x697   :  { %4509 = vmatpush3.bf16.msra.mxu1 %v8038_v5  ;;  %2828 = vmatprep.mubr.bf16.mxu1 %v6534_v63  ;;  %v6651_v63 = vld [vmem:[#allocation3 + $0x48] sm:$0xff] }
 0x698   :  { %4510 = vmatprep.subr.bf16.mxu1 %v6393_v1 }
 0x69b   :  { %4511 = vmatpush3.bf16.msra.mxu1 %v6400_v0 }
 0x69c   :  { %4512 = vmatprep.subr.bf16.mxu1 %v6403_v49 }
 0x69f   :  { %4513 = vmatpush3.bf16.msra.mxu1 %v6408_v14 }
 0x6a0   :  { %4514 = vmatprep.subr.bf16.mxu1 %v6411_v39 }
 0x6a3   :  { %4515 = vmatpush3.bf16.msra.mxu1 %v6416_v10  ;;  %v6629_v10 = vld [vmem:[#allocation3 + $0x8] sm:$0xff] }
 0x6a4   :  { %4516 = vmatprep.subr.bf16.mxu1 %v6419_v15  ;;  %v6631_v15 = vld [vmem:[#allocation3 + $0x18] sm:$0xff]  ;;  %3065 = vmatprep.subr.bf16.mxu0 %v6629_v10 }
 0x6a7   :  { %4517 = vmatpush3.bf16.msra.mxu1 %v6424_v7  ;;  %v6633_v7 = vld [vmem:[#allocation3] sm:$0xff] }
 0x6a8   :  { %4518 = vmatprep.subr.bf16.mxu1 %v6427_v50  ;;  %v6637_v50 = vld [vmem:[#allocation3 + $0x10] sm:$0xff]  ;;  %3066 = vmatpush1.bf16.msra.mxu0 %v6633_v7 }
 0x6ab   :  { %4519 = vmatpush3.bf16.msra.mxu1 %v6432_v40 }
 0x6ac   :  { %4520 = vmatprep.subr.bf16.mxu1 %v6435_v42  ;;  %v6645_v42 = vld [vmem:[#allocation3 + $0x50] sm:$0xff] }
 0x6ad   :  { %3067 = vmatprep.subr.bf16.mxu0 %v6645_v42 }
 0x6ae   :  { %3068 = vmatpush1.bf16.msra.mxu0 %v6651_v63 }
 0x6af   :  { %4521 = vmatpush3.bf16.msra.mxu1 %v6440_v3  ;;  %v6647_v3 = vld [vmem:[#allocation3 + $0x60] sm:$0xff]  ;;  %3069 = vmatprep.subr.bf16.mxu0 %v6657_v43 }
 0x6b0   :  { %4522 = vmatprep.subr.bf16.mxu1 %v8039_v21  ;;  %v8056_v21 = vld [vmem:[#allocation45_spill] sm:$0xff] }
 0x6b2   :  { %3070 = vmatpush1.bf16.msra.mxu0 %v6663_v13 }
 0x6b3   :  { %4523 = vmatpush3.bf16.msra.mxu1 %v8040_v27  ;;  %3071 = vmatprep.subr.bf16.mxu0 %v6669_v31 }
 0x6b4   :  { %3106 = vmatprep.subr.bf16.mxu1 %v6631_v15 }
 0x6b6   :  { %2829 = vmatmul.mubr.bf16.vlgmr.msra.gmra.mrb[88].mxu1 %v6536_v59  ;;  %v6653_v59 = vld [vmem:[#allocation3 + $0x58] sm:$0xff]  ;;  %3072 = vmatpush1.bf16.msra.mxu0 %v6675_v56 }
 0x6b7   :  { %3107 = vmatpush1.bf16.msra.mxu1 %v6637_v50  ;;  %3073 = vmatprep.subr.bf16.mxu0 %v6681_v37 }
 0x6b8   :  { %3108 = vmatprep.subr.bf16.mxu1 %v6647_v3 }
 0x6ba   :  { %3074 = vmatpush1.bf16.msra.mxu0 %v6687_v62 }
 0x6bb   :  { %3109 = vmatpush1.bf16.msra.mxu1 %v6653_v59  ;;  %3075 = vmatprep.subr.bf16.mxu0 %v6693_v36 }
 0x6bc   :  { %3110 = vmatprep.subr.bf16.mxu1 %v6659_v9 }
 0x6be   :  { %3076 = vmatpush1.bf16.msra.mxu0 %v6699_v4 }
 0x6bf   :  { %3111 = vmatpush1.bf16.msra.mxu1 %v6665_v54  ;;  %3077 = vmatprep.subr.bf16.mxu0 %v6705_v38 }
 0x6c0   :  { %3112 = vmatprep.subr.bf16.mxu1 %v6671_v22 }
 0x6c2   :  { %3078 = vmatpush1.bf16.msra.mxu0 %v6711_v35 }
 0x6c3   :  { %3113 = vmatpush1.bf16.msra.mxu1 %v6677_v53  ;;  %3079 = vmatprep.subr.bf16.mxu0 %v6717_v61 }
 0x6c4   :  { %3114 = vmatprep.subr.bf16.mxu1 %v6683_v11 }
 0x6c6   :  { %3080 = vmatpush1.bf16.msra.mxu0 %v6723_v17 }
 0x6c7   :  { %3115 = vmatpush1.bf16.msra.mxu1 %v6689_v33  ;;  %3081 = vmatprep.subr.bf16.mxu0 %v6729_v28 }
 0x6c8   :  { %3116 = vmatprep.subr.bf16.mxu1 %v6695_v25 }
 0x6ca   :  { %3082 = vmatpush1.bf16.msra.mxu0 %v6735_v41 }
 0x6cb   :  { %3117 = vmatpush1.bf16.msra.mxu1 %v6701_v20  ;;  %3083 = vmatprep.subr.bf16.mxu0 %v6741_v24 }
 0x6cc   :  { %3118 = vmatprep.subr.bf16.mxu1 %v6707_v8 }
 0x6ce   :  { %3084 = vmatpush1.bf16.msra.mxu0 %v6753_v30 }
 0x6cf   :  { %3119 = vmatpush1.bf16.msra.mxu1 %v6713_v46  ;;  %v8081_v46 = vld [vmem:[#allocation73_spill] sm:$0xff] }
 0x6d0   :  { %3120 = vmatprep.subr.bf16.mxu1 %v6719_v58  ;;  %v8080_v58 = vld [vmem:[#allocation46_spill] sm:$0xff] }
 0x6d3   :  { %3121 = vmatpush1.bf16.msra.mxu1 %v6725_v57 }
 0x6d4   :  { %3122 = vmatprep.subr.bf16.mxu1 %v6731_v16  ;;  %v8079_v16 = vld [vmem:[#allocation72_spill] sm:$0xff] }
 0x6d7   :  { %3123 = vmatpush1.bf16.msra.mxu1 %v6737_v45  ;;  %v8078_v45 = vld [vmem:[#allocation44_spill] sm:$0xff] }
 0x6d8   :  { %3124 = vmatprep.subr.bf16.mxu1 %v6743_v12 }
 0x6db   :  { %3125 = vmatpush1.bf16.msra.mxu1 %v6755_v19  ;;  %v6839_v19 = vld [vmem:[#allocation3 + $0x38] sm:$0xff] }
 0x6dc   :  { %8077 = vst [vmem:[#allocation103_spill] sm:$0xff] %v6839_v19 }
 0x6e5   :  { %v4268_v1 = vpop.xlane.xlu1 %4267 }
 0x6e6   :  { %v4291_v39 = vadd.f32 %v8041_v32, %v4268_v1 }
 0x6e8   :  { %v4299_v0 = vsub.f32 0.0, %v4291_v39 }
 0x6ea   :  { %v4310_v44 = vmul.f32 1.442695, %v4299_v0 }
 0x6ec   :  { %4712 = vpow2.f32 %v4310_v44  ;;  %v6765_v44 = vld [vmem:[#allocation3 + $0x2d8] sm:$0xff] }
 0x6ed   :  { %3085 = vmatprep.subr.bf16.mxu0 %v6765_v44 }
 0x6f6   :  { %v4713_v49 = vpop.eup %4712 }
 0x6f7   :  { %v4323_v14 = vadd.f32 1.0, %v4713_v49  ;;  %v6767_v49 = vld [vmem:[#allocation3 + $0x2e8] sm:$0xff] }
 0x6f8   :  { %8057 = vst [vmem:[#allocation26_spill] sm:$0xff] %v6767_v49  ;;  %3126 = vmatprep.subr.bf16.mxu1 %v6767_v49  ;;  %v6833_v49 = vld [vmem:[#allocation3 + $0x448] sm:$0xff] }
 0x6f9   :  { %4714 = vrcp.f32 %v4323_v14  ;;  %v6771_v14 = vld [vmem:[#allocation3 + $0x2d0] sm:$0xff]  ;;  %8075 = vst [vmem:[#allocation102_spill] sm:$0xff] %v6833_v49 }
 0x6fa   :  { %3086 = vmatpush1.bf16.msra.mxu0 %v6771_v14 }
 0x703   :  { %v4715_v40 = vpop.eup %4714 }
 0x704   :  { %4340 = vst.msk [vmem:[%s7391_s6 + $0x18] sm:$0xff] %vm4336_vm1, %v4715_v40  ;;  %v6773_v40 = vld [vmem:[#allocation3 + $0x2e0] sm:$0xff] }
 0x705   :  { %8058 = vst [vmem:[#allocation37_spill] sm:$0xff] %v6773_v40  ;;  %3127 = vmatpush1.bf16.msra.mxu1 %v6773_v40  ;;  %v6825_v40 = vld [vmem:[#allocation3 + $0x450] sm:$0xff] }
 0x706   :  { %8073 = vst [vmem:[#allocation83_spill] sm:$0xff] %v6825_v40 }
 0x729   :  { %v2666_v2 = vpop.f32.mrb[80].mxu1  ;;  %v2707_v47 = vpop.f32.mrb[72].mxu0 }
 0x72a   :  { %v6746_v48 = vadd.f32 %v2666_v2, %v8052_v23  ;;  %v6749_v34 = vadd.f32 %v2707_v47, %v8053_v55  ;;  %v2668_v18 = vpop.f32.mrb[81].mxu1  ;;  %v2709_v26 = vpop.f32.mrb[73].mxu0  ;;  %v6777_v2 = vld [vmem:[#allocation3 + $0x320] sm:$0xff]  ;;  %v6779_v47 = vld [vmem:[#allocation3 + $0x330] sm:$0xff]  ;;  %v6783_v23 = vld [vmem:[#allocation3 + $0x318] sm:$0xff] }
 0x72b   :  { %v6758_v5 = vadd.f32 %v2668_v18, %v8055_v51  ;;  %v6761_v27 = vadd.f32 %v2709_v26, %v8056_v21  ;;  %v2670_v1 = vpop.f32.mrb[82].mxu1  ;;  %v2711_v32 = vpop.f32.mrb[74].mxu0  ;;  %8059 = vst [vmem:[#allocation36_spill] sm:$0xff] %v6779_v47  ;;  %3087 = vmatprep.subr.bf16.mxu0 %v6777_v2  ;;  %3128 = vmatprep.subr.bf16.mxu1 %v6779_v47  ;;  %v6785_v55 = vld [vmem:[#allocation3 + $0x328] sm:$0xff]  ;;  %v6789_v26 = vld [vmem:[#allocation3 + $0x378] sm:$0xff]  ;;  %v6795_v51 = vld [vmem:[#allocation3 + $0x360] sm:$0xff] }
 0x72c   :  { %v2671_v39 = vpop.f32.mrb[83].mxu1  ;;  %v2712_v0 = vpop.f32.mrb[75].mxu0  ;;  %8060 = vst [vmem:[#allocation64_spill] sm:$0xff] %v6785_v55  ;;  %v6787_v18 = vld [vmem:[#allocation3 + $0x368] sm:$0xff]  ;;  %8061 = vst [vmem:[#allocation38_spill] sm:$0xff] %v6789_v26  ;;  %3088 = vmatpush1.bf16.msra.mxu0 %v6783_v23  ;;  %3129 = vmatpush1.bf16.msra.mxu1 %v6785_v55  ;;  %v6797_v21 = vld [vmem:[#allocation3 + $0x370] sm:$0xff] }
 0x72d   :  { %3089 = vmatprep.subr.bf16.mxu0 %v6787_v18  ;;  %3130 = vmatprep.subr.bf16.mxu1 %v6789_v26  ;;  %8062 = vst [vmem:[#allocation66_spill] sm:$0xff] %v6795_v51  ;;  %8063 = vst [vmem:[#allocation59_spill] sm:$0xff] %v6797_v21  ;;  %v6799_v1 = vld [vmem:[#allocation3 + $0x3b0] sm:$0xff]  ;;  %v6801_v32 = vld [vmem:[#allocation3 + $0x3c0] sm:$0xff]  ;;  %v2860_v8 = vmul.f32 %v6761_v27, %v6761_v27  ;;  %v2845_v33 = vsub.f32 0.0, %v6746_v48 }
 0x72e   :  { %8064 = vst [vmem:[#allocation80_spill] sm:$0xff] %v6799_v1  ;;  %8065 = vst [vmem:[#allocation81_spill] sm:$0xff] %v6801_v32  ;;  %v6807_v39 = vld [vmem:[#allocation3 + $0x3a8] sm:$0xff]  ;;  %v6809_v0 = vld [vmem:[#allocation3 + $0x3b8] sm:$0xff] }
 0x72f   :  { %8066 = vst [vmem:[#allocation88_spill] sm:$0xff] %v6807_v39  ;;  %8067 = vst [vmem:[#allocation90_spill] sm:$0xff] %v6809_v0  ;;  %v6811_v26 = vld [vmem:[#allocation3 + $0x3f8] sm:$0xff]  ;;  %v6813_v55 = vld [vmem:[#allocation3 + $0x408] sm:$0xff] }
 0x730   :  { %3090 = vmatpush1.bf16.msra.mxu0 %v6795_v51  ;;  %3131 = vmatpush1.bf16.msra.mxu1 %v6797_v21  ;;  %8068 = vst [vmem:[#allocation97_spill] sm:$0xff] %v6811_v26  ;;  %8069 = vst [vmem:[#allocation99_spill] sm:$0xff] %v6813_v55  ;;  %v6819_v21 = vld [vmem:[#allocation3 + $0x3f0] sm:$0xff]  ;;  %v6821_v47 = vld [vmem:[#allocation3 + $0x400] sm:$0xff] }
 0x731   :  { %3091 = vmatprep.subr.bf16.mxu0 %v6799_v1  ;;  %3132 = vmatprep.subr.bf16.mxu1 %v6801_v32  ;;  %8070 = vst [vmem:[#allocation92_spill] sm:$0xff] %v6819_v21  ;;  %8071 = vst [vmem:[#allocation94_spill] sm:$0xff] %v6821_v47  ;;  %v6823_v32 = vld [vmem:[#allocation3 + $0x440] sm:$0xff] }
 0x732   :  { %8072 = vst [vmem:[#allocation82_spill] sm:$0xff] %v6823_v32 }
 0x734   :  { %3092 = vmatpush1.bf16.msra.mxu0 %v6807_v39  ;;  %3133 = vmatpush1.bf16.msra.mxu1 %v6809_v0  ;;  %v6831_v0 = vld [vmem:[#allocation3 + $0x438] sm:$0xff] }
 0x735   :  { %3093 = vmatprep.subr.bf16.mxu0 %v6811_v26  ;;  %3134 = vmatprep.subr.bf16.mxu1 %v6813_v55  ;;  %8074 = vst [vmem:[#allocation98_spill] sm:$0xff] %v6831_v0  ;;  %v6837_v55 = vld [vmem:[#allocation3 + $0x28] sm:$0xff] }
 0x736   :  { %8076 = vst [vmem:[#allocation101_spill] sm:$0xff] %v6837_v55 }
 0x738   :  { %3094 = vmatpush1.bf16.msra.mxu0 %v6819_v21  ;;  %3135 = vmatpush1.bf16.msra.mxu1 %v6821_v47 }
 0x739   :  { %3095 = vmatprep.subr.bf16.mxu0 %v6823_v32  ;;  %3136 = vmatprep.subr.bf16.mxu1 %v6825_v40 }
 0x73c   :  { %3096 = vmatpush1.bf16.msra.mxu0 %v6831_v0  ;;  %3137 = vmatpush1.bf16.msra.mxu1 %v6833_v49 }
 0x73d   :  { %3147 = vmatprep.subr.bf16.mxu0 %v6837_v55  ;;  %3188 = vmatprep.subr.bf16.mxu1 %v6839_v19 }
 0x769   :  { %v2748_v47 = vpop.f32.mrb[84].mxu1  ;;  %v2789_v12 = vpop.f32.mrb[76].mxu0 }
 0x76a   :  { %v2840_v40 = vadd.f32 %v2748_v47, %v8078_v45  ;;  %v2842_v57 = vadd.f32 %v2789_v12, %v8079_v16  ;;  %v2750_v32 = vpop.f32.mrb[85].mxu1  ;;  %v2791_v21 = vpop.f32.mrb[77].mxu0 }
 0x76b   :  { %v2841_v0 = vadd.f32 %v2750_v32, %v8080_v58  ;;  %v2843_v49 = vadd.f32 %v2791_v21, %v8081_v46  ;;  %v2752_v26 = vpop.f32.mrb[86].mxu1  ;;  %v2793_v39 = vpop.f32.mrb[78].mxu0 }
 0x76c   :  { %v2861_v55 = vmul.f32 %v2840_v40, %v2840_v40  ;;  %v2868_v20 = vmul.f32 %v2842_v57, %v2842_v57  ;;  %v2753_v19 = vpop.f32.mrb[87].mxu1  ;;  %v2794_v1 = vpop.f32.mrb[79].mxu0  ;;  %v2850_v26 = vsub.f32 0.0, %v6758_v5 }
 0x76d   :  { %v2867_v51 = vmul.f32 %v2841_v0, %v2841_v0  ;;  %v2846_v1 = vmul.f32 1.442695, %v2845_v33  ;;  %v2855_v33 = vsub.f32 0.0, %v6749_v34 }
 0x76e   :  { %v2862_v25 = vadd.f32 %v2861_v55, %v2860_v8  ;;  %v2851_v19 = vmul.f32 1.442695, %v2850_v26 }
 0x76f   :  { %v2869_v45 = vadd.f32 %v2868_v20, %v2867_v51 }
 0x770   :  { %v2863_v47 = vmax.f32 %v2862_v25, 1.0 }
 0x771   :  { %v2870_v16 = vmax.f32 %v2869_v45, 1.0  ;;  %v8082_v45 = vld [vmem:[#allocation67_spill] sm:$0xff] }
 0x772   :  { %4716 = vrsqrt.f32 %v2863_v47 }
 0x773   :  { %4718 = vrsqrt.f32 %v2870_v16 }
 0x774   :  { %4720 = vpow2.f32 %v2851_v19 }
 0x775   :  { %4722 = vpow2.f32 %v2846_v1 }
 0x77c   :  { %v4717_v12 = vpop.eup %4716 }
 0x77d   :  { %v4719_v58 = vpop.eup %4718  ;;  %v2866_v32 = vmul.f32 %v4717_v12, %v2840_v40  ;;  %v2865_v46 = vmul.f32 %v4717_v12, %v6761_v27  ;;  %v2874_v40 = vmul.f32 %v2843_v49, %v2843_v49 }
 0x77e   :  { %v2872_v21 = vmul.f32 %v4719_v58, %v2841_v0  ;;  %v2873_v39 = vmul.f32 %v4719_v58, %v2842_v57  ;;  %v4721_v27 = vpop.eup %4720 }
 0x77f   :  { %v4723_v5 = vpop.eup %4722  ;;  %v2853_v0 = vadd.f32 1.0, %v4721_v27 }
 0x780   :  { %v2848_v58 = vadd.f32 1.0, %v4723_v5 }
 0x789   :  { %v4524_v20 = vpop.f32.mrb[88].mxu1 }
 0x78a   :  { %v4525_v25 = vpop.f32.mrb[89].mxu1 }
 0x78b   :  { %v4526_v8 = vadd.f32 %v4525_v25, %v4524_v20  ;;  %v4527_v55 = vpop.f32.mrb[90].mxu1  ;;  %v2856_v20 = vmul.f32 1.442695, %v2855_v33 }
 0x78c   :  { %v4528_v51 = vpop.f32.mrb[91].mxu1 }
 0x78d   :  { %v2844_v47 = vadd.f32 %v4526_v8, %v8082_v45 }
 0x78f   :  { %v2875_v16 = vmul.f32 %v2844_v47, %v2844_v47 }
 0x791   :  { %v2876_v12 = vadd.f32 %v2875_v16, %v2874_v40 }
 0x793   :  { %v2877_v57 = vmax.f32 %v2876_v12, 1.0 }
 0x795   :  { %4724 = vrsqrt.f32 %v2877_v57 }
 0x796   :  { %4726 = vrcp.f32 %v2853_v0 }
 0x797   :  { %4728 = vrcp.f32 %v2848_v58 }
 0x798   :  { %4730 = vpow2.f32 %v2856_v20 }
 0x79f   :  { %v4725_v48 = vpop.eup %4724 }
 0x7a0   :  { %v2879_v26 = vmul.f32 %v4725_v48, %v2843_v49  ;;  %v2880_v19 = vmul.f32 %v4725_v48, %v2844_v47  ;;  %v4727_v1 = vpop.eup %4726 }
 0x7a1   :  { %v4729_v55 = vpop.eup %4728 }
 0x7a2   :  { %v2881_v25 = vmul.f32 %v4727_v1, %v2879_v26  ;;  %v2882_v8 = vmul.f32 %v4727_v1, %v2880_v19  ;;  %v2883_v27 = vmul.f32 %v4729_v55, %v6526_v60  ;;  %v2888_v5 = vmul.f32 %v4729_v55, %v6528_v52  ;;  %v4731_v26 = vpop.eup %4730 }
 0x7a3   :  { %v2858_v52 = vadd.f32 1.0, %v4731_v26  ;;  %v6906_v26 = vld [vmem:[#allocation3 + $0x110] sm:$0xff] }
 0x7a4   :  { %v2884_v51 = vmul.f32 %v2881_v25, %v2865_v46  ;;  %v2885_v45 = vmul.f32 %v2882_v8, %v2866_v32  ;;  %v2889_v40 = vmul.f32 %v2882_v8, %v2865_v46  ;;  %v2890_v16 = vmul.f32 %v2881_v25, %v2866_v32 }
 0x7a6   :  { %v2886_v12 = vsub.f32 %v2884_v51, %v2885_v45  ;;  %v2891_v0 = vadd.f32 %v2890_v16, %v2889_v40 }
 0x7a8   :  { %v6856_v34 = vadd.f32 %v2886_v12, %v2883_v27  ;;  %v6858_v49 = vadd.f32 %v2891_v0, %v2888_v5  ;;  %v6870_v27 = vld [vmem:[#allocation3 + $0x20] sm:$0xff]  ;;  %v6872_v12 = vld [vmem:[#allocation3 + $0x30] sm:$0xff] }
 0x7a9   :  { %v6878_v0 = vld [vmem:[#allocation3 + $0x70] sm:$0xff] }
 0x7aa   :  { %v2893_v47 = vmul.f32 %v6856_v34, %v2872_v21  ;;  %v2894_v57 = vmul.f32 %v6858_v49, %v2873_v39  ;;  %v2896_v58 = vmul.f32 %v6858_v49, %v2872_v21  ;;  %v2897_v46 = vmul.f32 %v6856_v34, %v2873_v39 }
 0x7ac   :  { %v2895_v32 = vsub.f32 %v2893_v47, %v2894_v57  ;;  %v2898_v33 = vadd.f32 %v2897_v46, %v2896_v58  ;;  %v6882_v47 = vld [vmem:[#allocation3 + $0x80] sm:$0xff]  ;;  %v6885_v57 = vld [vmem:[#allocation3 + $0x68] sm:$0xff]  ;;  %v6887_v58 = vld [vmem:[#allocation3 + $0x78] sm:$0xff] }
 0x7ad   :  { %v6891_v46 = vld [vmem:[#allocation3 + $0xb8] sm:$0xff] }
 0x7ae   :  { %v2899_v48 = vmul.f32 %v2895_v32, %v2895_v32  ;;  %v2900_v60 = vmul.f32 %v2898_v33, %v2898_v33 }
 0x7b0   :  { %v2901_v19 = vadd.f32 %v2900_v60, %v2899_v48  ;;  %v6902_v48 = vld [vmem:[#allocation3 + $0xc0] sm:$0xff] }
 0x7b1   :  { %v6904_v60 = vld [vmem:[#allocation3 + $0x100] sm:$0xff] }
 0x7b2   :  { %v2902_v1 = vmax.f32 %v2901_v19, 1.0  ;;  %v6912_v19 = vld [vmem:[#allocation3 + $0xf8] sm:$0xff] }
 0x7b4   :  { %4732 = vrsqrt.f32 %v2902_v1  ;;  %v6916_v1 = vld [vmem:[#allocation3 + $0x148] sm:$0xff] }
 0x7b5   :  { %4734 = vrcp.f32 %v2858_v52  ;;  %v6914_v52 = vld [vmem:[#allocation3 + $0x108] sm:$0xff] }
 0x7be   :  { %v4733_v20 = vpop.eup %4732 }
 0x7bf   :  { %v2905_v25 = vmul.f32 %v4733_v20, %v2898_v33  ;;  %v2904_v8 = vmul.f32 %v4733_v20, %v2895_v32  ;;  %v4735_v55 = vpop.eup %4734  ;;  %v6893_v32 = vld [vmem:[#allocation3 + $0xc8] sm:$0xff]  ;;  %v6900_v33 = vld [vmem:[#allocation3 + $0xb0] sm:$0xff]  ;;  %v6918_v20 = vld [vmem:[#allocation3 + $0x158] sm:$0xff] }
 0x7c1   :  { %v2907_v51 = vmul.f32 %v4735_v55, %v2905_v25  ;;  %v2906_v45 = vmul.f32 %v4735_v55, %v2904_v8  ;;  %v6924_v25 = vld [vmem:[#allocation3 + $0x140] sm:$0xff]  ;;  %v6926_v8 = vld [vmem:[#allocation3 + $0x150] sm:$0xff] }
 0x7c2   :  { %8083 = vst [vmem:[#allocation106_spill] sm:$0xff] %v6924_v25  ;;  %8084 = vst [vmem:[#allocation110_spill] sm:$0xff] %v6926_v8  ;;  %v6928_v55 = vld [vmem:[#allocation3 + $0x190] sm:$0xff] }
 0x7c3   :  { %v6864_v40 = vpack.c.bf16 %v2907_v51, %v2907_v51  ;;  %v6866_v21 = vpack.c.bf16 %v2906_v45, %v2906_v45  ;;  %v4249_v39 = vmul.f32 %v5508_v6, %v2906_v45  ;;  %v4250_v16 = vmul.f32 %v5512_v29, %v2907_v51  ;;  %8085 = vst [vmem:[#allocation84_spill] sm:$0xff] %v6928_v55  ;;  %v6930_v51 = vld [vmem:[#allocation3 + $0x1a0] sm:$0xff]  ;;  %v6936_v45 = vld [vmem:[#allocation3 + $0x188] sm:$0xff] }
 0x7c4   :  { %8086 = vst [vmem:[#allocation85_spill] sm:$0xff] %v6930_v51  ;;  %8087 = vst [vmem:[#allocation105_spill] sm:$0xff] %v6936_v45 }
 0x7c5   :  { %3097 = vmatprep.mubr.bf16.mxu0 %v6864_v40  ;;  %3138 = vmatprep.mubr.bf16.mxu1 %v6864_v40  ;;  %v4269_v5 = vadd.f32 %v4250_v16, %v4249_v39  ;;  %v6938_v39 = vld [vmem:[#allocation3 + $0x198] sm:$0xff] }
 0x7c6   :  { %3098 = vmatmul.mubr.bf16.vlgmr.msra.gmra.mrb[80].mxu0 %v6866_v21  ;;  %3139 = vmatmul.mubr.bf16.vlgmr.msra.gmra.mrb[92].mxu1 %v6866_v21  ;;  %8088 = vst [vmem:[#allocation107_spill] sm:$0xff] %v6938_v39  ;;  %v6940_v16 = vld [vmem:[#allocation3 + $0x1d8] sm:$0xff] }
 0x7c7   :  { %3148 = vmatpush1.bf16.msra.mxu0 %v6870_v27  ;;  %3189 = vmatpush1.bf16.msra.mxu1 %v6872_v12  ;;  %8089 = vst [vmem:[#allocation86_spill] sm:$0xff] %v6940_v16 }
 0x7c8   :  { %4270 = vadd.xlane.f32.xlu0 %v4269_v5  ;;  %3179 = vmatprep.mubr.bf16.mxu0 %v6864_v40  ;;  %v6942_v5 = vld [vmem:[#allocation3 + $0x1e8] sm:$0xff] }
 0x7c9   :  { %3220 = vmatprep.mubr.bf16.mxu1 %v6864_v40  ;;  %3149 = vmatprep.subr.bf16.mxu0 %v6878_v0  ;;  %8090 = vst [vmem:[#allocation87_spill] sm:$0xff] %v6942_v5 }
 0x7ca   :  { %3190 = vmatprep.subr.bf16.mxu1 %v6882_v47 }
 0x7cb   :  { %3150 = vmatpush1.bf16.msra.mxu0 %v6885_v57  ;;  %3191 = vmatpush1.bf16.msra.mxu1 %v6887_v58 }
 0x7cc   :  { %3151 = vmatprep.subr.bf16.mxu0 %v6891_v46  ;;  %3192 = vmatprep.subr.bf16.mxu1 %v6893_v32 }
 0x7cf   :  { %3152 = vmatpush1.bf16.msra.mxu0 %v6900_v33  ;;  %3193 = vmatpush1.bf16.msra.mxu1 %v6902_v48 }
 0x7d0   :  { %3153 = vmatprep.subr.bf16.mxu0 %v6904_v60  ;;  %3194 = vmatprep.subr.bf16.mxu1 %v6906_v26 }
 0x7d3   :  { %3154 = vmatpush1.bf16.msra.mxu0 %v6912_v19  ;;  %3195 = vmatpush1.bf16.msra.mxu1 %v6914_v52 }
 0x7d4   :  { %3155 = vmatprep.subr.bf16.mxu0 %v6916_v1  ;;  %3196 = vmatprep.subr.bf16.mxu1 %v6918_v20 }
 0x7d7   :  { %3156 = vmatpush1.bf16.msra.mxu0 %v6924_v25  ;;  %3197 = vmatpush1.bf16.msra.mxu1 %v6926_v8  ;;  %v6948_v8 = vld [vmem:[#allocation3 + $0x1d0] sm:$0xff] }
 0x7d8   :  { %3157 = vmatprep.subr.bf16.mxu0 %v6928_v55  ;;  %3198 = vmatprep.subr.bf16.mxu1 %v6930_v51  ;;  %8091 = vst [vmem:[#allocation109_spill] sm:$0xff] %v6948_v8  ;;  %v6950_v55 = vld [vmem:[#allocation3 + $0x1e0] sm:$0xff]  ;;  %v6954_v25 = vld [vmem:[#allocation3 + $0x230] sm:$0xff] }
 0x7d9   :  { %8092 = vst [vmem:[#allocation111_spill] sm:$0xff] %v6950_v55  ;;  %v6952_v51 = vld [vmem:[#allocation3 + $0x220] sm:$0xff]  ;;  %8094 = vst [vmem:[#allocation91_spill] sm:$0xff] %v6954_v25 }
 0x7da   :  { %8093 = vst [vmem:[#allocation89_spill] sm:$0xff] %v6952_v51 }
 0x7db   :  { %3158 = vmatpush1.bf16.msra.mxu0 %v6936_v45  ;;  %3199 = vmatpush1.bf16.msra.mxu1 %v6938_v39  ;;  %v6960_v39 = vld [vmem:[#allocation3 + $0x218] sm:$0xff] }
 0x7dc   :  { %3159 = vmatprep.subr.bf16.mxu0 %v6940_v16  ;;  %3200 = vmatprep.subr.bf16.mxu1 %v6942_v5  ;;  %8095 = vst [vmem:[#allocation93_spill] sm:$0xff] %v6960_v39  ;;  %v6962_v16 = vld [vmem:[#allocation3 + $0x228] sm:$0xff]  ;;  %v6966_v45 = vld [vmem:[#allocation3 + $0x278] sm:$0xff] }
 0x7dd   :  { %8096 = vst [vmem:[#allocation96_spill] sm:$0xff] %v6962_v16  ;;  %v6964_v5 = vld [vmem:[#allocation3 + $0x268] sm:$0xff]  ;;  %8098 = vst [vmem:[#allocation104_spill] sm:$0xff] %v6966_v45 }
 0x7de   :  { %8097 = vst [vmem:[#allocation100_spill] sm:$0xff] %v6964_v5 }
 0x7df   :  { %3160 = vmatpush1.bf16.msra.mxu0 %v6948_v8  ;;  %3201 = vmatpush1.bf16.msra.mxu1 %v6950_v55  ;;  %v6972_v55 = vld [vmem:[#allocation3 + $0x260] sm:$0xff] }
 0x7e0   :  { %3161 = vmatprep.subr.bf16.mxu0 %v6952_v51  ;;  %3202 = vmatprep.subr.bf16.mxu1 %v6954_v25  ;;  %8099 = vst [vmem:[#allocation108_spill] sm:$0xff] %v6972_v55  ;;  %v6974_v51 = vld [vmem:[#allocation3 + $0x270] sm:$0xff]  ;;  %v6978_v8 = vld [vmem:[#allocation3 + $0x2c0] sm:$0xff] }
 0x7e1   :  { %8100 = vst [vmem:[#allocation112_spill] sm:$0xff] %v6974_v51  ;;  %v6976_v25 = vld [vmem:[#allocation3 + $0x2b0] sm:$0xff]  ;;  %8102 = vst [vmem:[#allocation39_spill] sm:$0xff] %v6978_v8 }
 0x7e2   :  { %8101 = vst [vmem:[#allocation28_spill] sm:$0xff] %v6976_v25 }
 0x7e3   :  { %3162 = vmatpush1.bf16.msra.mxu0 %v6960_v39  ;;  %3203 = vmatpush1.bf16.msra.mxu1 %v6962_v16  ;;  %v6984_v16 = vld [vmem:[#allocation3 + $0x2a8] sm:$0xff] }
 0x7e4   :  { %3163 = vmatprep.subr.bf16.mxu0 %v6964_v5  ;;  %3204 = vmatprep.subr.bf16.mxu1 %v6966_v45  ;;  %8103 = vst [vmem:[#allocation30_spill] sm:$0xff] %v6984_v16  ;;  %v6986_v5 = vld [vmem:[#allocation3 + $0x2b8] sm:$0xff]  ;;  %v6990_v39 = vld [vmem:[#allocation3 + $0x308] sm:$0xff] }
 0x7e5   :  { %8104 = vst [vmem:[#allocation41_spill] sm:$0xff] %v6986_v5  ;;  %v6988_v45 = vld [vmem:[#allocation3 + $0x2f8] sm:$0xff]  ;;  %8106 = vst [vmem:[#allocation68_spill] sm:$0xff] %v6990_v39 }
 0x7e6   :  { %8105 = vst [vmem:[#allocation40_spill] sm:$0xff] %v6988_v45 }
 0x7e7   :  { %3164 = vmatpush1.bf16.msra.mxu0 %v6972_v55  ;;  %3205 = vmatpush1.bf16.msra.mxu1 %v6974_v51  ;;  %v6996_v51 = vld [vmem:[#allocation3 + $0x2f0] sm:$0xff] }
 0x7e8   :  { %3165 = vmatprep.subr.bf16.mxu0 %v6976_v25  ;;  %3206 = vmatprep.subr.bf16.mxu1 %v6978_v8  ;;  %8107 = vst [vmem:[#allocation42_spill] sm:$0xff] %v6996_v51  ;;  %v6998_v25 = vld [vmem:[#allocation3 + $0x300] sm:$0xff]  ;;  %v7002_v55 = vld [vmem:[#allocation3 + $0x350] sm:$0xff] }
 0x7e9   :  { %8108 = vst [vmem:[#allocation70_spill] sm:$0xff] %v6998_v25  ;;  %v7000_v8 = vld [vmem:[#allocation3 + $0x340] sm:$0xff]  ;;  %8110 = vst [vmem:[#allocation20_spill] sm:$0xff] %v7002_v55 }
 0x7ea   :  { %8109 = vst [vmem:[#allocation61_spill] sm:$0xff] %v7000_v8 }
 0x7eb   :  { %3166 = vmatpush1.bf16.msra.mxu0 %v6984_v16  ;;  %3207 = vmatpush1.bf16.msra.mxu1 %v6986_v5  ;;  %v7008_v5 = vld [vmem:[#allocation3 + $0x338] sm:$0xff] }
 0x7ec   :  { %3167 = vmatprep.subr.bf16.mxu0 %v6988_v45  ;;  %3208 = vmatprep.subr.bf16.mxu1 %v6990_v39  ;;  %8111 = vst [vmem:[#allocation31_spill] sm:$0xff] %v7008_v5  ;;  %v7010_v45 = vld [vmem:[#allocation3 + $0x348] sm:$0xff]  ;;  %v7014_v16 = vld [vmem:[#allocation3 + $0x398] sm:$0xff] }
 0x7ed   :  { %8112 = vst [vmem:[#allocation22_spill] sm:$0xff] %v7010_v45  ;;  %v7012_v39 = vld [vmem:[#allocation3 + $0x388] sm:$0xff]  ;;  %8114 = vst [vmem:[#allocation32_spill] sm:$0xff] %v7014_v16 }
 0x7ee   :  { %8113 = vst [vmem:[#allocation33_spill] sm:$0xff] %v7012_v39 }
 0x7ef   :  { %3168 = vmatpush1.bf16.msra.mxu0 %v6996_v51  ;;  %3209 = vmatpush1.bf16.msra.mxu1 %v6998_v25  ;;  %v7020_v25 = vld [vmem:[#allocation3 + $0x380] sm:$0xff] }
 0x7f0   :  { %3169 = vmatprep.subr.bf16.mxu0 %v7000_v8  ;;  %3210 = vmatprep.subr.bf16.mxu1 %v7002_v55  ;;  %8115 = vst [vmem:[#allocation60_spill] sm:$0xff] %v7020_v25  ;;  %v7022_v8 = vld [vmem:[#allocation3 + $0x390] sm:$0xff]  ;;  %v7026_v51 = vld [vmem:[#allocation3 + $0x3e0] sm:$0xff] }
 0x7f1   :  { %8116 = vst [vmem:[#allocation34_spill] sm:$0xff] %v7022_v8  ;;  %v7024_v55 = vld [vmem:[#allocation3 + $0x3d0] sm:$0xff]  ;;  %8118 = vst [vmem:[#allocation63_spill] sm:$0xff] %v7026_v51 }
 0x7f2   :  { %8117 = vst [vmem:[#allocation62_spill] sm:$0xff] %v7024_v55 }
 0x7f3   :  { %3170 = vmatpush1.bf16.msra.mxu0 %v7008_v5  ;;  %3211 = vmatpush1.bf16.msra.mxu1 %v7010_v45  ;;  %v7032_v45 = vld [vmem:[#allocation3 + $0x3c8] sm:$0xff] }
 0x7f4   :  { %3171 = vmatprep.subr.bf16.mxu0 %v7012_v39  ;;  %3212 = vmatprep.subr.bf16.mxu1 %v7014_v16  ;;  %8119 = vst [vmem:[#allocation113_spill] sm:$0xff] %v7032_v45  ;;  %v7034_v39 = vld [vmem:[#allocation3 + $0x3d8] sm:$0xff]  ;;  %v7038_v5 = vld [vmem:[#allocation3 + $0x428] sm:$0xff] }
 0x7f5   :  { %8120 = vst [vmem:[#allocation114_spill] sm:$0xff] %v7034_v39  ;;  %v7036_v16 = vld [vmem:[#allocation3 + $0x418] sm:$0xff]  ;;  %8122 = vst [vmem:[#allocation116_spill] sm:$0xff] %v7038_v5 }
 0x7f6   :  { %8121 = vst [vmem:[#allocation115_spill] sm:$0xff] %v7036_v16 }
 0x7f7   :  { %3172 = vmatpush1.bf16.msra.mxu0 %v7020_v25  ;;  %3213 = vmatpush1.bf16.msra.mxu1 %v7022_v8  ;;  %v7044_v8 = vld [vmem:[#allocation3 + $0x410] sm:$0xff] }
 0x7f8   :  { %3173 = vmatprep.subr.bf16.mxu0 %v7024_v55  ;;  %3214 = vmatprep.subr.bf16.mxu1 %v7026_v51  ;;  %v7046_v55 = vld [vmem:[#allocation3 + $0x420] sm:$0xff]  ;;  %v7050_v25 = vld [vmem:[#allocation3 + $0x470] sm:$0xff] }
 0x7f9   :  { %8123 = vst [vmem:[#allocation117_spill] sm:$0xff] %v7046_v55  ;;  %v7048_v51 = vld [vmem:[#allocation3 + $0x460] sm:$0xff] }
 0x7fb   :  { %3174 = vmatpush1.bf16.msra.mxu0 %v7032_v45  ;;  %3215 = vmatpush1.bf16.msra.mxu1 %v7034_v39  ;;  %v7056_v39 = vld [vmem:[#allocation3 + $0x458] sm:$0xff]  ;;  %v7065_v45 = vld [vmem:[#allocation3 + $0x40] sm:$0xff] }
 0x7fc   :  { %3175 = vmatprep.subr.bf16.mxu0 %v7036_v16  ;;  %3216 = vmatprep.subr.bf16.mxu1 %v7038_v5  ;;  %8124 = vst [vmem:[#allocation118_spill] sm:$0xff] %v7056_v39  ;;  %v7058_v16 = vld [vmem:[#allocation3 + $0x468] sm:$0xff]  ;;  %v7060_v5 = vld [vmem:[#allocation3 + $0x280] sm:$0xff]  ;;  %8126 = vst [vmem:[#allocation120_spill] sm:$0xff] %v7065_v45 }
 0x7fd   :  { %8125 = vst [vmem:[#allocation119_spill] sm:$0xff] %v7060_v5 }
 0x7ff   :  { %3176 = vmatpush1.bf16.msra.mxu0 %v7044_v8  ;;  %3217 = vmatpush1.bf16.msra.mxu1 %v7046_v55  ;;  %v7068_v55 = vld [vmem:[#allocation3 + $0x2c8] sm:$0xff] }
 0x800   :  { %3177 = vmatprep.subr.bf16.mxu0 %v7048_v51  ;;  %3218 = vmatprep.subr.bf16.mxu1 %v7050_v25 }
 0x803   :  { %3178 = vmatpush1.bf16.msra.mxu0 %v7056_v39  ;;  %3219 = vmatpush1.bf16.msra.mxu1 %v7058_v16  ;;  %v7075_v39 = vld [vmem:[#allocation3 + $0x88] sm:$0xff] }
 0x804   :  { %4530 = vmatprep.subr.bf16.mxu0 %v7060_v5  ;;  %3498 = vmatprep.subr.bf16.mxu1 %v6629_v10  ;;  %v7078_v5 = vld [vmem:[#allocation3 + $0x310] sm:$0xff] }
 0x805   :  { %v7083_v10 = vld [vmem:[#allocation3 + $0xd0] sm:$0xff] }
 0x806   :  { %3180 = vmatmul.mubr.bf16.vlgmr.msra.gmra.mrb[84].mxu0 %v6866_v21  ;;  %3221 = vmatmul.mubr.bf16.vlgmr.msra.gmra.mrb[96].mxu1 %v6866_v21 }
 0x807   :  { %4531 = vmatpush3.bf16.msra.mxu0 %v7065_v45  ;;  %3261 = vmatprep.mubr.bf16.mxu0 %v6864_v40  ;;  %v7086_v45 = vld [vmem:[#allocation3 + $0x358] sm:$0xff] }
 0x808   :  { %4532 = vmatprep.subr.bf16.mxu0 %v7068_v55  ;;  %3499 = vmatpush1.bf16.msra.mxu1 %v6633_v7  ;;  %v7091_v7 = vld [vmem:[#allocation3 + $0x118] sm:$0xff] }
 0x809   :  { %3500 = vmatprep.subr.bf16.mxu1 %v6645_v42  ;;  %v7094_v42 = vld [vmem:[#allocation3 + $0x3a0] sm:$0xff] }
 0x80b   :  { %4533 = vmatpush3.bf16.msra.mxu0 %v7075_v39 }
 0x80c   :  { %4534 = vmatprep.subr.bf16.mxu0 %v7078_v5  ;;  %3501 = vmatpush1.bf16.msra.mxu1 %v6651_v63  ;;  %v7099_v63 = vld [vmem:[#allocation3 + $0x160] sm:$0xff] }
 0x80d   :  { %3502 = vmatprep.subr.bf16.mxu1 %v6657_v43  ;;  %v7102_v43 = vld [vmem:[#allocation3 + $0x3e8] sm:$0xff] }
 0x80f   :  { %4535 = vmatpush3.bf16.msra.mxu0 %v7083_v10 }
 0x810   :  { %4536 = vmatprep.subr.bf16.mxu0 %v7086_v45  ;;  %3503 = vmatpush1.bf16.msra.mxu1 %v6663_v13  ;;  %v7107_v13 = vld [vmem:[#allocation3 + $0x1a8] sm:$0xff] }
 0x811   :  { %3504 = vmatprep.subr.bf16.mxu1 %v6669_v31  ;;  %v7110_v31 = vld [vmem:[#allocation3 + $0x430] sm:$0xff] }
 0x813   :  { %4537 = vmatpush3.bf16.msra.mxu0 %v7091_v7 }
 0x814   :  { %4538 = vmatprep.subr.bf16.mxu0 %v7094_v42  ;;  %3505 = vmatpush1.bf16.msra.mxu1 %v6675_v56  ;;  %v7115_v56 = vld [vmem:[#allocation3 + $0x1f0] sm:$0xff] }
 0x815   :  { %3506 = vmatprep.subr.bf16.mxu1 %v6681_v37  ;;  %v7118_v37 = vld [vmem:[#allocation3 + $0x478] sm:$0xff] }
 0x816   :  { %8127 = vst [vmem:[#allocation121_spill] sm:$0xff] %v7118_v37 }
 0x817   :  { %4539 = vmatpush3.bf16.msra.mxu0 %v7099_v63 }
 0x818   :  { %4540 = vmatprep.subr.bf16.mxu0 %v7102_v43  ;;  %3507 = vmatpush1.bf16.msra.mxu1 %v6687_v62  ;;  %v7123_v62 = vld [vmem:[#allocation3 + $0x238] sm:$0xff] }
 0x819   :  { %3508 = vmatprep.subr.bf16.mxu1 %v6693_v36  ;;  %8128 = vst [vmem:[#allocation122_spill] sm:$0xff] %v7123_v62  ;;  %v8138_v36 = vld [vmem:[#allocation156_spill] sm:$0xff] }
 0x81b   :  { %4541 = vmatpush3.bf16.msra.mxu0 %v7107_v13 }
 0x81c   :  { %4542 = vmatprep.subr.bf16.mxu0 %v7110_v31  ;;  %3509 = vmatpush1.bf16.msra.mxu1 %v6699_v4  ;;  %v8139_v4 = vld [vmem:[#allocation92_spill] sm:$0xff] }
 0x81d   :  { %3510 = vmatprep.subr.bf16.mxu1 %v6705_v38  ;;  %v8140_v38 = vld [vmem:[#allocation82_spill] sm:$0xff] }
 0x81f   :  { %4543 = vmatpush3.bf16.msra.mxu0 %v7115_v56 }
 0x820   :  { %4544 = vmatprep.subr.bf16.mxu0 %v7118_v37  ;;  %3511 = vmatpush1.bf16.msra.mxu1 %v6711_v35  ;;  %v8141_v35 = vld [vmem:[#allocation157_spill] sm:$0xff] }
 0x821   :  { %3512 = vmatprep.subr.bf16.mxu1 %v6717_v61  ;;  %v8142_v61 = vld [vmem:[#allocation158_spill] sm:$0xff] }
 0x823   :  { %4545 = vmatpush3.bf16.msra.mxu0 %v7123_v62 }
 0x824   :  { %3539 = vmatprep.subr.bf16.mxu0 %v6631_v15  ;;  %3513 = vmatpush1.bf16.msra.mxu1 %v6723_v17  ;;  %v8129_v15 = vld [vmem:[#allocation151_spill] sm:$0xff]  ;;  %v8143_v17 = vld [vmem:[#allocation98_spill] sm:$0xff] }
 0x825   :  { %3514 = vmatprep.subr.bf16.mxu1 %v6729_v28  ;;  %v8144_v28 = vld [vmem:[#allocation101_spill] sm:$0xff] }
 0x826   :  { %3262 = vmatmul.mubr.bf16.vlgmr.msra.gmra.mrb[88].mxu0 %v6866_v21  ;;  %v7172_v21 = vld [vmem:[#allocation9] ss:$0 sm:$0xff] }
 0x827   :  { %3540 = vmatpush1.bf16.msra.mxu0 %v6637_v50  ;;  %v8130_v50 = vld [vmem:[#allocation152_spill] sm:$0xff]  ;;  %8153 = vst [vmem:[#allocation123_spill] sm:$0xff] %v7172_v21 }
 0x828   :  { %3541 = vmatprep.subr.bf16.mxu0 %v6647_v3  ;;  %3515 = vmatpush1.bf16.msra.mxu1 %v6735_v41  ;;  %v8131_v3 = vld [vmem:[#allocation66_spill] sm:$0xff]  ;;  %v8145_v41 = vld [vmem:[#allocation95_spill] sm:$0xff] }
 0x829   :  { %3516 = vmatprep.subr.bf16.mxu1 %v6741_v24  ;;  %v8146_v24 = vld [vmem:[#allocation24_spill] sm:$0xff] }
 0x82b   :  { %3542 = vmatpush1.bf16.msra.mxu0 %v6653_v59  ;;  %v8132_v59 = vld [vmem:[#allocation80_spill] sm:$0xff] }
 0x82c   :  { %3543 = vmatprep.subr.bf16.mxu0 %v6659_v9  ;;  %3517 = vmatpush1.bf16.msra.mxu1 %v6753_v30  ;;  %v8133_v9 = vld [vmem:[#allocation153_spill] sm:$0xff]  ;;  %v8147_v30 = vld [vmem:[#allocation35_spill] sm:$0xff] }
 0x82d   :  { %3518 = vmatprep.subr.bf16.mxu1 %v6765_v44  ;;  %v8148_v44 = vld [vmem:[#allocation26_spill] sm:$0xff] }
 0x82f   :  { %3544 = vmatpush1.bf16.msra.mxu0 %v6665_v54  ;;  %v8134_v54 = vld [vmem:[#allocation154_spill] sm:$0xff] }
 0x830   :  { %3545 = vmatprep.subr.bf16.mxu0 %v6671_v22  ;;  %3519 = vmatpush1.bf16.msra.mxu1 %v6771_v14  ;;  %v8135_v22 = vld [vmem:[#allocation88_spill] sm:$0xff]  ;;  %v8149_v14 = vld [vmem:[#allocation37_spill] sm:$0xff] }
 0x831   :  { %3520 = vmatprep.subr.bf16.mxu1 %v6777_v2  ;;  %v8150_v2 = vld [vmem:[#allocation36_spill] sm:$0xff] }
 0x833   :  { %3546 = vmatpush1.bf16.msra.mxu0 %v6677_v53  ;;  %v8136_v53 = vld [vmem:[#allocation97_spill] sm:$0xff] }
 0x834   :  { %3547 = vmatprep.subr.bf16.mxu0 %v6683_v11  ;;  %3521 = vmatpush1.bf16.msra.mxu1 %v6783_v23  ;;  %v8137_v11 = vld [vmem:[#allocation155_spill] sm:$0xff]  ;;  %v8151_v23 = vld [vmem:[#allocation64_spill] sm:$0xff] }
 0x835   :  { %3522 = vmatprep.subr.bf16.mxu1 %v6787_v18  ;;  %v8152_v18 = vld [vmem:[#allocation38_spill] sm:$0xff] }
 0x837   :  { %3548 = vmatpush1.bf16.msra.mxu0 %v8129_v15 }
 0x838   :  { %3549 = vmatprep.subr.bf16.mxu0 %v8130_v50  ;;  %3523 = vmatpush1.bf16.msra.mxu1 %v8131_v3  ;;  %v8154_v50 = vld [vmem:[#allocation59_spill] sm:$0xff] }
 0x839   :  { %3524 = vmatprep.subr.bf16.mxu1 %v8132_v59  ;;  %v8155_v59 = vld [vmem:[#allocation81_spill] sm:$0xff] }
 0x83b   :  { %3550 = vmatpush1.bf16.msra.mxu0 %v8133_v9 }
 0x83c   :  { %3551 = vmatprep.subr.bf16.mxu0 %v8134_v54  ;;  %3525 = vmatpush1.bf16.msra.mxu1 %v8135_v22  ;;  %v8156_v54 = vld [vmem:[#allocation90_spill] sm:$0xff]  ;;  %v8157_v22 = vld [vmem:[#allocation99_spill] sm:$0xff] }
 0x83d   :  { %3526 = vmatprep.subr.bf16.mxu1 %v8136_v53  ;;  %v8158_v53 = vld [vmem:[#allocation94_spill] sm:$0xff] }
 0x83f   :  { %3552 = vmatpush1.bf16.msra.mxu0 %v8137_v11  ;;  %v8159_v11 = vld [vmem:[#allocation83_spill] sm:$0xff] }
 0x840   :  { %3553 = vmatprep.subr.bf16.mxu0 %v8138_v36  ;;  %3527 = vmatpush1.bf16.msra.mxu1 %v8139_v4  ;;  %v8160_v36 = vld [vmem:[#allocation102_spill] sm:$0xff]  ;;  %v8161_v4 = vld [vmem:[#allocation103_spill] sm:$0xff] }
 0x841   :  { %3528 = vmatprep.subr.bf16.mxu1 %v8140_v38 }
 0x843   :  { %3554 = vmatpush1.bf16.msra.mxu0 %v8141_v35 }
 0x844   :  { %3555 = vmatprep.subr.bf16.mxu0 %v8142_v61  ;;  %3529 = vmatpush1.bf16.msra.mxu1 %v8143_v17 }
 0x845   :  { %3580 = vmatprep.subr.bf16.mxu1 %v8144_v28 }
 0x847   :  { %3556 = vmatpush1.bf16.msra.mxu0 %v8145_v41  ;;  %v8162_v41 = vld [vmem:[#allocation19_spill] sm:$0xff] }
 0x848   :  { %3557 = vmatprep.subr.bf16.mxu0 %v8146_v24 }
 0x84b   :  { %3558 = vmatpush1.bf16.msra.mxu0 %v8147_v30  ;;  %v8163_v30 = vld [vmem:[#allocation47_spill] sm:$0xff] }
 0x84c   :  { %3559 = vmatprep.subr.bf16.mxu0 %v8148_v44 }
 0x84f   :  { %3560 = vmatpush1.bf16.msra.mxu0 %v8149_v14 }
 0x850   :  { %3561 = vmatprep.subr.bf16.mxu0 %v8150_v2 }
 0x853   :  { %3562 = vmatpush1.bf16.msra.mxu0 %v8151_v23  ;;  %v8164_v23 = vld [vmem:[#allocation21_spill] sm:$0xff] }
 0x854   :  { %3563 = vmatprep.subr.bf16.mxu0 %v8152_v18 }
 0x855   :  { %v4271_v40 = vpop.xlane.xlu0 %4270 }
 0x856   :  { %v4292_v15 = vadd.f32 %v7172_v21, %v4271_v40  ;;  %v8165_v40 = vld [vmem:[#allocation49_spill] sm:$0xff] }
 0x857   :  { %3564 = vmatpush1.bf16.msra.mxu0 %v8154_v50 }
 0x858   :  { %v4300_v3 = vsub.f32 0.0, %v4292_v15  ;;  %3565 = vmatprep.subr.bf16.mxu0 %v8155_v59 }
 0x85a   :  { %v4312_v9 = vmul.f32 1.442695, %v4300_v3 }
 0x85b   :  { %3566 = vmatpush1.bf16.msra.mxu0 %v8156_v54 }
 0x85c   :  { %4736 = vpow2.f32 %v4312_v9  ;;  %3567 = vmatprep.subr.bf16.mxu0 %v8157_v22 }
 0x85f   :  { %3568 = vmatpush1.bf16.msra.mxu0 %v8158_v53  ;;  %v8166_v53 = vld [vmem:[#allocation48_spill] sm:$0xff] }
 0x860   :  { %3569 = vmatprep.subr.bf16.mxu0 %v8159_v11 }
 0x863   :  { %3570 = vmatpush1.bf16.msra.mxu0 %v8160_v36  ;;  %v8167_v36 = vld [vmem:[#allocation74_spill] sm:$0xff] }
 0x864   :  { %3621 = vmatprep.subr.bf16.mxu0 %v8161_v4 }
 0x866   :  { %v4737_v38 = vpop.eup %4736 }
 0x867   :  { %v4324_v35 = vadd.f32 1.0, %v4737_v38 }
 0x869   :  { %4738 = vrcp.f32 %v4324_v35 }
 0x873   :  { %v4739_v61 = vpop.eup %4738 }
 0x874   :  { %4341 = vst.msk [vmem:[%s7391_s6 + $0x20] sm:$0xff] %vm4336_vm1, %v4739_v61  ;;  %v8168_v61 = vld [vmem:[#allocation50_spill] sm:$0xff] }
 0x899   :  { %v3099_v17 = vpop.f32.mrb[80].mxu0  ;;  %v3140_v28 = vpop.f32.mrb[92].mxu1 }
 0x89a   :  { %v3269_v24 = vadd.f32 %v3099_v17, %v8162_v41  ;;  %v7189_v44 = vadd.f32 %v3140_v28, %v8163_v30  ;;  %v3101_v14 = vpop.f32.mrb[81].mxu0  ;;  %v3142_v2 = vpop.f32.mrb[93].mxu1  ;;  %v8169_v28 = vld [vmem:[#allocation75_spill] sm:$0xff] }
 0x89b   :  { %v3270_v18 = vadd.f32 %v3101_v14, %v8164_v23  ;;  %v3272_v15 = vadd.f32 %v3142_v2, %v8165_v40  ;;  %v3103_v50 = vpop.f32.mrb[82].mxu0  ;;  %v3144_v3 = vpop.f32.mrb[94].mxu1 }
 0x89c   :  { %v3104_v59 = vpop.f32.mrb[83].mxu0  ;;  %v3145_v9 = vpop.f32.mrb[95].mxu1 }
 0x89d   :  { %v3293_v23 = vmul.f32 %v3272_v15, %v3272_v15 }
 0x8d9   :  { %v3181_v54 = vpop.f32.mrb[84].mxu0  ;;  %v3222_v22 = vpop.f32.mrb[96].mxu1 }
 0x8da   :  { %v3273_v11 = vadd.f32 %v3181_v54, %v8166_v53  ;;  %v3275_v4 = vadd.f32 %v3222_v22, %v8167_v36  ;;  %v3183_v38 = vpop.f32.mrb[85].mxu0  ;;  %v3224_v35 = vpop.f32.mrb[97].mxu1 }
 0x8db   :  { %v3274_v17 = vadd.f32 %v3183_v38, %v8168_v61  ;;  %v3276_v41 = vadd.f32 %v3224_v35, %v8169_v28  ;;  %v3185_v30 = vpop.f32.mrb[86].mxu0  ;;  %v3226_v14 = vpop.f32.mrb[98].mxu1  ;;  %v3283_v61 = vsub.f32 0.0, %v3270_v18 }
 0x8dc   :  { %v3294_v2 = vmul.f32 %v3273_v11, %v3273_v11  ;;  %v3301_v40 = vmul.f32 %v3275_v4, %v3275_v4  ;;  %v3186_v50 = vpop.f32.mrb[87].mxu0  ;;  %v3227_v3 = vpop.f32.mrb[99].mxu1  ;;  %v3278_v30 = vsub.f32 0.0, %v3269_v24 }
 0x8dd   :  { %v3300_v59 = vmul.f32 %v3274_v17, %v3274_v17  ;;  %v3284_v14 = vmul.f32 1.442695, %v3283_v61 }
 0x8de   :  { %v3295_v9 = vadd.f32 %v3294_v2, %v3293_v23  ;;  %v3279_v37 = vmul.f32 1.442695, %v3278_v30 }
 0x8df   :  { %v3302_v21 = vadd.f32 %v3301_v40, %v3300_v59  ;;  %v3307_v59 = vmul.f32 %v3276_v41, %v3276_v41 }
 0x8e0   :  { %v3296_v62 = vmax.f32 %v3295_v9, 1.0 }
 0x8e1   :  { %v3303_v54 = vmax.f32 %v3302_v21, 1.0  ;;  %v8170_v21 = vld [vmem:[#allocation71_spill] sm:$0xff] }
 0x8e2   :  { %4740 = vrsqrt.f32 %v3296_v62 }
 0x8e3   :  { %4742 = vrsqrt.f32 %v3303_v54 }
 0x8e4   :  { %4744 = vpow2.f32 %v3284_v14 }
 0x8e5   :  { %4746 = vpow2.f32 %v3279_v37  ;;  %v3288_v37 = vsub.f32 0.0, %v7189_v44 }
 0x8e7   :  { %v3289_v30 = vmul.f32 1.442695, %v3288_v37 }
 0x8ec   :  { %v4741_v22 = vpop.eup %4740 }
 0x8ed   :  { %v4743_v53 = vpop.eup %4742  ;;  %v3299_v36 = vmul.f32 %v4741_v22, %v3273_v11  ;;  %v3298_v38 = vmul.f32 %v4741_v22, %v3272_v15 }
 0x8ee   :  { %v3305_v35 = vmul.f32 %v4743_v53, %v3274_v17  ;;  %v3306_v28 = vmul.f32 %v4743_v53, %v3275_v4  ;;  %v4745_v54 = vpop.eup %4744 }
 0x8ef   :  { %v4747_v15 = vpop.eup %4746  ;;  %v3286_v18 = vadd.f32 1.0, %v4745_v54 }
 0x8f0   :  { %v3281_v4 = vadd.f32 1.0, %v4747_v15 }
 0x8f9   :  { %v4546_v50 = vpop.f32.mrb[88].mxu0 }
 0x8fa   :  { %v4547_v3 = vpop.f32.mrb[89].mxu0 }
 0x8fb   :  { %v4548_v23 = vadd.f32 %v4547_v3, %v4546_v50  ;;  %v4549_v2 = vpop.f32.mrb[90].mxu0 }
 0x8fc   :  { %v4550_v40 = vpop.f32.mrb[91].mxu0 }
 0x8fd   :  { %v3277_v62 = vadd.f32 %v4548_v23, %v8170_v21 }
 0x8ff   :  { %v3308_v9 = vmul.f32 %v3277_v62, %v3277_v62 }
 0x901   :  { %v3309_v11 = vadd.f32 %v3308_v9, %v3307_v59 }
 0x903   :  { %v3310_v17 = vmax.f32 %v3309_v11, 1.0 }
 0x905   :  { %4748 = vrsqrt.f32 %v3310_v17 }
 0x906   :  { %4750 = vrcp.f32 %v3286_v18 }
 0x907   :  { %4752 = vrcp.f32 %v3281_v4 }
 0x908   :  { %4754 = vpow2.f32 %v3289_v30 }
 0x90f   :  { %v4749_v24 = vpop.eup %4748 }
 0x910   :  { %v3312_v22 = vmul.f32 %v4749_v24, %v3276_v41  ;;  %v3313_v53 = vmul.f32 %v4749_v24, %v3277_v62  ;;  %v4751_v61 = vpop.eup %4750 }
 0x911   :  { %v4753_v3 = vpop.eup %4752 }
 0x912   :  { %v3314_v14 = vmul.f32 %v4751_v61, %v3312_v22  ;;  %v3315_v50 = vmul.f32 %v4751_v61, %v3313_v53  ;;  %v3316_v59 = vmul.f32 %v4753_v3, %v6856_v34  ;;  %v3321_v54 = vmul.f32 %v4753_v3, %v6858_v49  ;;  %v4755_v37 = vpop.eup %4754 }
 0x913   :  { %v3291_v49 = vadd.f32 1.0, %v4755_v37  ;;  %v8200_v37 = vld [vmem:[#allocation22_spill] sm:$0xff] }
 0x914   :  { %v3317_v23 = vmul.f32 %v3314_v14, %v3298_v38  ;;  %v3318_v2 = vmul.f32 %v3315_v50, %v3299_v36  ;;  %v3322_v40 = vmul.f32 %v3315_v50, %v3298_v38  ;;  %v3323_v21 = vmul.f32 %v3314_v14, %v3299_v36 }
 0x916   :  { %v3319_v9 = vsub.f32 %v3317_v23, %v3318_v2  ;;  %v3324_v11 = vadd.f32 %v3323_v21, %v3322_v40  ;;  %v8187_v21 = vld [vmem:[#allocation108_spill] sm:$0xff] }
 0x918   :  { %v7201_v44 = vadd.f32 %v3319_v9, %v3316_v59  ;;  %v7203_v41 = vadd.f32 %v3324_v11, %v3321_v54  ;;  %v8188_v59 = vld [vmem:[#allocation112_spill] sm:$0xff]  ;;  %v8190_v54 = vld [vmem:[#allocation39_spill] sm:$0xff]  ;;  %v8191_v11 = vld [vmem:[#allocation30_spill] sm:$0xff] }
 0x919   :  { %v8189_v9 = vld [vmem:[#allocation28_spill] sm:$0xff] }
 0x91a   :  { %v3326_v62 = vmul.f32 %v7201_v44, %v3305_v35  ;;  %v3327_v15 = vmul.f32 %v7203_v41, %v3306_v28  ;;  %v3329_v18 = vmul.f32 %v7203_v41, %v3305_v35  ;;  %v3330_v38 = vmul.f32 %v7201_v44, %v3306_v28 }
 0x91c   :  { %v3328_v36 = vsub.f32 %v3326_v62, %v3327_v15  ;;  %v3331_v17 = vadd.f32 %v3330_v38, %v3329_v18  ;;  %v8192_v62 = vld [vmem:[#allocation41_spill] sm:$0xff]  ;;  %v8193_v15 = vld [vmem:[#allocation40_spill] sm:$0xff]  ;;  %v8195_v38 = vld [vmem:[#allocation42_spill] sm:$0xff] }
 0x91d   :  { %v8194_v18 = vld [vmem:[#allocation68_spill] sm:$0xff] }
 0x91e   :  { %v3332_v4 = vmul.f32 %v3328_v36, %v3328_v36  ;;  %v3333_v34 = vmul.f32 %v3331_v17, %v3331_v17 }
 0x920   :  { %v3334_v24 = vadd.f32 %v3333_v34, %v3332_v4  ;;  %v8198_v4 = vld [vmem:[#allocation20_spill] sm:$0xff]  ;;  %v8199_v34 = vld [vmem:[#allocation31_spill] sm:$0xff] }
 0x922   :  { %v3335_v22 = vmax.f32 %v3334_v24, 1.0  ;;  %v8201_v24 = vld [vmem:[#allocation33_spill] sm:$0xff] }
 0x924   :  { %4756 = vrsqrt.f32 %v3335_v22  ;;  %v8203_v22 = vld [vmem:[#allocation60_spill] sm:$0xff] }
 0x925   :  { %4758 = vrcp.f32 %v3291_v49  ;;  %v8202_v49 = vld [vmem:[#allocation32_spill] sm:$0xff] }
 0x92e   :  { %v4757_v53 = vpop.eup %4756 }
 0x92f   :  { %v3338_v61 = vmul.f32 %v4757_v53, %v3331_v17  ;;  %v3337_v30 = vmul.f32 %v4757_v53, %v3328_v36  ;;  %v4759_v14 = vpop.eup %4758  ;;  %v8196_v36 = vld [vmem:[#allocation70_spill] sm:$0xff]  ;;  %v8197_v17 = vld [vmem:[#allocation61_spill] sm:$0xff] }
 0x930   :  { %v8204_v53 = vld [vmem:[#allocation34_spill] sm:$0xff] }
 0x931   :  { %v3340_v50 = vmul.f32 %v4759_v14, %v3338_v61  ;;  %v3339_v3 = vmul.f32 %v4759_v14, %v3337_v30  ;;  %v8205_v61 = vld [vmem:[#allocation62_spill] sm:$0xff]  ;;  %v8206_v30 = vld [vmem:[#allocation63_spill] sm:$0xff]  ;;  %v8207_v14 = vld [vmem:[#allocation113_spill] sm:$0xff] }
 0x933   :  { %v7209_v23 = vpack.c.bf16 %v3340_v50, %v3340_v50  ;;  %v7211_v35 = vpack.c.bf16 %v3339_v3, %v3339_v3  ;;  %v4251_v28 = vmul.f32 %v5508_v6, %v3339_v3  ;;  %v4252_v2 = vmul.f32 %v5512_v29, %v3340_v50  ;;  %v8208_v50 = vld [vmem:[#allocation114_spill] sm:$0xff]  ;;  %v8209_v3 = vld [vmem:[#allocation115_spill] sm:$0xff] }
 0x935   :  { %3530 = vmatprep.mubr.bf16.mxu1 %v7209_v23  ;;  %3571 = vmatprep.mubr.bf16.mxu0 %v7209_v23  ;;  %v4272_v40 = vadd.f32 %v4252_v2, %v4251_v28  ;;  %v8210_v28 = vld [vmem:[#allocation116_spill] sm:$0xff]  ;;  %v8211_v2 = vld [vmem:[#allocation117_spill] sm:$0xff] }
 0x936   :  { %3531 = vmatmul.mubr.bf16.vlgmr.msra.gmra.mrb[100].mxu1 %v7211_v35  ;;  %3572 = vmatmul.mubr.bf16.vlgmr.msra.gmra.mrb[92].mxu0 %v7211_v35 }
 0x937   :  { %3581 = vmatpush1.bf16.msra.mxu1 %v6870_v27  ;;  %3622 = vmatpush1.bf16.msra.mxu0 %v6872_v12  ;;  %v8171_v27 = vld [vmem:[#allocation106_spill] sm:$0xff] }
 0x938   :  { %4273 = vadd.xlane.f32.xlu1 %v4272_v40  ;;  %3612 = vmatprep.mubr.bf16.mxu1 %v7209_v23  ;;  %v8172_v12 = vld [vmem:[#allocation110_spill] sm:$0xff] }
 0x939   :  { %3653 = vmatprep.mubr.bf16.mxu0 %v7209_v23  ;;  %3582 = vmatprep.subr.bf16.mxu1 %v6878_v0  ;;  %v8173_v0 = vld [vmem:[#allocation84_spill] sm:$0xff]  ;;  %v8212_v40 = vld [vmem:[#allocation118_spill] sm:$0xff] }
 0x93a   :  { %3623 = vmatprep.subr.bf16.mxu0 %v6882_v47  ;;  %v8174_v47 = vld [vmem:[#allocation85_spill] sm:$0xff] }
 0x93b   :  { %3583 = vmatpush1.bf16.msra.mxu1 %v6885_v57  ;;  %3624 = vmatpush1.bf16.msra.mxu0 %v6887_v58  ;;  %v8175_v57 = vld [vmem:[#allocation105_spill] sm:$0xff]  ;;  %v8176_v58 = vld [vmem:[#allocation107_spill] sm:$0xff] }
 0x93c   :  { %3584 = vmatprep.subr.bf16.mxu1 %v6891_v46  ;;  %3625 = vmatprep.subr.bf16.mxu0 %v6893_v32  ;;  %v8177_v46 = vld [vmem:[#allocation86_spill] sm:$0xff]  ;;  %v8178_v32 = vld [vmem:[#allocation87_spill] sm:$0xff] }
 0x93f   :  { %3585 = vmatpush1.bf16.msra.mxu1 %v6900_v33  ;;  %3626 = vmatpush1.bf16.msra.mxu0 %v6902_v48  ;;  %v8179_v33 = vld [vmem:[#allocation109_spill] sm:$0xff]  ;;  %v8180_v48 = vld [vmem:[#allocation111_spill] sm:$0xff] }
 0x940   :  { %3586 = vmatprep.subr.bf16.mxu1 %v6904_v60  ;;  %3627 = vmatprep.subr.bf16.mxu0 %v6906_v26  ;;  %v8181_v60 = vld [vmem:[#allocation89_spill] sm:$0xff]  ;;  %v8182_v26 = vld [vmem:[#allocation91_spill] sm:$0xff] }
 0x943   :  { %3587 = vmatpush1.bf16.msra.mxu1 %v6912_v19  ;;  %3628 = vmatpush1.bf16.msra.mxu0 %v6914_v52  ;;  %v8183_v19 = vld [vmem:[#allocation93_spill] sm:$0xff]  ;;  %v8184_v52 = vld [vmem:[#allocation96_spill] sm:$0xff] }
 0x944   :  { %3588 = vmatprep.subr.bf16.mxu1 %v6916_v1  ;;  %3629 = vmatprep.subr.bf16.mxu0 %v6918_v20  ;;  %v8185_v1 = vld [vmem:[#allocation100_spill] sm:$0xff] }
 0x945   :  { %v8186_v20 = vld [vmem:[#allocation104_spill] sm:$0xff] }
 0x947   :  { %3589 = vmatpush1.bf16.msra.mxu1 %v8171_v27  ;;  %3630 = vmatpush1.bf16.msra.mxu0 %v8172_v12  ;;  %v8213_v27 = vld [vmem:[#allocation119_spill] sm:$0xff]  ;;  %v8214_v12 = vld [vmem:[#allocation120_spill] sm:$0xff] }
 0x948   :  { %3590 = vmatprep.subr.bf16.mxu1 %v8173_v0  ;;  %3631 = vmatprep.subr.bf16.mxu0 %v8174_v47  ;;  %v3806_v0 = vld [vmem:[#allocation3 + $0x98] sm:$0xff]  ;;  %v3808_v47 = vld [vmem:[#allocation3 + $0xa8] sm:$0xff] }
 0x94b   :  { %3591 = vmatpush1.bf16.msra.mxu1 %v8175_v57  ;;  %3632 = vmatpush1.bf16.msra.mxu0 %v8176_v58  ;;  %v3805_v57 = vld [vmem:[#allocation3 + $0x90] sm:$0xff]  ;;  %v3807_v58 = vld [vmem:[#allocation3 + $0xa0] sm:$0xff] }
 0x94c   :  { %3592 = vmatprep.subr.bf16.mxu1 %v8177_v46  ;;  %3633 = vmatprep.subr.bf16.mxu0 %v8178_v32  ;;  %v3815_v46 = vld [vmem:[#allocation3 + $0xe0] sm:$0xff]  ;;  %v3817_v32 = vld [vmem:[#allocation3 + $0xf0] sm:$0xff] }
 0x94f   :  { %3593 = vmatpush1.bf16.msra.mxu1 %v8179_v33  ;;  %3634 = vmatpush1.bf16.msra.mxu0 %v8180_v48  ;;  %v3814_v33 = vld [vmem:[#allocation3 + $0xd8] sm:$0xff]  ;;  %v3816_v48 = vld [vmem:[#allocation3 + $0xe8] sm:$0xff] }
 0x950   :  { %3594 = vmatprep.subr.bf16.mxu1 %v8181_v60  ;;  %3635 = vmatprep.subr.bf16.mxu0 %v8182_v26  ;;  %v3824_v60 = vld [vmem:[#allocation3 + $0x128] sm:$0xff]  ;;  %v3826_v26 = vld [vmem:[#allocation3 + $0x138] sm:$0xff] }
 0x953   :  { %3595 = vmatpush1.bf16.msra.mxu1 %v8183_v19  ;;  %3636 = vmatpush1.bf16.msra.mxu0 %v8184_v52  ;;  %v3823_v19 = vld [vmem:[#allocation3 + $0x120] sm:$0xff]  ;;  %v3825_v52 = vld [vmem:[#allocation3 + $0x130] sm:$0xff] }
 0x954   :  { %3596 = vmatprep.subr.bf16.mxu1 %v8185_v1  ;;  %3637 = vmatprep.subr.bf16.mxu0 %v8186_v20  ;;  %v3833_v1 = vld [vmem:[#allocation3 + $0x170] sm:$0xff]  ;;  %v3835_v20 = vld [vmem:[#allocation3 + $0x180] sm:$0xff] }
 0x957   :  { %3597 = vmatpush1.bf16.msra.mxu1 %v8187_v21  ;;  %3638 = vmatpush1.bf16.msra.mxu0 %v8188_v59  ;;  %v3832_v21 = vld [vmem:[#allocation3 + $0x168] sm:$0xff]  ;;  %v3834_v59 = vld [vmem:[#allocation3 + $0x178] sm:$0xff] }
 0x958   :  { %3598 = vmatprep.subr.bf16.mxu1 %v8189_v9  ;;  %3639 = vmatprep.subr.bf16.mxu0 %v8190_v54  ;;  %v3842_v9 = vld [vmem:[#allocation3 + $0x1b8] sm:$0xff]  ;;  %v3844_v54 = vld [vmem:[#allocation3 + $0x1c8] sm:$0xff] }
 0x95b   :  { %3599 = vmatpush1.bf16.msra.mxu1 %v8191_v11  ;;  %3640 = vmatpush1.bf16.msra.mxu0 %v8192_v62  ;;  %v3841_v11 = vld [vmem:[#allocation3 + $0x1b0] sm:$0xff]  ;;  %v3843_v62 = vld [vmem:[#allocation3 + $0x1c0] sm:$0xff] }
 0x95c   :  { %3600 = vmatprep.subr.bf16.mxu1 %v8193_v15  ;;  %3641 = vmatprep.subr.bf16.mxu0 %v8194_v18  ;;  %v3851_v15 = vld [vmem:[#allocation3 + $0x200] sm:$0xff]  ;;  %v3853_v18 = vld [vmem:[#allocation3 + $0x210] sm:$0xff] }
 0x95f   :  { %3601 = vmatpush1.bf16.msra.mxu1 %v8195_v38  ;;  %3642 = vmatpush1.bf16.msra.mxu0 %v8196_v36  ;;  %v3850_v38 = vld [vmem:[#allocation3 + $0x1f8] sm:$0xff]  ;;  %v3852_v36 = vld [vmem:[#allocation3 + $0x208] sm:$0xff] }
 0x960   :  { %3602 = vmatprep.subr.bf16.mxu1 %v8197_v17  ;;  %3643 = vmatprep.subr.bf16.mxu0 %v8198_v4  ;;  %v3860_v17 = vld [vmem:[#allocation3 + $0x248] sm:$0xff]  ;;  %v3862_v4 = vld [vmem:[#allocation3 + $0x258] sm:$0xff] }
 0x963   :  { %3603 = vmatpush1.bf16.msra.mxu1 %v8199_v34  ;;  %3644 = vmatpush1.bf16.msra.mxu0 %v8200_v37  ;;  %v3859_v34 = vld [vmem:[#allocation3 + $0x240] sm:$0xff]  ;;  %v3861_v37 = vld [vmem:[#allocation3 + $0x250] sm:$0xff] }
 0x964   :  { %3604 = vmatprep.subr.bf16.mxu1 %v8201_v24  ;;  %3645 = vmatprep.subr.bf16.mxu0 %v8202_v49 }
 0x967   :  { %3605 = vmatpush1.bf16.msra.mxu1 %v8203_v22  ;;  %3646 = vmatpush1.bf16.msra.mxu0 %v8204_v53  ;;  %v3869_v22 = vld [vmem:[#allocation3 + $0x290] sm:$0xff]  ;;  %v3871_v53 = vld [vmem:[#allocation3 + $0x2a0] sm:$0xff] }
 0x968   :  { %3606 = vmatprep.subr.bf16.mxu1 %v8205_v61  ;;  %3647 = vmatprep.subr.bf16.mxu0 %v8206_v30  ;;  %v8218_v61 = vld [vmem:[#allocation23_spill] sm:$0xff] }
 0x96b   :  { %3607 = vmatpush1.bf16.msra.mxu1 %v8207_v14  ;;  %3648 = vmatpush1.bf16.msra.mxu0 %v8208_v50  ;;  %v8219_v14 = vld [vmem:[#allocation51_spill] sm:$0xff] }
 0x96c   :  { %3608 = vmatprep.subr.bf16.mxu1 %v8209_v3  ;;  %3649 = vmatprep.subr.bf16.mxu0 %v8210_v28 }
 0x96f   :  { %3609 = vmatpush1.bf16.msra.mxu1 %v7044_v8  ;;  %3650 = vmatpush1.bf16.msra.mxu0 %v8211_v2  ;;  %v8216_v8 = vld [vmem:[#allocation122_spill] sm:$0xff] }
 0x970   :  { %3610 = vmatprep.subr.bf16.mxu1 %v7048_v51  ;;  %3651 = vmatprep.subr.bf16.mxu0 %v7050_v25  ;;  %v8215_v25 = vld [vmem:[#allocation121_spill] sm:$0xff]  ;;  %v8217_v51 = vld [vmem:[#allocation123_spill] sm:$0xff] }
 0x971   :  { %v3868_v2 = vld [vmem:[#allocation3 + $0x288] sm:$0xff] }
 0x973   :  { %3611 = vmatpush1.bf16.msra.mxu1 %v8212_v40  ;;  %3652 = vmatpush1.bf16.msra.mxu0 %v7058_v16  ;;  %v3870_v40 = vld [vmem:[#allocation3 + $0x298] sm:$0xff] }
 0x974   :  { %4552 = vmatprep.subr.bf16.mxu1 %v8213_v27  ;;  %v8220_v27 = vld [vmem:[#allocation25_spill] sm:$0xff] }
 0x976   :  { %3613 = vmatmul.mubr.bf16.vlgmr.msra.gmra.mrb[104].mxu1 %v7211_v35  ;;  %3654 = vmatmul.mubr.bf16.vlgmr.msra.gmra.mrb[96].mxu0 %v7211_v35 }
 0x977   :  { %4553 = vmatpush3.bf16.msra.mxu1 %v8214_v12  ;;  %3694 = vmatprep.mubr.bf16.mxu1 %v7209_v23  ;;  %v3796_v23 = vld [vmem:[#allocation3 + $0x48] sm:$0xff] }
 0x978   :  { %4554 = vmatprep.subr.bf16.mxu1 %v7068_v55 }
 0x97b   :  { %4555 = vmatpush3.bf16.msra.mxu1 %v7075_v39 }
 0x97c   :  { %4556 = vmatprep.subr.bf16.mxu1 %v7078_v5 }
 0x97f   :  { %4557 = vmatpush3.bf16.msra.mxu1 %v7083_v10 }
 0x980   :  { %4558 = vmatprep.subr.bf16.mxu1 %v7086_v45 }
 0x983   :  { %4559 = vmatpush3.bf16.msra.mxu1 %v7091_v7  ;;  %v3788_v7 = vld [vmem:[#allocation3 + $0x8] sm:$0xff] }
 0x984   :  { %4560 = vmatprep.subr.bf16.mxu1 %v7094_v42  ;;  %v3790_v42 = vld [vmem:[#allocation3 + $0x18] sm:$0xff]  ;;  %3931 = vmatprep.subr.bf16.mxu0 %v3788_v7  ;;  %v3879_v7 = vld [vmem:[#allocation3 + $0x2e0] sm:$0xff] }
 0x987   :  { %4561 = vmatpush3.bf16.msra.mxu1 %v7099_v63  ;;  %v3787_v63 = vld [vmem:[#allocation3] sm:$0xff] }
 0x988   :  { %4562 = vmatprep.subr.bf16.mxu1 %v7102_v43  ;;  %v3789_v43 = vld [vmem:[#allocation3 + $0x10] sm:$0xff]  ;;  %3932 = vmatpush1.bf16.msra.mxu0 %v3787_v63 }
 0x989   :  { %v3889_v63 = vld [vmem:[#allocation3 + $0x330] sm:$0xff] }
 0x98b   :  { %4563 = vmatpush3.bf16.msra.mxu1 %v7107_v13 }
 0x98c   :  { %4564 = vmatprep.subr.bf16.mxu1 %v7110_v31  ;;  %v3797_v31 = vld [vmem:[#allocation3 + $0x50] sm:$0xff] }
 0x98d   :  { %3933 = vmatprep.subr.bf16.mxu0 %v3797_v31  ;;  %v3896_v31 = vld [vmem:[#allocation3 + $0x368] sm:$0xff] }
 0x98e   :  { %3934 = vmatpush1.bf16.msra.mxu0 %v3796_v23  ;;  %v3895_v23 = vld [vmem:[#allocation3 + $0x360] sm:$0xff] }
 0x98f   :  { %4565 = vmatpush3.bf16.msra.mxu1 %v7115_v56  ;;  %v3799_v56 = vld [vmem:[#allocation3 + $0x60] sm:$0xff]  ;;  %3935 = vmatprep.subr.bf16.mxu0 %v3806_v0  ;;  %v3905_v0 = vld [vmem:[#allocation3 + $0x3b0] sm:$0xff] }
 0x990   :  { %4566 = vmatprep.subr.bf16.mxu1 %v8215_v25  ;;  %v8221_v25 = vld [vmem:[#allocation53_spill] sm:$0xff] }
 0x992   :  { %3936 = vmatpush1.bf16.msra.mxu0 %v3805_v57  ;;  %v3904_v57 = vld [vmem:[#allocation3 + $0x3a8] sm:$0xff] }
 0x993   :  { %4567 = vmatpush3.bf16.msra.mxu1 %v8216_v8  ;;  %3937 = vmatprep.subr.bf16.mxu0 %v3815_v46  ;;  %v3914_v46 = vld [vmem:[#allocation3 + $0x3f8] sm:$0xff] }
 0x994   :  { %3972 = vmatprep.subr.bf16.mxu1 %v3790_v42  ;;  %v3887_v42 = vld [vmem:[#allocation3 + $0x320] sm:$0xff] }
 0x996   :  { %3695 = vmatmul.mubr.bf16.vlgmr.msra.gmra.mrb[108].mxu1 %v7211_v35  ;;  %v3798_v35 = vld [vmem:[#allocation3 + $0x58] sm:$0xff]  ;;  %3938 = vmatpush1.bf16.msra.mxu0 %v3814_v33  ;;  %v3913_v33 = vld [vmem:[#allocation3 + $0x3f0] sm:$0xff] }
 0x997   :  { %3973 = vmatpush1.bf16.msra.mxu1 %v3789_v43  ;;  %3939 = vmatprep.subr.bf16.mxu0 %v3824_v60  ;;  %v3886_v43 = vld [vmem:[#allocation3 + $0x318] sm:$0xff]  ;;  %v3923_v60 = vld [vmem:[#allocation3 + $0x440] sm:$0xff] }
 0x998   :  { %3974 = vmatprep.subr.bf16.mxu1 %v3799_v56  ;;  %v3898_v56 = vld [vmem:[#allocation3 + $0x378] sm:$0xff] }
 0x99a   :  { %3940 = vmatpush1.bf16.msra.mxu0 %v3823_v19  ;;  %v3922_v19 = vld [vmem:[#allocation3 + $0x438] sm:$0xff] }
 0x99b   :  { %3975 = vmatpush1.bf16.msra.mxu1 %v3798_v35  ;;  %3941 = vmatprep.subr.bf16.mxu0 %v3833_v1  ;;  %v3897_v35 = vld [vmem:[#allocation3 + $0x370] sm:$0xff]  ;;  %v3792_v1 = vld [vmem:[#allocation3 + $0x28] sm:$0xff] }
 0x99c   :  { %3976 = vmatprep.subr.bf16.mxu1 %v3808_v47  ;;  %v3907_v47 = vld [vmem:[#allocation3 + $0x3c0] sm:$0xff] }
 0x99e   :  { %3942 = vmatpush1.bf16.msra.mxu0 %v3832_v21 }
 0x99f   :  { %3977 = vmatpush1.bf16.msra.mxu1 %v3807_v58  ;;  %3943 = vmatprep.subr.bf16.mxu0 %v3842_v9  ;;  %v3906_v58 = vld [vmem:[#allocation3 + $0x3b8] sm:$0xff] }
 0x9a0   :  { %3978 = vmatprep.subr.bf16.mxu1 %v3817_v32  ;;  %v3916_v32 = vld [vmem:[#allocation3 + $0x408] sm:$0xff]  ;;  %v8222_v9 = vld [vmem:[#allocation52_spill] sm:$0xff] }
 0x9a2   :  { %3944 = vmatpush1.bf16.msra.mxu0 %v3841_v11  ;;  %v8223_v11 = vld [vmem:[#allocation76_spill] sm:$0xff] }
 0x9a3   :  { %3979 = vmatpush1.bf16.msra.mxu1 %v3816_v48  ;;  %3945 = vmatprep.subr.bf16.mxu0 %v3851_v15  ;;  %v3915_v48 = vld [vmem:[#allocation3 + $0x400] sm:$0xff] }
 0x9a4   :  { %3980 = vmatprep.subr.bf16.mxu1 %v3826_v26  ;;  %v3925_v26 = vld [vmem:[#allocation3 + $0x450] sm:$0xff] }
 0x9a6   :  { %3946 = vmatpush1.bf16.msra.mxu0 %v3850_v38  ;;  %v8224_v38 = vld [vmem:[#allocation54_spill] sm:$0xff] }
 0x9a7   :  { %3981 = vmatpush1.bf16.msra.mxu1 %v3825_v52  ;;  %3947 = vmatprep.subr.bf16.mxu0 %v3860_v17  ;;  %v3924_v52 = vld [vmem:[#allocation3 + $0x448] sm:$0xff] }
 0x9a8   :  { %3982 = vmatprep.subr.bf16.mxu1 %v3835_v20  ;;  %v3794_v20 = vld [vmem:[#allocation3 + $0x38] sm:$0xff]  ;;  %v8225_v17 = vld [vmem:[#allocation77_spill] sm:$0xff] }
 0x9aa   :  { %3948 = vmatpush1.bf16.msra.mxu0 %v3859_v34 }
 0x9ab   :  { %3983 = vmatpush1.bf16.msra.mxu1 %v3834_v59  ;;  %3949 = vmatprep.subr.bf16.mxu0 %v3869_v22 }
 0x9ac   :  { %3984 = vmatprep.subr.bf16.mxu1 %v3844_v54 }
 0x9ae   :  { %3950 = vmatpush1.bf16.msra.mxu0 %v3868_v2 }
 0x9af   :  { %3985 = vmatpush1.bf16.msra.mxu1 %v3843_v62 }
 0x9b0   :  { %3986 = vmatprep.subr.bf16.mxu1 %v3853_v18 }
 0x9b3   :  { %3987 = vmatpush1.bf16.msra.mxu1 %v3852_v36 }
 0x9b4   :  { %3988 = vmatprep.subr.bf16.mxu1 %v3862_v4 }
 0x9b7   :  { %3989 = vmatpush1.bf16.msra.mxu1 %v3861_v37 }
 0x9b8   :  { %3990 = vmatprep.subr.bf16.mxu1 %v3871_v53 }
 0x9bb   :  { %3991 = vmatpush1.bf16.msra.mxu1 %v3870_v40 }
 0x9c5   :  { %v4274_v55 = vpop.xlane.xlu1 %4273 }
 0x9c6   :  { %v4293_v45 = vadd.f32 %v8217_v51, %v4274_v55 }
 0x9c8   :  { %v4301_v39 = vsub.f32 0.0, %v4293_v45 }
 0x9ca   :  { %v4314_v16 = vmul.f32 1.442695, %v4301_v39 }
 0x9cc   :  { %4760 = vpow2.f32 %v4314_v16  ;;  %v3878_v16 = vld [vmem:[#allocation3 + $0x2d8] sm:$0xff] }
 0x9cd   :  { %3951 = vmatprep.subr.bf16.mxu0 %v3878_v16 }
 0x9d6   :  { %v4761_v5 = vpop.eup %4760 }
 0x9d7   :  { %v4325_v10 = vadd.f32 1.0, %v4761_v5  ;;  %v3880_v5 = vld [vmem:[#allocation3 + $0x2e8] sm:$0xff] }
 0x9d8   :  { %3992 = vmatprep.subr.bf16.mxu1 %v3880_v5 }
 0x9d9   :  { %4762 = vrcp.f32 %v4325_v10  ;;  %v3877_v10 = vld [vmem:[#allocation3 + $0x2d0] sm:$0xff]  ;;  %3993 = vmatpush1.bf16.msra.mxu1 %v3879_v7 }
 0x9da   :  { %3952 = vmatpush1.bf16.msra.mxu0 %v3877_v10  ;;  %3994 = vmatprep.subr.bf16.mxu1 %v3889_v63 }
 0x9db   :  { %3953 = vmatprep.subr.bf16.mxu0 %v3887_v42 }
 0x9de   :  { %3954 = vmatpush1.bf16.msra.mxu0 %v3886_v43 }
 0x9df   :  { %3955 = vmatprep.subr.bf16.mxu0 %v3896_v31 }
 0x9e2   :  { %3956 = vmatpush1.bf16.msra.mxu0 %v3895_v23 }
 0x9e3   :  { %v4763_v13 = vpop.eup %4762  ;;  %3957 = vmatprep.subr.bf16.mxu0 %v3905_v0 }
 0x9e4   :  { %4342 = vst.msk [vmem:[%s7391_s6 + $0x28] sm:$0xff] %vm4336_vm1, %v4763_v13  ;;  %v3888_v13 = vld [vmem:[#allocation3 + $0x328] sm:$0xff] }
 0x9e5   :  { %3995 = vmatpush1.bf16.msra.mxu1 %v3888_v13 }
 0x9e6   :  { %3996 = vmatprep.subr.bf16.mxu1 %v3898_v56  ;;  %3958 = vmatpush1.bf16.msra.mxu0 %v3904_v57  ;;  %v8226_v56 = vld [vmem:[#allocation65_spill] sm:$0xff] }
 0x9e7   :  { %3959 = vmatprep.subr.bf16.mxu0 %v3914_v46 }
 0x9e9   :  { %3997 = vmatpush1.bf16.msra.mxu1 %v3897_v35 }
 0x9ea   :  { %3998 = vmatprep.subr.bf16.mxu1 %v3907_v47  ;;  %3960 = vmatpush1.bf16.msra.mxu0 %v3913_v33 }
 0x9eb   :  { %3961 = vmatprep.subr.bf16.mxu0 %v3923_v60 }
 0x9ed   :  { %3999 = vmatpush1.bf16.msra.mxu1 %v3906_v58 }
 0x9ee   :  { %4000 = vmatprep.subr.bf16.mxu1 %v3916_v32  ;;  %3962 = vmatpush1.bf16.msra.mxu0 %v3922_v19 }
 0x9ef   :  { %4013 = vmatprep.subr.bf16.mxu0 %v3792_v1 }
 0x9f1   :  { %4001 = vmatpush1.bf16.msra.mxu1 %v3915_v48 }
 0x9f2   :  { %4002 = vmatprep.subr.bf16.mxu1 %v3925_v26 }
 0x9f5   :  { %4003 = vmatpush1.bf16.msra.mxu1 %v3924_v52 }
 0x9f6   :  { %4054 = vmatprep.subr.bf16.mxu1 %v3794_v20 }
 0xa09   :  { %v3532_v24 = vpop.f32.mrb[100].mxu1  ;;  %v3573_v49 = vpop.f32.mrb[92].mxu0 }
 0xa0a   :  { %v7309_v30 = vadd.f32 %v3532_v24, %v8218_v61  ;;  %v7312_v50 = vadd.f32 %v3573_v49, %v8219_v14  ;;  %v3534_v3 = vpop.f32.mrb[101].mxu1  ;;  %v3575_v28 = vpop.f32.mrb[93].mxu0 }
 0xa0b   :  { %v7315_v12 = vadd.f32 %v3534_v3, %v8220_v27  ;;  %v7318_v8 = vadd.f32 %v3575_v28, %v8221_v25  ;;  %v3536_v55 = vpop.f32.mrb[102].mxu1  ;;  %v3577_v51 = vpop.f32.mrb[94].mxu0 }
 0xa0c   :  { %v3537_v45 = vpop.f32.mrb[103].mxu1  ;;  %v3578_v39 = vpop.f32.mrb[95].mxu0  ;;  %v3711_v5 = vsub.f32 0.0, %v7309_v30  ;;  %v3721_v30 = vsub.f32 0.0, %v7312_v50 }
 0xa0d   :  { %v3726_v24 = vmul.f32 %v7318_v8, %v7318_v8  ;;  %v3716_v45 = vsub.f32 0.0, %v7315_v12 }
 0xa0e   :  { %v3712_v7 = vmul.f32 1.442695, %v3711_v5  ;;  %v3722_v26 = vmul.f32 1.442695, %v3721_v30  ;;  %v3801_v5 = vld [vmem:[#allocation3 + $0x70] sm:$0xff]  ;;  %v3836_v30 = vld [vmem:[#allocation3 + $0x188] sm:$0xff] }
 0xa0f   :  { %v3717_v10 = vmul.f32 1.442695, %v3716_v45  ;;  %v3791_v45 = vld [vmem:[#allocation3 + $0x20] sm:$0xff] }
 0xa49   :  { %v3614_v21 = vpop.f32.mrb[104].mxu1  ;;  %v3655_v59 = vpop.f32.mrb[96].mxu0 }
 0xa4a   :  { %v3706_v54 = vadd.f32 %v3614_v21, %v8222_v9  ;;  %v3708_v62 = vadd.f32 %v3655_v59, %v8223_v11  ;;  %v3616_v15 = vpop.f32.mrb[105].mxu1  ;;  %v3657_v18 = vpop.f32.mrb[97].mxu0 }
 0xa4b   :  { %v3707_v36 = vadd.f32 %v3616_v15, %v8224_v38  ;;  %v3709_v4 = vadd.f32 %v3657_v18, %v8225_v17  ;;  %v3618_v34 = vpop.f32.mrb[106].mxu1  ;;  %v3659_v37 = vpop.f32.mrb[98].mxu0 }
 0xa4c   :  { %v3727_v49 = vmul.f32 %v3706_v54, %v3706_v54  ;;  %v3734_v22 = vmul.f32 %v3708_v62, %v3708_v62  ;;  %v3619_v53 = vpop.f32.mrb[107].mxu1  ;;  %v3660_v61 = vpop.f32.mrb[99].mxu0 }
 0xa4d   :  { %v3733_v14 = vmul.f32 %v3707_v36, %v3707_v36  ;;  %v3740_v35 = vmul.f32 %v3709_v4, %v3709_v4 }
 0xa4e   :  { %v3728_v3 = vadd.f32 %v3727_v49, %v3726_v24 }
 0xa4f   :  { %v3735_v28 = vadd.f32 %v3734_v22, %v3733_v14 }
 0xa50   :  { %v3729_v2 = vmax.f32 %v3728_v3, 1.0 }
 0xa51   :  { %v3736_v40 = vmax.f32 %v3735_v28, 1.0 }
 0xa52   :  { %4764 = vrsqrt.f32 %v3729_v2 }
 0xa53   :  { %4766 = vrsqrt.f32 %v3736_v40 }
 0xa54   :  { %4768 = vpow2.f32 %v3717_v10  ;;  %v3803_v10 = vld [vmem:[#allocation3 + $0x80] sm:$0xff] }
 0xa55   :  { %4770 = vpow2.f32 %v3712_v7  ;;  %v3800_v7 = vld [vmem:[#allocation3 + $0x68] sm:$0xff] }
 0xa5c   :  { %v4765_v27 = vpop.eup %4764 }
 0xa5d   :  { %v4767_v25 = vpop.eup %4766  ;;  %v3732_v55 = vmul.f32 %v4765_v27, %v3706_v54  ;;  %v3731_v51 = vmul.f32 %v4765_v27, %v7318_v8 }
 0xa5e   :  { %v3738_v39 = vmul.f32 %v4767_v25, %v3707_v36  ;;  %v3739_v16 = vmul.f32 %v4767_v25, %v3708_v62  ;;  %v4769_v8 = vpop.eup %4768 }
 0xa5f   :  { %v4771_v12 = vpop.eup %4770  ;;  %v3719_v57 = vadd.f32 1.0, %v4769_v8  ;;  %v3828_v8 = vld [vmem:[#allocation3 + $0x148] sm:$0xff] }
 0xa60   :  { %v3714_v46 = vadd.f32 1.0, %v4771_v12  ;;  %v3827_v12 = vld [vmem:[#allocation3 + $0x140] sm:$0xff] }
 0xa69   :  { %v4568_v42 = vpop.f32.mrb[108].mxu1 }
 0xa6a   :  { %v4569_v63 = vpop.f32.mrb[109].mxu1 }
 0xa6b   :  { %v4570_v43 = vadd.f32 %v4569_v63, %v4568_v42  ;;  %v4571_v13 = vpop.f32.mrb[110].mxu1  ;;  %v3802_v42 = vld [vmem:[#allocation3 + $0x78] sm:$0xff] }
 0xa6c   :  { %v4572_v31 = vpop.f32.mrb[111].mxu1  ;;  %v3810_v63 = vld [vmem:[#allocation3 + $0xb8] sm:$0xff]  ;;  %v3809_v13 = vld [vmem:[#allocation3 + $0xb0] sm:$0xff] }
 0xa6d   :  { %v3710_v23 = vadd.f32 %v4570_v43, %v8226_v56  ;;  %v3812_v43 = vld [vmem:[#allocation3 + $0xc8] sm:$0xff]  ;;  %v3811_v31 = vld [vmem:[#allocation3 + $0xc0] sm:$0xff] }
 0xa6e   :  { %v3819_v56 = vld [vmem:[#allocation3 + $0x100] sm:$0xff] }
 0xa6f   :  { %v3741_v0 = vmul.f32 %v3710_v23, %v3710_v23 }
 0xa71   :  { %v3742_v47 = vadd.f32 %v3741_v0, %v3740_v35  ;;  %v3818_v35 = vld [vmem:[#allocation3 + $0xf8] sm:$0xff]  ;;  %v3820_v0 = vld [vmem:[#allocation3 + $0x108] sm:$0xff] }
 0xa73   :  { %v3743_v58 = vmax.f32 %v3742_v47, 1.0  ;;  %v3830_v47 = vld [vmem:[#allocation3 + $0x158] sm:$0xff] }
 0xa75   :  { %4772 = vrsqrt.f32 %v3743_v58  ;;  %v3837_v58 = vld [vmem:[#allocation3 + $0x190] sm:$0xff] }
 0xa76   :  { %4774 = vrcp.f32 %v3719_v57  ;;  %v3829_v57 = vld [vmem:[#allocation3 + $0x150] sm:$0xff] }
 0xa77   :  { %4776 = vrcp.f32 %v3714_v46  ;;  %v3839_v46 = vld [vmem:[#allocation3 + $0x1a0] sm:$0xff] }
 0xa78   :  { %4778 = vpow2.f32 %v3722_v26  ;;  %v3847_v26 = vld [vmem:[#allocation3 + $0x1e0] sm:$0xff] }
 0xa7f   :  { %v4773_v32 = vpop.eup %4772 }
 0xa80   :  { %v3745_v33 = vmul.f32 %v4773_v32, %v3709_v4  ;;  %v3746_v48 = vmul.f32 %v4773_v32, %v3710_v23  ;;  %v4775_v60 = vpop.eup %4774  ;;  %v3821_v23 = vld [vmem:[#allocation3 + $0x110] sm:$0xff]  ;;  %v3838_v32 = vld [vmem:[#allocation3 + $0x198] sm:$0xff] }
 0xa81   :  { %v4777_v1 = vpop.eup %4776 }
 0xa82   :  { %v3747_v19 = vmul.f32 %v4775_v60, %v3745_v33  ;;  %v3748_v52 = vmul.f32 %v4775_v60, %v3746_v48  ;;  %v3749_v54 = vmul.f32 %v4777_v1, %v7201_v44  ;;  %v3754_v62 = vmul.f32 %v4777_v1, %v7203_v41  ;;  %v4779_v49 = vpop.eup %4778  ;;  %v3846_v33 = vld [vmem:[#allocation3 + $0x1d8] sm:$0xff]  ;;  %v3848_v48 = vld [vmem:[#allocation3 + $0x1e8] sm:$0xff]  ;;  %v3845_v60 = vld [vmem:[#allocation3 + $0x1d0] sm:$0xff] }
 0xa83   :  { %v3724_v41 = vadd.f32 1.0, %v4779_v49  ;;  %v3854_v1 = vld [vmem:[#allocation3 + $0x218] sm:$0xff]  ;;  %v3892_v49 = vld [vmem:[#allocation3 + $0x348] sm:$0xff] }
 0xa84   :  { %v3750_v20 = vmul.f32 %v3747_v19, %v3731_v51  ;;  %v3751_v21 = vmul.f32 %v3748_v52, %v3732_v55  ;;  %v3755_v59 = vmul.f32 %v3748_v52, %v3731_v51  ;;  %v3756_v9 = vmul.f32 %v3747_v19, %v3732_v55  ;;  %v3855_v19 = vld [vmem:[#allocation3 + $0x220] sm:$0xff]  ;;  %v3857_v52 = vld [vmem:[#allocation3 + $0x230] sm:$0xff] }
 0xa86   :  { %v3752_v11 = vsub.f32 %v3750_v20, %v3751_v21  ;;  %v3757_v15 = vadd.f32 %v3756_v9, %v3755_v59  ;;  %v3856_v20 = vld [vmem:[#allocation3 + $0x228] sm:$0xff]  ;;  %v3866_v59 = vld [vmem:[#allocation3 + $0x278] sm:$0xff]  ;;  %v3863_v9 = vld [vmem:[#allocation3 + $0x260] sm:$0xff] }
 0xa87   :  { %v3864_v21 = vld [vmem:[#allocation3 + $0x268] sm:$0xff] }
 0xa88   :  { %v7333_v50 = vadd.f32 %v3752_v11, %v3749_v54  ;;  %v7335_v18 = vadd.f32 %v3757_v15, %v3754_v62  ;;  %v3865_v54 = vld [vmem:[#allocation3 + $0x270] sm:$0xff]  ;;  %v3875_v62 = vld [vmem:[#allocation3 + $0x2c0] sm:$0xff]  ;;  %v3872_v15 = vld [vmem:[#allocation3 + $0x2a8] sm:$0xff] }
 0xa89   :  { %v3873_v11 = vld [vmem:[#allocation3 + $0x2b0] sm:$0xff] }
 0xa8a   :  { %v3759_v38 = vmul.f32 %v7333_v50, %v3738_v39  ;;  %v3760_v36 = vmul.f32 %v7335_v18, %v3739_v16  ;;  %v3762_v17 = vmul.f32 %v7335_v18, %v3738_v39  ;;  %v3763_v4 = vmul.f32 %v7333_v50, %v3739_v16  ;;  %v3793_v39 = vld [vmem:[#allocation3 + $0x30] sm:$0xff] }
 0xa8c   :  { %v3761_v34 = vsub.f32 %v3759_v38, %v3760_v36  ;;  %v3764_v37 = vadd.f32 %v3763_v4, %v3762_v17  ;;  %v3874_v38 = vld [vmem:[#allocation3 + $0x2b8] sm:$0xff]  ;;  %v3884_v17 = vld [vmem:[#allocation3 + $0x308] sm:$0xff]  ;;  %v3881_v4 = vld [vmem:[#allocation3 + $0x2f0] sm:$0xff] }
 0xa8d   :  { %v3882_v36 = vld [vmem:[#allocation3 + $0x2f8] sm:$0xff] }
 0xa8e   :  { %v3765_v24 = vmul.f32 %v3761_v34, %v3761_v34  ;;  %v3766_v44 = vmul.f32 %v3764_v37, %v3764_v37 }
 0xa90   :  { %v3767_v22 = vadd.f32 %v3766_v44, %v3765_v24  ;;  %v3893_v24 = vld [vmem:[#allocation3 + $0x350] sm:$0xff]  ;;  %v3890_v44 = vld [vmem:[#allocation3 + $0x338] sm:$0xff] }
 0xa92   :  { %v3768_v53 = vmax.f32 %v3767_v22, 1.0  ;;  %v3900_v22 = vld [vmem:[#allocation3 + $0x388] sm:$0xff] }
 0xa94   :  { %4780 = vrsqrt.f32 %v3768_v53  ;;  %v3899_v53 = vld [vmem:[#allocation3 + $0x380] sm:$0xff] }
 0xa95   :  { %4782 = vrcp.f32 %v3724_v41  ;;  %v3902_v41 = vld [vmem:[#allocation3 + $0x398] sm:$0xff] }
 0xa9e   :  { %v4781_v61 = vpop.eup %4780 }
 0xa9f   :  { %v3771_v14 = vmul.f32 %v4781_v61, %v3764_v37  ;;  %v3770_v3 = vmul.f32 %v4781_v61, %v3761_v34  ;;  %v4783_v28 = vpop.eup %4782  ;;  %v3883_v34 = vld [vmem:[#allocation3 + $0x300] sm:$0xff]  ;;  %v3901_v61 = vld [vmem:[#allocation3 + $0x390] sm:$0xff] }
 0xaa0   :  { %v3891_v37 = vld [vmem:[#allocation3 + $0x340] sm:$0xff] }
 0xaa1   :  { %v3773_v2 = vmul.f32 %v4783_v28, %v3771_v14  ;;  %v3772_v40 = vmul.f32 %v4783_v28, %v3770_v3  ;;  %v3909_v14 = vld [vmem:[#allocation3 + $0x3d0] sm:$0xff]  ;;  %v3911_v3 = vld [vmem:[#allocation3 + $0x3e0] sm:$0xff]  ;;  %v3908_v28 = vld [vmem:[#allocation3 + $0x3c8] sm:$0xff] }
 0xaa3   :  { %v7341_v27 = vpack.c.bf16 %v3773_v2, %v3773_v2  ;;  %v7343_v25 = vpack.c.bf16 %v3772_v40, %v3772_v40  ;;  %v4253_v55 = vmul.f32 %v5508_v6, %v3772_v40  ;;  %v4254_v51 = vmul.f32 %v5512_v29, %v3773_v2  ;;  %v3910_v2 = vld [vmem:[#allocation3 + $0x3d8] sm:$0xff] }
 0xaa4   :  { %v3918_v40 = vld [vmem:[#allocation3 + $0x418] sm:$0xff] }
 0xaa5   :  { %3963 = vmatprep.mubr.bf16.mxu0 %v7341_v27  ;;  %4004 = vmatprep.mubr.bf16.mxu1 %v7341_v27  ;;  %v4275_v16 = vadd.f32 %v4254_v51, %v4253_v55  ;;  %v3920_v55 = vld [vmem:[#allocation3 + $0x428] sm:$0xff]  ;;  %v3917_v51 = vld [vmem:[#allocation3 + $0x410] sm:$0xff] }
 0xaa6   :  { %3964 = vmatmul.mubr.bf16.vlgmr.msra.gmra.mrb[100].mxu0 %v7343_v25  ;;  %4005 = vmatmul.mubr.bf16.vlgmr.msra.gmra.mrb[112].mxu1 %v7343_v25 }
 0xaa7   :  { %4014 = vmatpush1.bf16.msra.mxu0 %v3791_v45  ;;  %4055 = vmatpush1.bf16.msra.mxu1 %v3793_v39  ;;  %v3919_v45 = vld [vmem:[#allocation3 + $0x420] sm:$0xff] }
 0xaa8   :  { %4276 = vadd.xlane.f32.xlu0 %v4275_v16  ;;  %4045 = vmatprep.mubr.bf16.mxu0 %v7341_v27  ;;  %v3927_v39 = vld [vmem:[#allocation3 + $0x460] sm:$0xff]  ;;  %v3929_v16 = vld [vmem:[#allocation3 + $0x470] sm:$0xff] }
 0xaa9   :  { %4086 = vmatprep.mubr.bf16.mxu1 %v7341_v27  ;;  %4015 = vmatprep.subr.bf16.mxu0 %v3801_v5  ;;  %v3926_v5 = vld [vmem:[#allocation3 + $0x458] sm:$0xff] }
 0xaaa   :  { %4056 = vmatprep.subr.bf16.mxu1 %v3803_v10  ;;  %v3928_v10 = vld [vmem:[#allocation3 + $0x468] sm:$0xff] }
 0xaab   :  { %4016 = vmatpush1.bf16.msra.mxu0 %v3800_v7  ;;  %4057 = vmatpush1.bf16.msra.mxu1 %v3802_v42  ;;  %v3867_v7 = vld [vmem:[#allocation3 + $0x280] sm:$0xff] }
 0xaac   :  { %4017 = vmatprep.subr.bf16.mxu0 %v3810_v63  ;;  %4058 = vmatprep.subr.bf16.mxu1 %v3812_v43  ;;  %v3795_v42 = vld [vmem:[#allocation3 + $0x40] sm:$0xff]  ;;  %v3876_v63 = vld [vmem:[#allocation3 + $0x2c8] sm:$0xff] }
 0xaad   :  { %v3804_v43 = vld [vmem:[#allocation3 + $0x88] sm:$0xff] }
 0xaaf   :  { %4018 = vmatpush1.bf16.msra.mxu0 %v3809_v13  ;;  %4059 = vmatpush1.bf16.msra.mxu1 %v3811_v31  ;;  %v3885_v13 = vld [vmem:[#allocation3 + $0x310] sm:$0xff] }
 0xab0   :  { %4019 = vmatprep.subr.bf16.mxu0 %v3819_v56  ;;  %4060 = vmatprep.subr.bf16.mxu1 %v3821_v23  ;;  %v3813_v31 = vld [vmem:[#allocation3 + $0xd0] sm:$0xff]  ;;  %v3894_v56 = vld [vmem:[#allocation3 + $0x358] sm:$0xff] }
 0xab1   :  { %v3822_v23 = vld [vmem:[#allocation3 + $0x118] sm:$0xff] }
 0xab3   :  { %4020 = vmatpush1.bf16.msra.mxu0 %v3818_v35  ;;  %4061 = vmatpush1.bf16.msra.mxu1 %v3820_v0  ;;  %v3903_v35 = vld [vmem:[#allocation3 + $0x3a0] sm:$0xff] }
 0xab4   :  { %4021 = vmatprep.subr.bf16.mxu0 %v3828_v8  ;;  %4062 = vmatprep.subr.bf16.mxu1 %v3830_v47  ;;  %v3831_v0 = vld [vmem:[#allocation3 + $0x160] sm:$0xff]  ;;  %v3912_v8 = vld [vmem:[#allocation3 + $0x3e8] sm:$0xff] }
 0xab5   :  { %v3840_v47 = vld [vmem:[#allocation3 + $0x1a8] sm:$0xff] }
 0xab7   :  { %4022 = vmatpush1.bf16.msra.mxu0 %v3827_v12  ;;  %4063 = vmatpush1.bf16.msra.mxu1 %v3829_v57  ;;  %v3921_v12 = vld [vmem:[#allocation3 + $0x430] sm:$0xff]  ;;  %v3930_v57 = vld [vmem:[#allocation3 + $0x478] sm:$0xff] }
 0xab8   :  { %4023 = vmatprep.subr.bf16.mxu0 %v3837_v58  ;;  %4064 = vmatprep.subr.bf16.mxu1 %v3839_v46  ;;  %v3858_v58 = vld [vmem:[#allocation3 + $0x238] sm:$0xff] }
 0xabb   :  { %4024 = vmatpush1.bf16.msra.mxu0 %v3836_v30  ;;  %4065 = vmatpush1.bf16.msra.mxu1 %v3838_v32  ;;  %v7357_v30 = vld [vmem:[#allocation9] ss:$0 sm:$0xff] }
 0xabc   :  { %4025 = vmatprep.subr.bf16.mxu0 %v3846_v33  ;;  %4066 = vmatprep.subr.bf16.mxu1 %v3848_v48 }
 0xabf   :  { %4026 = vmatpush1.bf16.msra.mxu0 %v3845_v60  ;;  %4067 = vmatpush1.bf16.msra.mxu1 %v3847_v26 }
 0xac0   :  { %4027 = vmatprep.subr.bf16.mxu0 %v3855_v19  ;;  %4068 = vmatprep.subr.bf16.mxu1 %v3857_v52 }
 0xac3   :  { %4028 = vmatpush1.bf16.msra.mxu0 %v3854_v1  ;;  %4069 = vmatpush1.bf16.msra.mxu1 %v3856_v20 }
 0xac4   :  { %4029 = vmatprep.subr.bf16.mxu0 %v3864_v21  ;;  %4070 = vmatprep.subr.bf16.mxu1 %v3866_v59  ;;  %v8228_v21 = vld [vmem:[#allocation55_spill] sm:$0xff] }
 0xac7   :  { %4030 = vmatpush1.bf16.msra.mxu0 %v3863_v9  ;;  %4071 = vmatpush1.bf16.msra.mxu1 %v3865_v54 }
 0xac8   :  { %4031 = vmatprep.subr.bf16.mxu0 %v3873_v11  ;;  %4072 = vmatprep.subr.bf16.mxu1 %v3875_v62  ;;  %v8229_v11 = vld [vmem:[#allocation29_spill] sm:$0xff] }
 0xacb   :  { %4032 = vmatpush1.bf16.msra.mxu0 %v3872_v15  ;;  %4073 = vmatpush1.bf16.msra.mxu1 %v3874_v38  ;;  %v8230_v15 = vld [vmem:[#allocation57_spill] sm:$0xff] }
 0xacc   :  { %4033 = vmatprep.subr.bf16.mxu0 %v3882_v36  ;;  %4074 = vmatprep.subr.bf16.mxu1 %v3884_v17 }
 0xacf   :  { %4034 = vmatpush1.bf16.msra.mxu0 %v3881_v4  ;;  %4075 = vmatpush1.bf16.msra.mxu1 %v3883_v34 }
 0xad0   :  { %4035 = vmatprep.subr.bf16.mxu0 %v3891_v37  ;;  %4076 = vmatprep.subr.bf16.mxu1 %v3893_v24 }
 0xad3   :  { %4036 = vmatpush1.bf16.msra.mxu0 %v3890_v44  ;;  %4077 = vmatpush1.bf16.msra.mxu1 %v3892_v49  ;;  %v8231_v44 = vld [vmem:[#allocation56_spill] sm:$0xff] }
 0xad4   :  { %4037 = vmatprep.subr.bf16.mxu0 %v3900_v22  ;;  %4078 = vmatprep.subr.bf16.mxu1 %v3902_v41  ;;  %v8232_v22 = vld [vmem:[#allocation78_spill] sm:$0xff] }
 0xad7   :  { %4038 = vmatpush1.bf16.msra.mxu0 %v3899_v53  ;;  %4079 = vmatpush1.bf16.msra.mxu1 %v3901_v61 }
 0xad8   :  { %4039 = vmatprep.subr.bf16.mxu0 %v3909_v14  ;;  %4080 = vmatprep.subr.bf16.mxu1 %v3911_v3  ;;  %v8233_v14 = vld [vmem:[#allocation58_spill] sm:$0xff] }
 0xadb   :  { %4040 = vmatpush1.bf16.msra.mxu0 %v3908_v28  ;;  %4081 = vmatpush1.bf16.msra.mxu1 %v3910_v2  ;;  %v8234_v28 = vld [vmem:[#allocation79_spill] sm:$0xff] }
 0xadc   :  { %4041 = vmatprep.subr.bf16.mxu0 %v3918_v40  ;;  %4082 = vmatprep.subr.bf16.mxu1 %v3920_v55 }
 0xadf   :  { %4042 = vmatpush1.bf16.msra.mxu0 %v3917_v51  ;;  %4083 = vmatpush1.bf16.msra.mxu1 %v3919_v45 }
 0xae0   :  { %4043 = vmatprep.subr.bf16.mxu0 %v3927_v39  ;;  %4084 = vmatprep.subr.bf16.mxu1 %v3929_v16 }
 0xae3   :  { %4044 = vmatpush1.bf16.msra.mxu0 %v3926_v5  ;;  %4085 = vmatpush1.bf16.msra.mxu1 %v3928_v10 }
 0xae4   :  { %4574 = vmatprep.subr.bf16.mxu0 %v3867_v7 }
 0xae6   :  { %4046 = vmatmul.mubr.bf16.vlgmr.msra.gmra.mrb[104].mxu0 %v7343_v25  ;;  %4087 = vmatmul.mubr.bf16.vlgmr.msra.gmra.mrb[116].mxu1 %v7343_v25 }
 0xae7   :  { %4575 = vmatpush3.bf16.msra.mxu0 %v3795_v42  ;;  %4127 = vmatprep.mubr.bf16.mxu0 %v7341_v27  ;;  %v3849_v27 = vld [vmem:[#allocation3 + $0x1f0] sm:$0xff] }
 0xae8   :  { %4576 = vmatprep.subr.bf16.mxu0 %v3876_v63 }
 0xaeb   :  { %4577 = vmatpush3.bf16.msra.mxu0 %v3804_v43 }
 0xaec   :  { %4578 = vmatprep.subr.bf16.mxu0 %v3885_v13 }
 0xaef   :  { %4579 = vmatpush3.bf16.msra.mxu0 %v3813_v31 }
 0xaf0   :  { %4580 = vmatprep.subr.bf16.mxu0 %v3894_v56 }
 0xaf3   :  { %4581 = vmatpush3.bf16.msra.mxu0 %v3822_v23 }
 0xaf4   :  { %4582 = vmatprep.subr.bf16.mxu0 %v3903_v35 }
 0xaf7   :  { %4583 = vmatpush3.bf16.msra.mxu0 %v3831_v0 }
 0xaf8   :  { %4584 = vmatprep.subr.bf16.mxu0 %v3912_v8 }
 0xafb   :  { %4585 = vmatpush3.bf16.msra.mxu0 %v3840_v47 }
 0xafc   :  { %4586 = vmatprep.subr.bf16.mxu0 %v3921_v12 }
 0xaff   :  { %4587 = vmatpush3.bf16.msra.mxu0 %v3849_v27 }
 0xb00   :  { %4588 = vmatprep.subr.bf16.mxu0 %v3930_v57 }
 0xb03   :  { %4589 = vmatpush3.bf16.msra.mxu0 %v3858_v58 }
 0xb06   :  { %4128 = vmatmul.mubr.bf16.vlgmr.msra.gmra.mrb[108].mxu0 %v7343_v25  ;;  %v8227_v25 = vld [vmem:[#allocation27_spill] sm:$0xff] }
 0xb35   :  { %v4277_v46 = vpop.xlane.xlu0 %4276 }
 0xb36   :  { %v4294_v32 = vadd.f32 %v7357_v30, %v4277_v46 }
 0xb38   :  { %v4302_v33 = vsub.f32 0.0, %v4294_v32 }
 0xb3a   :  { %v4316_v48 = vmul.f32 1.442695, %v4302_v33 }
 0xb3c   :  { %4784 = vpow2.f32 %v4316_v48  ;;  %v8235_v48 = vld [vmem:[#allocation69_spill] sm:$0xff] }
 0xb46   :  { %v4785_v60 = vpop.eup %4784 }
 0xb47   :  { %v4326_v26 = vadd.f32 1.0, %v4785_v60 }
 0xb49   :  { %4786 = vrcp.f32 %v4326_v26 }
 0xb53   :  { %v4787_v19 = vpop.eup %4786 }
 0xb54   :  { %4343 = vst.msk [vmem:[%s7391_s6 + $0x30] sm:$0xff] %vm4336_vm1, %v4787_v19 }
 0xb79   :  { %v3965_v52 = vpop.f32.mrb[100].mxu0  ;;  %v4006_v1 = vpop.f32.mrb[112].mxu1 }
 0xb7a   :  { %v4135_v20 = vadd.f32 %v3965_v52, %v8227_v25  ;;  %v7366_v59 = vadd.f32 %v4006_v1, %v8228_v21  ;;  %v3967_v9 = vpop.f32.mrb[101].mxu0  ;;  %v4008_v54 = vpop.f32.mrb[113].mxu1 }
 0xb7b   :  { %v4136_v62 = vadd.f32 %v3967_v9, %v8229_v11  ;;  %v4138_v38 = vadd.f32 %v4008_v54, %v8230_v15  ;;  %v3969_v36 = vpop.f32.mrb[102].mxu0  ;;  %v4010_v17 = vpop.f32.mrb[114].mxu1 }
 0xb7c   :  { %v3970_v4 = vpop.f32.mrb[103].mxu0  ;;  %v4011_v34 = vpop.f32.mrb[115].mxu1  ;;  %v4144_v47 = vsub.f32 0.0, %v4135_v20  ;;  %v4154_v20 = vsub.f32 0.0, %v7366_v59 }
 0xb7d   :  { %v4159_v51 = vmul.f32 %v4138_v38, %v4138_v38  ;;  %v4149_v35 = vsub.f32 0.0, %v4136_v62 }
 0xb7e   :  { %v4145_v27 = vmul.f32 1.442695, %v4144_v47  ;;  %v4155_v36 = vmul.f32 1.442695, %v4154_v20 }
 0xb7f   :  { %v4150_v12 = vmul.f32 1.442695, %v4149_v35 }
 0xbb9   :  { %v4047_v37 = vpop.f32.mrb[104].mxu0  ;;  %v4088_v24 = vpop.f32.mrb[116].mxu1 }
 0xbba   :  { %v4139_v49 = vadd.f32 %v4047_v37, %v8231_v44  ;;  %v4141_v41 = vadd.f32 %v4088_v24, %v8232_v22  ;;  %v4049_v53 = vpop.f32.mrb[105].mxu0  ;;  %v4090_v61 = vpop.f32.mrb[117].mxu1 }
 0xbbb   :  { %v4140_v3 = vadd.f32 %v4049_v53, %v8233_v14  ;;  %v4142_v2 = vadd.f32 %v4090_v61, %v8234_v28  ;;  %v4051_v40 = vpop.f32.mrb[106].mxu0  ;;  %v4092_v55 = vpop.f32.mrb[118].mxu1 }
 0xbbc   :  { %v4160_v45 = vmul.f32 %v4139_v49, %v4139_v49  ;;  %v4167_v39 = vmul.f32 %v4141_v41, %v4141_v41  ;;  %v4052_v16 = vpop.f32.mrb[107].mxu0  ;;  %v4093_v5 = vpop.f32.mrb[119].mxu1 }
 0xbbd   :  { %v4166_v10 = vmul.f32 %v4140_v3, %v4140_v3  ;;  %v4173_v26 = vmul.f32 %v4142_v2, %v4142_v2 }
 0xbbe   :  { %v4161_v7 = vadd.f32 %v4160_v45, %v4159_v51 }
 0xbbf   :  { %v4168_v42 = vadd.f32 %v4167_v39, %v4166_v10 }
 0xbc0   :  { %v4162_v63 = vmax.f32 %v4161_v7, 1.0 }
 0xbc1   :  { %v4169_v43 = vmax.f32 %v4168_v42, 1.0 }
 0xbc2   :  { %4788 = vrsqrt.f32 %v4162_v63 }
 0xbc3   :  { %4790 = vrsqrt.f32 %v4169_v43 }
 0xbc4   :  { %4792 = vpow2.f32 %v4150_v12 }
 0xbc5   :  { %4794 = vpow2.f32 %v4145_v27 }
 0xbcc   :  { %v4789_v13 = vpop.eup %4788 }
 0xbcd   :  { %v4791_v31 = vpop.eup %4790  ;;  %v4165_v56 = vmul.f32 %v4789_v13, %v4139_v49  ;;  %v4164_v23 = vmul.f32 %v4789_v13, %v4138_v38 }
 0xbce   :  { %v4171_v0 = vmul.f32 %v4791_v31, %v4140_v3  ;;  %v4172_v8 = vmul.f32 %v4791_v31, %v4141_v41  ;;  %v4793_v52 = vpop.eup %4792 }
 0xbcf   :  { %v4795_v25 = vpop.eup %4794  ;;  %v4152_v21 = vadd.f32 1.0, %v4793_v52 }
 0xbd0   :  { %v4147_v54 = vadd.f32 1.0, %v4795_v25 }
 0xbd9   :  { %v4590_v57 = vpop.f32.mrb[108].mxu0 }
 0xbda   :  { %v4591_v58 = vpop.f32.mrb[109].mxu0 }
 0xbdb   :  { %v4592_v46 = vadd.f32 %v4591_v58, %v4590_v57  ;;  %v4593_v32 = vpop.f32.mrb[110].mxu0 }
 0xbdc   :  { %v4594_v33 = vpop.f32.mrb[111].mxu0 }
 0xbdd   :  { %v4143_v60 = vadd.f32 %v4592_v46, %v8235_v48 }
 0xbdf   :  { %v4174_v19 = vmul.f32 %v4143_v60, %v4143_v60 }
 0xbe1   :  { %v4175_v1 = vadd.f32 %v4174_v19, %v4173_v26 }
 0xbe3   :  { %v4176_v9 = vmax.f32 %v4175_v1, 1.0 }
 0xbe5   :  { %4796 = vrsqrt.f32 %v4176_v9 }
 0xbe6   :  { %4798 = vrcp.f32 %v4152_v21 }
 0xbe7   :  { %4800 = vrcp.f32 %v4147_v54 }
 0xbe8   :  { %4802 = vpow2.f32 %v4155_v36 }
 0xbef   :  { %v4797_v11 = vpop.eup %4796 }
 0xbf0   :  { %v4178_v62 = vmul.f32 %v4797_v11, %v4142_v2  ;;  %v4179_v15 = vmul.f32 %v4797_v11, %v4143_v60  ;;  %v4799_v38 = vpop.eup %4798 }
 0xbf1   :  { %v4801_v34 = vpop.eup %4800 }
 0xbf2   :  { %v4180_v17 = vmul.f32 %v4799_v38, %v4178_v62  ;;  %v4181_v4 = vmul.f32 %v4799_v38, %v4179_v15  ;;  %v4182_v22 = vmul.f32 %v4801_v34, %v7333_v50  ;;  %v4187_v53 = vmul.f32 %v4801_v34, %v7335_v18  ;;  %v4803_v16 = vpop.eup %4802 }
 0xbf3   :  { %v4157_v10 = vadd.f32 1.0, %v4803_v16 }
 0xbf4   :  { %v4183_v37 = vmul.f32 %v4180_v17, %v4164_v23  ;;  %v4184_v24 = vmul.f32 %v4181_v4, %v4165_v56  ;;  %v4188_v44 = vmul.f32 %v4181_v4, %v4164_v23  ;;  %v4189_v49 = vmul.f32 %v4180_v17, %v4165_v56 }
 0xbf6   :  { %v4185_v41 = vsub.f32 %v4183_v37, %v4184_v24  ;;  %v4190_v61 = vadd.f32 %v4189_v49, %v4188_v44 }
 0xbf8   :  { %v4186_v59 = vadd.f32 %v4185_v41, %v4182_v22  ;;  %v4191_v14 = vadd.f32 %v4190_v61, %v4187_v53 }
 0xbfa   :  { %v4192_v3 = vmul.f32 %v4186_v59, %v4171_v0  ;;  %v4193_v28 = vmul.f32 %v4191_v14, %v4172_v8  ;;  %v4195_v2 = vmul.f32 %v4191_v14, %v4171_v0  ;;  %v4196_v40 = vmul.f32 %v4186_v59, %v4172_v8 }
 0xbfc   :  { %v4194_v55 = vsub.f32 %v4192_v3, %v4193_v28  ;;  %v4197_v51 = vadd.f32 %v4196_v40, %v4195_v2 }
 0xbfe   :  { %v4198_v45 = vmul.f32 %v4194_v55, %v4194_v55  ;;  %v4199_v39 = vmul.f32 %v4197_v51, %v4197_v51 }
 0xc00   :  { %v4200_v5 = vadd.f32 %v4199_v39, %v4198_v45 }
 0xc02   :  { %v4201_v7 = vmax.f32 %v4200_v5, 1.0 }
 0xc04   :  { %4804 = vrsqrt.f32 %v4201_v7 }
 0xc05   :  { %4806 = vrcp.f32 %v4157_v10 }
 0xc0e   :  { %v4805_v50 = vpop.eup %4804 }
 0xc0f   :  { %v4203_v42 = vmul.f32 %v4805_v50, %v4194_v55  ;;  %v4204_v18 = vmul.f32 %v4805_v50, %v4197_v51  ;;  %v4807_v63 = vpop.eup %4806 }
 0xc11   :  { %v4205_v43 = vmul.f32 %v4807_v63, %v4203_v42  ;;  %v4206_v13 = vmul.f32 %v4807_v63, %v4204_v18 }
 0xc13   :  { %v4255_v31 = vmul.f32 %v5508_v6, %v4205_v43  ;;  %v4256_v56 = vmul.f32 %v5512_v29, %v4206_v13 }
 0xc15   :  { %v4278_v23 = vadd.f32 %v4256_v56, %v4255_v31 }
 0xc17   :  { %4279 = vadd.xlane.f32.xlu1 %v4278_v23 }
 0xca4   :  { %v4280_v35 = vpop.xlane.xlu1 %4279 }
 0xca5   :  { %v4295_v0 = vadd.f32 %v7357_v30, %v4280_v35 }
 0xca7   :  { %v4303_v8 = vsub.f32 0.0, %v4295_v0 }
 0xca9   :  { %v4318_v47 = vmul.f32 1.442695, %v4303_v8 }
 0xcab   :  { %4808 = vpow2.f32 %v4318_v47 }
 0xcb5   :  { %v4809_v12 = vpop.eup %4808 }
 0xcb6   :  { %v4327_v27 = vadd.f32 1.0, %v4809_v12 }
 0xcb8   :  { %4810 = vrcp.f32 %v4327_v27 }
 0xcc2   :  { %v4811_v57 = vpop.eup %4810 }
 0xcc3   :  { %4344 = vst.msk [vmem:[%s7391_s6 + $0x38] sm:$0xff] %vm4336_vm1, %v4811_v57 }

</bundles_post_ra>
